<compile_context>
chip_gen: v5e
topology: v5e:2x2
jax: 0.10.0
libtpu: 0.0.40
codegen_flags: <defaults>
</compile_context>

<pallas_src>
import functools

import jax
import jax.numpy as jnp
from jax.experimental import pallas as pl
from jax.experimental.pallas import tpu as pltpu

EPS = 1e-5
LANE = 128


def _round_up(x, m):
    return ((x + m - 1) // m) * m


def mlp_kernel(x_ref, w1_ref, b1_ref, a1_ref, w2_ref, b2_ref, a2_ref,
               w3_ref, b3_ref, out_ref, *, nc_pad, transpose_out):
    # fc1 (+ folded bn1): x arrives f32 from HBM, cast to bf16 on the VPU
    # (free filler under the MXU), f32 accumulation, f32 epilogue.
    x = x_ref[...].astype(jnp.bfloat16)
    h = jnp.dot(x, w1_ref[...], preferred_element_type=jnp.float32)
    h = h + b1_ref[...]
    h = jnp.where(h > 0, h, a1_ref[0, 0] * h)     # PReLU; dropout = identity (eval)

    # fc2 (+ folded bn2)
    h = jnp.dot(h.astype(jnp.bfloat16), w2_ref[...],
                preferred_element_type=jnp.float32)
    h = h + b2_ref[...]
    h = jnp.where(h > 0, h, a2_ref[0, 0] * h)

    # fc3 (lanes padded to 128 for the MXU)
    h = jnp.dot(h.astype(jnp.bfloat16), w3_ref[...],
                preferred_element_type=jnp.float32)
    h = h + b3_ref[...]

    if transpose_out:
        # (TB, 128) -> (128, TB) on the XLU (hidden under MXU slack), keep only
        # the real class rows so sigmoid runs on a dense layout and the HBM
        # writeback is ~nc/128 of the padded layout.
        hT = h.T[:nc_pad, :]
        out_ref[...] = jax.nn.sigmoid(hT)
    else:
        # Small-batch single-tile path: padded columns are exactly 0 (-> 0.5
        # after sigmoid) and are sliced off by the wrapper.  Do NOT reduce over
        # the raw kernel output.
        out_ref[...] = jax.nn.sigmoid(h)


def prepare_params(p):
    """One-time parameter prep: fold BN (running stats) + biases into the
    Linear weights, cast matmul operands to bf16, pad fc3 to 128 lanes."""
    s1 = p["g1"] * jax.lax.rsqrt(p["v1"] + EPS)                 # (1, 1024)
    w1 = (p["w1"] * s1).astype(jnp.bfloat16)
    b1 = (p["b1"] - p["m1"]) * s1 + p["bt1"]

    s2 = p["g2"] * jax.lax.rsqrt(p["v2"] + EPS)                 # (1, 512)
    w2 = (p["w2"] * s2).astype(jnp.bfloat16)
    b2 = (p["b2"] - p["m2"]) * s2 + p["bt2"]

    nc = p["w3"].shape[1]
    npad = _round_up(max(nc, 1), LANE)
    w3 = jnp.zeros((p["w3"].shape[0], npad), jnp.float32).at[:, :nc].set(p["w3"])
    w3 = w3.astype(jnp.bfloat16)
    b3 = jnp.zeros((1, npad), jnp.float32).at[:, :nc].set(p["b3"])

    return dict(w1=w1, b1=b1, a1=p["a1"], w2=w2, b2=b2, a2=p["a2"],
                w3=w3, b3=b3, num_classes=nc)


def baseline_model1_forward(x, prep, *, tb=512):
    """x: (B, inputsize) float32. prep: output of prepare_params."""
    B, inputsize = x.shape
    nc = prep["num_classes"]
    H1 = prep["w1"].shape[1]
    H2 = prep["w2"].shape[1]
    npad = prep["w3"].shape[1]
    nc_pad = _round_up(nc, 8)

    vmem = pltpu.MemorySpace.VMEM
    smem = pltpu.MemorySpace.SMEM

    weight_bytes = 2 * (inputsize * H1 + H1 * H2 + H2 * npad)   # bf16, one copy
    if weight_bytes > 40 * 1024 * 1024:
        # TODO(synk): K-tiled fallback for very large inputsize (weights would
        # not stay VMEM-resident); not needed for typical feature sizes here.
        raise NotImplementedError("inputsize too large for VMEM-resident weights")

    # Weights/biases use constant index maps -> fetched once, VMEM-resident.
    weight_specs = [
        pl.BlockSpec((inputsize, H1), lambda i: (0, 0), memory_space=vmem),  # w1
        pl.BlockSpec((1, H1),         lambda i: (0, 0), memory_space=vmem),  # b1'
        pl.BlockSpec(memory_space=smem),                                     # PReLU a1
        pl.BlockSpec((H1, H2),        lambda i: (0, 0), memory_space=vmem),  # w2
        pl.BlockSpec((1, H2),         lambda i: (0, 0), memory_space=vmem),  # b2'
        pl.BlockSpec(memory_space=smem),                                     # PReLU a2
        pl.BlockSpec((H2, npad),      lambda i: (0, 0), memory_space=vmem),  # w3 (padded)
        pl.BlockSpec((1, npad),       lambda i: (0, 0), memory_space=vmem),  # b3 (padded)
    ]
    weight_args = (prep["w1"], prep["b1"], prep["a1"],
                   prep["w2"], prep["b2"], prep["a2"],
                   prep["w3"], prep["b3"])

    def vmem_limit(tb_rows, out_cols):
        est = (2 * weight_bytes                            # weights (double buffered)
               + 2 * 4 * (H1 + H2 + npad)                  # biases
               + 2 * 4 * tb_rows * (inputsize + out_cols)  # x / out tiles (x2 buffers)
               + 2 * 4 * tb_rows * (H1 + H2 + npad)        # f32 activation temporaries
               + (4 << 20))                                 # headroom
        return int(min(max(est, 32 << 20), 64 << 20))

    if B > 128:
        # ---- gridded path: batch tiles of TB rows (TB % 128 == 0) -----------
        # TB chosen so the grid has >=2 steps (v7x megacore); ragged batches use
        # a partial last x block (no wrapper-side pad/copy of x).
        TB = min(_round_up(max(tb, 128), 128), _round_up(pl.cdiv(B, 2), 128))
        num_tiles = pl.cdiv(B, TB)
        out = pl.pallas_call(
            functools.partial(mlp_kernel, nc_pad=nc_pad, transpose_out=True),
            out_shape=jax.ShapeDtypeStruct((nc_pad, num_tiles * TB), jnp.float32),
            grid=(num_tiles,),
            in_specs=[pl.BlockSpec((TB, inputsize), lambda i: (i, 0),
                                   memory_space=vmem)] + weight_specs,
            out_specs=pl.BlockSpec((nc_pad, TB), lambda i: (0, i),
                                   memory_space=vmem),
            compiler_params=pltpu.CompilerParams(
                dimension_semantics=("parallel",),
                vmem_limit_bytes=vmem_limit(TB, nc_pad),
            ),
        )(x, *weight_args)
        # Columns >= B come from undefined pad rows of the last block (rows are
        # independent, so they never contaminate valid rows) -> slice them off.
        return out[:nc, :B].T

    # ---- small-batch path: one full-array block (any B), un-transposed output.
    out = pl.pallas_call(
        functools.partial(mlp_kernel, nc_pad=nc_pad, transpose_out=False),
        out_shape=jax.ShapeDtypeStruct((B, npad), jnp.float32),
        grid=(1,),
        in_specs=[pl.BlockSpec((B, inputsize), lambda i: (0, 0),
                               memory_space=vmem)] + weight_specs,
        out_specs=pl.BlockSpec((B, npad), lambda i: (0, 0), memory_space=vmem),
        compiler_params=pltpu.CompilerParams(
            dimension_semantics=("arbitrary",),
            vmem_limit_bytes=vmem_limit(max(B, 8), npad),
        ),
    )(x, *weight_args)
    return out[:, :nc]


def make_params(key, inputsize, num_classes):
    """Deterministic synthetic parameters matching BaselineModel1's shapes."""
    ks = jax.random.split(key, 12)
    f32 = jnp.float32

    def u(k, shape, scale):
        return jax.random.uniform(k, shape, f32, -1.0, 1.0) * scale

    # fc1: (inputsize -> 1024), stored transposed as (inputsize, 1024)
    w1 = u(ks[0], (inputsize, 1024), 1.0 / jnp.sqrt(inputsize))
    b1 = u(ks[1], (1, 1024), 0.1)
    g1 = 1.0 + u(ks[2], (1, 1024), 0.1)
    bt1 = u(ks[3], (1, 1024), 0.1)
    m1 = u(ks[4], (1, 1024), 0.1)
    v1 = 1.0 + jnp.abs(u(ks[5], (1, 1024), 0.1))
    a1 = jnp.full((1, 1), 0.25, f32)  # PReLU default init

    # fc2: (1024 -> 512)
    w2 = u(ks[6], (1024, 512), 1.0 / jnp.sqrt(1024.0))
    b2 = u(ks[7], (1, 512), 0.1)
    g2 = 1.0 + u(ks[8], (1, 512), 0.1)
    bt2 = u(ks[9], (1, 512), 0.1)
    m2 = u(ks[10], (1, 512), 0.1)
    v2 = 1.0 + jnp.abs(u(ks[11], (1, 512), 0.1))
    a2 = jnp.full((1, 1), 0.25, f32)

    # fc3: (512 -> num_classes)
    k3a, k3b = jax.random.split(ks[11])
    w3 = u(k3a, (512, num_classes), 1.0 / jnp.sqrt(512.0))
    b3 = u(k3b, (1, num_classes), 0.1)

    return dict(
        w1=w1, b1=b1, g1=g1, bt1=bt1, m1=m1, v1=v1, a1=a1,
        w2=w2, b2=b2, g2=g2, bt2=bt2, m2=m2, v2=v2, a2=a2,
        w3=w3, b3=b3,
    )


def reference_forward(x, p):
    """Pure-JAX f32 reference of the inference-mode forward pass."""
    h = x @ p["w1"] + p["b1"]
    h = (h - p["m1"]) * (p["g1"] / jnp.sqrt(p["v1"] + EPS)) + p["bt1"]
    h = jnp.where(h > 0, h, p["a1"][0, 0] * h)
    h = h @ p["w2"] + p["b2"]
    h = (h - p["m2"]) * (p["g2"] / jnp.sqrt(p["v2"] + EPS)) + p["bt2"]
    h = jnp.where(h > 0, h, p["a2"][0, 0] * h)
    h = h @ p["w3"] + p["b3"]
    return jax.nn.sigmoid(h)


if __name__ == "__main__":
    key = jax.random.PRNGKey(0)
    kx, kp = jax.random.split(key)

    inputsize, num_classes = 32, 1
    params = make_params(kp, inputsize, num_classes)
    prep = prepare_params(params)

    # Gridded path: B=260 -> TB=256, 2 grid steps (megacore on v7x), ragged
    # last tile (only 4 valid rows), lane-dense transposed output.
    B = 260
    x = jax.random.normal(kx, (B, inputsize), jnp.float32)
    out = jax.block_until_ready(baseline_model1_forward(x, prep))
    ref = reference_forward(x, params)
    assert out.shape == (B, num_classes)
    err = float(jnp.max(jnp.abs(out - ref)))
    # bf16 matmul operands (f32 accumulation) vs the pure-f32 reference.
    assert err < 3e-2, f"gridded path mismatch vs reference: max abs err {err}"

    # Small-batch single-tile path.
    Bs = 20
    xs = x[:Bs]
    outs = jax.block_until_ready(baseline_model1_forward(xs, prep))
    refs = reference_forward(xs, params)
    assert outs.shape == (Bs, num_classes)
    errs = float(jnp.max(jnp.abs(outs - refs)))
    assert errs < 3e-2, f"small-batch path mismatch vs reference: max abs err {errs}"

    # TODO(synk): Dropout / training-mode BatchNorm (batch statistics) are not
    # modeled; forward is implemented in eval() semantics (dropout identity,
    # BN running stats folded into the fc weights).
    print("KERNEL_OK")
</pallas_src>

<mosaic_0001>
module attributes {stable_mosaic.version = 11 : i64} {
  func.func @mlp_kernel(%arg0: i32, %arg1: memref<256x32xf32, #tpu.memory_space<vmem>>, %arg2: memref<32x1024xbf16, #tpu.memory_space<vmem>>, %arg3: memref<1x1024xf32, #tpu.memory_space<vmem>>, %arg4: memref<1x1xf32, #tpu.memory_space<smem>>, %arg5: memref<1024x512xbf16, #tpu.memory_space<vmem>>, %arg6: memref<1x512xf32, #tpu.memory_space<vmem>>, %arg7: memref<1x1xf32, #tpu.memory_space<smem>>, %arg8: memref<512x128xbf16, #tpu.memory_space<vmem>>, %arg9: memref<1x128xf32, #tpu.memory_space<vmem>>, %arg10: memref<8x256xf32, #tpu.memory_space<vmem>>) attributes {dimension_semantics = [#tpu.dimension_semantics<parallel>], iteration_bounds = array<i64: 2>, scalar_prefetch = 0 : i64, scratch_operands = 0 : i64, tpu.core_type = #tpu.core_type<tc>, window_params = [{transform_indices = @transform_0, window_bounds = array<i64: 256, 32>}, {pipeline_mode = #tpu.pipeline_mode<synchronous>, transform_indices = @transform_1, window_bounds = array<i64: 32, 1024>}, {pipeline_mode = #tpu.pipeline_mode<synchronous>, transform_indices = @transform_2, window_bounds = array<i64: 1, 1024>}, {transform_indices = @transform_3, window_bounds = array<i64: 1, 1>}, {pipeline_mode = #tpu.pipeline_mode<synchronous>, transform_indices = @transform_4, window_bounds = array<i64: 1024, 512>}, {pipeline_mode = #tpu.pipeline_mode<synchronous>, transform_indices = @transform_5, window_bounds = array<i64: 1, 512>}, {transform_indices = @transform_6, window_bounds = array<i64: 1, 1>}, {pipeline_mode = #tpu.pipeline_mode<synchronous>, transform_indices = @transform_7, window_bounds = array<i64: 512, 128>}, {pipeline_mode = #tpu.pipeline_mode<synchronous>, transform_indices = @transform_8, window_bounds = array<i64: 1, 128>}, {transform_indices = @transform_9, window_bounds = array<i64: 8, 256>}]} {
    %c0 = arith.constant 0 : index
    %c0_0 = arith.constant 0 : index
    %0 = vector.load %arg1[%c0, %c0_0] : memref<256x32xf32, #tpu.memory_space<vmem>>, vector<256x32xf32>
    %1 = arith.truncf %0 : vector<256x32xf32> to vector<256x32xbf16>
    %c0_1 = arith.constant 0 : index
    %c0_2 = arith.constant 0 : index
    %2 = vector.load %arg2[%c0_1, %c0_2] : memref<32x1024xbf16, #tpu.memory_space<vmem>>, vector<32x1024xbf16>
    %cst = arith.constant dense<0.000000e+00> : vector<256x1024xf32>
    %3 = tpu.matmul %1, %2, %cst {dimension_numbers = #tpu.dot_dimension_numbers<[1], [0], [0], [1], [0, 0, 1, 1], [], []>} : vector<256x32xbf16>, vector<32x1024xbf16>, vector<256x1024xf32> -> vector<256x1024xf32>
    %c0_3 = arith.constant 0 : index
    %c0_4 = arith.constant 0 : index
    %4 = vector.load %arg3[%c0_3, %c0_4] : memref<1x1024xf32, #tpu.memory_space<vmem>>, vector<1x1024xf32>
    %5 = vector.broadcast %4 : vector<1x1024xf32> to vector<256x1024xf32>
    %6 = arith.addf %3, %5 : vector<256x1024xf32>
    %cst_5 = arith.constant 0.000000e+00 : f32
    %7 = vector.broadcast %cst_5 : f32 to vector<256x1024xf32>
    %8 = arith.cmpf ogt, %6, %7 : vector<256x1024xf32>
    %c0_6 = arith.constant 0 : index
    %c0_7 = arith.constant 0 : index
    %9 = memref.load %arg4[%c0_6, %c0_7] : memref<1x1xf32, #tpu.memory_space<smem>>
    %10 = vector.broadcast %9 : f32 to vector<256x1024xf32>
    %11 = arith.mulf %10, %6 : vector<256x1024xf32>
    %12 = arith.select %8, %6, %11 : vector<256x1024xi1>, vector<256x1024xf32>
    %13 = arith.truncf %12 : vector<256x1024xf32> to vector<256x1024xbf16>
    %c0_8 = arith.constant 0 : index
    %c0_9 = arith.constant 0 : index
    %14 = vector.load %arg5[%c0_8, %c0_9] : memref<1024x512xbf16, #tpu.memory_space<vmem>>, vector<1024x512xbf16>
    %cst_10 = arith.constant dense<0.000000e+00> : vector<256x512xf32>
    %15 = tpu.matmul %13, %14, %cst_10 {dimension_numbers = #tpu.dot_dimension_numbers<[1], [0], [0], [1], [0, 0, 1, 1], [], []>} : vector<256x1024xbf16>, vector<1024x512xbf16>, vector<256x512xf32> -> vector<256x512xf32>
    %c0_11 = arith.constant 0 : index
    %c0_12 = arith.constant 0 : index
    %16 = vector.load %arg6[%c0_11, %c0_12] : memref<1x512xf32, #tpu.memory_space<vmem>>, vector<1x512xf32>
    %17 = vector.broadcast %16 : vector<1x512xf32> to vector<256x512xf32>
    %18 = arith.addf %15, %17 : vector<256x512xf32>
    %cst_13 = arith.constant 0.000000e+00 : f32
    %19 = vector.broadcast %cst_13 : f32 to vector<256x512xf32>
    %20 = arith.cmpf ogt, %18, %19 : vector<256x512xf32>
    %c0_14 = arith.constant 0 : index
    %c0_15 = arith.constant 0 : index
    %21 = memref.load %arg7[%c0_14, %c0_15] : memref<1x1xf32, #tpu.memory_space<smem>>
    %22 = vector.broadcast %21 : f32 to vector<256x512xf32>
    %23 = arith.mulf %22, %18 : vector<256x512xf32>
    %24 = arith.select %20, %18, %23 : vector<256x512xi1>, vector<256x512xf32>
    %25 = arith.truncf %24 : vector<256x512xf32> to vector<256x512xbf16>
    %c0_16 = arith.constant 0 : index
    %c0_17 = arith.constant 0 : index
    %26 = vector.load %arg8[%c0_16, %c0_17] : memref<512x128xbf16, #tpu.memory_space<vmem>>, vector<512x128xbf16>
    %cst_18 = arith.constant dense<0.000000e+00> : vector<256x128xf32>
    %27 = tpu.matmul %25, %26, %cst_18 {dimension_numbers = #tpu.dot_dimension_numbers<[1], [0], [0], [1], [0, 0, 1, 1], [], []>} : vector<256x512xbf16>, vector<512x128xbf16>, vector<256x128xf32> -> vector<256x128xf32>
    %c0_19 = arith.constant 0 : index
    %c0_20 = arith.constant 0 : index
    %28 = vector.load %arg9[%c0_19, %c0_20] : memref<1x128xf32, #tpu.memory_space<vmem>>, vector<1x128xf32>
    %29 = vector.broadcast %28 : vector<1x128xf32> to vector<256x128xf32>
    %30 = arith.addf %27, %29 : vector<256x128xf32>
    %31 = tpu.transpose %30, [1, 0] : vector<256x128xf32> -> vector<128x256xf32>
    %32 = vector.extract_strided_slice %31 {offsets = [0, 0], sizes = [8, 256], strides = [1, 1]} : vector<128x256xf32> to vector<8x256xf32>
    %33 = arith.negf %32 : vector<8x256xf32>
    %34 = math.exp %33 : vector<8x256xf32>
    %cst_21 = arith.constant 1.000000e+00 : f32
    %35 = vector.broadcast %cst_21 : f32 to vector<8x256xf32>
    %36 = arith.addf %35, %34 : vector<8x256xf32>
    %37 = arith.divf %35, %36 : vector<8x256xf32>
    %c0_22 = arith.constant 0 : index
    %c0_23 = arith.constant 0 : index
    %38 = vector.load %arg10[%c0_22, %c0_23] : memref<8x256xf32, #tpu.memory_space<vmem>>, vector<8x256xf32>
    tpu.vector_store %arg10[%c0_22, %c0_23], %37 {strides = array<i32>} : memref<8x256xf32, #tpu.memory_space<vmem>>, vector<8x256xf32>,
    return
  }
  func.func @transform_0(%arg0: i32) -> (i32, i32) {
    %c0_i32 = arith.constant 0 : i32
    %c0_i32_0 = arith.constant 0 : i32
    return %arg0, %c0_i32 : i32, i32
  }
  func.func @transform_1(%arg0: i32) -> (i32, i32) {
    %c0_i32 = arith.constant 0 : i32
    %c0_i32_0 = arith.constant 0 : i32
    %c0_i32_1 = arith.constant 0 : i32
    return %c0_i32, %c0_i32_0 : i32, i32
  }
  func.func @transform_2(%arg0: i32) -> (i32, i32) {
    %c0_i32 = arith.constant 0 : i32
    %c0_i32_0 = arith.constant 0 : i32
    %c0_i32_1 = arith.constant 0 : i32
    return %c0_i32, %c0_i32_0 : i32, i32
  }
  func.func @transform_3(%arg0: i32) -> (i32, i32) {
    %c0_i32 = arith.constant 0 : i32
    %c0_i32_0 = arith.constant 0 : i32
    %c0_i32_1 = arith.constant 0 : i32
    return %c0_i32, %c0_i32_0 : i32, i32
  }
  func.func @transform_4(%arg0: i32) -> (i32, i32) {
    %c0_i32 = arith.constant 0 : i32
    %c0_i32_0 = arith.constant 0 : i32
    %c0_i32_1 = arith.constant 0 : i32
    return %c0_i32, %c0_i32_0 : i32, i32
  }
  func.func @transform_5(%arg0: i32) -> (i32, i32) {
    %c0_i32 = arith.constant 0 : i32
    %c0_i32_0 = arith.constant 0 : i32
    %c0_i32_1 = arith.constant 0 : i32
    return %c0_i32, %c0_i32_0 : i32, i32
  }
  func.func @transform_6(%arg0: i32) -> (i32, i32) {
    %c0_i32 = arith.constant 0 : i32
    %c0_i32_0 = arith.constant 0 : i32
    %c0_i32_1 = arith.constant 0 : i32
    return %c0_i32, %c0_i32_0 : i32, i32
  }
  func.func @transform_7(%arg0: i32) -> (i32, i32) {
    %c0_i32 = arith.constant 0 : i32
    %c0_i32_0 = arith.constant 0 : i32
    %c0_i32_1 = arith.constant 0 : i32
    return %c0_i32, %c0_i32_0 : i32, i32
  }
  func.func @transform_8(%arg0: i32) -> (i32, i32) {
    %c0_i32 = arith.constant 0 : i32
    %c0_i32_0 = arith.constant 0 : i32
    %c0_i32_1 = arith.constant 0 : i32
    return %c0_i32, %c0_i32_0 : i32, i32
  }
  func.func @transform_9(%arg0: i32) -> (i32, i32) {
    %c0_i32 = arith.constant 0 : i32
    %c0_i32_0 = arith.constant 0 : i32
    return %c0_i32, %arg0 : i32, i32
  }
}

</mosaic_0001>

<bundles_post_ra>
// kernel: tpu_custom_call.1
= control target key start
LH: loop header
LB: loop body
LE: loop exit
PB: predicated region body
PF: predicated region fallthrough
CT: control target
= control target key end

     0   :  { %s12922_s0 = inlined_call_operand.vmem [shape: f32[260,32], index: 0, kind: input, shape index: {}]   ;;  %s12923_s1 = inlined_call_operand.hbm [shape: bf16[32,1024], index: 1, kind: input, shape index: {}]   ;;  %s12924_s2 = inlined_call_operand.vmem [shape: f32[1,1024], index: 2, kind: input, shape index: {}]   ;;  %s12925_s3 = inlined_call_operand.<no memory space> [shape: f32[1,1], index: 3, kind: input, shape index: {}]   ;;  %s12926_s4 = inlined_call_operand.hbm [shape: bf16[1024,512], index: 4, kind: input, shape index: {}]   ;;  %s12927_s5 = inlined_call_operand.vmem [shape: f32[1,512], index: 5, kind: input, shape index: {}]   ;;  %s12928_s6 = inlined_call_operand.<no memory space> [shape: f32[1,1], index: 6, kind: input, shape index: {}]   ;;  %s12929_s7 = inlined_call_operand.vmem [shape: bf16[512,128], index: 7, kind: input, shape index: {}]   ;;  %s12930_s8 = inlined_call_operand.vmem [shape: f32[1,128], index: 8, kind: input, shape index: {}]   ;;  %s12931_s9 = inlined_call_operand.hbm [shape: f32[8,512], index: 9, kind: output, shape index: {}]  }
   0x1   :  { %14 = sst [smem:[#allocation2]] %s12925_s3 }
   0x2   :  { %15 = sst [smem:[#allocation3]] %s12928_s6 }
   0x3   :  { %16 = vsyncpa [#allocation5], 0 }
   0x4   :  { %17 = vsyncpa [#allocation8], 0 }
   0x5   :  { %18 = vsyncpa [#allocation6], 0 }
   0x6   :  { %20 = vsyncpa [#allocation6 + $0x1], 0  ;;  %s9812_s13 = smov 0   ;;  %s9814_s14 = smov 0  }
   0x7   :  { %s9816_s15 = smov 0   ;;  %s9818_s16 = smov 0  }
   0x8 LB: > { %s9833_s3 = sadd.s32 4294967295, %s9748_s16   ;;  %s7874_s6 = sadd.s32 4294967294, %s9748_s16   ;;  %s9748_s16 = sphi %s9818_s16, %s14020_s16   ;;  %s9744_s15 = sphi %s9816_s15, %s14019_s15   ;;  %s9740_s14 = sphi %s9814_s14, %s14018_s14   ;;  %s9736_s13 = sphi %s9812_s13, %s14017_s13  }
   0x9   : > { %s9837_s17 = sadd.s32 1, %s9748_s16   ;;  %s227_s18 = sadd.s32 1, %s9744_s15 }
   0xa   : > { %s224_s19 = ssub.s32 %s9748_s16, %s9837_s17  ;;  %p237_p0 = scmp.ne.s32.totalorder %s9744_s15, %s9740_s14 }
   0xb   : > { %p225_p1 = scmp.eq.s32.totalorder %s224_s19, 0  ;;  %p238_p2 = scmp.eq.s32.totalorder %s9833_s3, 1 }
   0xc   : > { %p243_p3 = scmp.ne.s32.totalorder %s9740_s14, %s9736_s13  ;;  %p244_p4 = scmp.eq.s32.totalorder %s7874_s6, 1 }
   0xd   : > { %s9848_s20 = scalar_select %p225_p1, %s9744_s15, %s227_s18  }
   0xe   : > { %p9850_p5 = por %p238_p2, %p237_p0  ;;  %p9854_p6 = por %p244_p4, %p243_p3 }
   0xf   : > { %p7875_p7 = scmp.ge.s32.totalorder %s9748_s16, 1  ;;  %p251_p8 = scmp.lt.s32.totalorder %s9748_s16, 3 }
  0x10   : > { %p9562_p9 = scmp.eq.s32.totalorder %s9833_s3, 0  ;;  %s262_s26 = sshll.u32 %s12923_s1, 4  ;;  %s263_s26 = int_to_ptr.hbm [resolvable:$true] %s262_s26 }
  0x11   : > { %p9861_p10 = pnand %p7875_p7, %p251_p8  ;;  %s9750_s27 = smov [#allocation4]  }
  0x12   : > { %s264_s28 = sshll.u32 %s9750_s27, 4  ;;  %s282_s10 = sshll.u32 %s12926_s4, 4  ;;  %s265_s28 = int_to_ptr.vmem [resolvable:$true] %s264_s28  ;;  %s283_s10 = int_to_ptr.hbm [resolvable:$true] %s282_s10 }
  0x13   : > { %p9551_p11 = pneg %p9861_p10  ;;  %s9751_s11 = smov 512  }
  0x14   : > { %s9752_s12 = smov 32   ;;  %s9753_s6 = smov [#allocation7]  }
  0x15   : > { %p9552_p12 = pnand %p9562_p9, %p9551_p11  ;;  %s284_s18 = sshll.u32 %s9753_s6, 4  ;;  %s285_s18 = int_to_ptr.vmem [resolvable:$true] %s284_s18 }
  0x16   : > { %s9754_s19 = smov 256   ;;  %s9755_s24 = smov 16  }
  0x17   : > { %9554 = dma.hbm_to_vmem [thread:$0]  (!%p9552_p12), %s263_s26, 2048, %s265_s28, [#allocation5], %s9751_s11, %s9751_s11, %s9752_s12  }
  0x18   : > { %9557 = dma.hbm_to_vmem [thread:$0]  (!%p9552_p12), %s283_s10, 32768, %s285_s18, [#allocation8], %s9754_s19, %s9754_s19, %s9755_s24  }
  0x19   : > { %329 = sbr.rel (%p9861_p10) target bundleno = 3066 (0xbfa), region = 56 }
  0x1e   : > { %9723 = dma.done.wait (%p9562_p9), [#allocation5], 2048  }
  0x1f   : > { %9725 = vsyncadd (%p9562_p9), [#allocation5], 4294965248 }
  0x20   : > { %9727 = dma.done.wait (%p9562_p9), [#allocation8], 32768  }
  0x21   : > { %9729 = vsyncadd (%p9562_p9), [#allocation8], 4294934528  ;;  %s7883_s25 = sshll.u32 %s9833_s3, 5  ;;  %v7919_v0 = vld [vmem:[#allocation4 + $0x40] sm:$0xf]  ;;  %vm553_vm0 = vcmask 261120  }
  0x22   : > { %p380_p13 = scmp.lt.s32.totalorder %s7883_s25, 32  ;;  %v9248_v1 = vld [vmem:[#allocation4 + $0x5c] sm:$0xf0]  ;;  %v9244_v2 = vld [vmem:[#allocation4 + $0x44] sm:$0xf]  ;;  %s1570_s10 = sld [smem:[#allocation2]] }
  0x23   : > { %v7920_v3 = vor.u32 %v9248_v1, %v7919_v0  ;;  %v7921_v4 = vld [vmem:[#allocation4 + $0x60] sm:$0xf0]  ;;  %v7927_v5 = vld [vmem:[#allocation4 + $0x48] sm:$0xf]  ;;  %v9245_v9 = vld [vmem:[#allocation4 + $0x4c] sm:$0xf] }
  0x24   : > { %s14022_s25 = smov (!%p380_p13, %s7883_s25), 32  ;;  %v9249_v6 = vld [vmem:[#allocation4 + $0x64] sm:$0xf0]  ;;  %v7924_v7 = vor.u32 %v9244_v2, %v7921_v4  ;;  %v7929_v10 = vld [vmem:[#allocation4 + $0x68] sm:$0xf0]  ;;  %s6734_s19 = sld [smem:[#allocation3]] }
  0x25   : > { %s7884_s26 = sshll.u32 %s14022_s25, 3  ;;  %v7928_v8 = vor.u32 %v9249_v6, %v7927_v5  ;;  %v7887_v11 = vld [vmem:[#allocation4] sm:$0xf]  ;;  %608 = vmatpush.bf16.msra.mxu0 %v7920_v3  ;;  %v7932_v12 = vor.u32 %v9245_v9, %v7929_v10  ;;  %v9236_v14 = vld [vmem:[#allocation4 + $0x4] sm:$0xf]  ;;  %s9698_s25 = scalar_lea.hbm %s12931_s9, 32 }
  0x26   : > { %s9889_s28 = scalar_lea.vmem %s12922_s0, %s7884_s26  ;;  %v9240_v13 = vld [vmem:[#allocation4 + $0x1c] sm:$0xf0]  ;;  %v7889_v15 = vld [vmem:[#allocation4 + $0x20] sm:$0xf0]  ;;  %697 = vmatpush.bf16.msra.mxu1 %v7924_v7  ;;  %v7895_v18 = vld [vmem:[#allocation4 + $0x8] sm:$0xf] }
  0x27   : > { %786 = vmatpush.bf16.msra.mxu2 %v7928_v8  ;;  %v7888_v16 = vor.u32 %v9240_v13, %v7887_v11  ;;  %v7892_v17 = vor.u32 %v9236_v14, %v7889_v15  ;;  %v9241_v19 = vld [vmem:[#allocation4 + $0x24] sm:$0xf0]  ;;  %v9237_v20 = vld [vmem:[#allocation4 + $0xc] sm:$0xf]  ;;  %875 = vmatpush.bf16.msra.mxu3 %v7932_v12  ;;  %v391_v23 = vld [vmem:[%s9889_s28] sm:$0xff]  ;;  %s372_s26 = sand.u32 1, %s9740_s14  }
  0x28   : > { %v7896_v21 = vor.u32 %v9241_v19, %v7895_v18  ;;  %v7897_v22 = vld [vmem:[#allocation4 + $0x28] sm:$0xf0]  ;;  %v7943_v27 = vld [vmem:[#allocation4 + $0x58] sm:$0xf]  ;;  %v7935_v29 = vld [vmem:[#allocation4 + $0x50] sm:$0xf] }
  0x29   : > { %v392_v24 = vld [vmem:[%s9889_s28 + $0x8] sm:$0xff]  ;;  %v7900_v25 = vor.u32 %v9237_v20, %v7897_v22  ;;  %v9251_v28 = vld [vmem:[#allocation4 + $0x74] sm:$0xf0]  ;;  %609 = vmatpush.bf16.msra.mxu0 %v7888_v16  ;;  %v9250_v31 = vld [vmem:[#allocation4 + $0x6c] sm:$0xf0]  ;;  %s7882_s23 = sshll.u32 %s372_s26, 4 }
  0x2a   : > { %v9893_v26 = vpack.c.bf16 %v392_v24, %v391_v23  ;;  %v7944_v30 = vor.u32 %v9251_v28, %v7943_v27  ;;  %v9247_v32 = vld [vmem:[#allocation4 + $0x5c] sm:$0xf]  ;;  %698 = vmatpush.bf16.msra.mxu1 %v7892_v17  ;;  %v7936_v34 = vor.u32 %v9250_v31, %v7935_v29  ;;  %v9246_v36 = vld [vmem:[#allocation4 + $0x54] sm:$0xf]  ;;  %v395_v42 = vld [vmem:[%s9889_s28 + $0x20] sm:$0xff]  ;;  %v10007_v17 = vstv %s1570_s10  ;;  %s374_s27 = scalar_lea.vmem [#allocation9], %s7882_s23 }
  0x2b   : > { %v7945_v33 = vld [vmem:[#allocation4 + $0x78] sm:$0xf0]  ;;  %787 = vmatpush.bf16.msra.mxu2 %v7896_v21  ;;  %v7937_v37 = vld [vmem:[#allocation4 + $0x70] sm:$0xf0]  ;;  %876 = vmatpush.bf16.msra.mxu3 %v7900_v25  ;;  %v396_v43 = vld [vmem:[%s9889_s28 + $0x28] sm:$0xff]  ;;  %s7790_s11 = sshll.u32 %s374_s27, 4  ;;  %s7791_s11 = int_to_ptr.vmem [resolvable:$true] %s7790_s11 }
  0x2c   : > { %v7948_v35 = vor.u32 %v9247_v32, %v7945_v33  ;;  %v7940_v38 = vor.u32 %v9246_v36, %v7937_v37  ;;  %7949 = vmatmul.msk.bf16.vlgmr.msra.gmra.mxu0 %vm553_vm0, %v9893_v26  ;;  %v393_v39 = vld [vmem:[%s9889_s28 + $0x10] sm:$0xff]  ;;  %v394_v40 = vld [vmem:[%s9889_s28 + $0x18] sm:$0xff]  ;;  %v9917_v44 = vpack.c.bf16 %v396_v43, %v395_v42  ;;  %v399_v48 = vld [vmem:[%s9889_s28 + $0x40] sm:$0xff] }
  0x2d   : > { %7965 = vmatmul.msk.bf16.vlgmr.msra.gmra.mxu1 %vm553_vm0, %v9893_v26  ;;  %964 = vmatpush.bf16.msrb.mxu0 %v7936_v34  ;;  %v9905_v41 = vpack.c.bf16 %v394_v40, %v393_v39  ;;  %v397_v45 = vld [vmem:[%s9889_s28 + $0x30] sm:$0xff]  ;;  %v398_v46 = vld [vmem:[%s9889_s28 + $0x38] sm:$0xff]  ;;  %v400_v49 = vld [vmem:[%s9889_s28 + $0x48] sm:$0xff] }
  0x2e   : > { %7981 = vmatmul.msk.bf16.vlgmr.msra.gmra.mxu2 %vm553_vm0, %v9893_v26  ;;  %7997 = vmatmul.msk.bf16.vlgmr.msra.gmra.mxu3 %vm553_vm0, %v9893_v26  ;;  %v9929_v47 = vpack.c.bf16 %v398_v46, %v397_v45  ;;  %v9941_v50 = vpack.c.bf16 %v400_v49, %v399_v48  ;;  %v401_v51 = vld [vmem:[%s9889_s28 + $0x50] sm:$0xff]  ;;  %v402_v52 = vld [vmem:[%s9889_s28 + $0x58] sm:$0xff]  ;;  %v403_v54 = vld [vmem:[%s9889_s28 + $0x60] sm:$0xff] }
  0x2f   : > { %1142 = vmatpush.bf16.msrb.mxu2 %v7944_v30  ;;  %1231 = vmatpush.bf16.msrb.mxu3 %v7948_v35  ;;  %v9953_v53 = vpack.c.bf16 %v402_v52, %v401_v51  ;;  %v404_v55 = vld [vmem:[%s9889_s28 + $0x68] sm:$0xff]  ;;  %v7911_v57 = vld [vmem:[#allocation4 + $0x18] sm:$0xf]  ;;  %v7903_v59 = vld [vmem:[#allocation4 + $0x10] sm:$0xf] }
  0x30   : > { %1053 = vmatpush.bf16.msrb.mxu1 %v7940_v38  ;;  %v9965_v56 = vpack.c.bf16 %v404_v55, %v403_v54  ;;  %v9243_v58 = vld [vmem:[#allocation4 + $0x34] sm:$0xf0]  ;;  %v9242_v61 = vld [vmem:[#allocation4 + $0x2c] sm:$0xf0]  ;;  %v9239_v62 = vld [vmem:[#allocation4 + $0x1c] sm:$0xf] }
  0x31   : > { %v7912_v60 = vor.u32 %v9243_v58, %v7911_v57  ;;  %v7913_v63 = vld [vmem:[#allocation4 + $0x38] sm:$0xf0]  ;;  %v7904_v0 = vor.u32 %v9242_v61, %v7903_v59  ;;  %v405_v2 = vld [vmem:[%s9889_s28 + $0x70] sm:$0xff]  ;;  %v407_v8 = vld [vmem:[%s9889_s28 + $0x80] sm:$0xff] }
  0x32   : > { %v7916_v1 = vor.u32 %v9239_v62, %v7913_v63  ;;  %v406_v3 = vld [vmem:[%s9889_s28 + $0x78] sm:$0xff]  ;;  %v9238_v4 = vld [vmem:[#allocation4 + $0x14] sm:$0xf]  ;;  %v408_v9 = vld [vmem:[%s9889_s28 + $0x88] sm:$0xff] }
  0x33   : > { %1143 = vmatpush.bf16.msrb.mxu2 %v7912_v60  ;;  %965 = vmatpush.bf16.msrb.mxu0 %v7904_v0  ;;  %v7905_v5 = vld [vmem:[#allocation4 + $0x30] sm:$0xf0]  ;;  %v9977_v7 = vpack.c.bf16 %v406_v3, %v405_v2  ;;  %v455_v10 = vld [vmem:[%s12924_s2] sm:$0xff]  ;;  %v9992_v11 = vpack.c.bf16 %v408_v9, %v407_v8  ;;  %v410_v34 = vld [vmem:[%s9889_s28 + $0x98] sm:$0xff] }
  0x34   : > { %1232 = vmatpush.bf16.msrb.mxu3 %v7916_v1  ;;  %v7908_v6 = vor.u32 %v9238_v4, %v7905_v5  ;;  %v9994_v13 = vperm.slane %v455_v10, 0  ;;  %v9996_v15 = vperm.slane %v455_v10, 1  ;;  %v10010_v20 = vperm.slane %v455_v10, 2  ;;  %v409_v33 = vld [vmem:[%s9889_s28 + $0x90] sm:$0xff] }
  0x35   : > { %v10013_v24 = vperm.slane %v455_v10, 3  ;;  %v10028_v45 = vpack.c.bf16 %v410_v34, %v409_v33 }
  0x36   : > { %1054 = vmatpush.bf16.msrb.mxu1 %v7908_v6 }
  0x3c   : > { %7950 = vmatmul.msk.bf16.gmra.mxu0 %vm553_vm0, %v9905_v41 }
  0x3d   : > { %7966 = vmatmul.msk.bf16.gmra.mxu1 %vm553_vm0, %v9905_v41 }
  0x3e   : > { %7982 = vmatmul.msk.bf16.gmra.mxu2 %vm553_vm0, %v9905_v41  ;;  %7998 = vmatmul.msk.bf16.gmra.mxu3 %vm553_vm0, %v9905_v41 }
  0x4c   : > { %7951 = vmatmul.msk.bf16.gmra.mxu0 %vm553_vm0, %v9917_v44 }
  0x4d   : > { %7967 = vmatmul.msk.bf16.gmra.mxu1 %vm553_vm0, %v9917_v44 }
  0x4e   : > { %7983 = vmatmul.msk.bf16.gmra.mxu2 %vm553_vm0, %v9917_v44  ;;  %7999 = vmatmul.msk.bf16.gmra.mxu3 %vm553_vm0, %v9917_v44 }
  0x5c   : > { %7952 = vmatmul.msk.bf16.gmra.mxu0 %vm553_vm0, %v9929_v47 }
  0x5d   : > { %7968 = vmatmul.msk.bf16.gmra.mxu1 %vm553_vm0, %v9929_v47 }
  0x5e   : > { %7984 = vmatmul.msk.bf16.gmra.mxu2 %vm553_vm0, %v9929_v47  ;;  %8000 = vmatmul.msk.bf16.gmra.mxu3 %vm553_vm0, %v9929_v47 }
  0x6c   : > { %7953 = vmatmul.msk.bf16.gmra.mxu0 %vm553_vm0, %v9941_v50 }
  0x6d   : > { %7969 = vmatmul.msk.bf16.gmra.mxu1 %vm553_vm0, %v9941_v50 }
  0x6e   : > { %7985 = vmatmul.msk.bf16.gmra.mxu2 %vm553_vm0, %v9941_v50  ;;  %8001 = vmatmul.msk.bf16.gmra.mxu3 %vm553_vm0, %v9941_v50 }
  0x7c   : > { %7954 = vmatmul.msk.bf16.gmra.mxu0 %vm553_vm0, %v9953_v53 }
  0x7d   : > { %7970 = vmatmul.msk.bf16.gmra.mxu1 %vm553_vm0, %v9953_v53 }
  0x7e   : > { %7986 = vmatmul.msk.bf16.gmra.mxu2 %vm553_vm0, %v9953_v53  ;;  %8002 = vmatmul.msk.bf16.gmra.mxu3 %vm553_vm0, %v9953_v53 }
  0x8c   : > { %7955 = vmatmul.msk.bf16.gmra.mxu0 %vm553_vm0, %v9965_v56 }
  0x8d   : > { %7971 = vmatmul.msk.bf16.gmra.mxu1 %vm553_vm0, %v9965_v56 }
  0x8e   : > { %7987 = vmatmul.msk.bf16.gmra.mxu2 %vm553_vm0, %v9965_v56  ;;  %8003 = vmatmul.msk.bf16.gmra.mxu3 %vm553_vm0, %v9965_v56 }
  0x9c   : > { %7956 = vmatmul.msk.bf16.gmra.mxu0 %vm553_vm0, %v9977_v7 }
  0x9d   : > { %7972 = vmatmul.msk.bf16.gmra.mxu1 %vm553_vm0, %v9977_v7 }
  0x9e   : > { %7988 = vmatmul.msk.bf16.gmra.mxu2 %vm553_vm0, %v9977_v7  ;;  %8004 = vmatmul.msk.bf16.gmra.mxu3 %vm553_vm0, %v9977_v7 }
  0xa9   : > { %v611_v12 = vpop.f32.mrf.mxu0 }
  0xaa   : > { %v700_v14 = vpop.f32.mrf.mxu1  ;;  %v612_v16 = vadd.f32 %v611_v12, %v9994_v13 }
  0xab   : > { %v701_v18 = vadd.f32 %v700_v14, %v9996_v15 }
  0xac   : > { %7957 = vmatmul.msk.bf16.gmra.mxu0 %vm553_vm0, %v9992_v11  ;;  %v1572_v23 = vmul.f32 %v10007_v17, %v612_v16  ;;  %vm1314_vm1 = vcmp.gt.f32.partialorder %v612_v16, 0.0 }
  0xad   : > { %7973 = vmatmul.msk.bf16.gmra.mxu1 %vm553_vm0, %v9992_v11  ;;  %v1573_v28 = vmul.f32 %v10007_v17, %v701_v18  ;;  %vm1315_vm2 = vcmp.gt.f32.partialorder %v701_v18, 0.0 }
  0xae   : > { %7989 = vmatmul.msk.bf16.gmra.mxu2 %vm553_vm0, %v9992_v11  ;;  %8005 = vmatmul.msk.bf16.gmra.mxu3 %vm553_vm0, %v9992_v11  ;;  %v1828_v35 = vsel %vm1314_vm1, %v612_v16, %v1572_v23 }
  0xaf   : > { %v1829_v38 = vsel %vm1315_vm2, %v701_v18, %v1573_v28 }
  0xb1   : > { %v789_v19 = vpop.f32.mrf.mxu2  ;;  %v878_v21 = vpop.f32.mrf.mxu3 }
  0xb2   : > { %v613_v22 = vpop.f32.mrf.mxu0  ;;  %v702_v27 = vpop.f32.mrf.mxu1  ;;  %v790_v31 = vadd.f32 %v789_v19, %v10010_v20  ;;  %v879_v36 = vadd.f32 %v878_v21, %v10013_v24  ;;  %v411_v19 = vld [vmem:[%s9889_s28 + $0xa0] sm:$0xff]  ;;  %v412_v21 = vld [vmem:[%s9889_s28 + $0xa8] sm:$0xff] }
  0xb3   : > { %v614_v25 = vadd.f32 %v613_v22, %v9994_v13  ;;  %v703_v29 = vadd.f32 %v702_v27, %v9996_v15 }
  0xb4   : > { %v1574_v46 = vmul.f32 %v10007_v17, %v790_v31  ;;  %vm1316_vm5 = vcmp.gt.f32.partialorder %v790_v31, 0.0  ;;  %v1575_v52 = vmul.f32 %v10007_v17, %v879_v36  ;;  %vm1317_vm6 = vcmp.gt.f32.partialorder %v879_v36, 0.0 }
  0xb5   : > { %vm1322_vm3 = vcmp.gt.f32.partialorder %v614_v25, 0.0  ;;  %v1580_v30 = vmul.f32 %v10007_v17, %v614_v25  ;;  %vm1323_vm4 = vcmp.gt.f32.partialorder %v703_v29, 0.0  ;;  %v1581_v32 = vmul.f32 %v10007_v17, %v703_v29 }
  0xb6   : > { %v1830_v59 = vsel %vm1316_vm5, %v790_v31, %v1574_v46  ;;  %v1831_v61 = vsel %vm1317_vm6, %v879_v36, %v1575_v52 }
  0xb7   : > { %v1836_v37 = vsel %vm1322_vm3, %v614_v25, %v1580_v30  ;;  %v1837_v40 = vsel %vm1323_vm4, %v703_v29, %v1581_v32  ;;  %v10064_v32 = vpack.c.bf16 %v412_v21, %v411_v19 }
  0xb8   : > { %v10024_v39 = vpack.c.bf16 %v1836_v37, %v1828_v35  ;;  %v10026_v42 = vpack.c.bf16 %v1837_v40, %v1829_v38 }
  0xb9   : > { %v791_v43 = vpop.f32.mrf.mxu2  ;;  %v880_v49 = vpop.f32.mrf.mxu3 }
  0xba   : > { %13188 = vst [vmem:[#allocation13_spill] sm:$0xff] %v10024_v39  ;;  %v792_v48 = vadd.f32 %v791_v43, %v10010_v20  ;;  %v616_v51 = vpop.f32.mrf.mxu0  ;;  %v881_v54 = vadd.f32 %v880_v49, %v10013_v24  ;;  %v705_v55 = vpop.f32.mrf.mxu1 }
  0xbb   : > { %13189 = vst [vmem:[#allocation14_spill] sm:$0xff] %v10026_v42  ;;  %v617_v0 = vadd.f32 %v616_v51, %v9994_v13  ;;  %v706_v2 = vadd.f32 %v705_v55, %v9996_v15 }
  0xbc   : > { %vm1324_vm7 = vcmp.gt.f32.partialorder %v792_v48, 0.0  ;;  %v1582_v57 = vmul.f32 %v10007_v17, %v792_v48  ;;  %vm1325_vm8 = vcmp.gt.f32.partialorder %v881_v54, 0.0  ;;  %v1583_v58 = vmul.f32 %v10007_v17, %v881_v54  ;;  %7958 = vmatmul.msk.bf16.gmra.mxu0 %vm553_vm0, %v10028_v45 }
  0xbd   : > { %7974 = vmatmul.msk.bf16.gmra.mxu1 %vm553_vm0, %v10028_v45  ;;  %v1588_v6 = vmul.f32 %v10007_v17, %v617_v0  ;;  %vm1330_vm9 = vcmp.gt.f32.partialorder %v617_v0, 0.0  ;;  %v1589_v10 = vmul.f32 %v10007_v17, %v706_v2  ;;  %vm1331_vm10 = vcmp.gt.f32.partialorder %v706_v2, 0.0 }
  0xbe   : > { %v1838_v60 = vsel %vm1324_vm7, %v792_v48, %v1582_v57  ;;  %7990 = vmatmul.msk.bf16.gmra.mxu2 %vm553_vm0, %v10028_v45  ;;  %v1839_v63 = vsel %vm1325_vm8, %v881_v54, %v1583_v58  ;;  %8006 = vmatmul.msk.bf16.gmra.mxu3 %vm553_vm0, %v10028_v45 }
  0xbf   : > { %v10042_v62 = vpack.c.bf16 %v1838_v60, %v1830_v59  ;;  %v10047_v1 = vpack.c.bf16 %v1839_v63, %v1831_v61  ;;  %v1844_v22 = vsel %vm1330_vm9, %v617_v0, %v1588_v6  ;;  %v1845_v27 = vsel %vm1331_vm10, %v706_v2, %v1589_v10  ;;  %v414_v10 = vld [vmem:[%s9889_s28 + $0xb8] sm:$0xff] }
  0xc1   : > { %13190 = vst [vmem:[#allocation15_spill] sm:$0xff] %v10042_v62  ;;  %v794_v3 = vpop.f32.mrf.mxu2  ;;  %v883_v4 = vpop.f32.mrf.mxu3 }
  0xc2   : > { %13191 = vst [vmem:[#allocation16_spill] sm:$0xff] %v10047_v1  ;;  %v618_v5 = vpop.f32.mrf.mxu0  ;;  %v707_v9 = vpop.f32.mrf.mxu1  ;;  %v795_v16 = vadd.f32 %v794_v3, %v10010_v20  ;;  %v884_v23 = vadd.f32 %v883_v4, %v10013_v24 }
  0xc3   : > { %v619_v8 = vadd.f32 %v618_v5, %v9994_v13  ;;  %v708_v12 = vadd.f32 %v707_v9, %v9996_v15  ;;  %v413_v9 = vld [vmem:[%s9889_s28 + $0xb0] sm:$0xff] }
  0xc4   : > { %v1590_v33 = vmul.f32 %v10007_v17, %v795_v16  ;;  %vm1332_vm13 = vcmp.gt.f32.partialorder %v795_v16, 0.0  ;;  %v1591_v37 = vmul.f32 %v10007_v17, %v884_v23  ;;  %vm1333_vm14 = vcmp.gt.f32.partialorder %v884_v23, 0.0 }
  0xc5   : > { %vm1338_vm11 = vcmp.gt.f32.partialorder %v619_v8, 0.0  ;;  %v1596_v14 = vmul.f32 %v10007_v17, %v619_v8  ;;  %vm1339_vm12 = vcmp.gt.f32.partialorder %v708_v12, 0.0  ;;  %v1597_v18 = vmul.f32 %v10007_v17, %v708_v12 }
  0xc6   : > { %v1846_v48 = vsel %vm1332_vm13, %v795_v16, %v1590_v33  ;;  %v1847_v51 = vsel %vm1333_vm14, %v884_v23, %v1591_v37 }
  0xc7   : > { %v1852_v25 = vsel %vm1338_vm11, %v619_v8, %v1596_v14  ;;  %v1853_v29 = vsel %vm1339_vm12, %v708_v12, %v1597_v18 }
  0xc8   : > { %v10060_v28 = vpack.c.bf16 %v1852_v25, %v1844_v22  ;;  %v10062_v30 = vpack.c.bf16 %v1853_v29, %v1845_v27  ;;  %v10100_v25 = vpack.c.bf16 %v414_v10, %v413_v9  ;;  %v416_v9 = vld [vmem:[%s9889_s28 + $0xc8] sm:$0xff] }
  0xc9   : > { %v796_v31 = vpop.f32.mrf.mxu2  ;;  %v885_v35 = vpop.f32.mrf.mxu3 }
  0xca   : > { %13192 = vst [vmem:[#allocation17_spill] sm:$0xff] %v10060_v28  ;;  %v797_v34 = vadd.f32 %v796_v31, %v10010_v20  ;;  %v621_v36 = vpop.f32.mrf.mxu0  ;;  %v886_v38 = vadd.f32 %v885_v35, %v10013_v24  ;;  %v710_v40 = vpop.f32.mrf.mxu1 }
  0xcb   : > { %13193 = vst [vmem:[#allocation18_spill] sm:$0xff] %v10062_v30  ;;  %v622_v55 = vadd.f32 %v621_v36, %v9994_v13  ;;  %v711_v58 = vadd.f32 %v710_v40, %v9996_v15 }
  0xcc   : > { %vm1340_vm15 = vcmp.gt.f32.partialorder %v797_v34, 0.0  ;;  %v1598_v43 = vmul.f32 %v10007_v17, %v797_v34  ;;  %vm1341_vm1 = vcmp.gt.f32.partialorder %v886_v38, 0.0  ;;  %v1599_v46 = vmul.f32 %v10007_v17, %v886_v38  ;;  %7959 = vmatmul.msk.bf16.gmra.mxu0 %vm553_vm0, %v10064_v32 }
  0xcd   : > { %7975 = vmatmul.msk.bf16.gmra.mxu1 %vm553_vm0, %v10064_v32  ;;  %v1604_v63 = vmul.f32 %v10007_v17, %v622_v55  ;;  %vm1346_vm2 = vcmp.gt.f32.partialorder %v622_v55, 0.0  ;;  %v1605_v3 = vmul.f32 %v10007_v17, %v711_v58  ;;  %vm1347_vm3 = vcmp.gt.f32.partialorder %v711_v58, 0.0 }
  0xce   : > { %v1854_v49 = vsel %vm1340_vm15, %v797_v34, %v1598_v43  ;;  %7991 = vmatmul.msk.bf16.gmra.mxu2 %vm553_vm0, %v10064_v32  ;;  %v1855_v54 = vsel %vm1341_vm1, %v886_v38, %v1599_v46  ;;  %8007 = vmatmul.msk.bf16.gmra.mxu3 %vm553_vm0, %v10064_v32 }
  0xcf   : > { %v10078_v52 = vpack.c.bf16 %v1854_v49, %v1846_v48  ;;  %v10083_v57 = vpack.c.bf16 %v1855_v54, %v1847_v51  ;;  %v1860_v12 = vsel %vm1346_vm2, %v622_v55, %v1604_v63  ;;  %v1861_v18 = vsel %vm1347_vm3, %v711_v58, %v1605_v3 }
  0xd1   : > { %13194 = vst [vmem:[#allocation19_spill] sm:$0xff] %v10078_v52  ;;  %v799_v59 = vpop.f32.mrf.mxu2  ;;  %v888_v60 = vpop.f32.mrf.mxu3 }
  0xd2   : > { %13195 = vst [vmem:[#allocation20_spill] sm:$0xff] %v10083_v57  ;;  %v623_v61 = vpop.f32.mrf.mxu0  ;;  %v712_v2 = vpop.f32.mrf.mxu1  ;;  %v800_v6 = vadd.f32 %v799_v59, %v10010_v20  ;;  %v889_v14 = vadd.f32 %v888_v60, %v10013_v24 }
  0xd3   : > { %v624_v0 = vadd.f32 %v623_v61, %v9994_v13  ;;  %v713_v4 = vadd.f32 %v712_v2, %v9996_v15 }
  0xd4   : > { %v1606_v27 = vmul.f32 %v10007_v17, %v800_v6  ;;  %vm1348_vm6 = vcmp.gt.f32.partialorder %v800_v6, 0.0  ;;  %v1607_v34 = vmul.f32 %v10007_v17, %v889_v14  ;;  %vm1349_vm7 = vcmp.gt.f32.partialorder %v889_v14, 0.0 }
  0xd5   : > { %vm1354_vm4 = vcmp.gt.f32.partialorder %v624_v0, 0.0  ;;  %v1612_v5 = vmul.f32 %v10007_v17, %v624_v0  ;;  %vm1355_vm5 = vcmp.gt.f32.partialorder %v713_v4, 0.0  ;;  %v1613_v8 = vmul.f32 %v10007_v17, %v713_v4 }
  0xd6   : > { %v1862_v40 = vsel %vm1348_vm6, %v800_v6, %v1606_v27  ;;  %v1863_v46 = vsel %vm1349_vm7, %v889_v14, %v1607_v34 }
  0xd7   : > { %v1868_v16 = vsel %vm1354_vm4, %v624_v0, %v1612_v5  ;;  %v1869_v21 = vsel %vm1355_vm5, %v713_v4, %v1613_v8  ;;  %v415_v8 = vld [vmem:[%s9889_s28 + $0xc0] sm:$0xff] }
  0xd8   : > { %v10096_v19 = vpack.c.bf16 %v1868_v16, %v1860_v12  ;;  %v10098_v22 = vpack.c.bf16 %v1869_v21, %v1861_v18 }
  0xd9   : > { %v801_v23 = vpop.f32.mrf.mxu2  ;;  %v890_v31 = vpop.f32.mrf.mxu3 }
  0xda   : > { %13196 = vst [vmem:[#allocation21_spill] sm:$0xff] %v10096_v19  ;;  %v802_v29 = vadd.f32 %v801_v23, %v10010_v20  ;;  %v626_v33 = vpop.f32.mrf.mxu0  ;;  %v891_v35 = vadd.f32 %v890_v31, %v10013_v24  ;;  %v715_v36 = vpop.f32.mrf.mxu1 }
  0xdb   : > { %13197 = vst [vmem:[#allocation22_spill] sm:$0xff] %v10098_v22  ;;  %v627_v51 = vadd.f32 %v626_v33, %v9994_v13  ;;  %v716_v55 = vadd.f32 %v715_v36, %v9996_v15 }
  0xdc   : > { %vm1356_vm8 = vcmp.gt.f32.partialorder %v802_v29, 0.0  ;;  %v1614_v37 = vmul.f32 %v10007_v17, %v802_v29  ;;  %vm1357_vm9 = vcmp.gt.f32.partialorder %v891_v35, 0.0  ;;  %v1615_v38 = vmul.f32 %v10007_v17, %v891_v35  ;;  %7960 = vmatmul.msk.bf16.gmra.mxu0 %vm553_vm0, %v10100_v25 }
  0xdd   : > { %7976 = vmatmul.msk.bf16.gmra.mxu1 %vm553_vm0, %v10100_v25  ;;  %v1620_v61 = vmul.f32 %v10007_v17, %v627_v51  ;;  %vm1362_vm10 = vcmp.gt.f32.partialorder %v627_v51, 0.0  ;;  %v1621_v2 = vmul.f32 %v10007_v17, %v716_v55  ;;  %vm1363_vm11 = vcmp.gt.f32.partialorder %v716_v55, 0.0 }
  0xde   : > { %v1870_v43 = vsel %vm1356_vm8, %v802_v29, %v1614_v37  ;;  %7992 = vmatmul.msk.bf16.gmra.mxu2 %vm553_vm0, %v10100_v25  ;;  %v1871_v49 = vsel %vm1357_vm9, %v891_v35, %v1615_v38  ;;  %8008 = vmatmul.msk.bf16.gmra.mxu3 %vm553_vm0, %v10100_v25  ;;  %v10136_v29 = vpack.c.bf16 %v416_v9, %v415_v8 }
  0xdf   : > { %v10114_v48 = vpack.c.bf16 %v1870_v43, %v1862_v40  ;;  %v10119_v54 = vpack.c.bf16 %v1871_v49, %v1863_v46  ;;  %v1876_v10 = vsel %vm1362_vm10, %v627_v51, %v1620_v61  ;;  %v1877_v16 = vsel %vm1363_vm11, %v716_v55, %v1621_v2 }
  0xe1   : > { %13198 = vst [vmem:[#allocation23_spill] sm:$0xff] %v10114_v48  ;;  %v804_v58 = vpop.f32.mrf.mxu2  ;;  %v893_v59 = vpop.f32.mrf.mxu3 }
  0xe2   : > { %13199 = vst [vmem:[#allocation24_spill] sm:$0xff] %v10119_v54  ;;  %v628_v60 = vpop.f32.mrf.mxu0  ;;  %v717_v0 = vpop.f32.mrf.mxu1  ;;  %v805_v5 = vadd.f32 %v804_v58, %v10010_v20  ;;  %v894_v12 = vadd.f32 %v893_v59, %v10013_v24 }
  0xe3   : > { %v629_v63 = vadd.f32 %v628_v60, %v9994_v13  ;;  %v718_v3 = vadd.f32 %v717_v0, %v9996_v15 }
  0xe4   : > { %v1622_v31 = vmul.f32 %v10007_v17, %v805_v5  ;;  %vm1364_vm14 = vcmp.gt.f32.partialorder %v805_v5, 0.0  ;;  %v1623_v36 = vmul.f32 %v10007_v17, %v894_v12  ;;  %vm1365_vm15 = vcmp.gt.f32.partialorder %v894_v12, 0.0 }
  0xe5   : > { %vm1370_vm12 = vcmp.gt.f32.partialorder %v629_v63, 0.0  ;;  %v1628_v4 = vmul.f32 %v10007_v17, %v629_v63  ;;  %vm1371_vm13 = vcmp.gt.f32.partialorder %v718_v3, 0.0  ;;  %v1629_v6 = vmul.f32 %v10007_v17, %v718_v3 }
  0xe6   : > { %v1878_v46 = vsel %vm1364_vm14, %v805_v5, %v1622_v31  ;;  %v1879_v51 = vsel %vm1365_vm15, %v894_v12, %v1623_v36 }
  0xe7   : > { %v1884_v14 = vsel %vm1370_vm12, %v629_v63, %v1628_v4  ;;  %v1885_v21 = vsel %vm1371_vm13, %v718_v3, %v1629_v6 }
  0xe8   : > { %v10132_v18 = vpack.c.bf16 %v1884_v14, %v1876_v10  ;;  %v10134_v23 = vpack.c.bf16 %v1885_v21, %v1877_v16  ;;  %v417_v14 = vld [vmem:[%s9889_s28 + $0xd0] sm:$0xff]  ;;  %v418_v16 = vld [vmem:[%s9889_s28 + $0xd8] sm:$0xff] }
  0xe9   : > { %v806_v27 = vpop.f32.mrf.mxu2  ;;  %v895_v34 = vpop.f32.mrf.mxu3 }
  0xea   : > { %13200 = vst [vmem:[#allocation25_spill] sm:$0xff] %v10132_v18  ;;  %v807_v33 = vadd.f32 %v806_v27, %v10010_v20  ;;  %v631_v35 = vpop.f32.mrf.mxu0  ;;  %v896_v37 = vadd.f32 %v895_v34, %v10013_v24  ;;  %v720_v38 = vpop.f32.mrf.mxu1 }
  0xeb   : > { %13201 = vst [vmem:[#allocation26_spill] sm:$0xff] %v10134_v23  ;;  %v632_v59 = vadd.f32 %v631_v35, %v9994_v13  ;;  %v721_v61 = vadd.f32 %v720_v38, %v9996_v15  ;;  %v10172_v38 = vpack.c.bf16 %v418_v16, %v417_v14 }
  0xec   : > { %vm1372_vm1 = vcmp.gt.f32.partialorder %v807_v33, 0.0  ;;  %v1630_v40 = vmul.f32 %v10007_v17, %v807_v33  ;;  %vm1373_vm2 = vcmp.gt.f32.partialorder %v896_v37, 0.0  ;;  %v1631_v43 = vmul.f32 %v10007_v17, %v896_v37  ;;  %7961 = vmatmul.msk.bf16.gmra.mxu0 %vm553_vm0, %v10136_v29 }
  0xed   : > { %7977 = vmatmul.msk.bf16.gmra.mxu1 %vm553_vm0, %v10136_v29  ;;  %v1636_v3 = vmul.f32 %v10007_v17, %v632_v59  ;;  %vm1378_vm3 = vcmp.gt.f32.partialorder %v632_v59, 0.0  ;;  %v1637_v6 = vmul.f32 %v10007_v17, %v721_v61  ;;  %vm1379_vm4 = vcmp.gt.f32.partialorder %v721_v61, 0.0 }
  0xee   : > { %v1886_v49 = vsel %vm1372_vm1, %v807_v33, %v1630_v40  ;;  %7993 = vmatmul.msk.bf16.gmra.mxu2 %vm553_vm0, %v10136_v29  ;;  %v1887_v58 = vsel %vm1373_vm2, %v896_v37, %v1631_v43  ;;  %8009 = vmatmul.msk.bf16.gmra.mxu3 %vm553_vm0, %v10136_v29 }
  0xef   : > { %v10150_v55 = vpack.c.bf16 %v1886_v49, %v1878_v46  ;;  %v10155_v60 = vpack.c.bf16 %v1887_v58, %v1879_v51  ;;  %v1892_v21 = vsel %vm1378_vm3, %v632_v59, %v1636_v3  ;;  %v1893_v33 = vsel %vm1379_vm4, %v721_v61, %v1637_v6 }
  0xf1   : > { %13202 = vst [vmem:[#allocation27_spill] sm:$0xff] %v10150_v55  ;;  %v809_v63 = vpop.f32.mrf.mxu2  ;;  %v898_v0 = vpop.f32.mrf.mxu3 }
  0xf2   : > { %13203 = vst [vmem:[#allocation28_spill] sm:$0xff] %v10155_v60  ;;  %v633_v2 = vpop.f32.mrf.mxu0  ;;  %v722_v5 = vpop.f32.mrf.mxu1  ;;  %v810_v10 = vadd.f32 %v809_v63, %v10010_v20  ;;  %v899_v27 = vadd.f32 %v898_v0, %v10013_v24 }
  0xf3   : > { %v634_v4 = vadd.f32 %v633_v2, %v9994_v13  ;;  %v723_v8 = vadd.f32 %v722_v5, %v9996_v15 }
  0xf4   : > { %v1638_v40 = vmul.f32 %v10007_v17, %v810_v10  ;;  %vm1380_vm7 = vcmp.gt.f32.partialorder %v810_v10, 0.0  ;;  %v1639_v51 = vmul.f32 %v10007_v17, %v899_v27  ;;  %vm1381_vm8 = vcmp.gt.f32.partialorder %v899_v27, 0.0 }
  0xf5   : > { %vm1386_vm5 = vcmp.gt.f32.partialorder %v634_v4, 0.0  ;;  %v1644_v9 = vmul.f32 %v10007_v17, %v634_v4  ;;  %vm1387_vm6 = vcmp.gt.f32.partialorder %v723_v8, 0.0  ;;  %v1645_v12 = vmul.f32 %v10007_v17, %v723_v8 }
  0xf6   : > { %v1894_v0 = vsel %vm1380_vm7, %v810_v10, %v1638_v40  ;;  %v1895_v3 = vsel %vm1381_vm8, %v899_v27, %v1639_v51 }
  0xf7   : > { %v1900_v31 = vsel %vm1386_vm5, %v634_v4, %v1644_v9  ;;  %v1901_v35 = vsel %vm1387_vm6, %v723_v8, %v1645_v12 }
  0xf8   : > { %v10168_v34 = vpack.c.bf16 %v1900_v31, %v1892_v21  ;;  %v10170_v36 = vpack.c.bf16 %v1901_v35, %v1893_v33 }
  0xf9   : > { %v811_v37 = vpop.f32.mrf.mxu2  ;;  %v900_v46 = vpop.f32.mrf.mxu3 }
  0xfa   : > { %13204 = vst [vmem:[#allocation29_spill] sm:$0xff] %v10168_v34  ;;  %v812_v43 = vadd.f32 %v811_v37, %v10010_v20  ;;  %v636_v49 = vpop.f32.mrf.mxu0  ;;  %v901_v58 = vadd.f32 %v900_v46, %v10013_v24  ;;  %v725_v59 = vpop.f32.mrf.mxu1  ;;  %v420_v46 = vld [vmem:[%s9889_s28 + $0xe8] sm:$0xff] }
  0xfb   : > { %13205 = vst [vmem:[#allocation30_spill] sm:$0xff] %v10170_v36  ;;  %v637_v6 = vadd.f32 %v636_v49, %v9994_v13  ;;  %v726_v9 = vadd.f32 %v725_v59, %v9996_v15 }
  0xfc   : > { %vm1388_vm9 = vcmp.gt.f32.partialorder %v812_v43, 0.0  ;;  %v1646_v61 = vmul.f32 %v10007_v17, %v812_v43  ;;  %vm1389_vm10 = vcmp.gt.f32.partialorder %v901_v58, 0.0  ;;  %v1647_v63 = vmul.f32 %v10007_v17, %v901_v58  ;;  %7962 = vmatmul.msk.bf16.gmra.mxu0 %vm553_vm0, %v10172_v38 }
  0xfd   : > { %7978 = vmatmul.msk.bf16.gmra.mxu1 %vm553_vm0, %v10172_v38  ;;  %v1652_v16 = vmul.f32 %v10007_v17, %v637_v6  ;;  %vm1394_vm11 = vcmp.gt.f32.partialorder %v637_v6, 0.0  ;;  %v1653_v31 = vmul.f32 %v10007_v17, %v726_v9  ;;  %vm1395_vm12 = vcmp.gt.f32.partialorder %v726_v9, 0.0 }
  0xfe   : > { %v1902_v2 = vsel %vm1388_vm9, %v812_v43, %v1646_v61  ;;  %7994 = vmatmul.msk.bf16.gmra.mxu2 %vm553_vm0, %v10172_v38  ;;  %v1903_v5 = vsel %vm1389_vm10, %v901_v58, %v1647_v63  ;;  %8010 = vmatmul.msk.bf16.gmra.mxu3 %vm553_vm0, %v10172_v38  ;;  %v419_v43 = vld [vmem:[%s9889_s28 + $0xe0] sm:$0xff] }
  0xff   : > { %v10186_v4 = vpack.c.bf16 %v1902_v2, %v1894_v0  ;;  %v10191_v8 = vpack.c.bf16 %v1903_v5, %v1895_v3  ;;  %v1908_v49 = vsel %vm1394_vm11, %v637_v6, %v1652_v16  ;;  %v1909_v59 = vsel %vm1395_vm12, %v726_v9, %v1653_v31 }
 0x100   : > { %v10208_v3 = vpack.c.bf16 %v420_v46, %v419_v43 }
 0x101   : > { %13206 = vst [vmem:[#allocation31_spill] sm:$0xff] %v10186_v4  ;;  %v814_v10 = vpop.f32.mrf.mxu2  ;;  %v903_v12 = vpop.f32.mrf.mxu3 }
 0x102   : > { %13207 = vst [vmem:[#allocation32_spill] sm:$0xff] %v10191_v8  ;;  %v638_v14 = vpop.f32.mrf.mxu0  ;;  %v727_v27 = vpop.f32.mrf.mxu1  ;;  %v815_v37 = vadd.f32 %v814_v10, %v10010_v20  ;;  %v904_v51 = vadd.f32 %v903_v12, %v10013_v24 }
 0x103   : > { %v639_v21 = vadd.f32 %v638_v14, %v9994_v13  ;;  %v728_v33 = vadd.f32 %v727_v27, %v9996_v15 }
 0x104   : > { %v1654_v5 = vmul.f32 %v10007_v17, %v815_v37  ;;  %vm1396_vm15 = vcmp.gt.f32.partialorder %v815_v37, 0.0  ;;  %v1655_v6 = vmul.f32 %v10007_v17, %v904_v51  ;;  %vm1397_vm1 = vcmp.gt.f32.partialorder %v904_v51, 0.0 }
 0x105   : > { %vm1402_vm13 = vcmp.gt.f32.partialorder %v639_v21, 0.0  ;;  %v1660_v35 = vmul.f32 %v10007_v17, %v639_v21  ;;  %vm1403_vm14 = vcmp.gt.f32.partialorder %v728_v33, 0.0  ;;  %v1661_v40 = vmul.f32 %v10007_v17, %v728_v33 }
 0x106   : > { %v1910_v31 = vsel %vm1396_vm15, %v815_v37, %v1654_v5 }
 0x107   : > { %v1916_v58 = vsel %vm1402_vm13, %v639_v21, %v1660_v35  ;;  %v1917_v63 = vsel %vm1403_vm14, %v728_v33, %v1661_v40  ;;  %v1911_v35 = vsel %vm1397_vm1, %v904_v51, %v1655_v6  ;;  %v9378_v51 = vld [vmem:[#allocation7 + $0x3ec] sm:$0xf0] }
 0x108   : > { %v10204_v61 = vpack.c.bf16 %v1916_v58, %v1908_v49  ;;  %v10206_v0 = vpack.c.bf16 %v1917_v63, %v1909_v59  ;;  %v8447_v58 = vld [vmem:[#allocation7 + $0x2e0] sm:$0xf]  ;;  %v9346_v59 = vld [vmem:[#allocation7 + $0x2ec] sm:$0xf0] }
 0x109   : > { %v816_v2 = vpop.f32.mrf.mxu2  ;;  %v905_v14 = vpop.f32.mrf.mxu3  ;;  %v8191_v63 = vld [vmem:[#allocation7 + $0xe0] sm:$0xf]  ;;  %v8448_v5 = vor.u32 %v9346_v59, %v8447_v58 }
 0x10a   : > { %13208 = vst [vmem:[#allocation33_spill] sm:$0xff] %v10204_v61  ;;  %v817_v10 = vadd.f32 %v816_v2, %v10010_v20  ;;  %v641_v27 = vpop.f32.mrf.mxu0  ;;  %v906_v12 = vadd.f32 %v905_v14, %v10013_v24  ;;  %v730_v9 = vpop.f32.mrf.mxu1  ;;  %v8575_v14 = vld [vmem:[#allocation7 + $0x3e0] sm:$0xf] }
 0x10b   : > { %13209 = vst [vmem:[#allocation34_spill] sm:$0xff] %v10206_v0  ;;  %v642_v46 = vadd.f32 %v641_v27, %v9994_v13  ;;  %v731_v37 = vadd.f32 %v730_v9, %v9996_v15  ;;  %3936 = vmatpush.bf16.msra.mxu2 %v8448_v5 }
 0x10c   : > { %vm1404_vm2 = vcmp.gt.f32.partialorder %v817_v10, 0.0  ;;  %v1662_v16 = vmul.f32 %v10007_v17, %v817_v10  ;;  %vm1405_vm3 = vcmp.gt.f32.partialorder %v906_v12, 0.0  ;;  %v1663_v21 = vmul.f32 %v10007_v17, %v906_v12  ;;  %7963 = vmatmul.msk.bf16.gmra.mxu0 %vm553_vm0, %v10208_v3 }
 0x10d   : > { %7979 = vmatmul.msk.bf16.gmra.mxu1 %vm553_vm0, %v10208_v3  ;;  %v1668_v27 = vmul.f32 %v10007_v17, %v642_v46  ;;  %vm1410_vm4 = vcmp.gt.f32.partialorder %v642_v46, 0.0  ;;  %v1669_v9 = vmul.f32 %v10007_v17, %v731_v37  ;;  %vm1411_vm5 = vcmp.gt.f32.partialorder %v731_v37, 0.0 }
 0x10e   : > { %v1918_v33 = vsel %vm1404_vm2, %v817_v10, %v1662_v16  ;;  %7995 = vmatmul.msk.bf16.gmra.mxu2 %vm553_vm0, %v10208_v3  ;;  %v1919_v43 = vsel %vm1405_vm3, %v906_v12, %v1663_v21  ;;  %8011 = vmatmul.msk.bf16.gmra.mxu3 %vm553_vm0, %v10208_v3  ;;  %v9282_v10 = vld [vmem:[#allocation7 + $0xec] sm:$0xf0]  ;;  %v8576_v21 = vor.u32 %v9378_v51, %v8575_v14 }
 0x10f   : > { %v10222_v40 = vpack.c.bf16 %v1918_v33, %v1910_v31  ;;  %v10227_v49 = vpack.c.bf16 %v1919_v43, %v1911_v35  ;;  %v8192_v12 = vor.u32 %v9282_v10, %v8191_v63  ;;  %v421_v63 = vld [vmem:[%s9889_s28 + $0xf0] sm:$0xff]  ;;  %v422_v10 = vld [vmem:[%s9889_s28 + $0xf8] sm:$0xff]  ;;  %v1924_v14 = vsel %vm1410_vm4, %v642_v46, %v1668_v27  ;;  %s9540_s28 = sshll.u32 %s9833_s3, 4  ;;  %s7777_s3 = scalar_lea.sflag [#allocation6], %s372_s26 }
 0x110   : > { %4025 = vmatpush.bf16.msra.mxu3 %v8576_v21  ;;  %s7788_s10 = scalar_lea.hbm %s12931_s9, %s9540_s28 }
 0x111   : > { %13210 = vst [vmem:[#allocation35_spill] sm:$0xff] %v10222_v40  ;;  %v819_v2 = vpop.f32.mrf.mxu2  ;;  %v908_v6 = vpop.f32.mrf.mxu3  ;;  %3758 = vmatpush.bf16.msra.mxu0 %v8192_v12  ;;  %s7792_s12 = sshll.u32 %s7788_s10, 4  ;;  %s7793_s12 = int_to_ptr.hbm [resolvable:$true] %s7792_s12 }
 0x112   : > { %13211 = vst [vmem:[#allocation36_spill] sm:$0xff] %v10227_v49  ;;  %v643_v16 = vpop.f32.mrf.mxu0  ;;  %v732_v33 = vpop.f32.mrf.mxu1  ;;  %v820_v58 = vadd.f32 %v819_v2, %v10010_v20  ;;  %v909_v5 = vadd.f32 %v908_v6, %v10013_v24  ;;  %v9314_v49 = vld [vmem:[#allocation7 + $0x1ec] sm:$0xf0]  ;;  %v10244_v2 = vpack.c.bf16 %v422_v10, %v421_v63  ;;  %s9692_s6 = sshra.s32 %s7793_s12, 4  ;;  %s9693_s6 = int_to_ptr.hbm [resolvable:$true] %s9692_s6 }
 0x113   : > { %v644_v31 = vadd.f32 %v643_v16, %v9994_v13  ;;  %v733_v35 = vadd.f32 %v732_v33, %v9996_v15  ;;  %v8319_v16 = vld [vmem:[#allocation7 + $0x1e0] sm:$0xf]  ;;  %v1925_v33 = vsel %vm1411_vm5, %v731_v37, %v1669_v9  ;;  %s9694_s18 = scalar_lea.hbm %s9693_s6, 16  ;;  %p9699_p3 = scmp.lt.s32.totalorder %s9693_s6, %s12931_s9 }
 0x114   : > { %v8320_v40 = vor.u32 %v9314_v49, %v8319_v16  ;;  %v1670_v8 = vmul.f32 %v10007_v17, %v820_v58  ;;  %vm1412_vm8 = vcmp.gt.f32.partialorder %v820_v58, 0.0  ;;  %v1671_v6 = vmul.f32 %v10007_v17, %v909_v5  ;;  %p9695_p0 = scmp.ne.s32.totalorder %s9693_s6, %s9694_s18  ;;  %p9700_p4 = scmp.lt.s32.totalorder %s9698_s25, %s9694_s18 }
 0x115   : > { %vm1418_vm6 = vcmp.gt.f32.partialorder %v644_v31, 0.0  ;;  %v1676_v43 = vmul.f32 %v10007_v17, %v644_v31  ;;  %vm1419_vm7 = vcmp.gt.f32.partialorder %v733_v35, 0.0  ;;  %v1677_v59 = vmul.f32 %v10007_v17, %v733_v35 }
 0x116   : > { %3847 = vmatpush.bf16.msra.mxu1 %v8320_v40  ;;  %vm1413_vm9 = vcmp.gt.f32.partialorder %v909_v5, 0.0  ;;  %p9696_p1 = pnand %p9695_p0, %p9850_p5  ;;  %p9701_p7 = por %p9700_p4, %p9699_p3 }
 0x117   : > { %v1932_v51 = vsel %vm1418_vm6, %v644_v31, %v1676_v43  ;;  %v1933_v21 = vsel %vm1419_vm7, %v733_v35, %v1677_v59  ;;  %v1927_v40 = vsel %vm1413_vm9, %v909_v5, %v1671_v6 }
 0x118   : > { %v10240_v12 = vpack.c.bf16 %v1932_v51, %v1924_v14  ;;  %v10242_v0 = vpack.c.bf16 %v1933_v21, %v1925_v33  ;;  %p9697_p2 = pneg %p9696_p1 }
 0x119   : > { %v821_v61 = vpop.f32.mrf.mxu2  ;;  %v910_v46 = vpop.f32.mrf.mxu3 }
 0x11a   : > { %13212 = vst [vmem:[#allocation37_spill] sm:$0xff] %v10240_v12  ;;  %v822_v4 = vadd.f32 %v821_v61, %v10010_v20  ;;  %v646_v27 = vpop.f32.mrf.mxu0  ;;  %v911_v37 = vadd.f32 %v910_v46, %v10013_v24  ;;  %v735_v31 = vpop.f32.mrf.mxu1  ;;  %v1926_v61 = vsel %vm1412_vm8, %v820_v58, %v1670_v8  ;;  %p9702_p8 = pnand %p9701_p7, %p9697_p2 }
 0x11b   : > { %13213 = vst [vmem:[#allocation38_spill] sm:$0xff] %v10242_v0  ;;  %v647_v63 = vadd.f32 %v646_v27, %v9994_v13  ;;  %v736_v8 = vadd.f32 %v735_v31, %v9996_v15 }
 0x11c   : > { %vm1420_vm10 = vcmp.gt.f32.partialorder %v822_v4, 0.0  ;;  %v1678_v49 = vmul.f32 %v10007_v17, %v822_v4  ;;  %vm1421_vm11 = vcmp.gt.f32.partialorder %v911_v37, 0.0  ;;  %v1679_v9 = vmul.f32 %v10007_v17, %v911_v37  ;;  %7964 = vmatmul.msk.bf16.gmra.mxu0 %vm553_vm0, %v10244_v2 }
 0x11d   : > { %7980 = vmatmul.msk.bf16.gmra.mxu1 %vm553_vm0, %v10244_v2  ;;  %v1684_v51 = vmul.f32 %v10007_v17, %v647_v63  ;;  %vm1426_vm12 = vcmp.gt.f32.partialorder %v647_v63, 0.0  ;;  %v1685_v33 = vmul.f32 %v10007_v17, %v736_v8  ;;  %vm1427_vm13 = vcmp.gt.f32.partialorder %v736_v8, 0.0 }
 0x11e   : > { %v1934_v35 = vsel %vm1420_vm10, %v822_v4, %v1678_v49  ;;  %7996 = vmatmul.msk.bf16.gmra.mxu2 %vm553_vm0, %v10244_v2  ;;  %v1935_v59 = vsel %vm1421_vm11, %v911_v37, %v1679_v9  ;;  %8012 = vmatmul.msk.bf16.gmra.mxu3 %vm553_vm0, %v10244_v2 }
 0x11f   : > { %v10258_v43 = vpack.c.bf16 %v1934_v35, %v1926_v61  ;;  %v10263_v10 = vpack.c.bf16 %v1935_v59, %v1927_v40  ;;  %v1940_v37 = vsel %vm1426_vm12, %v647_v63, %v1684_v51  ;;  %v1941_v9 = vsel %vm1427_vm13, %v736_v8, %v1685_v33 }
 0x121   : > { %13214 = vst [vmem:[#allocation39_spill] sm:$0xff] %v10258_v43  ;;  %v824_v4 = vpop.f32.mrf.mxu2  ;;  %v913_v58 = vpop.f32.mrf.mxu3 }
 0x122   : > { %13215 = vst [vmem:[#allocation40_spill] sm:$0xff] %v10263_v10  ;;  %v648_v14 = vpop.f32.mrf.mxu0  ;;  %v737_v5 = vpop.f32.mrf.mxu1  ;;  %v825_v27 = vadd.f32 %v824_v4, %v10010_v20  ;;  %v914_v31 = vadd.f32 %v913_v58, %v10013_v24 }
 0x123   : > { %v649_v16 = vadd.f32 %v648_v14, %v9994_v13  ;;  %v738_v21 = vadd.f32 %v737_v5, %v9996_v15 }
 0x124   : > { %v1686_v14 = vmul.f32 %v10007_v17, %v825_v27  ;;  %vm1428_vm1 = vcmp.gt.f32.partialorder %v825_v27, 0.0  ;;  %v1687_v43 = vmul.f32 %v10007_v17, %v914_v31  ;;  %vm1429_vm2 = vcmp.gt.f32.partialorder %v914_v31, 0.0 }
 0x125   : > { %vm1434_vm14 = vcmp.gt.f32.partialorder %v649_v16, 0.0  ;;  %v1692_v46 = vmul.f32 %v10007_v17, %v649_v16  ;;  %vm1435_vm15 = vcmp.gt.f32.partialorder %v738_v21, 0.0  ;;  %v1693_v6 = vmul.f32 %v10007_v17, %v738_v21 }
 0x127   : > { %v1948_v49 = vsel %vm1434_vm14, %v649_v16, %v1692_v46  ;;  %v1949_v35 = vsel %vm1435_vm15, %v738_v21, %v1693_v6  ;;  %v1942_v16 = vsel %vm1428_vm1, %v825_v27, %v1686_v14 }
 0x128   : > { %v10274_v61 = vpack.c.bf16 %v1948_v49, %v1940_v37  ;;  %v10276_v40 = vpack.c.bf16 %v1949_v35, %v1941_v9  ;;  %v8431_v49 = vld [vmem:[#allocation7 + $0x2c0] sm:$0xf]  ;;  %v9342_v9 = vld [vmem:[#allocation7 + $0x2cc] sm:$0xf0] }
 0x129   : > { %v826_v59 = vpop.f32.mrf.mxu2  ;;  %v915_v10 = vpop.f32.mrf.mxu3  ;;  %v8175_v35 = vld [vmem:[#allocation7 + $0xc0] sm:$0xf]  ;;  %v8432_v14 = vor.u32 %v9342_v9, %v8431_v49 }
 0x12a   : > { %13216 = vst [vmem:[#allocation41_spill] sm:$0xff] %v10274_v61  ;;  %v827_v5 = vadd.f32 %v826_v59, %v10010_v20  ;;  %v651_v4 = vpop.f32.mrf.mxu0  ;;  %v916_v63 = vadd.f32 %v915_v10, %v10013_v24  ;;  %v740_v58 = vpop.f32.mrf.mxu1  ;;  %v1943_v10 = vsel %vm1429_vm2, %v914_v31, %v1687_v43  ;;  %v9374_v43 = vld [vmem:[#allocation7 + $0x3cc] sm:$0xf0] }
 0x12b   : > { %13217 = vst [vmem:[#allocation42_spill] sm:$0xff] %v10276_v40  ;;  %v652_v6 = vadd.f32 %v651_v4, %v9994_v13  ;;  %v741_v27 = vadd.f32 %v740_v58, %v9996_v15  ;;  %3937 = vmatpush.bf16.msra.mxu2 %v8432_v14 }
 0x12c   : > { %vm1436_vm3 = vcmp.gt.f32.partialorder %v827_v5, 0.0  ;;  %v1694_v8 = vmul.f32 %v10007_v17, %v827_v5  ;;  %vm1437_vm4 = vcmp.gt.f32.partialorder %v916_v63, 0.0  ;;  %v1695_v51 = vmul.f32 %v10007_v17, %v916_v63  ;;  %8013 = vmatmul.msk.bf16.vlgmr.msrb.gmra.mxu0 %vm553_vm0, %v9893_v26 }
 0x12d   : > { %8029 = vmatmul.msk.bf16.vlgmr.msrb.gmra.mxu1 %vm553_vm0, %v9893_v26  ;;  %v1700_v4 = vmul.f32 %v10007_v17, %v652_v6  ;;  %vm1442_vm5 = vcmp.gt.f32.partialorder %v652_v6, 0.0  ;;  %v1701_v58 = vmul.f32 %v10007_v17, %v741_v27  ;;  %vm1443_vm6 = vcmp.gt.f32.partialorder %v741_v27, 0.0 }
 0x12e   : > { %v1950_v33 = vsel %vm1436_vm3, %v827_v5, %v1694_v8  ;;  %8045 = vmatmul.msk.bf16.vlgmr.msrb.gmra.mxu2 %vm553_vm0, %v9893_v26  ;;  %v1951_v46 = vsel %vm1437_vm4, %v916_v63, %v1695_v51  ;;  %8061 = vmatmul.msk.bf16.vlgmr.msrb.gmra.mxu3 %vm553_vm0, %v9893_v26  ;;  %v9278_v5 = vld [vmem:[#allocation7 + $0xcc] sm:$0xf0]  ;;  %v8559_v8 = vld [vmem:[#allocation7 + $0x3c0] sm:$0xf] }
 0x12f   : > { %v10290_v21 = vpack.c.bf16 %v1950_v33, %v1942_v16  ;;  %v10295_v37 = vpack.c.bf16 %v1951_v46, %v1943_v10  ;;  %v8176_v63 = vor.u32 %v9278_v5, %v8175_v35  ;;  %v8560_v51 = vor.u32 %v9374_v43, %v8559_v8  ;;  %v8303_v8 = vld [vmem:[#allocation7 + $0x1c0] sm:$0xf]  ;;  %v9310_v43 = vld [vmem:[#allocation7 + $0x1cc] sm:$0xf0] }
 0x130   : > { %v1956_v35 = vsel %vm1442_vm5, %v652_v6, %v1700_v4 }
 0x131   : > { %13218 = vst [vmem:[#allocation43_spill] sm:$0xff] %v10290_v21  ;;  %v829_v59 = vpop.f32.mrf.mxu2  ;;  %v918_v31 = vpop.f32.mrf.mxu3  ;;  %3759 = vmatpush.bf16.msra.mxu0 %v8176_v63  ;;  %4026 = vmatpush.bf16.msra.mxu3 %v8560_v51  ;;  %v8304_v51 = vor.u32 %v9310_v43, %v8303_v8 }
 0x132   : > { %13219 = vst [vmem:[#allocation44_spill] sm:$0xff] %v10295_v37  ;;  %v653_v16 = vpop.f32.mrf.mxu0  ;;  %v742_v33 = vpop.f32.mrf.mxu1  ;;  %v830_v49 = vadd.f32 %v829_v59, %v10010_v20  ;;  %v919_v5 = vadd.f32 %v918_v31, %v10013_v24 }
 0x133   : > { %v654_v26 = vadd.f32 %v653_v16, %v9994_v13  ;;  %v743_v10 = vadd.f32 %v742_v33, %v9996_v15  ;;  %v1957_v16 = vsel %vm1443_vm6, %v741_v27, %v1701_v58  ;;  %3848 = vmatpush.bf16.msra.mxu1 %v8304_v51 }
 0x134   : > { %v1702_v40 = vmul.f32 %v10007_v17, %v830_v49  ;;  %vm1444_vm9 = vcmp.gt.f32.partialorder %v830_v49, 0.0  ;;  %v1703_v6 = vmul.f32 %v10007_v17, %v919_v5  ;;  %vm1445_vm10 = vcmp.gt.f32.partialorder %v919_v5, 0.0 }
 0x135   : > { %vm1450_vm7 = vcmp.gt.f32.partialorder %v654_v26, 0.0  ;;  %v1708_v46 = vmul.f32 %v10007_v17, %v654_v26  ;;  %vm1451_vm8 = vcmp.gt.f32.partialorder %v743_v10, 0.0  ;;  %v1709_v9 = vmul.f32 %v10007_v17, %v743_v10 }
 0x137   : > { %v1964_v14 = vsel %vm1450_vm7, %v654_v26, %v1708_v46  ;;  %v1965_v63 = vsel %vm1451_vm8, %v743_v10, %v1709_v9 }
 0x138   : > { %v10306_v37 = vpack.c.bf16 %v1964_v14, %v1956_v35  ;;  %v10308_v33 = vpack.c.bf16 %v1965_v63, %v1957_v16 }
 0x139   : > { %v831_v21 = vpop.f32.mrf.mxu2  ;;  %v920_v61 = vpop.f32.mrf.mxu3 }
 0x13a   : > { %13220 = vst [vmem:[#allocation45_spill] sm:$0xff] %v10306_v37  ;;  %v832_v59 = vadd.f32 %v831_v21, %v10010_v20  ;;  %v656_v0 = vpop.f32.mrf.mxu0  ;;  %v921_v31 = vadd.f32 %v920_v61, %v10013_v24  ;;  %v745_v27 = vpop.f32.mrf.mxu1  ;;  %v1958_v21 = vsel %vm1444_vm9, %v830_v49, %v1702_v40  ;;  %v1959_v61 = vsel %vm1445_vm10, %v919_v5, %v1703_v6 }
 0x13b   : > { %13221 = vst [vmem:[#allocation46_spill] sm:$0xff] %v10308_v33  ;;  %v657_v9 = vadd.f32 %v656_v0, %v9994_v13  ;;  %v746_v40 = vadd.f32 %v745_v27, %v9996_v15 }
 0x13c   : > { %vm1452_vm11 = vcmp.gt.f32.partialorder %v832_v59, 0.0  ;;  %v1710_v4 = vmul.f32 %v10007_v17, %v832_v59  ;;  %vm1453_vm12 = vcmp.gt.f32.partialorder %v921_v31, 0.0  ;;  %v1711_v26 = vmul.f32 %v10007_v17, %v921_v31  ;;  %8014 = vmatmul.msk.bf16.gmra.mxu0 %vm553_vm0, %v9905_v41 }
 0x13d   : > { %8030 = vmatmul.msk.bf16.gmra.mxu1 %vm553_vm0, %v9905_v41  ;;  %v1716_v43 = vmul.f32 %v10007_v17, %v657_v9  ;;  %vm1458_vm13 = vcmp.gt.f32.partialorder %v657_v9, 0.0  ;;  %v1717_v63 = vmul.f32 %v10007_v17, %v746_v40  ;;  %vm1459_vm14 = vcmp.gt.f32.partialorder %v746_v40, 0.0 }
 0x13e   : > { %v1966_v58 = vsel %vm1452_vm11, %v832_v59, %v1710_v4  ;;  %8046 = vmatmul.msk.bf16.gmra.mxu2 %vm553_vm0, %v9905_v41  ;;  %v1967_v46 = vsel %vm1453_vm12, %v921_v31, %v1711_v26  ;;  %8062 = vmatmul.msk.bf16.gmra.mxu3 %vm553_vm0, %v9905_v41 }
 0x13f   : > { %v10322_v10 = vpack.c.bf16 %v1966_v58, %v1958_v21  ;;  %v10327_v35 = vpack.c.bf16 %v1967_v46, %v1959_v61  ;;  %v1972_v6 = vsel %vm1458_vm13, %v657_v9, %v1716_v43  ;;  %v1973_v4 = vsel %vm1459_vm14, %v746_v40, %v1717_v63 }
 0x141   : > { %13222 = vst [vmem:[#allocation47_spill] sm:$0xff] %v10322_v10  ;;  %v834_v49 = vpop.f32.mrf.mxu2  ;;  %v923_v14 = vpop.f32.mrf.mxu3 }
 0x142   : > { %13223 = vst [vmem:[#allocation48_spill] sm:$0xff] %v10327_v35  ;;  %v658_v8 = vpop.f32.mrf.mxu0  ;;  %v747_v5 = vpop.f32.mrf.mxu1  ;;  %v835_v51 = vadd.f32 %v834_v49, %v10010_v20  ;;  %v924_v31 = vadd.f32 %v923_v14, %v10013_v24 }
 0x143   : > { %v659_v16 = vadd.f32 %v658_v8, %v9994_v13  ;;  %v748_v0 = vadd.f32 %v747_v5, %v9996_v15 }
 0x144   : > { %v1718_v46 = vmul.f32 %v10007_v17, %v835_v51  ;;  %vm1460_vm2 = vcmp.gt.f32.partialorder %v835_v51, 0.0  ;;  %v1719_v35 = vmul.f32 %v10007_v17, %v924_v31  ;;  %vm1461_vm3 = vcmp.gt.f32.partialorder %v924_v31, 0.0 }
 0x145   : > { %vm1466_vm15 = vcmp.gt.f32.partialorder %v659_v16, 0.0  ;;  %v1724_v41 = vmul.f32 %v10007_v17, %v659_v16  ;;  %vm1467_vm1 = vcmp.gt.f32.partialorder %v748_v0, 0.0  ;;  %v1725_v59 = vmul.f32 %v10007_v17, %v748_v0 }
 0x147   : > { %v1980_v27 = vsel %vm1466_vm15, %v659_v16, %v1724_v41  ;;  %v1981_v21 = vsel %vm1467_vm1, %v748_v0, %v1725_v59  ;;  %v1974_v16 = vsel %vm1460_vm2, %v835_v51, %v1718_v46  ;;  %v1975_v0 = vsel %vm1461_vm3, %v924_v31, %v1719_v35  ;;  %v9370_v35 = vld [vmem:[#allocation7 + $0x3ac] sm:$0xf0] }
 0x148   : > { %v10338_v26 = vpack.c.bf16 %v1980_v27, %v1972_v6  ;;  %v10340_v58 = vpack.c.bf16 %v1981_v21, %v1973_v4  ;;  %v8415_v4 = vld [vmem:[#allocation7 + $0x2a0] sm:$0xf]  ;;  %v9338_v21 = vld [vmem:[#allocation7 + $0x2ac] sm:$0xf0] }
 0x149   : > { %v836_v61 = vpop.f32.mrf.mxu2  ;;  %v925_v5 = vpop.f32.mrf.mxu3 }
 0x14a   : > { %13224 = vst [vmem:[#allocation49_spill] sm:$0xff] %v10338_v26  ;;  %v837_v8 = vadd.f32 %v836_v61, %v10010_v20  ;;  %v661_v49 = vpop.f32.mrf.mxu0  ;;  %v926_v9 = vadd.f32 %v925_v5, %v10013_v24  ;;  %v750_v14 = vpop.f32.mrf.mxu1  ;;  %v8159_v61 = vld [vmem:[#allocation7 + $0xa0] sm:$0xf]  ;;  %v9274_v5 = vld [vmem:[#allocation7 + $0xac] sm:$0xf0] }
 0x14b   : > { %13225 = vst [vmem:[#allocation50_spill] sm:$0xff] %v10340_v58  ;;  %v662_v6 = vadd.f32 %v661_v49, %v9994_v13  ;;  %v751_v51 = vadd.f32 %v750_v14, %v9996_v15 }
 0x14c   : > { %vm1468_vm4 = vcmp.gt.f32.partialorder %v837_v8, 0.0  ;;  %v1726_v40 = vmul.f32 %v10007_v17, %v837_v8  ;;  %vm1469_vm5 = vcmp.gt.f32.partialorder %v926_v9, 0.0  ;;  %v1727_v43 = vmul.f32 %v10007_v17, %v926_v9  ;;  %8015 = vmatmul.msk.bf16.gmra.mxu0 %vm553_vm0, %v9917_v44 }
 0x14d   : > { %8031 = vmatmul.msk.bf16.gmra.mxu1 %vm553_vm0, %v9917_v44  ;;  %v1732_v49 = vmul.f32 %v10007_v17, %v662_v6  ;;  %vm1474_vm6 = vcmp.gt.f32.partialorder %v662_v6, 0.0  ;;  %v1733_v14 = vmul.f32 %v10007_v17, %v751_v51  ;;  %vm1475_vm7 = vcmp.gt.f32.partialorder %v751_v51, 0.0 }
 0x14e   : > { %v1982_v63 = vsel %vm1468_vm4, %v837_v8, %v1726_v40  ;;  %8047 = vmatmul.msk.bf16.gmra.mxu2 %vm553_vm0, %v9917_v44  ;;  %v1983_v59 = vsel %vm1469_vm5, %v926_v9, %v1727_v43  ;;  %8063 = vmatmul.msk.bf16.gmra.mxu3 %vm553_vm0, %v9917_v44  ;;  %v8416_v8 = vor.u32 %v9338_v21, %v8415_v4  ;;  %v8543_v40 = vld [vmem:[#allocation7 + $0x3a0] sm:$0xf] }
 0x14f   : > { %v10354_v41 = vpack.c.bf16 %v1982_v63, %v1974_v16  ;;  %v10359_v27 = vpack.c.bf16 %v1983_v59, %v1975_v0  ;;  %v8160_v9 = vor.u32 %v9274_v5, %v8159_v61  ;;  %v8544_v43 = vor.u32 %v9370_v35, %v8543_v40  ;;  %v8287_v40 = vld [vmem:[#allocation7 + $0x1a0] sm:$0xf]  ;;  %v9306_v35 = vld [vmem:[#allocation7 + $0x1ac] sm:$0xf0] }
 0x150   : > { %3938 = vmatpush.bf16.msra.mxu2 %v8416_v8  ;;  %v1988_v61 = vsel %vm1474_vm6, %v662_v6, %v1732_v49 }
 0x151   : > { %13226 = vst [vmem:[#allocation51_spill] sm:$0xff] %v10354_v41  ;;  %v839_v46 = vpop.f32.mrf.mxu2  ;;  %v928_v31 = vpop.f32.mrf.mxu3  ;;  %3760 = vmatpush.bf16.msra.mxu0 %v8160_v9  ;;  %4027 = vmatpush.bf16.msra.mxu3 %v8544_v43  ;;  %v8288_v43 = vor.u32 %v9306_v35, %v8287_v40 }
 0x152   : > { %13227 = vst [vmem:[#allocation52_spill] sm:$0xff] %v10359_v27  ;;  %v663_v16 = vpop.f32.mrf.mxu0  ;;  %v752_v63 = vpop.f32.mrf.mxu1  ;;  %v840_v4 = vadd.f32 %v839_v46, %v10010_v20  ;;  %v929_v5 = vadd.f32 %v928_v31, %v10013_v24 }
 0x153   : > { %v664_v44 = vadd.f32 %v663_v16, %v9994_v13  ;;  %v753_v0 = vadd.f32 %v752_v63, %v9996_v15  ;;  %v1989_v16 = vsel %vm1475_vm7, %v751_v51, %v1733_v14  ;;  %3849 = vmatpush.bf16.msra.mxu1 %v8288_v43 }
 0x154   : > { %v1734_v58 = vmul.f32 %v10007_v17, %v840_v4  ;;  %vm1476_vm10 = vcmp.gt.f32.partialorder %v840_v4, 0.0  ;;  %v1735_v6 = vmul.f32 %v10007_v17, %v929_v5  ;;  %vm1477_vm11 = vcmp.gt.f32.partialorder %v929_v5, 0.0 }
 0x155   : > { %vm1482_vm8 = vcmp.gt.f32.partialorder %v664_v44, 0.0  ;;  %v1740_v59 = vmul.f32 %v10007_v17, %v664_v44  ;;  %vm1483_vm9 = vcmp.gt.f32.partialorder %v753_v0, 0.0  ;;  %v1741_v21 = vmul.f32 %v10007_v17, %v753_v0 }
 0x157   : > { %v1996_v8 = vsel %vm1482_vm8, %v664_v44, %v1740_v59  ;;  %v1997_v9 = vsel %vm1483_vm9, %v753_v0, %v1741_v21 }
 0x158   : > { %v10370_v27 = vpack.c.bf16 %v1996_v8, %v1988_v61  ;;  %v10372_v63 = vpack.c.bf16 %v1997_v9, %v1989_v16 }
 0x159   : > { %v841_v41 = vpop.f32.mrf.mxu2  ;;  %v930_v26 = vpop.f32.mrf.mxu3 }
 0x15a   : > { %13228 = vst [vmem:[#allocation53_spill] sm:$0xff] %v10370_v27  ;;  %v842_v46 = vadd.f32 %v841_v41, %v10010_v20  ;;  %v666_v10 = vpop.f32.mrf.mxu0  ;;  %v931_v31 = vadd.f32 %v930_v26, %v10013_v24  ;;  %v755_v51 = vpop.f32.mrf.mxu1  ;;  %v1990_v41 = vsel %vm1476_vm10, %v840_v4, %v1734_v58  ;;  %v1991_v26 = vsel %vm1477_vm11, %v929_v5, %v1735_v6 }
 0x15b   : > { %13229 = vst [vmem:[#allocation54_spill] sm:$0xff] %v10372_v63  ;;  %v667_v21 = vadd.f32 %v666_v10, %v9994_v13  ;;  %v756_v58 = vadd.f32 %v755_v51, %v9996_v15 }
 0x15c   : > { %vm1484_vm12 = vcmp.gt.f32.partialorder %v842_v46, 0.0  ;;  %v1742_v49 = vmul.f32 %v10007_v17, %v842_v46  ;;  %vm1485_vm13 = vcmp.gt.f32.partialorder %v931_v31, 0.0  ;;  %v1743_v44 = vmul.f32 %v10007_v17, %v931_v31  ;;  %8016 = vmatmul.msk.bf16.gmra.mxu0 %vm553_vm0, %v9929_v47 }
 0x15d   : > { %8032 = vmatmul.msk.bf16.gmra.mxu1 %vm553_vm0, %v9929_v47  ;;  %v1748_v35 = vmul.f32 %v10007_v17, %v667_v21  ;;  %vm1490_vm14 = vcmp.gt.f32.partialorder %v667_v21, 0.0  ;;  %v1749_v9 = vmul.f32 %v10007_v17, %v756_v58  ;;  %vm1491_vm15 = vcmp.gt.f32.partialorder %v756_v58, 0.0 }
 0x15e   : > { %v1998_v14 = vsel %vm1484_vm12, %v842_v46, %v1742_v49  ;;  %8048 = vmatmul.msk.bf16.gmra.mxu2 %vm553_vm0, %v9929_v47  ;;  %v1999_v59 = vsel %vm1485_vm13, %v931_v31, %v1743_v44  ;;  %8064 = vmatmul.msk.bf16.gmra.mxu3 %vm553_vm0, %v9929_v47 }
 0x15f   : > { %v10386_v0 = vpack.c.bf16 %v1998_v14, %v1990_v41  ;;  %v10391_v61 = vpack.c.bf16 %v1999_v59, %v1991_v26  ;;  %v2004_v6 = vsel %vm1490_vm14, %v667_v21, %v1748_v35  ;;  %v2005_v49 = vsel %vm1491_vm15, %v756_v58, %v1749_v9 }
 0x161   : > { %13230 = vst [vmem:[#allocation55_spill] sm:$0xff] %v10386_v0  ;;  %v844_v4 = vpop.f32.mrf.mxu2  ;;  %v933_v8 = vpop.f32.mrf.mxu3 }
 0x162   : > { %13231 = vst [vmem:[#allocation56_spill] sm:$0xff] %v10391_v61  ;;  %v668_v40 = vpop.f32.mrf.mxu0  ;;  %v757_v5 = vpop.f32.mrf.mxu1  ;;  %v845_v43 = vadd.f32 %v844_v4, %v10010_v20  ;;  %v934_v31 = vadd.f32 %v933_v8, %v10013_v24 }
 0x163   : > { %v669_v16 = vadd.f32 %v668_v40, %v9994_v13  ;;  %v758_v10 = vadd.f32 %v757_v5, %v9996_v15 }
 0x164   : > { %v1750_v59 = vmul.f32 %v10007_v17, %v845_v43  ;;  %vm1492_vm3 = vcmp.gt.f32.partialorder %v845_v43, 0.0  ;;  %v1751_v61 = vmul.f32 %v10007_v17, %v934_v31  ;;  %vm1493_vm4 = vcmp.gt.f32.partialorder %v934_v31, 0.0 }
 0x165   : > { %vm1498_vm1 = vcmp.gt.f32.partialorder %v669_v16, 0.0  ;;  %v1756_v47 = vmul.f32 %v10007_v17, %v669_v16  ;;  %vm1499_vm2 = vcmp.gt.f32.partialorder %v758_v10, 0.0  ;;  %v1757_v46 = vmul.f32 %v10007_v17, %v758_v10 }
 0x167   : > { %v2012_v51 = vsel %vm1498_vm1, %v669_v16, %v1756_v47  ;;  %v2013_v41 = vsel %vm1499_vm2, %v758_v10, %v1757_v46  ;;  %v2006_v16 = vsel %vm1492_vm3, %v845_v43, %v1750_v59  ;;  %v2007_v10 = vsel %vm1493_vm4, %v934_v31, %v1751_v61  ;;  %v9366_v61 = vld [vmem:[#allocation7 + $0x38c] sm:$0xf0] }
 0x168   : > { %v10402_v44 = vpack.c.bf16 %v2012_v51, %v2004_v6  ;;  %v10404_v14 = vpack.c.bf16 %v2013_v41, %v2005_v49  ;;  %v8399_v49 = vld [vmem:[#allocation7 + $0x280] sm:$0xf]  ;;  %v9334_v41 = vld [vmem:[#allocation7 + $0x28c] sm:$0xf0] }
 0x169   : > { %v846_v26 = vpop.f32.mrf.mxu2  ;;  %v935_v5 = vpop.f32.mrf.mxu3 }
 0x16a   : > { %13232 = vst [vmem:[#allocation57_spill] sm:$0xff] %v10402_v44  ;;  %v847_v40 = vadd.f32 %v846_v26, %v10010_v20  ;;  %v671_v4 = vpop.f32.mrf.mxu0  ;;  %v936_v21 = vadd.f32 %v935_v5, %v10013_v24  ;;  %v760_v8 = vpop.f32.mrf.mxu1  ;;  %v8143_v26 = vld [vmem:[#allocation7 + $0x80] sm:$0xf]  ;;  %v9270_v5 = vld [vmem:[#allocation7 + $0x8c] sm:$0xf0] }
 0x16b   : > { %13233 = vst [vmem:[#allocation58_spill] sm:$0xff] %v10404_v14  ;;  %v672_v6 = vadd.f32 %v671_v4, %v9994_v13  ;;  %v761_v43 = vadd.f32 %v760_v8, %v9996_v15 }
 0x16c   : > { %vm1500_vm5 = vcmp.gt.f32.partialorder %v847_v40, 0.0  ;;  %v1758_v58 = vmul.f32 %v10007_v17, %v847_v40  ;;  %vm1501_vm6 = vcmp.gt.f32.partialorder %v936_v21, 0.0  ;;  %v1759_v35 = vmul.f32 %v10007_v17, %v936_v21  ;;  %8017 = vmatmul.msk.bf16.gmra.mxu0 %vm553_vm0, %v9941_v50 }
 0x16d   : > { %8033 = vmatmul.msk.bf16.gmra.mxu1 %vm553_vm0, %v9941_v50  ;;  %v1764_v4 = vmul.f32 %v10007_v17, %v672_v6  ;;  %vm1506_vm7 = vcmp.gt.f32.partialorder %v672_v6, 0.0  ;;  %v1765_v8 = vmul.f32 %v10007_v17, %v761_v43  ;;  %vm1507_vm8 = vcmp.gt.f32.partialorder %v761_v43, 0.0 }
 0x16e   : > { %v2014_v9 = vsel %vm1500_vm5, %v847_v40, %v1758_v58  ;;  %8049 = vmatmul.msk.bf16.gmra.mxu2 %vm553_vm0, %v9941_v50  ;;  %v2015_v46 = vsel %vm1501_vm6, %v936_v21, %v1759_v35  ;;  %8065 = vmatmul.msk.bf16.gmra.mxu3 %vm553_vm0, %v9941_v50  ;;  %v8400_v40 = vor.u32 %v9334_v41, %v8399_v49  ;;  %v8527_v58 = vld [vmem:[#allocation7 + $0x380] sm:$0xf] }
 0x16f   : > { %v10418_v47 = vpack.c.bf16 %v2014_v9, %v2006_v16  ;;  %v10423_v51 = vpack.c.bf16 %v2015_v46, %v2007_v10  ;;  %v8144_v21 = vor.u32 %v9270_v5, %v8143_v26  ;;  %v8528_v35 = vor.u32 %v9366_v61, %v8527_v58  ;;  %v8271_v58 = vld [vmem:[#allocation7 + $0x180] sm:$0xf]  ;;  %v9302_v61 = vld [vmem:[#allocation7 + $0x18c] sm:$0xf0] }
 0x170   : > { %3939 = vmatpush.bf16.msra.mxu2 %v8400_v40  ;;  %v2020_v26 = vsel %vm1506_vm7, %v672_v6, %v1764_v4 }
 0x171   : > { %13234 = vst [vmem:[#allocation59_spill] sm:$0xff] %v10418_v47  ;;  %v849_v59 = vpop.f32.mrf.mxu2  ;;  %v938_v31 = vpop.f32.mrf.mxu3  ;;  %3761 = vmatpush.bf16.msra.mxu0 %v8144_v21  ;;  %4028 = vmatpush.bf16.msra.mxu3 %v8528_v35  ;;  %v8272_v35 = vor.u32 %v9302_v61, %v8271_v58 }
 0x172   : > { %13235 = vst [vmem:[#allocation60_spill] sm:$0xff] %v10423_v51  ;;  %v673_v16 = vpop.f32.mrf.mxu0  ;;  %v762_v9 = vpop.f32.mrf.mxu1  ;;  %v850_v49 = vadd.f32 %v849_v59, %v10010_v20  ;;  %v939_v5 = vadd.f32 %v938_v31, %v10013_v24 }
 0x173   : > { %v674_v50 = vadd.f32 %v673_v16, %v9994_v13  ;;  %v763_v10 = vadd.f32 %v762_v9, %v9996_v15  ;;  %v2021_v16 = vsel %vm1507_vm8, %v761_v43, %v1765_v8  ;;  %3850 = vmatpush.bf16.msra.mxu1 %v8272_v35 }
 0x174   : > { %v1766_v14 = vmul.f32 %v10007_v17, %v850_v49  ;;  %vm1508_vm11 = vcmp.gt.f32.partialorder %v850_v49, 0.0  ;;  %v1767_v6 = vmul.f32 %v10007_v17, %v939_v5  ;;  %vm1509_vm12 = vcmp.gt.f32.partialorder %v939_v5, 0.0 }
 0x175   : > { %vm1514_vm9 = vcmp.gt.f32.partialorder %v674_v50, 0.0  ;;  %v1772_v46 = vmul.f32 %v10007_v17, %v674_v50  ;;  %vm1515_vm10 = vcmp.gt.f32.partialorder %v763_v10, 0.0  ;;  %v1773_v41 = vmul.f32 %v10007_v17, %v763_v10 }
 0x177   : > { %v2028_v40 = vsel %vm1514_vm9, %v674_v50, %v1772_v46  ;;  %v2029_v21 = vsel %vm1515_vm10, %v763_v10, %v1773_v41 }
 0x178   : > { %v10434_v51 = vpack.c.bf16 %v2028_v40, %v2020_v26  ;;  %v10436_v9 = vpack.c.bf16 %v2029_v21, %v2021_v16 }
 0x179   : > { %v851_v47 = vpop.f32.mrf.mxu2  ;;  %v940_v44 = vpop.f32.mrf.mxu3 }
 0x17a   : > { %13236 = vst [vmem:[#allocation61_spill] sm:$0xff] %v10434_v51  ;;  %v852_v59 = vadd.f32 %v851_v47, %v10010_v20  ;;  %v676_v0 = vpop.f32.mrf.mxu0  ;;  %v941_v31 = vadd.f32 %v940_v44, %v10013_v24  ;;  %v765_v43 = vpop.f32.mrf.mxu1  ;;  %v2022_v47 = vsel %vm1508_vm11, %v850_v49, %v1766_v14  ;;  %v2023_v44 = vsel %vm1509_vm12, %v939_v5, %v1767_v6 }
 0x17b   : > { %13237 = vst [vmem:[#allocation62_spill] sm:$0xff] %v10436_v9  ;;  %v677_v41 = vadd.f32 %v676_v0, %v9994_v13  ;;  %v766_v14 = vadd.f32 %v765_v43, %v9996_v15 }
 0x17c   : > { %vm1516_vm13 = vcmp.gt.f32.partialorder %v852_v59, 0.0  ;;  %v1774_v4 = vmul.f32 %v10007_v17, %v852_v59  ;;  %vm1517_vm14 = vcmp.gt.f32.partialorder %v941_v31, 0.0  ;;  %v1775_v50 = vmul.f32 %v10007_v17, %v941_v31  ;;  %8018 = vmatmul.msk.bf16.gmra.mxu0 %vm553_vm0, %v9953_v53 }
 0x17d   : > { %8034 = vmatmul.msk.bf16.gmra.mxu1 %vm553_vm0, %v9953_v53  ;;  %v1780_v61 = vmul.f32 %v10007_v17, %v677_v41  ;;  %vm1522_vm15 = vcmp.gt.f32.partialorder %v677_v41, 0.0  ;;  %v1781_v21 = vmul.f32 %v10007_v17, %v766_v14  ;;  %vm1523_vm1 = vcmp.gt.f32.partialorder %v766_v14, 0.0 }
 0x17e   : > { %v2030_v8 = vsel %vm1516_vm13, %v852_v59, %v1774_v4  ;;  %8050 = vmatmul.msk.bf16.gmra.mxu2 %vm553_vm0, %v9953_v53  ;;  %v2031_v46 = vsel %vm1517_vm14, %v941_v31, %v1775_v50  ;;  %8066 = vmatmul.msk.bf16.gmra.mxu3 %vm553_vm0, %v9953_v53 }
 0x17f   : > { %v10450_v10 = vpack.c.bf16 %v2030_v8, %v2022_v47  ;;  %v10455_v26 = vpack.c.bf16 %v2031_v46, %v2023_v44  ;;  %v2036_v6 = vsel %vm1522_vm15, %v677_v41, %v1780_v61  ;;  %v2037_v4 = vsel %vm1523_vm1, %v766_v14, %v1781_v21 }
 0x181   : > { %13238 = vst [vmem:[#allocation63_spill] sm:$0xff] %v10450_v10  ;;  %v854_v49 = vpop.f32.mrf.mxu2  ;;  %v943_v40 = vpop.f32.mrf.mxu3 }
 0x182   : > { %13239 = vst [vmem:[#allocation64_spill] sm:$0xff] %v10455_v26  ;;  %v678_v58 = vpop.f32.mrf.mxu0  ;;  %v767_v5 = vpop.f32.mrf.mxu1  ;;  %v855_v35 = vadd.f32 %v854_v49, %v10010_v20  ;;  %v944_v31 = vadd.f32 %v943_v40, %v10013_v24 }
 0x183   : > { %v679_v16 = vadd.f32 %v678_v58, %v9994_v13  ;;  %v768_v0 = vadd.f32 %v767_v5, %v9996_v15 }
 0x184   : > { %v1782_v46 = vmul.f32 %v10007_v17, %v855_v35  ;;  %vm1524_vm4 = vcmp.gt.f32.partialorder %v855_v35, 0.0  ;;  %v1783_v26 = vmul.f32 %v10007_v17, %v944_v31  ;;  %vm1525_vm5 = vcmp.gt.f32.partialorder %v944_v31, 0.0 }
 0x185   : > { %vm1530_vm2 = vcmp.gt.f32.partialorder %v679_v16, 0.0  ;;  %v1788_v53 = vmul.f32 %v10007_v17, %v679_v16  ;;  %vm1531_vm3 = vcmp.gt.f32.partialorder %v768_v0, 0.0  ;;  %v1789_v59 = vmul.f32 %v10007_v17, %v768_v0 }
 0x187   : > { %v2044_v43 = vsel %vm1530_vm2, %v679_v16, %v1788_v53  ;;  %v2045_v47 = vsel %vm1531_vm3, %v768_v0, %v1789_v59  ;;  %v2038_v16 = vsel %vm1524_vm4, %v855_v35, %v1782_v46  ;;  %v2039_v0 = vsel %vm1525_vm5, %v944_v31, %v1783_v26  ;;  %v9362_v26 = vld [vmem:[#allocation7 + $0x36c] sm:$0xf0] }
 0x188   : > { %v10466_v50 = vpack.c.bf16 %v2044_v43, %v2036_v6  ;;  %v10468_v8 = vpack.c.bf16 %v2045_v47, %v2037_v4  ;;  %v8383_v4 = vld [vmem:[#allocation7 + $0x260] sm:$0xf]  ;;  %v9330_v47 = vld [vmem:[#allocation7 + $0x26c] sm:$0xf0] }
 0x189   : > { %v856_v44 = vpop.f32.mrf.mxu2  ;;  %v945_v5 = vpop.f32.mrf.mxu3 }
 0x18a   : > { %13240 = vst [vmem:[#allocation65_spill] sm:$0xff] %v10466_v50  ;;  %v857_v58 = vadd.f32 %v856_v44, %v10010_v20  ;;  %v681_v49 = vpop.f32.mrf.mxu0  ;;  %v946_v41 = vadd.f32 %v945_v5, %v10013_v24  ;;  %v770_v40 = vpop.f32.mrf.mxu1  ;;  %v8127_v44 = vld [vmem:[#allocation7 + $0x60] sm:$0xf]  ;;  %v9266_v5 = vld [vmem:[#allocation7 + $0x6c] sm:$0xf0] }
 0x18b   : > { %13241 = vst [vmem:[#allocation66_spill] sm:$0xff] %v10468_v8  ;;  %v682_v6 = vadd.f32 %v681_v49, %v9994_v13  ;;  %v771_v35 = vadd.f32 %v770_v40, %v9996_v15 }
 0x18c   : > { %vm1532_vm6 = vcmp.gt.f32.partialorder %v857_v58, 0.0  ;;  %v1790_v14 = vmul.f32 %v10007_v17, %v857_v58  ;;  %vm1533_vm7 = vcmp.gt.f32.partialorder %v946_v41, 0.0  ;;  %v1791_v61 = vmul.f32 %v10007_v17, %v946_v41  ;;  %8019 = vmatmul.msk.bf16.gmra.mxu0 %vm553_vm0, %v9965_v56 }
 0x18d   : > { %8035 = vmatmul.msk.bf16.gmra.mxu1 %vm553_vm0, %v9965_v56  ;;  %v1796_v49 = vmul.f32 %v10007_v17, %v682_v6  ;;  %vm1538_vm8 = vcmp.gt.f32.partialorder %v682_v6, 0.0  ;;  %v1797_v40 = vmul.f32 %v10007_v17, %v771_v35  ;;  %vm1539_vm9 = vcmp.gt.f32.partialorder %v771_v35, 0.0 }
 0x18e   : > { %v2046_v21 = vsel %vm1532_vm6, %v857_v58, %v1790_v14  ;;  %8051 = vmatmul.msk.bf16.gmra.mxu2 %vm553_vm0, %v9965_v56  ;;  %v2047_v59 = vsel %vm1533_vm7, %v946_v41, %v1791_v61  ;;  %8067 = vmatmul.msk.bf16.gmra.mxu3 %vm553_vm0, %v9965_v56  ;;  %v8384_v58 = vor.u32 %v9330_v47, %v8383_v4  ;;  %v8511_v14 = vld [vmem:[#allocation7 + $0x360] sm:$0xf] }
 0x18f   : > { %v10482_v53 = vpack.c.bf16 %v2046_v21, %v2038_v16  ;;  %v10487_v43 = vpack.c.bf16 %v2047_v59, %v2039_v0  ;;  %v8128_v41 = vor.u32 %v9266_v5, %v8127_v44  ;;  %v8512_v61 = vor.u32 %v9362_v26, %v8511_v14  ;;  %v8255_v14 = vld [vmem:[#allocation7 + $0x160] sm:$0xf]  ;;  %v9298_v26 = vld [vmem:[#allocation7 + $0x16c] sm:$0xf0] }
 0x190   : > { %3940 = vmatpush.bf16.msra.mxu2 %v8384_v58  ;;  %v2052_v44 = vsel %vm1538_vm8, %v682_v6, %v1796_v49 }
 0x191   : > { %13242 = vst [vmem:[#allocation67_spill] sm:$0xff] %v10482_v53  ;;  %v859_v46 = vpop.f32.mrf.mxu2  ;;  %v948_v31 = vpop.f32.mrf.mxu3  ;;  %3762 = vmatpush.bf16.msra.mxu0 %v8128_v41  ;;  %4029 = vmatpush.bf16.msra.mxu3 %v8512_v61  ;;  %v8256_v61 = vor.u32 %v9298_v26, %v8255_v14 }
 0x192   : > { %13243 = vst [vmem:[#allocation68_spill] sm:$0xff] %v10487_v43  ;;  %v683_v16 = vpop.f32.mrf.mxu0  ;;  %v772_v21 = vpop.f32.mrf.mxu1  ;;  %v860_v4 = vadd.f32 %v859_v46, %v10010_v20  ;;  %v949_v5 = vadd.f32 %v948_v31, %v10013_v24 }
 0x193   : > { %v684_v56 = vadd.f32 %v683_v16, %v9994_v13  ;;  %v773_v0 = vadd.f32 %v772_v21, %v9996_v15  ;;  %v2053_v16 = vsel %vm1539_vm9, %v771_v35, %v1797_v40  ;;  %3851 = vmatpush.bf16.msra.mxu1 %v8256_v61 }
 0x194   : > { %v1798_v8 = vmul.f32 %v10007_v17, %v860_v4  ;;  %vm1540_vm12 = vcmp.gt.f32.partialorder %v860_v4, 0.0  ;;  %v1799_v6 = vmul.f32 %v10007_v17, %v949_v5  ;;  %vm1541_vm13 = vcmp.gt.f32.partialorder %v949_v5, 0.0 }
 0x195   : > { %vm1546_vm10 = vcmp.gt.f32.partialorder %v684_v56, 0.0  ;;  %v1804_v59 = vmul.f32 %v10007_v17, %v684_v56  ;;  %vm1547_vm11 = vcmp.gt.f32.partialorder %v773_v0, 0.0  ;;  %v1805_v47 = vmul.f32 %v10007_v17, %v773_v0 }
 0x197   : > { %v2060_v58 = vsel %vm1546_vm10, %v684_v56, %v1804_v59  ;;  %v2061_v41 = vsel %vm1547_vm11, %v773_v0, %v1805_v47 }
 0x198   : > { %v10498_v43 = vpack.c.bf16 %v2060_v58, %v2052_v44  ;;  %v10500_v21 = vpack.c.bf16 %v2061_v41, %v2053_v16 }
 0x199   : > { %v861_v53 = vpop.f32.mrf.mxu2  ;;  %v950_v50 = vpop.f32.mrf.mxu3 }
 0x19a   : > { %13244 = vst [vmem:[#allocation69_spill] sm:$0xff] %v10498_v43  ;;  %v862_v46 = vadd.f32 %v861_v53, %v10010_v20  ;;  %v686_v10 = vpop.f32.mrf.mxu0  ;;  %v951_v31 = vadd.f32 %v950_v50, %v10013_v24  ;;  %v775_v35 = vpop.f32.mrf.mxu1  ;;  %v2054_v53 = vsel %vm1540_vm12, %v860_v4, %v1798_v8  ;;  %v2055_v50 = vsel %vm1541_vm13, %v949_v5, %v1799_v6 }
 0x19b   : > { %13245 = vst [vmem:[#allocation70_spill] sm:$0xff] %v10500_v21  ;;  %v687_v47 = vadd.f32 %v686_v10, %v9994_v13  ;;  %v776_v8 = vadd.f32 %v775_v35, %v9996_v15 }
 0x19c   : > { %vm1548_vm14 = vcmp.gt.f32.partialorder %v862_v46, 0.0  ;;  %v1806_v49 = vmul.f32 %v10007_v17, %v862_v46  ;;  %vm1549_vm15 = vcmp.gt.f32.partialorder %v951_v31, 0.0  ;;  %v1807_v56 = vmul.f32 %v10007_v17, %v951_v31  ;;  %8020 = vmatmul.msk.bf16.gmra.mxu0 %vm553_vm0, %v9977_v7 }
 0x19d   : > { %8036 = vmatmul.msk.bf16.gmra.mxu1 %vm553_vm0, %v9977_v7  ;;  %v1812_v26 = vmul.f32 %v10007_v17, %v687_v47  ;;  %vm1554_vm1 = vcmp.gt.f32.partialorder %v687_v47, 0.0  ;;  %v1813_v41 = vmul.f32 %v10007_v17, %v776_v8  ;;  %vm1555_vm2 = vcmp.gt.f32.partialorder %v776_v8, 0.0 }
 0x19e   : > { %v2062_v40 = vsel %vm1548_vm14, %v862_v46, %v1806_v49  ;;  %8052 = vmatmul.msk.bf16.gmra.mxu2 %vm553_vm0, %v9977_v7  ;;  %v2063_v59 = vsel %vm1549_vm15, %v951_v31, %v1807_v56  ;;  %8068 = vmatmul.msk.bf16.gmra.mxu3 %vm553_vm0, %v9977_v7 }
 0x19f   : > { %v10514_v0 = vpack.c.bf16 %v2062_v40, %v2054_v53  ;;  %v10519_v44 = vpack.c.bf16 %v2063_v59, %v2055_v50  ;;  %v2068_v6 = vsel %vm1554_vm1, %v687_v47, %v1812_v26 }
 0x1a1   : > { %13246 = vst [vmem:[#allocation71_spill] sm:$0xff] %v10514_v0  ;;  %v864_v4 = vpop.f32.mrf.mxu2  ;;  %v953_v58 = vpop.f32.mrf.mxu3 }
 0x1a2   : > { %13247 = vst [vmem:[#allocation72_spill] sm:$0xff] %v10519_v44  ;;  %v688_v14 = vpop.f32.mrf.mxu0  ;;  %v777_v5 = vpop.f32.mrf.mxu1  ;;  %v865_v61 = vadd.f32 %v864_v4, %v10010_v20  ;;  %v954_v31 = vadd.f32 %v953_v58, %v10013_v24 }
 0x1a3   : > { %v689_v16 = vadd.f32 %v688_v14, %v9994_v13  ;;  %v778_v10 = vadd.f32 %v777_v5, %v9996_v15  ;;  %v2069_v13 = vsel %vm1555_vm2, %v776_v8, %v1813_v41  ;;  %v9614_v8 = vld [vmem:[%s12924_s2] sm:$0xff] }
 0x1a4   : > { %v1814_v40 = vmul.f32 %v10007_v17, %v865_v61  ;;  %vm1556_vm5 = vcmp.gt.f32.partialorder %v865_v61, 0.0  ;;  %v1815_v14 = vmul.f32 %v10007_v17, %v954_v31  ;;  %v10541_v58 = vperm.slane %v9614_v8, 4 }
 0x1a5   : > { %vm1562_vm3 = vcmp.gt.f32.partialorder %v689_v16, 0.0  ;;  %v1820_v7 = vmul.f32 %v10007_v17, %v689_v16  ;;  %vm1563_vm4 = vcmp.gt.f32.partialorder %v778_v10, 0.0  ;;  %v1821_v46 = vmul.f32 %v10007_v17, %v778_v10 }
 0x1a6   : > { %vm1557_vm6 = vcmp.gt.f32.partialorder %v954_v31, 0.0  ;;  %v10544_v5 = vperm.slane %v9614_v8, 5 }
 0x1a7   : > { %v2076_v35 = vsel %vm1562_vm3, %v689_v16, %v1820_v7  ;;  %v2077_v56 = vsel %vm1563_vm4, %v778_v10, %v1821_v46  ;;  %v2071_v10 = vsel %vm1557_vm6, %v954_v31, %v1815_v14  ;;  %v9358_v31 = vld [vmem:[#allocation7 + $0x34c] sm:$0xf0]  ;;  %v10561_v14 = vperm.slane %v9614_v8, 6 }
 0x1a8   : > { %v10530_v49 = vpack.c.bf16 %v2076_v35, %v2068_v6  ;;  %v10532_v53 = vpack.c.bf16 %v2077_v56, %v2069_v13  ;;  %v8367_v13 = vld [vmem:[#allocation7 + $0x240] sm:$0xf]  ;;  %v9326_v56 = vld [vmem:[#allocation7 + $0x24c] sm:$0xf0] }
 0x1a9   : > { %v866_v15 = vpop.f32.mrf.mxu2  ;;  %v955_v59 = vpop.f32.mrf.mxu3 }
 0x1aa   : > { %13248 = vst [vmem:[#allocation73_spill] sm:$0xff] %v10530_v49  ;;  %v867_v50 = vadd.f32 %v866_v15, %v10010_v20  ;;  %v967_v4 = vpop.f32.mrf.mxu0  ;;  %v956_v47 = vadd.f32 %v955_v59, %v10013_v24  ;;  %v1056_v26 = vpop.f32.mrf.mxu1  ;;  %v2070_v24 = vsel %vm1556_vm5, %v865_v61, %v1814_v40  ;;  %v8111_v15 = vld [vmem:[#allocation7 + $0x40] sm:$0xf]  ;;  %v9262_v59 = vld [vmem:[#allocation7 + $0x4c] sm:$0xf0] }
 0x1ab   : > { %13249 = vst [vmem:[#allocation74_spill] sm:$0xff] %v10532_v53  ;;  %v968_v6 = vadd.f32 %v967_v4, %v10541_v58  ;;  %v1057_v61 = vadd.f32 %v1056_v26, %v10544_v5  ;;  %v8112_v4 = vor.u32 %v9262_v59, %v8111_v15 }
 0x1ac   : > { %vm1564_vm7 = vcmp.gt.f32.partialorder %v867_v50, 0.0  ;;  %v1822_v16 = vmul.f32 %v10007_v17, %v867_v50  ;;  %vm1565_vm8 = vcmp.gt.f32.partialorder %v956_v47, 0.0  ;;  %v1823_v20 = vmul.f32 %v10007_v17, %v956_v47  ;;  %8021 = vmatmul.msk.bf16.gmra.mxu0 %vm553_vm0, %v9992_v11 }
 0x1ad   : > { %8037 = vmatmul.msk.bf16.gmra.mxu1 %vm553_vm0, %v9992_v11  ;;  %vm1318_vm9 = vcmp.gt.f32.partialorder %v968_v6, 0.0  ;;  %3763 = vmatpush.bf16.msra.mxu0 %v8112_v4  ;;  %vm1319_vm10 = vcmp.gt.f32.partialorder %v1057_v61, 0.0 }
 0x1ae   : > { %v2078_v41 = vsel %vm1564_vm7, %v867_v50, %v1822_v16  ;;  %8053 = vmatmul.msk.bf16.gmra.mxu2 %vm553_vm0, %v9992_v11  ;;  %v2079_v46 = vsel %vm1565_vm8, %v956_v47, %v1823_v20  ;;  %8069 = vmatmul.msk.bf16.gmra.mxu3 %vm553_vm0, %v9992_v11  ;;  %v8368_v50 = vor.u32 %v9326_v56, %v8367_v13  ;;  %v8495_v16 = vld [vmem:[#allocation7 + $0x340] sm:$0xf] }
 0x1af   : > { %v10553_v7 = vpack.c.bf16 %v2078_v41, %v2070_v24  ;;  %v10558_v35 = vpack.c.bf16 %v2079_v46, %v2071_v10  ;;  %v8496_v24 = vor.u32 %v9358_v31, %v8495_v16  ;;  %v1576_v11 = vmul.f32 %v10007_v17, %v968_v6  ;;  %v8239_v31 = vld [vmem:[#allocation7 + $0x140] sm:$0xf] }
 0x1b0   : > { %v10564_v41 = vperm.slane %v9614_v8, 7  ;;  %3941 = vmatpush.bf16.msra.mxu2 %v8368_v50  ;;  %v1577_v46 = vmul.f32 %v10007_v17, %v1057_v61 }
 0x1b1   : > { %13250 = vst [vmem:[#allocation75_spill] sm:$0xff] %v10553_v7  ;;  %v1145_v40 = vpop.f32.mrf.mxu2  ;;  %v1234_v47 = vpop.f32.mrf.mxu3  ;;  %4030 = vmatpush.bf16.msra.mxu3 %v8496_v24  ;;  %v1832_v59 = vsel %vm1318_vm9, %v968_v6, %v1576_v11 }
 0x1b2   : > { %13251 = vst [vmem:[#allocation76_spill] sm:$0xff] %v10558_v35  ;;  %v969_v20 = vpop.f32.mrf.mxu0  ;;  %v1058_v10 = vpop.f32.mrf.mxu1  ;;  %v1146_v15 = vadd.f32 %v1145_v40, %v10561_v14  ;;  %v1235_v16 = vadd.f32 %v1234_v47, %v10564_v41  ;;  %v1833_v35 = vsel %vm1319_vm10, %v1057_v61, %v1577_v46 }
 0x1b3   : > { %v970_v26 = vadd.f32 %v969_v20, %v10541_v58  ;;  %v1059_v13 = vadd.f32 %v1058_v10, %v10544_v5  ;;  %v9294_v20 = vld [vmem:[#allocation7 + $0x14c] sm:$0xf0] }
 0x1b4   : > { %v8240_v24 = vor.u32 %v9294_v20, %v8239_v31  ;;  %v1578_v49 = vmul.f32 %v10007_v17, %v1146_v15  ;;  %vm1320_vm13 = vcmp.gt.f32.partialorder %v1146_v15, 0.0  ;;  %v1579_v6 = vmul.f32 %v10007_v17, %v1235_v16 }
 0x1b5   : > { %vm1326_vm11 = vcmp.gt.f32.partialorder %v970_v26, 0.0  ;;  %v1584_v56 = vmul.f32 %v10007_v17, %v970_v26  ;;  %vm1327_vm12 = vcmp.gt.f32.partialorder %v1059_v13, 0.0  ;;  %v1585_v8 = vmul.f32 %v10007_v17, %v1059_v13 }
 0x1b6   : > { %3852 = vmatpush.bf16.msra.mxu1 %v8240_v24  ;;  %vm1321_vm14 = vcmp.gt.f32.partialorder %v1235_v16, 0.0 }
 0x1b7   : > { %v1840_v50 = vsel %vm1326_vm11, %v970_v26, %v1584_v56  ;;  %v1841_v4 = vsel %vm1327_vm12, %v1059_v13, %v1585_v8 }
 0x1b8   : > { %v10573_v7 = vpack.c.bf16 %v1840_v50, %v1832_v59  ;;  %v10575_v10 = vpack.c.bf16 %v1841_v4, %v1833_v35 }
 0x1b9   : > { %v1147_v53 = vpop.f32.mrf.mxu2  ;;  %v1236_v44 = vpop.f32.mrf.mxu3 }
 0x1ba   : > { %13252 = vst [vmem:[#allocation77_spill] sm:$0xff] %v10573_v7  ;;  %v1148_v40 = vadd.f32 %v1147_v53, %v10561_v14  ;;  %v972_v0 = vpop.f32.mrf.mxu0  ;;  %v1237_v47 = vadd.f32 %v1236_v44, %v10564_v41  ;;  %v1061_v61 = vpop.f32.mrf.mxu1  ;;  %v1834_v53 = vsel %vm1320_vm13, %v1146_v15, %v1578_v49  ;;  %v1835_v44 = vsel %vm1321_vm14, %v1235_v16, %v1579_v6 }
 0x1bb   : > { %13253 = vst [vmem:[#allocation78_spill] sm:$0xff] %v10575_v10  ;;  %v973_v56 = vadd.f32 %v972_v0, %v10541_v58  ;;  %v1062_v49 = vadd.f32 %v1061_v61, %v10544_v5 }
 0x1bc   : > { %vm1328_vm15 = vcmp.gt.f32.partialorder %v1148_v40, 0.0  ;;  %v1586_v11 = vmul.f32 %v10007_v17, %v1148_v40  ;;  %vm1329_vm1 = vcmp.gt.f32.partialorder %v1237_v47, 0.0  ;;  %v1587_v35 = vmul.f32 %v10007_v17, %v1237_v47  ;;  %8022 = vmatmul.msk.bf16.gmra.mxu0 %vm553_vm0, %v10028_v45 }
 0x1bd   : > { %8038 = vmatmul.msk.bf16.gmra.mxu1 %vm553_vm0, %v10028_v45  ;;  %v1592_v31 = vmul.f32 %v10007_v17, %v973_v56  ;;  %vm1334_vm2 = vcmp.gt.f32.partialorder %v973_v56, 0.0  ;;  %v1593_v4 = vmul.f32 %v10007_v17, %v1062_v49  ;;  %vm1335_vm3 = vcmp.gt.f32.partialorder %v1062_v49, 0.0 }
 0x1be   : > { %v1842_v26 = vsel %vm1328_vm15, %v1148_v40, %v1586_v11  ;;  %8054 = vmatmul.msk.bf16.gmra.mxu2 %vm553_vm0, %v10028_v45  ;;  %v1843_v13 = vsel %vm1329_vm1, %v1237_v47, %v1587_v35  ;;  %8070 = vmatmul.msk.bf16.gmra.mxu3 %vm553_vm0, %v10028_v45 }
 0x1bf   : > { %v10589_v46 = vpack.c.bf16 %v1842_v26, %v1834_v53  ;;  %v10594_v8 = vpack.c.bf16 %v1843_v13, %v1835_v44  ;;  %v1848_v6 = vsel %vm1334_vm2, %v973_v56, %v1592_v31  ;;  %v1849_v11 = vsel %vm1335_vm3, %v1062_v49, %v1593_v4 }
 0x1c1   : > { %13254 = vst [vmem:[#allocation79_spill] sm:$0xff] %v10589_v46  ;;  %v1150_v15 = vpop.f32.mrf.mxu2  ;;  %v1239_v59 = vpop.f32.mrf.mxu3 }
 0x1c2   : > { %13255 = vst [vmem:[#allocation80_spill] sm:$0xff] %v10594_v8  ;;  %v974_v50 = vpop.f32.mrf.mxu0  ;;  %v1063_v16 = vpop.f32.mrf.mxu1  ;;  %v1151_v24 = vadd.f32 %v1150_v15, %v10561_v14  ;;  %v1240_v47 = vadd.f32 %v1239_v59, %v10564_v41 }
 0x1c3   : > { %v975_v20 = vadd.f32 %v974_v50, %v10541_v58  ;;  %v1064_v0 = vadd.f32 %v1063_v16, %v10544_v5 }
 0x1c4   : > { %v1594_v13 = vmul.f32 %v10007_v17, %v1151_v24  ;;  %vm1336_vm6 = vcmp.gt.f32.partialorder %v1151_v24, 0.0  ;;  %v1595_v8 = vmul.f32 %v10007_v17, %v1240_v47  ;;  %vm1337_vm7 = vcmp.gt.f32.partialorder %v1240_v47, 0.0 }
 0x1c5   : > { %vm1342_vm4 = vcmp.gt.f32.partialorder %v975_v20, 0.0  ;;  %v1600_v45 = vmul.f32 %v10007_v17, %v975_v20  ;;  %vm1343_vm5 = vcmp.gt.f32.partialorder %v1064_v0, 0.0  ;;  %v1601_v40 = vmul.f32 %v10007_v17, %v1064_v0 }
 0x1c7   : > { %v1856_v61 = vsel %vm1342_vm4, %v975_v20, %v1600_v45  ;;  %v1857_v53 = vsel %vm1343_vm5, %v1064_v0, %v1601_v40  ;;  %v1850_v20 = vsel %vm1336_vm6, %v1151_v24, %v1594_v13  ;;  %v1851_v0 = vsel %vm1337_vm7, %v1240_v47, %v1595_v8  ;;  %v9354_v8 = vld [vmem:[#allocation7 + $0x32c] sm:$0xf0] }
 0x1c8   : > { %v10605_v35 = vpack.c.bf16 %v1856_v61, %v1848_v6  ;;  %v10607_v26 = vpack.c.bf16 %v1857_v53, %v1849_v11  ;;  %v8351_v11 = vld [vmem:[#allocation7 + $0x220] sm:$0xf]  ;;  %v9322_v53 = vld [vmem:[#allocation7 + $0x22c] sm:$0xf0] }
 0x1c9   : > { %v1152_v44 = vpop.f32.mrf.mxu2  ;;  %v1241_v16 = vpop.f32.mrf.mxu3 }
 0x1ca   : > { %13256 = vst [vmem:[#allocation81_spill] sm:$0xff] %v10605_v35  ;;  %v1153_v50 = vadd.f32 %v1152_v44, %v10561_v14  ;;  %v977_v15 = vpop.f32.mrf.mxu0  ;;  %v1242_v56 = vadd.f32 %v1241_v16, %v10564_v41  ;;  %v1066_v59 = vpop.f32.mrf.mxu1  ;;  %v8095_v44 = vld [vmem:[#allocation7 + $0x20] sm:$0xf]  ;;  %v9258_v16 = vld [vmem:[#allocation7 + $0x2c] sm:$0xf0] }
 0x1cb   : > { %13257 = vst [vmem:[#allocation82_spill] sm:$0xff] %v10607_v26  ;;  %v978_v6 = vadd.f32 %v977_v15, %v10541_v58  ;;  %v1067_v24 = vadd.f32 %v1066_v59, %v10544_v5 }
 0x1cc   : > { %vm1344_vm8 = vcmp.gt.f32.partialorder %v1153_v50, 0.0  ;;  %v1602_v49 = vmul.f32 %v10007_v17, %v1153_v50  ;;  %vm1345_vm9 = vcmp.gt.f32.partialorder %v1242_v56, 0.0  ;;  %v1603_v31 = vmul.f32 %v10007_v17, %v1242_v56  ;;  %8023 = vmatmul.msk.bf16.gmra.mxu0 %vm553_vm0, %v10064_v32 }
 0x1cd   : > { %8039 = vmatmul.msk.bf16.gmra.mxu1 %vm553_vm0, %v10064_v32  ;;  %v1608_v15 = vmul.f32 %v10007_v17, %v978_v6  ;;  %vm1350_vm10 = vcmp.gt.f32.partialorder %v978_v6, 0.0  ;;  %v1609_v59 = vmul.f32 %v10007_v17, %v1067_v24  ;;  %vm1351_vm11 = vcmp.gt.f32.partialorder %v1067_v24, 0.0 }
 0x1ce   : > { %v1858_v4 = vsel %vm1344_vm8, %v1153_v50, %v1602_v49  ;;  %8055 = vmatmul.msk.bf16.gmra.mxu2 %vm553_vm0, %v10064_v32  ;;  %v1859_v40 = vsel %vm1345_vm9, %v1242_v56, %v1603_v31  ;;  %8071 = vmatmul.msk.bf16.gmra.mxu3 %vm553_vm0, %v10064_v32  ;;  %v8352_v50 = vor.u32 %v9322_v53, %v8351_v11  ;;  %v8479_v49 = vld [vmem:[#allocation7 + $0x320] sm:$0xf] }
 0x1cf   : > { %v10621_v45 = vpack.c.bf16 %v1858_v4, %v1850_v20  ;;  %v10626_v61 = vpack.c.bf16 %v1859_v40, %v1851_v0  ;;  %v8096_v56 = vor.u32 %v9258_v16, %v8095_v44  ;;  %v8480_v31 = vor.u32 %v9354_v8, %v8479_v49  ;;  %v8223_v49 = vld [vmem:[#allocation7 + $0x120] sm:$0xf]  ;;  %v9290_v8 = vld [vmem:[#allocation7 + $0x12c] sm:$0xf0] }
 0x1d0   : > { %3942 = vmatpush.bf16.msra.mxu2 %v8352_v50  ;;  %v1864_v44 = vsel %vm1350_vm10, %v978_v6, %v1608_v15 }
 0x1d1   : > { %13258 = vst [vmem:[#allocation83_spill] sm:$0xff] %v10621_v45  ;;  %v1155_v13 = vpop.f32.mrf.mxu2  ;;  %v1244_v47 = vpop.f32.mrf.mxu3  ;;  %3764 = vmatpush.bf16.msra.mxu0 %v8096_v56  ;;  %4031 = vmatpush.bf16.msra.mxu3 %v8480_v31  ;;  %v8224_v31 = vor.u32 %v9290_v8, %v8223_v49 }
 0x1d2   : > { %13259 = vst [vmem:[#allocation84_spill] sm:$0xff] %v10626_v61  ;;  %v979_v20 = vpop.f32.mrf.mxu0  ;;  %v1068_v4 = vpop.f32.mrf.mxu1  ;;  %v1156_v11 = vadd.f32 %v1155_v13, %v10561_v14  ;;  %v1245_v16 = vadd.f32 %v1244_v47, %v10564_v41 }
 0x1d3   : > { %v980_v32 = vadd.f32 %v979_v20, %v10541_v58  ;;  %v1069_v0 = vadd.f32 %v1068_v4, %v10544_v5  ;;  %v1865_v20 = vsel %vm1351_vm11, %v1067_v24, %v1609_v59  ;;  %3853 = vmatpush.bf16.msra.mxu1 %v8224_v31 }
 0x1d4   : > { %v1610_v26 = vmul.f32 %v10007_v17, %v1156_v11  ;;  %vm1352_vm14 = vcmp.gt.f32.partialorder %v1156_v11, 0.0  ;;  %v1611_v6 = vmul.f32 %v10007_v17, %v1245_v16  ;;  %vm1353_vm15 = vcmp.gt.f32.partialorder %v1245_v16, 0.0 }
 0x1d5   : > { %vm1358_vm12 = vcmp.gt.f32.partialorder %v980_v32, 0.0  ;;  %v1616_v40 = vmul.f32 %v10007_v17, %v980_v32  ;;  %vm1359_vm13 = vcmp.gt.f32.partialorder %v1069_v0, 0.0  ;;  %v1617_v53 = vmul.f32 %v10007_v17, %v1069_v0 }
 0x1d7   : > { %v1872_v50 = vsel %vm1358_vm12, %v980_v32, %v1616_v40  ;;  %v1873_v56 = vsel %vm1359_vm13, %v1069_v0, %v1617_v53 }
 0x1d8   : > { %v10637_v61 = vpack.c.bf16 %v1872_v50, %v1864_v44  ;;  %v10639_v4 = vpack.c.bf16 %v1873_v56, %v1865_v20 }
 0x1d9   : > { %v1157_v45 = vpop.f32.mrf.mxu2  ;;  %v1246_v35 = vpop.f32.mrf.mxu3 }
 0x1da   : > { %13260 = vst [vmem:[#allocation85_spill] sm:$0xff] %v10637_v61  ;;  %v1158_v13 = vadd.f32 %v1157_v45, %v10561_v14  ;;  %v982_v46 = vpop.f32.mrf.mxu0  ;;  %v1247_v47 = vadd.f32 %v1246_v35, %v10564_v41  ;;  %v1071_v24 = vpop.f32.mrf.mxu1  ;;  %v1866_v45 = vsel %vm1352_vm14, %v1156_v11, %v1610_v26  ;;  %v1867_v35 = vsel %vm1353_vm15, %v1245_v16, %v1611_v6 }
 0x1db   : > { %13261 = vst [vmem:[#allocation86_spill] sm:$0xff] %v10639_v4  ;;  %v983_v53 = vadd.f32 %v982_v46, %v10541_v58  ;;  %v1072_v26 = vadd.f32 %v1071_v24, %v10544_v5 }
 0x1dc   : > { %vm1360_vm1 = vcmp.gt.f32.partialorder %v1158_v13, 0.0  ;;  %v1618_v15 = vmul.f32 %v10007_v17, %v1158_v13  ;;  %vm1361_vm2 = vcmp.gt.f32.partialorder %v1247_v47, 0.0  ;;  %v1619_v32 = vmul.f32 %v10007_v17, %v1247_v47  ;;  %8024 = vmatmul.msk.bf16.gmra.mxu0 %vm553_vm0, %v10100_v25 }
 0x1dd   : > { %8040 = vmatmul.msk.bf16.gmra.mxu1 %vm553_vm0, %v10100_v25  ;;  %v1624_v8 = vmul.f32 %v10007_v17, %v983_v53  ;;  %vm1366_vm3 = vcmp.gt.f32.partialorder %v983_v53, 0.0  ;;  %v1625_v56 = vmul.f32 %v10007_v17, %v1072_v26  ;;  %vm1367_vm4 = vcmp.gt.f32.partialorder %v1072_v26, 0.0 }
 0x1de   : > { %v1874_v59 = vsel %vm1360_vm1, %v1158_v13, %v1618_v15  ;;  %8056 = vmatmul.msk.bf16.gmra.mxu2 %vm553_vm0, %v10100_v25  ;;  %v1875_v40 = vsel %vm1361_vm2, %v1247_v47, %v1619_v32  ;;  %8072 = vmatmul.msk.bf16.gmra.mxu3 %vm553_vm0, %v10100_v25 }
 0x1df   : > { %v10653_v0 = vpack.c.bf16 %v1874_v59, %v1866_v45  ;;  %v10658_v44 = vpack.c.bf16 %v1875_v40, %v1867_v35  ;;  %v1880_v6 = vsel %vm1366_vm3, %v983_v53, %v1624_v8  ;;  %v1881_v15 = vsel %vm1367_vm4, %v1072_v26, %v1625_v56 }
 0x1e1   : > { %13262 = vst [vmem:[#allocation87_spill] sm:$0xff] %v10653_v0  ;;  %v1160_v11 = vpop.f32.mrf.mxu2  ;;  %v1249_v50 = vpop.f32.mrf.mxu3 }
 0x1e2   : > { %13263 = vst [vmem:[#allocation88_spill] sm:$0xff] %v10658_v44  ;;  %v984_v49 = vpop.f32.mrf.mxu0  ;;  %v1073_v16 = vpop.f32.mrf.mxu1  ;;  %v1161_v31 = vadd.f32 %v1160_v11, %v10561_v14  ;;  %v1250_v47 = vadd.f32 %v1249_v50, %v10564_v41 }
 0x1e3   : > { %v985_v20 = vadd.f32 %v984_v49, %v10541_v58  ;;  %v1074_v46 = vadd.f32 %v1073_v16, %v10544_v5 }
 0x1e4   : > { %v1626_v40 = vmul.f32 %v10007_v17, %v1161_v31  ;;  %vm1368_vm7 = vcmp.gt.f32.partialorder %v1161_v31, 0.0  ;;  %v1627_v44 = vmul.f32 %v10007_v17, %v1250_v47  ;;  %vm1369_vm8 = vcmp.gt.f32.partialorder %v1250_v47, 0.0 }
 0x1e5   : > { %vm1374_vm5 = vcmp.gt.f32.partialorder %v985_v20, 0.0  ;;  %v1632_v25 = vmul.f32 %v10007_v17, %v985_v20  ;;  %vm1375_vm6 = vcmp.gt.f32.partialorder %v1074_v46, 0.0  ;;  %v1633_v13 = vmul.f32 %v10007_v17, %v1074_v46 }
 0x1e7   : > { %v1888_v24 = vsel %vm1374_vm5, %v985_v20, %v1632_v25  ;;  %v1889_v45 = vsel %vm1375_vm6, %v1074_v46, %v1633_v13  ;;  %v1882_v20 = vsel %vm1368_vm7, %v1161_v31, %v1626_v40  ;;  %v1883_v46 = vsel %vm1369_vm8, %v1250_v47, %v1627_v44  ;;  %v9350_v44 = vld [vmem:[#allocation7 + $0x30c] sm:$0xf0] }
 0x1e8   : > { %v10669_v32 = vpack.c.bf16 %v1888_v24, %v1880_v6  ;;  %v10671_v59 = vpack.c.bf16 %v1889_v45, %v1881_v15  ;;  %v8335_v15 = vld [vmem:[#allocation7 + $0x200] sm:$0xf]  ;;  %v9318_v45 = vld [vmem:[#allocation7 + $0x20c] sm:$0xf0] }
 0x1e9   : > { %v1162_v35 = vpop.f32.mrf.mxu2  ;;  %v1251_v16 = vpop.f32.mrf.mxu3 }
 0x1ea   : > { %13264 = vst [vmem:[#allocation89_spill] sm:$0xff] %v10669_v32  ;;  %v1163_v49 = vadd.f32 %v1162_v35, %v10561_v14  ;;  %v987_v11 = vpop.f32.mrf.mxu0  ;;  %v1252_v53 = vadd.f32 %v1251_v16, %v10564_v41  ;;  %v1076_v50 = vpop.f32.mrf.mxu1  ;;  %v8079_v35 = vld [vmem:[#allocation7] sm:$0xf]  ;;  %v9254_v16 = vld [vmem:[#allocation7 + $0xc] sm:$0xf0] }
 0x1eb   : > { %13265 = vst [vmem:[#allocation90_spill] sm:$0xff] %v10671_v59  ;;  %v988_v6 = vadd.f32 %v987_v11, %v10541_v58  ;;  %v1077_v31 = vadd.f32 %v1076_v50, %v10544_v5 }
 0x1ec   : > { %vm1376_vm9 = vcmp.gt.f32.partialorder %v1163_v49, 0.0  ;;  %v1634_v26 = vmul.f32 %v10007_v17, %v1163_v49  ;;  %vm1377_vm10 = vcmp.gt.f32.partialorder %v1252_v53, 0.0  ;;  %v1635_v8 = vmul.f32 %v10007_v17, %v1252_v53  ;;  %8025 = vmatmul.msk.bf16.gmra.mxu0 %vm553_vm0, %v10136_v29 }
 0x1ed   : > { %8041 = vmatmul.msk.bf16.gmra.mxu1 %vm553_vm0, %v10136_v29  ;;  %v1640_v11 = vmul.f32 %v10007_v17, %v988_v6  ;;  %vm1382_vm11 = vcmp.gt.f32.partialorder %v988_v6, 0.0  ;;  %v1641_v50 = vmul.f32 %v10007_v17, %v1077_v31  ;;  %vm1383_vm12 = vcmp.gt.f32.partialorder %v1077_v31, 0.0 }
 0x1ee   : > { %v1890_v56 = vsel %vm1376_vm9, %v1163_v49, %v1634_v26  ;;  %8057 = vmatmul.msk.bf16.gmra.mxu2 %vm553_vm0, %v10136_v29  ;;  %v1891_v13 = vsel %vm1377_vm10, %v1252_v53, %v1635_v8  ;;  %8073 = vmatmul.msk.bf16.gmra.mxu3 %vm553_vm0, %v10136_v29  ;;  %v8336_v49 = vor.u32 %v9318_v45, %v8335_v15  ;;  %v8463_v26 = vld [vmem:[#allocation7 + $0x300] sm:$0xf] }
 0x1ef   : > { %v10685_v25 = vpack.c.bf16 %v1890_v56, %v1882_v20  ;;  %v10690_v24 = vpack.c.bf16 %v1891_v13, %v1883_v46  ;;  %v8080_v53 = vor.u32 %v9254_v16, %v8079_v35  ;;  %v8464_v8 = vor.u32 %v9350_v44, %v8463_v26  ;;  %v8207_v26 = vld [vmem:[#allocation7 + $0x100] sm:$0xf]  ;;  %v9286_v44 = vld [vmem:[#allocation7 + $0x10c] sm:$0xf0] }
 0x1f0   : > { %3943 = vmatpush.bf16.msra.mxu2 %v8336_v49  ;;  %v1896_v35 = vsel %vm1382_vm11, %v988_v6, %v1640_v11 }
 0x1f1   : > { %13266 = vst [vmem:[#allocation91_spill] sm:$0xff] %v10685_v25  ;;  %v1165_v40 = vpop.f32.mrf.mxu2  ;;  %v1254_v47 = vpop.f32.mrf.mxu3  ;;  %3765 = vmatpush.bf16.msra.mxu0 %v8080_v53  ;;  %4032 = vmatpush.bf16.msra.mxu3 %v8464_v8  ;;  %v8208_v8 = vor.u32 %v9286_v44, %v8207_v26 }
 0x1f2   : > { %13267 = vst [vmem:[#allocation92_spill] sm:$0xff] %v10690_v24  ;;  %v989_v20 = vpop.f32.mrf.mxu0  ;;  %v1078_v56 = vpop.f32.mrf.mxu1  ;;  %v1166_v15 = vadd.f32 %v1165_v40, %v10561_v14  ;;  %v1255_v16 = vadd.f32 %v1254_v47, %v10564_v41 }
 0x1f3   : > { %v990_v29 = vadd.f32 %v989_v20, %v10541_v58  ;;  %v1079_v46 = vadd.f32 %v1078_v56, %v10544_v5  ;;  %v1897_v20 = vsel %vm1383_vm12, %v1077_v31, %v1641_v50  ;;  %3854 = vmatpush.bf16.msra.mxu1 %v8208_v8 }
 0x1f4   : > { %v1642_v59 = vmul.f32 %v10007_v17, %v1166_v15  ;;  %vm1384_vm15 = vcmp.gt.f32.partialorder %v1166_v15, 0.0  ;;  %v1643_v6 = vmul.f32 %v10007_v17, %v1255_v16  ;;  %vm1385_vm1 = vcmp.gt.f32.partialorder %v1255_v16, 0.0 }
 0x1f5   : > { %vm1390_vm13 = vcmp.gt.f32.partialorder %v990_v29, 0.0  ;;  %v1648_v13 = vmul.f32 %v10007_v17, %v990_v29  ;;  %vm1391_vm14 = vcmp.gt.f32.partialorder %v1079_v46, 0.0  ;;  %v1649_v45 = vmul.f32 %v10007_v17, %v1079_v46 }
 0x1f7   : > { %v1904_v49 = vsel %vm1390_vm13, %v990_v29, %v1648_v13  ;;  %v1905_v53 = vsel %vm1391_vm14, %v1079_v46, %v1649_v45 }
 0x1f8   : > { %v10701_v24 = vpack.c.bf16 %v1904_v49, %v1896_v35  ;;  %v10703_v56 = vpack.c.bf16 %v1905_v53, %v1897_v20 }
 0x1f9   : > { %v1167_v25 = vpop.f32.mrf.mxu2  ;;  %v1256_v32 = vpop.f32.mrf.mxu3 }
 0x1fa   : > { %13268 = vst [vmem:[#allocation93_spill] sm:$0xff] %v10701_v24  ;;  %v1168_v40 = vadd.f32 %v1167_v25, %v10561_v14  ;;  %v992_v0 = vpop.f32.mrf.mxu0  ;;  %v1257_v47 = vadd.f32 %v1256_v32, %v10564_v41  ;;  %v1081_v31 = vpop.f32.mrf.mxu1  ;;  %v1898_v25 = vsel %vm1384_vm15, %v1166_v15, %v1642_v59  ;;  %v1899_v32 = vsel %vm1385_vm1, %v1255_v16, %v1643_v6 }
 0x1fb   : > { %13269 = vst [vmem:[#allocation94_spill] sm:$0xff] %v10703_v56  ;;  %v993_v45 = vadd.f32 %v992_v0, %v10541_v58  ;;  %v1082_v59 = vadd.f32 %v1081_v31, %v10544_v5 }
 0x1fc   : > { %vm1392_vm2 = vcmp.gt.f32.partialorder %v1168_v40, 0.0  ;;  %v1650_v11 = vmul.f32 %v10007_v17, %v1168_v40  ;;  %vm1393_vm3 = vcmp.gt.f32.partialorder %v1257_v47, 0.0  ;;  %v1651_v29 = vmul.f32 %v10007_v17, %v1257_v47  ;;  %8026 = vmatmul.msk.bf16.gmra.mxu0 %vm553_vm0, %v10172_v38 }
 0x1fd   : > { %8042 = vmatmul.msk.bf16.gmra.mxu1 %vm553_vm0, %v10172_v38  ;;  %v1656_v44 = vmul.f32 %v10007_v17, %v993_v45  ;;  %vm1398_vm4 = vcmp.gt.f32.partialorder %v993_v45, 0.0  ;;  %v1657_v53 = vmul.f32 %v10007_v17, %v1082_v59  ;;  %vm1399_vm5 = vcmp.gt.f32.partialorder %v1082_v59, 0.0 }
 0x1fe   : > { %v1906_v50 = vsel %vm1392_vm2, %v1168_v40, %v1650_v11  ;;  %8058 = vmatmul.msk.bf16.gmra.mxu2 %vm553_vm0, %v10172_v38  ;;  %v1907_v13 = vsel %vm1393_vm3, %v1257_v47, %v1651_v29  ;;  %8074 = vmatmul.msk.bf16.gmra.mxu3 %vm553_vm0, %v10172_v38 }
 0x1ff   : > { %v10717_v46 = vpack.c.bf16 %v1906_v50, %v1898_v25  ;;  %v10722_v35 = vpack.c.bf16 %v1907_v13, %v1899_v32  ;;  %v1912_v6 = vsel %vm1398_vm4, %v993_v45, %v1656_v44  ;;  %v1913_v11 = vsel %vm1399_vm5, %v1082_v59, %v1657_v53 }
 0x201   : > { %13270 = vst [vmem:[#allocation95_spill] sm:$0xff] %v10717_v46  ;;  %v1170_v15 = vpop.f32.mrf.mxu2  ;;  %v1259_v49 = vpop.f32.mrf.mxu3 }
 0x202   : > { %13271 = vst [vmem:[#allocation96_spill] sm:$0xff] %v10722_v35  ;;  %v994_v26 = vpop.f32.mrf.mxu0  ;;  %v1083_v16 = vpop.f32.mrf.mxu1  ;;  %v1171_v8 = vadd.f32 %v1170_v15, %v10561_v14  ;;  %v1260_v47 = vadd.f32 %v1259_v49, %v10564_v41 }
 0x203   : > { %v995_v20 = vadd.f32 %v994_v26, %v10541_v58  ;;  %v1084_v0 = vadd.f32 %v1083_v16, %v10544_v5 }
 0x204   : > { %v1658_v13 = vmul.f32 %v10007_v17, %v1171_v8  ;;  %vm1400_vm8 = vcmp.gt.f32.partialorder %v1171_v8, 0.0  ;;  %v1659_v35 = vmul.f32 %v10007_v17, %v1260_v47  ;;  %vm1401_vm9 = vcmp.gt.f32.partialorder %v1260_v47, 0.0 }
 0x205   : > { %vm1406_vm6 = vcmp.gt.f32.partialorder %v995_v20, 0.0  ;;  %v1664_v38 = vmul.f32 %v10007_v17, %v995_v20  ;;  %vm1407_vm7 = vcmp.gt.f32.partialorder %v1084_v0, 0.0  ;;  %v1665_v40 = vmul.f32 %v10007_v17, %v1084_v0 }
 0x207   : > { %v1920_v31 = vsel %vm1406_vm6, %v995_v20, %v1664_v38  ;;  %v1921_v25 = vsel %vm1407_vm7, %v1084_v0, %v1665_v40  ;;  %v1914_v20 = vsel %vm1400_vm8, %v1171_v8, %v1658_v13  ;;  %v1915_v0 = vsel %vm1401_vm9, %v1260_v47, %v1659_v35  ;;  %v9506_v35 = vld [vmem:[#allocation7 + $0x7ec] sm:$0xf0] }
 0x208   : > { %v10733_v29 = vpack.c.bf16 %v1920_v31, %v1912_v6  ;;  %v10735_v50 = vpack.c.bf16 %v1921_v25, %v1913_v11  ;;  %v8959_v11 = vld [vmem:[#allocation7 + $0x6e0] sm:$0xf]  ;;  %v9474_v25 = vld [vmem:[#allocation7 + $0x6ec] sm:$0xf0] }
 0x209   : > { %v1172_v32 = vpop.f32.mrf.mxu2  ;;  %v1261_v16 = vpop.f32.mrf.mxu3 }
 0x20a   : > { %13272 = vst [vmem:[#allocation97_spill] sm:$0xff] %v10733_v29  ;;  %v1173_v26 = vadd.f32 %v1172_v32, %v10561_v14  ;;  %v997_v15 = vpop.f32.mrf.mxu0  ;;  %v1262_v45 = vadd.f32 %v1261_v16, %v10564_v41  ;;  %v1086_v49 = vpop.f32.mrf.mxu1  ;;  %v8703_v32 = vld [vmem:[#allocation7 + $0x4e0] sm:$0xf]  ;;  %v9410_v16 = vld [vmem:[#allocation7 + $0x4ec] sm:$0xf0] }
 0x20b   : > { %13273 = vst [vmem:[#allocation98_spill] sm:$0xff] %v10735_v50  ;;  %v998_v6 = vadd.f32 %v997_v15, %v10541_v58  ;;  %v1087_v8 = vadd.f32 %v1086_v49, %v10544_v5 }
 0x20c   : > { %vm1408_vm10 = vcmp.gt.f32.partialorder %v1173_v26, 0.0  ;;  %v1666_v59 = vmul.f32 %v10007_v17, %v1173_v26  ;;  %vm1409_vm11 = vcmp.gt.f32.partialorder %v1262_v45, 0.0  ;;  %v1667_v44 = vmul.f32 %v10007_v17, %v1262_v45  ;;  %8027 = vmatmul.msk.bf16.gmra.mxu0 %vm553_vm0, %v10208_v3 }
 0x20d   : > { %8043 = vmatmul.msk.bf16.gmra.mxu1 %vm553_vm0, %v10208_v3  ;;  %v1672_v15 = vmul.f32 %v10007_v17, %v998_v6  ;;  %vm1414_vm12 = vcmp.gt.f32.partialorder %v998_v6, 0.0  ;;  %v1673_v49 = vmul.f32 %v10007_v17, %v1087_v8  ;;  %vm1415_vm13 = vcmp.gt.f32.partialorder %v1087_v8, 0.0 }
 0x20e   : > { %v1922_v53 = vsel %vm1408_vm10, %v1173_v26, %v1666_v59  ;;  %8059 = vmatmul.msk.bf16.gmra.mxu2 %vm553_vm0, %v10208_v3  ;;  %v1923_v40 = vsel %vm1409_vm11, %v1262_v45, %v1667_v44  ;;  %8075 = vmatmul.msk.bf16.gmra.mxu3 %vm553_vm0, %v10208_v3  ;;  %v8960_v26 = vor.u32 %v9474_v25, %v8959_v11  ;;  %v9087_v59 = vld [vmem:[#allocation7 + $0x7e0] sm:$0xf] }
 0x20f   : > { %v10749_v38 = vpack.c.bf16 %v1922_v53, %v1914_v20  ;;  %v10754_v31 = vpack.c.bf16 %v1923_v40, %v1915_v0  ;;  %v8704_v45 = vor.u32 %v9410_v16, %v8703_v32  ;;  %v9088_v44 = vor.u32 %v9506_v35, %v9087_v59  ;;  %v8831_v59 = vld [vmem:[#allocation7 + $0x5e0] sm:$0xf]  ;;  %v9442_v35 = vld [vmem:[#allocation7 + $0x5ec] sm:$0xf0] }
 0x210   : > { %4292 = vmatpush.bf16.msrb.mxu2 %v8960_v26  ;;  %v1928_v32 = vsel %vm1414_vm12, %v998_v6, %v1672_v15 }
 0x211   : > { %13274 = vst [vmem:[#allocation99_spill] sm:$0xff] %v10749_v38  ;;  %v1175_v13 = vpop.f32.mrf.mxu2  ;;  %v1264_v47 = vpop.f32.mrf.mxu3  ;;  %4114 = vmatpush.bf16.msrb.mxu0 %v8704_v45  ;;  %4381 = vmatpush.bf16.msrb.mxu3 %v9088_v44  ;;  %v8832_v44 = vor.u32 %v9442_v35, %v8831_v59 }
 0x212   : > { %13275 = vst [vmem:[#allocation100_spill] sm:$0xff] %v10754_v31  ;;  %v999_v20 = vpop.f32.mrf.mxu0  ;;  %v1088_v53 = vpop.f32.mrf.mxu1  ;;  %v1176_v11 = vadd.f32 %v1175_v13, %v10561_v14  ;;  %v1265_v16 = vadd.f32 %v1264_v47, %v10564_v41 }
 0x213   : > { %v1000_v3 = vadd.f32 %v999_v20, %v10541_v58  ;;  %v1089_v0 = vadd.f32 %v1088_v53, %v10544_v5  ;;  %v1929_v20 = vsel %vm1415_vm13, %v1087_v8, %v1673_v49  ;;  %4203 = vmatpush.bf16.msrb.mxu1 %v8832_v44 }
 0x214   : > { %v1674_v50 = vmul.f32 %v10007_v17, %v1176_v11  ;;  %vm1416_vm1 = vcmp.gt.f32.partialorder %v1176_v11, 0.0  ;;  %v1675_v6 = vmul.f32 %v10007_v17, %v1265_v16  ;;  %vm1417_vm2 = vcmp.gt.f32.partialorder %v1265_v16, 0.0 }
 0x215   : > { %vm1422_vm14 = vcmp.gt.f32.partialorder %v1000_v3, 0.0  ;;  %v1680_v40 = vmul.f32 %v10007_v17, %v1000_v3  ;;  %vm1423_vm15 = vcmp.gt.f32.partialorder %v1089_v0, 0.0  ;;  %v1681_v25 = vmul.f32 %v10007_v17, %v1089_v0 }
 0x217   : > { %v1936_v26 = vsel %vm1422_vm14, %v1000_v3, %v1680_v40  ;;  %v1937_v45 = vsel %vm1423_vm15, %v1089_v0, %v1681_v25 }
 0x218   : > { %v10765_v31 = vpack.c.bf16 %v1936_v26, %v1928_v32  ;;  %v10767_v53 = vpack.c.bf16 %v1937_v45, %v1929_v20 }
 0x219   : > { %v1177_v38 = vpop.f32.mrf.mxu2  ;;  %v1266_v29 = vpop.f32.mrf.mxu3 }
 0x21a   : > { %13276 = vst [vmem:[#allocation101_spill] sm:$0xff] %v10765_v31  ;;  %v1178_v13 = vadd.f32 %v1177_v38, %v10561_v14  ;;  %v1002_v46 = vpop.f32.mrf.mxu0  ;;  %v1267_v47 = vadd.f32 %v1266_v29, %v10564_v41  ;;  %v1091_v8 = vpop.f32.mrf.mxu1  ;;  %v1930_v38 = vsel %vm1416_vm1, %v1176_v11, %v1674_v50  ;;  %v1931_v29 = vsel %vm1417_vm2, %v1265_v16, %v1675_v6 }
 0x21b   : > { %13277 = vst [vmem:[#allocation102_spill] sm:$0xff] %v10767_v53  ;;  %v1003_v25 = vadd.f32 %v1002_v46, %v10541_v58  ;;  %v1092_v50 = vadd.f32 %v1091_v8, %v10544_v5 }
 0x21c   : > { %vm1424_vm3 = vcmp.gt.f32.partialorder %v1178_v13, 0.0  ;;  %v1682_v15 = vmul.f32 %v10007_v17, %v1178_v13  ;;  %vm1425_vm4 = vcmp.gt.f32.partialorder %v1267_v47, 0.0  ;;  %v1683_v3 = vmul.f32 %v10007_v17, %v1267_v47  ;;  %8028 = vmatmul.msk.bf16.gmra.mxu0 %vm553_vm0, %v10244_v2 }
 0x21d   : > { %8044 = vmatmul.msk.bf16.gmra.mxu1 %vm553_vm0, %v10244_v2  ;;  %v1688_v35 = vmul.f32 %v10007_v17, %v1003_v25  ;;  %vm1430_vm5 = vcmp.gt.f32.partialorder %v1003_v25, 0.0  ;;  %v1689_v45 = vmul.f32 %v10007_v17, %v1092_v50  ;;  %vm1431_vm6 = vcmp.gt.f32.partialorder %v1092_v50, 0.0 }
 0x21e   : > { %v1938_v49 = vsel %vm1424_vm3, %v1178_v13, %v1682_v15  ;;  %8060 = vmatmul.msk.bf16.gmra.mxu2 %vm553_vm0, %v10244_v2  ;;  %v1939_v40 = vsel %vm1425_vm4, %v1267_v47, %v1683_v3  ;;  %8076 = vmatmul.msk.bf16.gmra.mxu3 %vm553_vm0, %v10244_v2 }
 0x21f   : > { %v10781_v0 = vpack.c.bf16 %v1938_v49, %v1930_v38  ;;  %v10786_v32 = vpack.c.bf16 %v1939_v40, %v1931_v29  ;;  %v1944_v6 = vsel %vm1430_vm5, %v1003_v25, %v1688_v35  ;;  %v1945_v15 = vsel %vm1431_vm6, %v1092_v50, %v1689_v45 }
 0x221   : > { %13278 = vst [vmem:[#allocation103_spill] sm:$0xff] %v10781_v0  ;;  %v1180_v11 = vpop.f32.mrf.mxu2  ;;  %v1269_v26 = vpop.f32.mrf.mxu3 }
 0x222   : > { %13279 = vst [vmem:[#allocation104_spill] sm:$0xff] %v10786_v32  ;;  %v1004_v59 = vpop.f32.mrf.mxu0  ;;  %v1093_v16 = vpop.f32.mrf.mxu1  ;;  %v1181_v44 = vadd.f32 %v1180_v11, %v10561_v14  ;;  %v1270_v47 = vadd.f32 %v1269_v26, %v10564_v41 }
 0x223   : > { %v1005_v20 = vadd.f32 %v1004_v59, %v10541_v58  ;;  %v1094_v46 = vadd.f32 %v1093_v16, %v10544_v5 }
 0x224   : > { %v1690_v40 = vmul.f32 %v10007_v17, %v1181_v44  ;;  %vm1432_vm8 = vcmp.gt.f32.partialorder %v1181_v44, 0.0  ;;  %v1691_v32 = vmul.f32 %v10007_v17, %v1270_v47  ;;  %vm1433_vm9 = vcmp.gt.f32.partialorder %v1270_v47, 0.0 }
 0x225   : > { %vm1438_vm7 = vcmp.gt.f32.partialorder %v1005_v20, 0.0  ;;  %v1696_v2 = vmul.f32 %v10007_v17, %v1005_v20  ;;  %vm1439_vm0 = vcmp.gt.f32.partialorder %v1094_v46, 0.0  ;;  %v1697_v13 = vmul.f32 %v10007_v17, %v1094_v46 }
 0x227   : > { %v1952_v8 = vsel %vm1438_vm7, %v1005_v20, %v1696_v2  ;;  %v1953_v38 = vsel %vm1439_vm0, %v1094_v46, %v1697_v13  ;;  %v1946_v20 = vsel %vm1432_vm8, %v1181_v44, %v1690_v40  ;;  %v1947_v46 = vsel %vm1433_vm9, %v1270_v47, %v1691_v32  ;;  %v8687_v44 = vld [vmem:[#allocation7 + $0x4c0] sm:$0xf] }
 0x228   : > { %v10797_v3 = vpack.c.bf16 %v1952_v8, %v1944_v6  ;;  %v10799_v49 = vpack.c.bf16 %v1953_v38, %v1945_v15  ;;  %v8943_v38 = vld [vmem:[#allocation7 + $0x6c0] sm:$0xf] }
 0x229   : > { %v1182_v29 = vpop.f32.mrf.mxu2  ;;  %v1271_v16 = vpop.f32.mrf.mxu3 }
 0x22a   : > { %13280 = vst [vmem:[#allocation105_spill] sm:$0xff] %v10799_v49  ;;  %v1183_v59 = vadd.f32 %v1182_v29, %v10561_v14  ;;  %v1007_v11 = vpop.f32.mrf.mxu0  ;;  %v1272_v25 = vadd.f32 %v1271_v16, %v10564_v41  ;;  %v1096_v26 = vpop.f32.mrf.mxu1  ;;  %v9470_v29 = vld [vmem:[#allocation7 + $0x6cc] sm:$0xf0] }
 0x22b   : > { %v1008_v6 = vadd.f32 %v1007_v11, %v10541_v58  ;;  %v1097_v15 = vadd.f32 %v1096_v26, %v10544_v5  ;;  %v9406_v16 = vld [vmem:[#allocation7 + $0x4cc] sm:$0xf0] }
 0x22c   : > { %vm1440_vm10 = vcmp.gt.f32.partialorder %v1183_v59, 0.0  ;;  %v1698_v50 = vmul.f32 %v10007_v17, %v1183_v59  ;;  %vm1441_vm11 = vcmp.gt.f32.partialorder %v1272_v25, 0.0  ;;  %v1699_v35 = vmul.f32 %v10007_v17, %v1272_v25  ;;  %3766 = vmatmul.bf16.vlgmr.msra.gmra.mxu0 %v10024_v39 }
 0x22d   : > { %3855 = vmatmul.bf16.vlgmr.msra.gmra.mxu1 %v10026_v42  ;;  %v1704_v11 = vmul.f32 %v10007_v17, %v1008_v6  ;;  %vm1446_vm12 = vcmp.gt.f32.partialorder %v1008_v6, 0.0  ;;  %v1705_v26 = vmul.f32 %v10007_v17, %v1097_v15  ;;  %vm1447_vm13 = vcmp.gt.f32.partialorder %v1097_v15, 0.0 }
 0x22e   : > { %v1954_v45 = vsel %vm1440_vm10, %v1183_v59, %v1698_v50  ;;  %3944 = vmatmul.bf16.vlgmr.msra.gmra.mxu2 %v10042_v62  ;;  %v1955_v13 = vsel %vm1441_vm11, %v1272_v25, %v1699_v35  ;;  %4033 = vmatmul.bf16.vlgmr.msra.gmra.mxu3 %v10047_v1  ;;  %v8944_v59 = vor.u32 %v9470_v29, %v8943_v38  ;;  %v9071_v50 = vld [vmem:[#allocation7 + $0x7c0] sm:$0xf]  ;;  %v9502_v62 = vld [vmem:[#allocation7 + $0x7cc] sm:$0xf0] }
 0x22f   : > { %v10810_v2 = vpack.c.bf16 %v1954_v45, %v1946_v20  ;;  %v10814_v8 = vpack.c.bf16 %v1955_v13, %v1947_v46  ;;  %v8688_v20 = vor.u32 %v9406_v16, %v8687_v44  ;;  %v9072_v25 = vor.u32 %v9502_v62, %v9071_v50  ;;  %v8815_v16 = vld [vmem:[#allocation7 + $0x5c0] sm:$0xf]  ;;  %v9438_v50 = vld [vmem:[#allocation7 + $0x5cc] sm:$0xf0] }
 0x230   : > { %4293 = vmatpush.bf16.msrb.mxu2 %v8944_v59  ;;  %v1960_v29 = vsel %vm1446_vm12, %v1008_v6, %v1704_v11 }
 0x231   : > { %13281 = vst [vmem:[#allocation106_spill] sm:$0xff] %v10810_v2  ;;  %v1185_v40 = vpop.f32.mrf.mxu2  ;;  %v1274_v32 = vpop.f32.mrf.mxu3  ;;  %4115 = vmatpush.bf16.msrb.mxu0 %v8688_v20  ;;  %4382 = vmatpush.bf16.msrb.mxu3 %v9072_v25  ;;  %v8816_v25 = vor.u32 %v9438_v50, %v8815_v16 }
 0x232   : > { %13282 = vst [vmem:[#allocation107_spill] sm:$0xff] %v10814_v8  ;;  %v1009_v47 = vpop.f32.mrf.mxu0  ;;  %v1098_v45 = vpop.f32.mrf.mxu1  ;;  %v1186_v38 = vadd.f32 %v1185_v40, %v10561_v14  ;;  %v1275_v44 = vadd.f32 %v1274_v32, %v10564_v41 }
 0x233   : > { %v1010_v35 = vadd.f32 %v1009_v47, %v10541_v58  ;;  %v1099_v46 = vadd.f32 %v1098_v45, %v10544_v5  ;;  %v1961_v47 = vsel %vm1447_vm13, %v1097_v15, %v1705_v26  ;;  %4204 = vmatpush.bf16.msrb.mxu1 %v8816_v25 }
 0x234   : > { %v1706_v39 = vmul.f32 %v10007_v17, %v1186_v38  ;;  %vm1448_vm1 = vcmp.gt.f32.partialorder %v1186_v38, 0.0  ;;  %v1707_v6 = vmul.f32 %v10007_v17, %v1275_v44  ;;  %vm1449_vm2 = vcmp.gt.f32.partialorder %v1275_v44, 0.0 }
 0x235   : > { %vm1454_vm14 = vcmp.gt.f32.partialorder %v1010_v35, 0.0  ;;  %v1712_v13 = vmul.f32 %v10007_v17, %v1010_v35  ;;  %vm1455_vm15 = vcmp.gt.f32.partialorder %v1099_v46, 0.0  ;;  %v1713_v62 = vmul.f32 %v10007_v17, %v1099_v46 }
 0x236   : > { %v1962_v26 = vsel %vm1448_vm1, %v1186_v38, %v1706_v39 }
 0x237   : > { %v1968_v59 = vsel %vm1454_vm14, %v1010_v35, %v1712_v13  ;;  %v1969_v20 = vsel %vm1455_vm15, %v1099_v46, %v1713_v62  ;;  %v1963_v46 = vsel %vm1449_vm2, %v1275_v44, %v1707_v6 }
 0x238   : > { %v10825_v1 = vpack.c.bf16 %v1968_v59, %v1960_v29  ;;  %v10827_v45 = vpack.c.bf16 %v1969_v20, %v1961_v47 }
 0x239   : > { %v1187_v42 = vpop.f32.mrf.mxu2  ;;  %v1276_v8 = vpop.f32.mrf.mxu3 }
 0x23a   : > { %13283 = vst [vmem:[#allocation108_spill] sm:$0xff] %v10825_v1  ;;  %v1188_v40 = vadd.f32 %v1187_v42, %v10561_v14  ;;  %v1012_v2 = vpop.f32.mrf.mxu0  ;;  %v1277_v32 = vadd.f32 %v1276_v8, %v10564_v41  ;;  %v1101_v15 = vpop.f32.mrf.mxu1 }
 0x23b   : > { %13284 = vst [vmem:[#allocation109_spill] sm:$0xff] %v10827_v45  ;;  %v1013_v62 = vadd.f32 %v1012_v2, %v10541_v58  ;;  %v1102_v59 = vadd.f32 %v1101_v15, %v10544_v5 }
 0x23c   : > { %vm1456_vm3 = vcmp.gt.f32.partialorder %v1188_v40, 0.0  ;;  %v1714_v11 = vmul.f32 %v10007_v17, %v1188_v40  ;;  %vm1457_vm4 = vcmp.gt.f32.partialorder %v1277_v32, 0.0  ;;  %v1715_v35 = vmul.f32 %v10007_v17, %v1277_v32  ;;  %3771 = vmatmul.bf16.gmra.mxu0 %v10060_v28 }
 0x23d   : > { %3860 = vmatmul.bf16.gmra.mxu1 %v10062_v30  ;;  %v1720_v38 = vmul.f32 %v10007_v17, %v1013_v62  ;;  %vm1462_vm5 = vcmp.gt.f32.partialorder %v1013_v62, 0.0  ;;  %v1721_v44 = vmul.f32 %v10007_v17, %v1102_v59  ;;  %vm1463_vm6 = vcmp.gt.f32.partialorder %v1102_v59, 0.0 }
 0x23e   : > { %v1970_v42 = vsel %vm1456_vm3, %v1188_v40, %v1714_v11  ;;  %3949 = vmatmul.bf16.gmra.mxu2 %v10078_v52  ;;  %v1971_v8 = vsel %vm1457_vm4, %v1277_v32, %v1715_v35  ;;  %4038 = vmatmul.bf16.gmra.mxu3 %v10083_v57 }
 0x23f   : > { %v10838_v13 = vpack.c.bf16 %v1970_v42, %v1962_v26  ;;  %v10842_v29 = vpack.c.bf16 %v1971_v8, %v1963_v46  ;;  %v1976_v32 = vsel %vm1462_vm5, %v1013_v62, %v1720_v38  ;;  %v1977_v35 = vsel %vm1463_vm6, %v1102_v59, %v1721_v44 }
 0x241   : > { %13285 = vst [vmem:[#allocation110_spill] sm:$0xff] %v10838_v13  ;;  %v1190_v16 = vpop.f32.mrf.mxu2  ;;  %v1279_v50 = vpop.f32.mrf.mxu3 }
 0x242   : > { %13286 = vst [vmem:[#allocation111_spill] sm:$0xff] %v10842_v29  ;;  %v1014_v39 = vpop.f32.mrf.mxu0  ;;  %v1103_v20 = vpop.f32.mrf.mxu1  ;;  %v1191_v40 = vadd.f32 %v1190_v16, %v10561_v14  ;;  %v1280_v15 = vadd.f32 %v1279_v50, %v10564_v41 }
 0x243   : > { %v1015_v47 = vadd.f32 %v1014_v39, %v10541_v58  ;;  %v1104_v25 = vadd.f32 %v1103_v20, %v10544_v5 }
 0x244   : > { %v1722_v39 = vmul.f32 %v10007_v17, %v1191_v40  ;;  %vm1464_vm8 = vcmp.gt.f32.partialorder %v1191_v40, 0.0  ;;  %v1723_v52 = vmul.f32 %v10007_v17, %v1280_v15  ;;  %vm1465_vm9 = vcmp.gt.f32.partialorder %v1280_v15, 0.0 }
 0x245   : > { %vm1470_vm7 = vcmp.gt.f32.partialorder %v1015_v47, 0.0  ;;  %v1728_v2 = vmul.f32 %v10007_v17, %v1015_v47  ;;  %vm1471_vm0 = vcmp.gt.f32.partialorder %v1104_v25, 0.0  ;;  %v1729_v6 = vmul.f32 %v10007_v17, %v1104_v25 }
 0x247   : > { %v1984_v11 = vsel %vm1470_vm7, %v1015_v47, %v1728_v2  ;;  %v1985_v42 = vsel %vm1471_vm0, %v1104_v25, %v1729_v6  ;;  %v1978_v47 = vsel %vm1464_vm8, %v1191_v40, %v1722_v39  ;;  %v1979_v25 = vsel %vm1465_vm9, %v1280_v15, %v1723_v52  ;;  %v8671_v40 = vld [vmem:[#allocation7 + $0x4a0] sm:$0xf] }
 0x248   : > { %v10853_v26 = vpack.c.bf16 %v1984_v11, %v1976_v32  ;;  %v10855_v46 = vpack.c.bf16 %v1985_v42, %v1977_v35  ;;  %v8927_v35 = vld [vmem:[#allocation7 + $0x6a0] sm:$0xf]  ;;  %v9466_v42 = vld [vmem:[#allocation7 + $0x6ac] sm:$0xf0] }
 0x249   : > { %v1192_v8 = vpop.f32.mrf.mxu2  ;;  %v1281_v57 = vpop.f32.mrf.mxu3  ;;  %v8928_v39 = vor.u32 %v9466_v42, %v8927_v35 }
 0x24a   : > { %v1193_v20 = vadd.f32 %v1192_v8, %v10561_v14  ;;  %v1017_v16 = vpop.f32.mrf.mxu0  ;;  %v1282_v62 = vadd.f32 %v1281_v57, %v10564_v41  ;;  %v1106_v50 = vpop.f32.mrf.mxu1 }
 0x24b   : > { %v1018_v6 = vadd.f32 %v1017_v16, %v10541_v58  ;;  %v1107_v11 = vadd.f32 %v1106_v50, %v10544_v5  ;;  %4294 = vmatpush.bf16.msrb.mxu2 %v8928_v39 }
 0x24c   : > { %vm1472_vm10 = vcmp.gt.f32.partialorder %v1193_v20, 0.0  ;;  %v1730_v59 = vmul.f32 %v10007_v17, %v1193_v20  ;;  %vm1473_vm11 = vcmp.gt.f32.partialorder %v1282_v62, 0.0  ;;  %v1731_v38 = vmul.f32 %v10007_v17, %v1282_v62  ;;  %3776 = vmatmul.bf16.gmra.mxu0 %v10096_v19 }
 0x24d   : > { %3865 = vmatmul.bf16.gmra.mxu1 %v10098_v22  ;;  %v1736_v16 = vmul.f32 %v10007_v17, %v1018_v6  ;;  %vm1478_vm12 = vcmp.gt.f32.partialorder %v1018_v6, 0.0  ;;  %v1737_v50 = vmul.f32 %v10007_v17, %v1107_v11  ;;  %vm1479_vm13 = vcmp.gt.f32.partialorder %v1107_v11, 0.0 }
 0x24e   : > { %v1986_v44 = vsel %vm1472_vm10, %v1193_v20, %v1730_v59  ;;  %3954 = vmatmul.bf16.gmra.mxu2 %v10114_v48  ;;  %v1987_v57 = vsel %vm1473_vm11, %v1282_v62, %v1731_v38  ;;  %4043 = vmatmul.bf16.gmra.mxu3 %v10119_v54  ;;  %v9402_v20 = vld [vmem:[#allocation7 + $0x4ac] sm:$0xf0]  ;;  %v9055_v59 = vld [vmem:[#allocation7 + $0x7a0] sm:$0xf] }
 0x24f   : > { %v10866_v2 = vpack.c.bf16 %v1986_v44, %v1978_v47  ;;  %v10870_v32 = vpack.c.bf16 %v1987_v57, %v1979_v25  ;;  %v9498_v48 = vld [vmem:[#allocation7 + $0x7ac] sm:$0xf0]  ;;  %v8672_v47 = vor.u32 %v9402_v20, %v8671_v40  ;;  %v1992_v42 = vsel %vm1478_vm12, %v1018_v6, %v1736_v16  ;;  %v8799_v20 = vld [vmem:[#allocation7 + $0x5a0] sm:$0xf] }
 0x250   : > { %v9056_v62 = vor.u32 %v9498_v48, %v9055_v59  ;;  %v9434_v59 = vld [vmem:[#allocation7 + $0x5ac] sm:$0xf0] }
 0x251   : > { %v1195_v8 = vpop.f32.mrf.mxu2  ;;  %v1284_v52 = vpop.f32.mrf.mxu3  ;;  %4116 = vmatpush.bf16.msrb.mxu0 %v8672_v47 }
 0x252   : > { %v1019_v15 = vpop.f32.mrf.mxu0  ;;  %v1108_v44 = vpop.f32.mrf.mxu1  ;;  %4383 = vmatpush.bf16.msrb.mxu3 %v9056_v62  ;;  %v1196_v35 = vadd.f32 %v1195_v8, %v10561_v14  ;;  %v1285_v40 = vadd.f32 %v1284_v52, %v10564_v41  ;;  %v8800_v62 = vor.u32 %v9434_v59, %v8799_v20 }
 0x253   : > { %v1020_v38 = vadd.f32 %v1019_v15, %v10541_v58  ;;  %v1109_v25 = vadd.f32 %v1108_v44, %v10544_v5  ;;  %v1993_v15 = vsel %vm1479_vm13, %v1107_v11, %v1737_v50 }
 0x254   : > { %v1738_v19 = vmul.f32 %v10007_v17, %v1196_v35  ;;  %4205 = vmatpush.bf16.msrb.mxu1 %v8800_v62  ;;  %vm1480_vm1 = vcmp.gt.f32.partialorder %v1196_v35, 0.0  ;;  %v1739_v6 = vmul.f32 %v10007_v17, %v1285_v40  ;;  %vm1481_vm2 = vcmp.gt.f32.partialorder %v1285_v40, 0.0 }
 0x255   : > { %vm1486_vm14 = vcmp.gt.f32.partialorder %v1020_v38, 0.0  ;;  %v1744_v57 = vmul.f32 %v10007_v17, %v1020_v38  ;;  %vm1487_vm15 = vcmp.gt.f32.partialorder %v1109_v25, 0.0  ;;  %v1745_v48 = vmul.f32 %v10007_v17, %v1109_v25 }
 0x256   : > { %v1994_v50 = vsel %vm1480_vm1, %v1196_v35, %v1738_v19 }
 0x257   : > { %v2000_v39 = vsel %vm1486_vm14, %v1020_v38, %v1744_v57  ;;  %v2001_v47 = vsel %vm1487_vm15, %v1109_v25, %v1745_v48  ;;  %v1995_v25 = vsel %vm1481_vm2, %v1285_v40, %v1739_v6 }
 0x258   : > { %v10881_v54 = vpack.c.bf16 %v2000_v39, %v1992_v42  ;;  %v10883_v44 = vpack.c.bf16 %v2001_v47, %v1993_v15 }
 0x259   : > { %v1197_v22 = vpop.f32.mrf.mxu2  ;;  %v1286_v30 = vpop.f32.mrf.mxu3 }
 0x25a   : > { %v1198_v8 = vadd.f32 %v1197_v22, %v10561_v14  ;;  %v1022_v28 = vpop.f32.mrf.mxu0  ;;  %v1287_v52 = vadd.f32 %v1286_v30, %v10564_v41  ;;  %v1111_v11 = vpop.f32.mrf.mxu1 }
 0x25b   : > { %v1023_v48 = vadd.f32 %v1022_v28, %v10541_v58  ;;  %v1112_v39 = vadd.f32 %v1111_v11, %v10544_v5 }
 0x25c   : > { %vm1488_vm3 = vcmp.gt.f32.partialorder %v1198_v8, 0.0  ;;  %v1746_v16 = vmul.f32 %v10007_v17, %v1198_v8  ;;  %vm1489_vm4 = vcmp.gt.f32.partialorder %v1287_v52, 0.0  ;;  %v1747_v38 = vmul.f32 %v10007_v17, %v1287_v52  ;;  %3781 = vmatmul.bf16.gmra.mxu0 %v10132_v18 }
 0x25d   : > { %3870 = vmatmul.bf16.gmra.mxu1 %v10134_v23  ;;  %v1752_v35 = vmul.f32 %v10007_v17, %v1023_v48  ;;  %vm1494_vm5 = vcmp.gt.f32.partialorder %v1023_v48, 0.0  ;;  %v1753_v40 = vmul.f32 %v10007_v17, %v1112_v39  ;;  %vm1495_vm6 = vcmp.gt.f32.partialorder %v1112_v39, 0.0 }
 0x25e   : > { %v2002_v22 = vsel %vm1488_vm3, %v1198_v8, %v1746_v16  ;;  %3959 = vmatmul.bf16.gmra.mxu2 %v10150_v55  ;;  %v2003_v30 = vsel %vm1489_vm4, %v1287_v52, %v1747_v38  ;;  %4048 = vmatmul.bf16.gmra.mxu3 %v10155_v60 }
 0x25f   : > { %v10894_v57 = vpack.c.bf16 %v2002_v22, %v1994_v50  ;;  %v10898_v42 = vpack.c.bf16 %v2003_v30, %v1995_v25  ;;  %v2008_v52 = vsel %vm1494_vm5, %v1023_v48, %v1752_v35  ;;  %v2009_v38 = vsel %vm1495_vm6, %v1112_v39, %v1753_v40 }
 0x261   : > { %v1200_v20 = vpop.f32.mrf.mxu2  ;;  %v1289_v59 = vpop.f32.mrf.mxu3 }
 0x262   : > { %v1024_v19 = vpop.f32.mrf.mxu0  ;;  %v1113_v47 = vpop.f32.mrf.mxu1  ;;  %v1201_v8 = vadd.f32 %v1200_v20, %v10561_v14  ;;  %v1290_v11 = vadd.f32 %v1289_v59, %v10564_v41 }
 0x263   : > { %v1025_v15 = vadd.f32 %v1024_v19, %v10541_v58  ;;  %v1114_v62 = vadd.f32 %v1113_v47, %v10544_v5 }
 0x264   : > { %v1754_v19 = vmul.f32 %v10007_v17, %v1201_v8  ;;  %vm1496_vm8 = vcmp.gt.f32.partialorder %v1201_v8, 0.0  ;;  %v1755_v55 = vmul.f32 %v10007_v17, %v1290_v11  ;;  %vm1497_vm9 = vcmp.gt.f32.partialorder %v1290_v11, 0.0 }
 0x265   : > { %vm1502_vm7 = vcmp.gt.f32.partialorder %v1025_v15, 0.0  ;;  %v1760_v28 = vmul.f32 %v10007_v17, %v1025_v15  ;;  %vm1503_vm0 = vcmp.gt.f32.partialorder %v1114_v62, 0.0  ;;  %v1761_v6 = vmul.f32 %v10007_v17, %v1114_v62 }
 0x267   : > { %v2016_v16 = vsel %vm1502_vm7, %v1025_v15, %v1760_v28  ;;  %v2017_v22 = vsel %vm1503_vm0, %v1114_v62, %v1761_v6  ;;  %v2010_v15 = vsel %vm1496_vm8, %v1201_v8, %v1754_v19  ;;  %v13287_v62 = vld [vmem:[#allocation31_spill] sm:$0xff]  ;;  %v2011_v28 = vsel %vm1497_vm9, %v1290_v11, %v1755_v55  ;;  %v8655_v8 = vld [vmem:[#allocation7 + $0x480] sm:$0xf] }
 0x268   : > { %v10909_v50 = vpack.c.bf16 %v2016_v16, %v2008_v52  ;;  %v10911_v25 = vpack.c.bf16 %v2017_v22, %v2009_v38  ;;  %v13289_v16 = vld [vmem:[#allocation32_spill] sm:$0xff] }
 0x269   : > { %v1202_v30 = vpop.f32.mrf.mxu2  ;;  %v1291_v60 = vpop.f32.mrf.mxu3 }
 0x26a   : > { %v1203_v47 = vadd.f32 %v1202_v30, %v10561_v14  ;;  %v1027_v20 = vpop.f32.mrf.mxu0  ;;  %v1292_v48 = vadd.f32 %v1291_v60, %v10564_v41  ;;  %v1116_v59 = vpop.f32.mrf.mxu1  ;;  %v8911_v30 = vld [vmem:[#allocation7 + $0x680] sm:$0xf] }
 0x26b   : > { %v1028_v52 = vadd.f32 %v1027_v20, %v10541_v58  ;;  %v1117_v22 = vadd.f32 %v1116_v59, %v10544_v5 }
 0x26c   : > { %vm1504_vm10 = vcmp.gt.f32.partialorder %v1203_v47, 0.0  ;;  %v1762_v39 = vmul.f32 %v10007_v17, %v1203_v47  ;;  %vm1505_vm11 = vcmp.gt.f32.partialorder %v1292_v48, 0.0  ;;  %v1763_v35 = vmul.f32 %v10007_v17, %v1292_v48  ;;  %3786 = vmatmul.bf16.gmra.mxu0 %v10168_v34  ;;  %v9462_v34 = vld [vmem:[#allocation7 + $0x68c] sm:$0xf0] }
 0x26d   : > { %3875 = vmatmul.bf16.gmra.mxu1 %v10170_v36  ;;  %v9039_v36 = vld [vmem:[#allocation7 + $0x780] sm:$0xf]  ;;  %v1768_v20 = vmul.f32 %v10007_v17, %v1028_v52  ;;  %vm1510_vm12 = vcmp.gt.f32.partialorder %v1028_v52, 0.0  ;;  %v1769_v59 = vmul.f32 %v10007_v17, %v1117_v22  ;;  %vm1511_vm13 = vcmp.gt.f32.partialorder %v1117_v22, 0.0 }
 0x26e   : > { %v2018_v40 = vsel %vm1504_vm10, %v1203_v47, %v1762_v39  ;;  %3964 = vmatmul.bf16.gmra.mxu2 %v13287_v62  ;;  %v2019_v60 = vsel %vm1505_vm11, %v1292_v48, %v1763_v35  ;;  %4053 = vmatmul.bf16.gmra.mxu3 %v13289_v16  ;;  %v8912_v47 = vor.u32 %v9462_v34, %v8911_v30  ;;  %v9398_v39 = vld [vmem:[#allocation7 + $0x48c] sm:$0xf0] }
 0x26f   : > { %v10922_v6 = vpack.c.bf16 %v2018_v40, %v2010_v15  ;;  %v10926_v38 = vpack.c.bf16 %v2019_v60, %v2011_v28  ;;  %v9494_v62 = vld [vmem:[#allocation7 + $0x78c] sm:$0xf0]  ;;  %v8656_v15 = vor.u32 %v9398_v39, %v8655_v8 }
 0x270   : > { %v9040_v48 = vor.u32 %v9494_v62, %v9039_v36  ;;  %4295 = vmatpush.bf16.msrb.mxu2 %v8912_v47  ;;  %v2024_v62 = vsel %vm1510_vm12, %v1028_v52, %v1768_v20  ;;  %v8783_v47 = vld [vmem:[#allocation7 + $0x580] sm:$0xf]  ;;  %v9430_v39 = vld [vmem:[#allocation7 + $0x58c] sm:$0xf0] }
 0x271   : > { %13288 = vst [vmem:[#allocation112_spill] sm:$0xff] %v10922_v6  ;;  %v1205_v19 = vpop.f32.mrf.mxu2  ;;  %v1294_v55 = vpop.f32.mrf.mxu3  ;;  %4117 = vmatpush.bf16.msrb.mxu0 %v8656_v15 }
 0x272   : > { %13290 = vst [vmem:[#allocation113_spill] sm:$0xff] %v10926_v38  ;;  %v1029_v11 = vpop.f32.mrf.mxu0  ;;  %v1118_v40 = vpop.f32.mrf.mxu1  ;;  %4384 = vmatpush.bf16.msrb.mxu3 %v9040_v48  ;;  %v1206_v60 = vadd.f32 %v1205_v19, %v10561_v14  ;;  %v1295_v30 = vadd.f32 %v1294_v55, %v10564_v41  ;;  %v8784_v48 = vor.u32 %v9430_v39, %v8783_v47  ;;  %v13296_v39 = vld [vmem:[#allocation36_spill] sm:$0xff] }
 0x273   : > { %v1030_v35 = vadd.f32 %v1029_v11, %v10541_v58  ;;  %v1119_v28 = vadd.f32 %v1118_v40, %v10544_v5  ;;  %v2025_v11 = vsel %vm1511_vm13, %v1117_v22, %v1769_v59  ;;  %v13292_v59 = vld [vmem:[#allocation33_spill] sm:$0xff] }
 0x274   : > { %v1770_v18 = vmul.f32 %v10007_v17, %v1206_v60  ;;  %4206 = vmatpush.bf16.msrb.mxu1 %v8784_v48  ;;  %vm1512_vm1 = vcmp.gt.f32.partialorder %v1206_v60, 0.0  ;;  %v1771_v52 = vmul.f32 %v10007_v17, %v1295_v30  ;;  %vm1513_vm2 = vcmp.gt.f32.partialorder %v1295_v30, 0.0 }
 0x275   : > { %vm1518_vm14 = vcmp.gt.f32.partialorder %v1030_v35, 0.0  ;;  %v1776_v34 = vmul.f32 %v10007_v17, %v1030_v35  ;;  %vm1519_vm15 = vcmp.gt.f32.partialorder %v1119_v28, 0.0  ;;  %v1777_v36 = vmul.f32 %v10007_v17, %v1119_v28 }
 0x277   : > { %v2032_v8 = vsel %vm1518_vm14, %v1030_v35, %v1776_v34  ;;  %v2033_v15 = vsel %vm1519_vm15, %v1119_v28, %v1777_v36  ;;  %v2026_v28 = vsel %vm1512_vm1, %v1206_v60, %v1770_v18  ;;  %v13293_v34 = vld [vmem:[#allocation34_spill] sm:$0xff]  ;;  %v13294_v36 = vld [vmem:[#allocation35_spill] sm:$0xff] }
 0x278   : > { %v10937_v16 = vpack.c.bf16 %v2032_v8, %v2024_v62  ;;  %v10939_v40 = vpack.c.bf16 %v2033_v15, %v2025_v11  ;;  %v2027_v62 = vsel %vm1513_vm2, %v1295_v30, %v1771_v52 }
 0x279   : > { %v1207_v23 = vpop.f32.mrf.mxu2  ;;  %v1296_v38 = vpop.f32.mrf.mxu3 }
 0x27a   : > { %13291 = vst [vmem:[#allocation114_spill] sm:$0xff] %v10939_v40  ;;  %v1208_v19 = vadd.f32 %v1207_v23, %v10561_v14  ;;  %v1032_v6 = vpop.f32.mrf.mxu0  ;;  %v1297_v55 = vadd.f32 %v1296_v38, %v10564_v41  ;;  %v1121_v22 = vpop.f32.mrf.mxu1 }
 0x27b   : > { %v1033_v47 = vadd.f32 %v1032_v6, %v10541_v58  ;;  %v1122_v15 = vadd.f32 %v1121_v22, %v10544_v5 }
 0x27c   : > { %vm1520_vm3 = vcmp.gt.f32.partialorder %v1208_v19, 0.0  ;;  %v1778_v20 = vmul.f32 %v10007_v17, %v1208_v19  ;;  %vm1521_vm4 = vcmp.gt.f32.partialorder %v1297_v55, 0.0  ;;  %v1779_v35 = vmul.f32 %v10007_v17, %v1297_v55  ;;  %3791 = vmatmul.bf16.gmra.mxu0 %v13292_v59 }
 0x27d   : > { %3880 = vmatmul.bf16.gmra.mxu1 %v13293_v34  ;;  %v1784_v60 = vmul.f32 %v10007_v17, %v1033_v47  ;;  %vm1526_vm5 = vcmp.gt.f32.partialorder %v1033_v47, 0.0  ;;  %v1785_v30 = vmul.f32 %v10007_v17, %v1122_v15  ;;  %vm1527_vm6 = vcmp.gt.f32.partialorder %v1122_v15, 0.0 }
 0x27e   : > { %v2034_v23 = vsel %vm1520_vm3, %v1208_v19, %v1778_v20  ;;  %3969 = vmatmul.bf16.gmra.mxu2 %v13294_v36  ;;  %v2035_v38 = vsel %vm1521_vm4, %v1297_v55, %v1779_v35  ;;  %4058 = vmatmul.bf16.gmra.mxu3 %v13296_v39 }
 0x27f   : > { %v10950_v8 = vpack.c.bf16 %v2034_v23, %v2026_v28  ;;  %v10954_v11 = vpack.c.bf16 %v2035_v38, %v2027_v62  ;;  %v2040_v35 = vsel %vm1526_vm5, %v1033_v47, %v1784_v60  ;;  %v2041_v62 = vsel %vm1527_vm6, %v1122_v15, %v1785_v30 }
 0x281   : > { %13295 = vst [vmem:[#allocation115_spill] sm:$0xff] %v10950_v8  ;;  %v1210_v48 = vpop.f32.mrf.mxu2  ;;  %v1299_v59 = vpop.f32.mrf.mxu3 }
 0x282   : > { %13297 = vst [vmem:[#allocation116_spill] sm:$0xff] %v10954_v11  ;;  %v1034_v18 = vpop.f32.mrf.mxu0  ;;  %v1123_v20 = vpop.f32.mrf.mxu1  ;;  %v1211_v55 = vadd.f32 %v1210_v48, %v10561_v14  ;;  %v1300_v28 = vadd.f32 %v1299_v59, %v10564_v41 }
 0x283   : > { %v1035_v19 = vadd.f32 %v1034_v18, %v10541_v58  ;;  %v1124_v52 = vadd.f32 %v1123_v20, %v10544_v5 }
 0x284   : > { %v1786_v36 = vmul.f32 %v10007_v17, %v1211_v55  ;;  %vm1528_vm8 = vcmp.gt.f32.partialorder %v1211_v55, 0.0  ;;  %v1787_v8 = vmul.f32 %v10007_v17, %v1300_v28  ;;  %vm1529_vm9 = vcmp.gt.f32.partialorder %v1300_v28, 0.0 }
 0x285   : > { %vm1534_vm7 = vcmp.gt.f32.partialorder %v1035_v19, 0.0  ;;  %v1792_v6 = vmul.f32 %v10007_v17, %v1035_v19  ;;  %vm1535_vm0 = vcmp.gt.f32.partialorder %v1124_v52, 0.0  ;;  %v1793_v22 = vmul.f32 %v10007_v17, %v1124_v52 }
 0x287   : > { %v2048_v23 = vsel %vm1534_vm7, %v1035_v19, %v1792_v6  ;;  %v2049_v18 = vsel %vm1535_vm0, %v1124_v52, %v1793_v22  ;;  %v2042_v19 = vsel %vm1528_vm8, %v1211_v55, %v1786_v36  ;;  %v13300_v52 = vld [vmem:[#allocation38_spill] sm:$0xff]  ;;  %v13301_v6 = vld [vmem:[#allocation39_spill] sm:$0xff]  ;;  %v2043_v22 = vsel %vm1529_vm9, %v1300_v28, %v1787_v8  ;;  %v8639_v36 = vld [vmem:[#allocation7 + $0x460] sm:$0xf] }
 0x288   : > { %v10965_v38 = vpack.c.bf16 %v2048_v23, %v2040_v35  ;;  %v10967_v39 = vpack.c.bf16 %v2049_v18, %v2041_v62  ;;  %v13303_v62 = vld [vmem:[#allocation40_spill] sm:$0xff] }
 0x289   : > { %v1212_v20 = vpop.f32.mrf.mxu2  ;;  %v1301_v11 = vpop.f32.mrf.mxu3 }
 0x28a   : > { %13298 = vst [vmem:[#allocation117_spill] sm:$0xff] %v10965_v38  ;;  %v1213_v34 = vadd.f32 %v1212_v20, %v10561_v14  ;;  %v1037_v48 = vpop.f32.mrf.mxu0  ;;  %v1302_v47 = vadd.f32 %v1301_v11, %v10564_v41  ;;  %v1126_v59 = vpop.f32.mrf.mxu1 }
 0x28b   : > { %13299 = vst [vmem:[#allocation118_spill] sm:$0xff] %v10967_v39  ;;  %v1038_v23 = vadd.f32 %v1037_v48, %v10541_v58  ;;  %v1127_v20 = vadd.f32 %v1126_v59, %v10544_v5  ;;  %v8895_v39 = vld [vmem:[#allocation7 + $0x660] sm:$0xf] }
 0x28c   : > { %vm1536_vm10 = vcmp.gt.f32.partialorder %v1213_v34, 0.0  ;;  %v1794_v15 = vmul.f32 %v10007_v17, %v1213_v34  ;;  %vm1537_vm11 = vcmp.gt.f32.partialorder %v1302_v47, 0.0  ;;  %v1795_v60 = vmul.f32 %v10007_v17, %v1302_v47  ;;  %3796 = vmatmul.bf16.gmra.mxu0 %v10240_v12  ;;  %v9458_v12 = vld [vmem:[#allocation7 + $0x66c] sm:$0xf0] }
 0x28d   : > { %3885 = vmatmul.bf16.gmra.mxu1 %v13300_v52  ;;  %v8896_v55 = vor.u32 %v9458_v12, %v8895_v39  ;;  %v9023_v52 = vld [vmem:[#allocation7 + $0x760] sm:$0xf]  ;;  %v1800_v48 = vmul.f32 %v10007_v17, %v1038_v23  ;;  %vm1542_vm12 = vcmp.gt.f32.partialorder %v1038_v23, 0.0  ;;  %v1801_v59 = vmul.f32 %v10007_v17, %v1127_v20  ;;  %v9426_v39 = vld [vmem:[#allocation7 + $0x56c] sm:$0xf0] }
 0x28e   : > { %v2050_v30 = vsel %vm1536_vm10, %v1213_v34, %v1794_v15  ;;  %3974 = vmatmul.bf16.gmra.mxu2 %v13301_v6  ;;  %v2051_v11 = vsel %vm1537_vm11, %v1302_v47, %v1795_v60  ;;  %4063 = vmatmul.bf16.gmra.mxu3 %v13303_v62  ;;  %v9394_v15 = vld [vmem:[#allocation7 + $0x46c] sm:$0xf0]  ;;  %v8767_v12 = vld [vmem:[#allocation7 + $0x560] sm:$0xf]  ;;  %vm1543_vm13 = vcmp.gt.f32.partialorder %v1127_v20, 0.0 }
 0x28f   : > { %v10978_v35 = vpack.c.bf16 %v2050_v30, %v2042_v19  ;;  %v10982_v18 = vpack.c.bf16 %v2051_v11, %v2043_v22  ;;  %v9490_v6 = vld [vmem:[#allocation7 + $0x76c] sm:$0xf0]  ;;  %v8640_v19 = vor.u32 %v9394_v15, %v8639_v36  ;;  %4296 = vmatpush.bf16.msrb.mxu2 %v8896_v55  ;;  %v8768_v36 = vor.u32 %v9426_v39, %v8767_v12 }
 0x290   : > { %v9024_v47 = vor.u32 %v9490_v6, %v9023_v52  ;;  %v2056_v55 = vsel %vm1542_vm12, %v1038_v23, %v1800_v48  ;;  %v2057_v62 = vsel %vm1543_vm13, %v1127_v20, %v1801_v59  ;;  %v13307_v12 = vld [vmem:[#allocation43_spill] sm:$0xff] }
 0x291   : > { %13302 = vst [vmem:[#allocation119_spill] sm:$0xff] %v10978_v35  ;;  %v1215_v34 = vpop.f32.mrf.mxu2  ;;  %v1304_v8 = vpop.f32.mrf.mxu3  ;;  %4118 = vmatpush.bf16.msrb.mxu0 %v8640_v19  ;;  %4207 = vmatpush.bf16.msrb.mxu1 %v8768_v36  ;;  %v13309_v36 = vld [vmem:[#allocation44_spill] sm:$0xff] }
 0x292   : > { %13304 = vst [vmem:[#allocation120_spill] sm:$0xff] %v10982_v18  ;;  %v1039_v28 = vpop.f32.mrf.mxu0  ;;  %v1128_v30 = vpop.f32.mrf.mxu1  ;;  %4385 = vmatpush.bf16.msrb.mxu3 %v9024_v47  ;;  %v1216_v52 = vadd.f32 %v1215_v34, %v10561_v14  ;;  %v1305_v15 = vadd.f32 %v1304_v8, %v10564_v41 }
 0x293   : > { %v1040_v60 = vadd.f32 %v1039_v28, %v10541_v58  ;;  %v1129_v22 = vadd.f32 %v1128_v30, %v10544_v5 }
 0x294   : > { %v1802_v35 = vmul.f32 %v10007_v17, %v1216_v52  ;;  %vm1544_vm1 = vcmp.gt.f32.partialorder %v1216_v52, 0.0  ;;  %v1803_v23 = vmul.f32 %v10007_v17, %v1305_v15  ;;  %vm1545_vm2 = vcmp.gt.f32.partialorder %v1305_v15, 0.0 }
 0x295   : > { %vm1550_vm14 = vcmp.gt.f32.partialorder %v1040_v60, 0.0  ;;  %v1808_v11 = vmul.f32 %v10007_v17, %v1040_v60  ;;  %vm1551_vm15 = vcmp.gt.f32.partialorder %v1129_v22, 0.0  ;;  %v1809_v6 = vmul.f32 %v10007_v17, %v1129_v22 }
 0x296   : > { %v2058_v59 = vsel %vm1544_vm1, %v1216_v52, %v1802_v35  ;;  %v2059_v39 = vsel %vm1545_vm2, %v1305_v15, %v1803_v23 }
 0x297   : > { %v2064_v28 = vsel %vm1550_vm14, %v1040_v60, %v1808_v11  ;;  %v2065_v19 = vsel %vm1551_vm15, %v1129_v22, %v1809_v6  ;;  %v13305_v60 = vld [vmem:[#allocation41_spill] sm:$0xff] }
 0x298   : > { %v10993_v30 = vpack.c.bf16 %v2064_v28, %v2056_v55  ;;  %v10995_v47 = vpack.c.bf16 %v2065_v19, %v2057_v62 }
 0x299   : > { %v1217_v18 = vpop.f32.mrf.mxu2  ;;  %v1306_v38 = vpop.f32.mrf.mxu3 }
 0x29a   : > { %v1218_v34 = vadd.f32 %v1217_v18, %v10561_v14  ;;  %v1042_v40 = vpop.f32.mrf.mxu0  ;;  %v1307_v8 = vadd.f32 %v1306_v38, %v10564_v41  ;;  %v1131_v48 = vpop.f32.mrf.mxu1  ;;  %v13306_v18 = vld [vmem:[#allocation42_spill] sm:$0xff] }
 0x29b   : > { %v1043_v6 = vadd.f32 %v1042_v40, %v10541_v58  ;;  %v1132_v28 = vadd.f32 %v1131_v48, %v10544_v5  ;;  %v2468_v40 = vld [vmem:[%s12927_s5] sm:$0xf] }
 0x29c   : > { %vm1552_vm3 = vcmp.gt.f32.partialorder %v1218_v34, 0.0  ;;  %v1810_v20 = vmul.f32 %v10007_v17, %v1218_v34  ;;  %vm1553_vm4 = vcmp.gt.f32.partialorder %v1307_v8, 0.0  ;;  %v1811_v62 = vmul.f32 %v10007_v17, %v1307_v8  ;;  %3801 = vmatmul.bf16.gmra.mxu0 %v13305_v60 }
 0x29d   : > { %3890 = vmatmul.bf16.gmra.mxu1 %v13306_v18  ;;  %v1816_v52 = vmul.f32 %v10007_v17, %v1043_v6  ;;  %vm1558_vm5 = vcmp.gt.f32.partialorder %v1043_v6, 0.0  ;;  %v1817_v15 = vmul.f32 %v10007_v17, %v1132_v28  ;;  %vm1559_vm6 = vcmp.gt.f32.partialorder %v1132_v28, 0.0 }
 0x29e   : > { %v2066_v22 = vsel %vm1552_vm3, %v1218_v34, %v1810_v20  ;;  %3979 = vmatmul.bf16.gmra.mxu2 %v13307_v12  ;;  %v2067_v38 = vsel %vm1553_vm4, %v1307_v8, %v1811_v62  ;;  %4068 = vmatmul.bf16.gmra.mxu3 %v13309_v36 }
 0x29f   : > { %v11006_v11 = vpack.c.bf16 %v2066_v22, %v2058_v59  ;;  %v11010_v55 = vpack.c.bf16 %v2067_v38, %v2059_v39  ;;  %v11024_v39 = vperm.slane %v2468_v40, 0  ;;  %v13313_v40 = vld [vmem:[#allocation47_spill] sm:$0xff] }
 0x2a1   : > { %13308 = vst [vmem:[#allocation121_spill] sm:$0xff] %v11006_v11  ;;  %v1220_v19 = vpop.f32.mrf.mxu2  ;;  %v1309_v60 = vpop.f32.mrf.mxu3 }
 0x2a2   : > { %13310 = vst [vmem:[#allocation122_spill] sm:$0xff] %v11010_v55  ;;  %v1044_v35 = vpop.f32.mrf.mxu0  ;;  %v1133_v20 = vpop.f32.mrf.mxu1  ;;  %v1221_v48 = vadd.f32 %v1220_v19, %v10561_v14  ;;  %v1310_v59 = vadd.f32 %v1309_v60, %v10564_v41 }
 0x2a3   : > { %v1045_v34 = vadd.f32 %v1044_v35, %v10541_v58  ;;  %v1134_v23 = vadd.f32 %v1133_v20, %v10544_v5  ;;  %v2072_v58 = vsel %vm1558_vm5, %v1043_v6, %v1816_v52  ;;  %v2073_v5 = vsel %vm1559_vm6, %v1132_v28, %v1817_v15 }
 0x2a4   : > { %v1818_v12 = vmul.f32 %v10007_v17, %v1221_v48  ;;  %vm1560_vm8 = vcmp.gt.f32.partialorder %v1221_v48, 0.0  ;;  %v1819_v6 = vmul.f32 %v10007_v17, %v1310_v59  ;;  %vm1561_vm9 = vcmp.gt.f32.partialorder %v1310_v59, 0.0 }
 0x2a5   : > { %vm1566_vm7 = vcmp.gt.f32.partialorder %v1045_v34, 0.0  ;;  %v1824_v8 = vmul.f32 %v10007_v17, %v1045_v34  ;;  %vm1567_vm0 = vcmp.gt.f32.partialorder %v1134_v23, 0.0  ;;  %v1825_v62 = vmul.f32 %v10007_v17, %v1134_v23 }
 0x2a7   : > { %v2080_v22 = vsel %vm1566_vm7, %v1045_v34, %v1824_v8  ;;  %v2081_v35 = vsel %vm1567_vm0, %v1134_v23, %v1825_v62  ;;  %v13315_v8 = vld [vmem:[#allocation48_spill] sm:$0xff]  ;;  %v8879_v62 = vld [vmem:[#allocation7 + $0x640] sm:$0xf] }
 0x2a8   : > { %v11026_v38 = vpack.c.bf16 %v2080_v22, %v2072_v58  ;;  %v11028_v20 = vpack.c.bf16 %v2081_v35, %v2073_v5  ;;  %v9454_v58 = vld [vmem:[#allocation7 + $0x64c] sm:$0xf0]  ;;  %v8623_v22 = vld [vmem:[#allocation7 + $0x440] sm:$0xf] }
 0x2a9   : > { %v1222_v36 = vpop.f32.mrf.mxu2  ;;  %v1311_v18 = vpop.f32.mrf.mxu3  ;;  %v9390_v35 = vld [vmem:[#allocation7 + $0x44c] sm:$0xf0] }
 0x2aa   : > { %13311 = vst [vmem:[#allocation123_spill] sm:$0xff] %v11026_v38  ;;  %v1223_v19 = vadd.f32 %v1222_v36, %v10561_v14  ;;  %v3767_v55 = vpop.f32.mrf.mxu0  ;;  %v1312_v60 = vadd.f32 %v1311_v18, %v10564_v41  ;;  %v3856_v28 = vpop.f32.mrf.mxu1  ;;  %v2074_v14 = vsel %vm1560_vm8, %v1221_v48, %v1818_v12  ;;  %v2075_v41 = vsel %vm1561_vm9, %v1310_v59, %v1819_v6  ;;  %v9486_v12 = vld [vmem:[#allocation7 + $0x74c] sm:$0xf0] }
 0x2ab   : > { %13312 = vst [vmem:[#allocation124_spill] sm:$0xff] %v11028_v20  ;;  %v3768_v52 = vadd.f32 %v3767_v55, %v11024_v39 }
 0x2ac   : > { %vm1568_vm10 = vcmp.gt.f32.partialorder %v1223_v19, 0.0  ;;  %v1826_v34 = vmul.f32 %v10007_v17, %v1223_v19  ;;  %vm1569_vm11 = vcmp.gt.f32.partialorder %v1312_v60, 0.0  ;;  %v1827_v15 = vmul.f32 %v10007_v17, %v1312_v60  ;;  %3806 = vmatmul.bf16.gmra.mxu0 %v10306_v37 }
 0x2ad   : > { %v3857_v23 = vadd.f32 %v3856_v28, %v3768_v52  ;;  %3895 = vmatmul.bf16.gmra.mxu1 %v10308_v33  ;;  %v8880_v17 = vor.u32 %v9454_v58, %v8879_v62  ;;  %v9007_v52 = vld [vmem:[#allocation7 + $0x740] sm:$0xf] }
 0x2ae   : > { %v2082_v36 = vsel %vm1568_vm10, %v1223_v19, %v1826_v34  ;;  %3984 = vmatmul.bf16.gmra.mxu2 %v13313_v40  ;;  %v2083_v55 = vsel %vm1569_vm11, %v1312_v60, %v1827_v15  ;;  %4073 = vmatmul.bf16.gmra.mxu3 %v13315_v8  ;;  %v8624_v19 = vor.u32 %v9390_v35, %v8623_v22 }
 0x2af   : > { %v11040_v18 = vpack.c.bf16 %v2082_v36, %v2074_v14  ;;  %v11043_v5 = vpack.c.bf16 %v2083_v55, %v2075_v41  ;;  %v9008_v28 = vor.u32 %v9486_v12, %v9007_v52  ;;  %4297 = vmatpush.bf16.msrb.mxu2 %v8880_v17  ;;  %v8751_v14 = vld [vmem:[#allocation7 + $0x540] sm:$0xf]  ;;  %v9422_v36 = vld [vmem:[#allocation7 + $0x54c] sm:$0xf0] }
 0x2b0   : > { %4119 = vmatpush.bf16.msrb.mxu0 %v8624_v19  ;;  %v8752_v55 = vor.u32 %v9422_v36, %v8751_v14  ;;  %v13318_v19 = vld [vmem:[#allocation50_spill] sm:$0xff] }
 0x2b1   : > { %13314 = vst [vmem:[#allocation125_spill] sm:$0xff] %v11040_v18  ;;  %v3945_v48 = vpop.f32.mrf.mxu2  ;;  %v4034_v40 = vpop.f32.mrf.mxu3  ;;  %4386 = vmatpush.bf16.msrb.mxu3 %v9008_v28  ;;  %v13320_v28 = vld [vmem:[#allocation52_spill] sm:$0xff] }
 0x2b2   : > { %13316 = vst [vmem:[#allocation126_spill] sm:$0xff] %v11043_v5  ;;  %v3946_v34 = vadd.f32 %v3945_v48, %v3857_v23  ;;  %v3769_v59 = vpop.f32.mrf.mxu0  ;;  %v3858_v60 = vpop.f32.mrf.mxu1  ;;  %4208 = vmatpush.bf16.msrb.mxu1 %v8752_v55  ;;  %v13317_v48 = vld [vmem:[#allocation49_spill] sm:$0xff] }
 0x2b3   : > { %v3770_v6 = vadd.f32 %v3769_v59, %v11024_v39 }
 0x2b4   : > { %v11046_v15 = vadd.f32 %v4034_v40, %v3946_v34  ;;  %v13319_v40 = vld [vmem:[#allocation51_spill] sm:$0xff] }
 0x2b5   : > { %v3859_v41 = vadd.f32 %v3858_v60, %v3770_v6 }
 0x2b9   : > { %v3947_v62 = vpop.f32.mrf.mxu2  ;;  %v4036_v22 = vpop.f32.mrf.mxu3 }
 0x2ba   : > { %v3948_v58 = vadd.f32 %v3947_v62, %v3859_v41  ;;  %v3772_v35 = vpop.f32.mrf.mxu0  ;;  %v3861_v52 = vpop.f32.mrf.mxu1 }
 0x2bb   : > { %v3773_v23 = vadd.f32 %v3772_v35, %v11024_v39 }
 0x2bc   : > { %v11049_v17 = vadd.f32 %v4036_v22, %v3948_v58  ;;  %3811 = vmatmul.bf16.gmra.mxu0 %v13317_v48  ;;  %v9418_v48 = vld [vmem:[#allocation7 + $0x52c] sm:$0xf0] }
 0x2bd   : > { %v3862_v12 = vadd.f32 %v3861_v52, %v3773_v23  ;;  %3900 = vmatmul.bf16.gmra.mxu1 %v13318_v19 }
 0x2be   : > { %3989 = vmatmul.bf16.gmra.mxu2 %v13319_v40  ;;  %4078 = vmatmul.bf16.gmra.mxu3 %v13320_v28 }
 0x2c1   : > { %v3950_v34 = vpop.f32.mrf.mxu2  ;;  %v4039_v6 = vpop.f32.mrf.mxu3 }
 0x2c2   : > { %v3951_v59 = vadd.f32 %v3950_v34, %v3862_v12  ;;  %v3774_v60 = vpop.f32.mrf.mxu0  ;;  %v3863_v36 = vpop.f32.mrf.mxu1  ;;  %v13321_v12 = vld [vmem:[#allocation55_spill] sm:$0xff]  ;;  %v13322_v34 = vld [vmem:[#allocation56_spill] sm:$0xff] }
 0x2c3   : > { %v3775_v14 = vadd.f32 %v3774_v60, %v11024_v39  ;;  %v8607_v60 = vld [vmem:[#allocation7 + $0x420] sm:$0xf] }
 0x2c4   : > { %v11056_v41 = vadd.f32 %v4039_v6, %v3951_v59  ;;  %v8863_v59 = vld [vmem:[#allocation7 + $0x620] sm:$0xf]  ;;  %v9450_v6 = vld [vmem:[#allocation7 + $0x62c] sm:$0xf0] }
 0x2c5   : > { %v3864_v55 = vadd.f32 %v3863_v36, %v3775_v14  ;;  %v8864_v14 = vor.u32 %v9450_v6, %v8863_v59  ;;  %v9386_v36 = vld [vmem:[#allocation7 + $0x42c] sm:$0xf0] }
 0x2c6   : > { %v8608_v19 = vor.u32 %v9386_v36, %v8607_v60 }
 0x2c7   : > { %4298 = vmatpush.bf16.msrb.mxu2 %v8864_v14 }
 0x2c8   : > { %4120 = vmatpush.bf16.msrb.mxu0 %v8608_v19  ;;  %v13324_v19 = vld [vmem:[#allocation58_spill] sm:$0xff] }
 0x2c9   : > { %v3952_v62 = vpop.f32.mrf.mxu2  ;;  %v4041_v22 = vpop.f32.mrf.mxu3 }
 0x2ca   : > { %v3953_v58 = vadd.f32 %v3952_v62, %v3864_v55  ;;  %v3777_v35 = vpop.f32.mrf.mxu0  ;;  %v3866_v52 = vpop.f32.mrf.mxu1  ;;  %v8991_v55 = vld [vmem:[#allocation7 + $0x720] sm:$0xf]  ;;  %v9482_v62 = vld [vmem:[#allocation7 + $0x72c] sm:$0xf0] }
 0x2cb   : > { %v3778_v23 = vadd.f32 %v3777_v35, %v11024_v39 }
 0x2cc   : > { %v11059_v40 = vadd.f32 %v4041_v22, %v3953_v58  ;;  %3816 = vmatmul.bf16.gmra.mxu0 %v10370_v27  ;;  %v8992_v58 = vor.u32 %v9482_v62, %v8991_v55 }
 0x2cd   : > { %v3867_v28 = vadd.f32 %v3866_v52, %v3778_v23  ;;  %3905 = vmatmul.bf16.gmra.mxu1 %v10372_v63 }
 0x2ce   : > { %3994 = vmatmul.bf16.gmra.mxu2 %v13321_v12  ;;  %4083 = vmatmul.bf16.gmra.mxu3 %v13322_v34  ;;  %v8735_v12 = vld [vmem:[#allocation7 + $0x520] sm:$0xf] }
 0x2cf   : > { %4387 = vmatpush.bf16.msrb.mxu3 %v8992_v58  ;;  %v8736_v6 = vor.u32 %v9418_v48, %v8735_v12  ;;  %v13325_v58 = vld [vmem:[#allocation59_spill] sm:$0xff] }
 0x2d1   : > { %v3955_v35 = vpop.f32.mrf.mxu2  ;;  %v4044_v23 = vpop.f32.mrf.mxu3  ;;  %4209 = vmatpush.bf16.msrb.mxu1 %v8736_v6 }
 0x2d2   : > { %v3956_v22 = vadd.f32 %v3955_v35, %v3867_v28  ;;  %v3779_v52 = vpop.f32.mrf.mxu0  ;;  %v3868_v27 = vpop.f32.mrf.mxu1  ;;  %v13323_v35 = vld [vmem:[#allocation57_spill] sm:$0xff] }
 0x2d3   : > { %v3780_v63 = vadd.f32 %v3779_v52, %v11024_v39 }
 0x2d4   : > { %v11066_v34 = vadd.f32 %v4044_v23, %v3956_v22  ;;  %v13326_v22 = vld [vmem:[#allocation60_spill] sm:$0xff] }
 0x2d5   : > { %v3869_v59 = vadd.f32 %v3868_v27, %v3780_v63 }
 0x2d9   : > { %v3957_v8 = vpop.f32.mrf.mxu2  ;;  %v4046_v60 = vpop.f32.mrf.mxu3 }
 0x2da   : > { %v3958_v33 = vadd.f32 %v3957_v8, %v3869_v59  ;;  %v3782_v36 = vpop.f32.mrf.mxu0  ;;  %v3871_v55 = vpop.f32.mrf.mxu1 }
 0x2db   : > { %v3783_v28 = vadd.f32 %v3782_v36, %v11024_v39 }
 0x2dc   : > { %v11069_v14 = vadd.f32 %v4046_v60, %v3958_v33  ;;  %3821 = vmatmul.bf16.gmra.mxu0 %v13323_v35  ;;  %v9414_v35 = vld [vmem:[#allocation7 + $0x50c] sm:$0xf0] }
 0x2dd   : > { %v3872_v62 = vadd.f32 %v3871_v55, %v3783_v28  ;;  %3910 = vmatmul.bf16.gmra.mxu1 %v13324_v19 }
 0x2de   : > { %3999 = vmatmul.bf16.gmra.mxu2 %v13325_v58  ;;  %4088 = vmatmul.bf16.gmra.mxu3 %v13326_v22 }
 0x2e1   : > { %v3960_v27 = vpop.f32.mrf.mxu2  ;;  %v4049_v48 = vpop.f32.mrf.mxu3 }
 0x2e2   : > { %v3961_v63 = vadd.f32 %v3960_v27, %v3872_v62  ;;  %v3784_v8 = vpop.f32.mrf.mxu0  ;;  %v3873_v23 = vpop.f32.mrf.mxu1  ;;  %v13327_v62 = vld [vmem:[#allocation63_spill] sm:$0xff]  ;;  %v13328_v27 = vld [vmem:[#allocation64_spill] sm:$0xff] }
 0x2e3   : > { %v3785_v12 = vadd.f32 %v3784_v8, %v11024_v39  ;;  %v8591_v8 = vld [vmem:[#allocation7 + $0x400] sm:$0xf] }
 0x2e4   : > { %v11076_v52 = vadd.f32 %v4049_v48, %v3961_v63  ;;  %v8847_v63 = vld [vmem:[#allocation7 + $0x600] sm:$0xf]  ;;  %v9446_v48 = vld [vmem:[#allocation7 + $0x60c] sm:$0xf0] }
 0x2e5   : > { %v3874_v33 = vadd.f32 %v3873_v23, %v3785_v12  ;;  %v8848_v12 = vor.u32 %v9446_v48, %v8847_v63  ;;  %v9382_v23 = vld [vmem:[#allocation7 + $0x40c] sm:$0xf0] }
 0x2e6   : > { %v8592_v19 = vor.u32 %v9382_v23, %v8591_v8 }
 0x2e7   : > { %4299 = vmatpush.bf16.msrb.mxu2 %v8848_v12 }
 0x2e8   : > { %4121 = vmatpush.bf16.msrb.mxu0 %v8592_v19  ;;  %v13330_v19 = vld [vmem:[#allocation66_spill] sm:$0xff] }
 0x2e9   : > { %v3962_v59 = vpop.f32.mrf.mxu2  ;;  %v4051_v60 = vpop.f32.mrf.mxu3 }
 0x2ea   : > { %v3963_v6 = vadd.f32 %v3962_v59, %v3874_v33  ;;  %v3787_v36 = vpop.f32.mrf.mxu0  ;;  %v3876_v55 = vpop.f32.mrf.mxu1  ;;  %v8975_v33 = vld [vmem:[#allocation7 + $0x700] sm:$0xf]  ;;  %v9478_v59 = vld [vmem:[#allocation7 + $0x70c] sm:$0xf0] }
 0x2eb   : > { %v3788_v28 = vadd.f32 %v3787_v36, %v11024_v39 }
 0x2ec   : > { %v11079_v58 = vadd.f32 %v4051_v60, %v3963_v6  ;;  %3826 = vmatmul.bf16.gmra.mxu0 %v10434_v51  ;;  %v8976_v6 = vor.u32 %v9478_v59, %v8975_v33 }
 0x2ed   : > { %v3877_v22 = vadd.f32 %v3876_v55, %v3788_v28  ;;  %3915 = vmatmul.bf16.gmra.mxu1 %v10436_v9 }
 0x2ee   : > { %4004 = vmatmul.bf16.gmra.mxu2 %v13327_v62  ;;  %4093 = vmatmul.bf16.gmra.mxu3 %v13328_v27  ;;  %v8719_v62 = vld [vmem:[#allocation7 + $0x500] sm:$0xf] }
 0x2ef   : > { %4388 = vmatpush.bf16.msrb.mxu3 %v8976_v6  ;;  %v8720_v48 = vor.u32 %v9414_v35, %v8719_v62  ;;  %v13331_v6 = vld [vmem:[#allocation67_spill] sm:$0xff] }
 0x2f1   : > { %v3965_v36 = vpop.f32.mrf.mxu2  ;;  %v4054_v28 = vpop.f32.mrf.mxu3  ;;  %4210 = vmatpush.bf16.msrb.mxu1 %v8720_v48 }
 0x2f2   : > { %v3966_v60 = vadd.f32 %v3965_v36, %v3877_v22  ;;  %v3789_v55 = vpop.f32.mrf.mxu0  ;;  %v3878_v51 = vpop.f32.mrf.mxu1  ;;  %v13329_v36 = vld [vmem:[#allocation65_spill] sm:$0xff] }
 0x2f3   : > { %v3790_v9 = vadd.f32 %v3789_v55, %v11024_v39 }
 0x2f4   : > { %v11086_v27 = vadd.f32 %v4054_v28, %v3966_v60  ;;  %v13332_v60 = vld [vmem:[#allocation68_spill] sm:$0xff] }
 0x2f5   : > { %v3879_v63 = vadd.f32 %v3878_v51, %v3790_v9 }
 0x2f9   : > { %v3967_v37 = vpop.f32.mrf.mxu2  ;;  %v4056_v8 = vpop.f32.mrf.mxu3 }
 0x2fa   : > { %v3968_v5 = vadd.f32 %v3967_v37, %v3879_v63  ;;  %v3792_v23 = vpop.f32.mrf.mxu0  ;;  %v3881_v33 = vpop.f32.mrf.mxu1 }
 0x2fb   : > { %v3793_v22 = vadd.f32 %v3792_v23, %v11024_v39 }
 0x2fc   : > { %v11089_v12 = vadd.f32 %v4056_v8, %v3968_v5  ;;  %3831 = vmatmul.bf16.gmra.mxu0 %v13329_v36  ;;  %v8321_v36 = vld [vmem:[#allocation7 + $0x1f0] sm:$0xf0] }
 0x2fd   : > { %v3882_v59 = vadd.f32 %v3881_v33, %v3793_v22  ;;  %3920 = vmatmul.bf16.gmra.mxu1 %v13330_v19 }
 0x2fe   : > { %4009 = vmatmul.bf16.gmra.mxu2 %v13331_v6  ;;  %4098 = vmatmul.bf16.gmra.mxu3 %v13332_v60 }
 0x301   : > { %v3970_v51 = vpop.f32.mrf.mxu2  ;;  %v4059_v35 = vpop.f32.mrf.mxu3 }
 0x302   : > { %v3971_v9 = vadd.f32 %v3970_v51, %v3882_v59  ;;  %v3794_v37 = vpop.f32.mrf.mxu0  ;;  %v3883_v28 = vpop.f32.mrf.mxu1  ;;  %v13333_v59 = vld [vmem:[#allocation71_spill] sm:$0xff]  ;;  %v13334_v51 = vld [vmem:[#allocation72_spill] sm:$0xff] }
 0x303   : > { %v3795_v62 = vadd.f32 %v3794_v37, %v11024_v39  ;;  %v9280_v37 = vld [vmem:[#allocation7 + $0xe4] sm:$0xf] }
 0x304   : > { %v11096_v55 = vadd.f32 %v4059_v35, %v3971_v9  ;;  %v9344_v9 = vld [vmem:[#allocation7 + $0x2e4] sm:$0xf]  ;;  %v8449_v35 = vld [vmem:[#allocation7 + $0x2f0] sm:$0xf0] }
 0x305   : > { %v3884_v5 = vadd.f32 %v3883_v28, %v3795_v62  ;;  %v8452_v62 = vor.u32 %v9344_v9, %v8449_v35  ;;  %v8193_v28 = vld [vmem:[#allocation7 + $0xf0] sm:$0xf0] }
 0x306   : > { %v8196_v19 = vor.u32 %v9280_v37, %v8193_v28 }
 0x307   : > { %4648 = vmatpush.bf16.msra.mxu2 %v8452_v62 }
 0x308   : > { %4470 = vmatpush.bf16.msra.mxu0 %v8196_v19  ;;  %v13336_v19 = vld [vmem:[#allocation74_spill] sm:$0xff] }
 0x309   : > { %v3972_v63 = vpop.f32.mrf.mxu2  ;;  %v4061_v8 = vpop.f32.mrf.mxu3 }
 0x30a   : > { %v3973_v48 = vadd.f32 %v3972_v63, %v3884_v5  ;;  %v3797_v23 = vpop.f32.mrf.mxu0  ;;  %v3886_v33 = vpop.f32.mrf.mxu1  ;;  %v9376_v5 = vld [vmem:[#allocation7 + $0x3e4] sm:$0xf]  ;;  %v8577_v63 = vld [vmem:[#allocation7 + $0x3f0] sm:$0xf0] }
 0x30b   : > { %v3798_v22 = vadd.f32 %v3797_v23, %v11024_v39 }
 0x30c   : > { %v11099_v6 = vadd.f32 %v4061_v8, %v3973_v48  ;;  %3836 = vmatmul.bf16.gmra.mxu0 %v10498_v43  ;;  %v8580_v48 = vor.u32 %v9376_v5, %v8577_v63 }
 0x30d   : > { %v3887_v60 = vadd.f32 %v3886_v33, %v3798_v22  ;;  %3925 = vmatmul.bf16.gmra.mxu1 %v10500_v21 }
 0x30e   : > { %4014 = vmatmul.bf16.gmra.mxu2 %v13333_v59  ;;  %4103 = vmatmul.bf16.gmra.mxu3 %v13334_v51  ;;  %v9312_v59 = vld [vmem:[#allocation7 + $0x1e4] sm:$0xf] }
 0x30f   : > { %4737 = vmatpush.bf16.msra.mxu3 %v8580_v48  ;;  %v8324_v35 = vor.u32 %v9312_v59, %v8321_v36  ;;  %v13337_v48 = vld [vmem:[#allocation75_spill] sm:$0xff] }
 0x311   : > { %v3975_v23 = vpop.f32.mrf.mxu2  ;;  %v4064_v22 = vpop.f32.mrf.mxu3  ;;  %4559 = vmatpush.bf16.msra.mxu1 %v8324_v35 }
 0x312   : > { %v3976_v8 = vadd.f32 %v3975_v23, %v3887_v60  ;;  %v3799_v33 = vpop.f32.mrf.mxu0  ;;  %v3888_v43 = vpop.f32.mrf.mxu1  ;;  %v13335_v23 = vld [vmem:[#allocation73_spill] sm:$0xff] }
 0x313   : > { %v3800_v21 = vadd.f32 %v3799_v33, %v11024_v39 }
 0x314   : > { %v11106_v51 = vadd.f32 %v4064_v22, %v3976_v8  ;;  %v13338_v8 = vld [vmem:[#allocation76_spill] sm:$0xff] }
 0x315   : > { %v3889_v9 = vadd.f32 %v3888_v43, %v3800_v21 }
 0x319   : > { %v3977_v18 = vpop.f32.mrf.mxu2  ;;  %v4066_v37 = vpop.f32.mrf.mxu3 }
 0x31a   : > { %v3978_v20 = vadd.f32 %v3977_v18, %v3889_v9  ;;  %v3802_v28 = vpop.f32.mrf.mxu0  ;;  %v3891_v5 = vpop.f32.mrf.mxu1 }
 0x31b   : > { %v3803_v60 = vadd.f32 %v3802_v28, %v11024_v39 }
 0x31c   : > { %v11109_v62 = vadd.f32 %v4066_v37, %v3978_v20  ;;  %3841 = vmatmul.bf16.gmra.mxu0 %v13335_v23  ;;  %v8305_v23 = vld [vmem:[#allocation7 + $0x1d0] sm:$0xf0] }
 0x31d   : > { %v3892_v63 = vadd.f32 %v3891_v5, %v3803_v60  ;;  %3930 = vmatmul.bf16.gmra.mxu1 %v13336_v19 }
 0x31e   : > { %4019 = vmatmul.bf16.gmra.mxu2 %v13337_v48  ;;  %4108 = vmatmul.bf16.gmra.mxu3 %v13338_v8 }
 0x321   : > { %v3980_v43 = vpop.f32.mrf.mxu2  ;;  %v4069_v36 = vpop.f32.mrf.mxu3 }
 0x322   : > { %v3981_v21 = vadd.f32 %v3980_v43, %v3892_v63  ;;  %v3804_v18 = vpop.f32.mrf.mxu0  ;;  %v3893_v22 = vpop.f32.mrf.mxu1  ;;  %v13340_v63 = vld [vmem:[#allocation79_spill] sm:$0xff]  ;;  %v13341_v43 = vld [vmem:[#allocation80_spill] sm:$0xff] }
 0x323   : > { %v3805_v59 = vadd.f32 %v3804_v18, %v11024_v39  ;;  %v9276_v18 = vld [vmem:[#allocation7 + $0xc4] sm:$0xf] }
 0x324   : > { %v11116_v33 = vadd.f32 %v4069_v36, %v3981_v21  ;;  %v9340_v21 = vld [vmem:[#allocation7 + $0x2c4] sm:$0xf]  ;;  %v8433_v36 = vld [vmem:[#allocation7 + $0x2d0] sm:$0xf0] }
 0x325   : > { %v3894_v20 = vadd.f32 %v3893_v22, %v3805_v59  ;;  %v8436_v59 = vor.u32 %v9340_v21, %v8433_v36  ;;  %v8177_v22 = vld [vmem:[#allocation7 + $0xd0] sm:$0xf0] }
 0x326   : > { %v8180_v19 = vor.u32 %v9276_v18, %v8177_v22 }
 0x327   : > { %4649 = vmatpush.bf16.msra.mxu2 %v8436_v59 }
 0x328   : > { %4471 = vmatpush.bf16.msra.mxu0 %v8180_v19  ;;  %v13343_v19 = vld [vmem:[#allocation82_spill] sm:$0xff] }
 0x329   : > { %v3982_v9 = vpop.f32.mrf.mxu2  ;;  %v4071_v37 = vpop.f32.mrf.mxu3 }
 0x32a   : > { %v3983_v35 = vadd.f32 %v3982_v9, %v3894_v20  ;;  %v3807_v28 = vpop.f32.mrf.mxu0  ;;  %v3896_v5 = vpop.f32.mrf.mxu1  ;;  %v9372_v20 = vld [vmem:[#allocation7 + $0x3c4] sm:$0xf]  ;;  %v8561_v9 = vld [vmem:[#allocation7 + $0x3d0] sm:$0xf0] }
 0x32b   : > { %v3808_v60 = vadd.f32 %v3807_v28, %v11024_v39 }
 0x32c   : > { %v11119_v48 = vadd.f32 %v4071_v37, %v3983_v35  ;;  %4122 = vmatmul.bf16.vlgmr.msrb.gmra.mxu0 %v10573_v7  ;;  %v8564_v35 = vor.u32 %v9372_v20, %v8561_v9 }
 0x32d   : > { %v3897_v8 = vadd.f32 %v3896_v5, %v3808_v60  ;;  %4211 = vmatmul.bf16.vlgmr.msrb.gmra.mxu1 %v10575_v10 }
 0x32e   : > { %13339 = vst [vmem:[#allocation127_spill] sm:$0xff] %v11119_v48  ;;  %4300 = vmatmul.bf16.vlgmr.msrb.gmra.mxu2 %v13340_v63  ;;  %4389 = vmatmul.bf16.vlgmr.msrb.gmra.mxu3 %v13341_v43  ;;  %v9308_v63 = vld [vmem:[#allocation7 + $0x1c4] sm:$0xf] }
 0x32f   : > { %4738 = vmatpush.bf16.msra.mxu3 %v8564_v35  ;;  %v8308_v36 = vor.u32 %v9308_v63, %v8305_v23  ;;  %v13344_v35 = vld [vmem:[#allocation83_spill] sm:$0xff] }
 0x331   : > { %v3985_v28 = vpop.f32.mrf.mxu2  ;;  %v4074_v60 = vpop.f32.mrf.mxu3  ;;  %4560 = vmatpush.bf16.msra.mxu1 %v8308_v36 }
 0x332   : > { %v3986_v37 = vadd.f32 %v3985_v28, %v3897_v8  ;;  %v3809_v5 = vpop.f32.mrf.mxu0  ;;  %v3898_v7 = vpop.f32.mrf.mxu1  ;;  %v13342_v28 = vld [vmem:[#allocation81_spill] sm:$0xff] }
 0x333   : > { %v3810_v10 = vadd.f32 %v3809_v5, %v11024_v39 }
 0x334   : > { %v11126_v43 = vadd.f32 %v4074_v60, %v3986_v37  ;;  %v13345_v37 = vld [vmem:[#allocation84_spill] sm:$0xff] }
 0x335   : > { %v3899_v21 = vadd.f32 %v3898_v7, %v3810_v10 }
 0x339   : > { %v3987_v48 = vpop.f32.mrf.mxu2  ;;  %v4076_v18 = vpop.f32.mrf.mxu3 }
 0x33a   : > { %v3988_v38 = vadd.f32 %v3987_v48, %v3899_v21  ;;  %v3812_v22 = vpop.f32.mrf.mxu0  ;;  %v3901_v20 = vpop.f32.mrf.mxu1 }
 0x33b   : > { %v3813_v8 = vadd.f32 %v3812_v22, %v11024_v39 }
 0x33c   : > { %v11129_v59 = vadd.f32 %v4076_v18, %v3988_v38  ;;  %4127 = vmatmul.bf16.gmra.mxu0 %v13342_v28  ;;  %v8289_v28 = vld [vmem:[#allocation7 + $0x1b0] sm:$0xf0] }
 0x33d   : > { %v3902_v9 = vadd.f32 %v3901_v20, %v3813_v8  ;;  %4216 = vmatmul.bf16.gmra.mxu1 %v13343_v19 }
 0x33e   : > { %4305 = vmatmul.bf16.gmra.mxu2 %v13344_v35  ;;  %4394 = vmatmul.bf16.gmra.mxu3 %v13345_v37 }
 0x341   : > { %v3990_v7 = vpop.f32.mrf.mxu2  ;;  %v4079_v23 = vpop.f32.mrf.mxu3 }
 0x342   : > { %v3991_v10 = vadd.f32 %v3990_v7, %v3902_v9  ;;  %v3814_v48 = vpop.f32.mrf.mxu0  ;;  %v3903_v60 = vpop.f32.mrf.mxu1  ;;  %v13348_v9 = vld [vmem:[#allocation87_spill] sm:$0xff]  ;;  %v13349_v7 = vld [vmem:[#allocation88_spill] sm:$0xff] }
 0x343   : > { %v3815_v63 = vadd.f32 %v3814_v48, %v11024_v39  ;;  %v9272_v48 = vld [vmem:[#allocation7 + $0xa4] sm:$0xf] }
 0x344   : > { %v11136_v5 = vadd.f32 %v4079_v23, %v3991_v10  ;;  %v9336_v10 = vld [vmem:[#allocation7 + $0x2a4] sm:$0xf]  ;;  %v8417_v23 = vld [vmem:[#allocation7 + $0x2b0] sm:$0xf0] }
 0x345   : > { %v3904_v38 = vadd.f32 %v3903_v60, %v3815_v63  ;;  %v8420_v63 = vor.u32 %v9336_v10, %v8417_v23  ;;  %v8161_v60 = vld [vmem:[#allocation7 + $0xb0] sm:$0xf0] }
 0x346   : > { %13346 = vst [vmem:[#allocation128_spill] sm:$0xff] %v11136_v5  ;;  %v8164_v19 = vor.u32 %v9272_v48, %v8161_v60 }
 0x347   : > { %4650 = vmatpush.bf16.msra.mxu2 %v8420_v63 }
 0x348   : > { %4472 = vmatpush.bf16.msra.mxu0 %v8164_v19  ;;  %v13351_v19 = vld [vmem:[#allocation90_spill] sm:$0xff] }
 0x349   : > { %v3992_v21 = vpop.f32.mrf.mxu2  ;;  %v4081_v18 = vpop.f32.mrf.mxu3 }
 0x34a   : > { %v3993_v36 = vadd.f32 %v3992_v21, %v3904_v38  ;;  %v3817_v22 = vpop.f32.mrf.mxu0  ;;  %v3906_v20 = vpop.f32.mrf.mxu1  ;;  %v9368_v38 = vld [vmem:[#allocation7 + $0x3a4] sm:$0xf]  ;;  %v8545_v21 = vld [vmem:[#allocation7 + $0x3b0] sm:$0xf0] }
 0x34b   : > { %v3818_v8 = vadd.f32 %v3817_v22, %v11024_v39 }
 0x34c   : > { %v11139_v35 = vadd.f32 %v4081_v18, %v3993_v36  ;;  %4132 = vmatmul.bf16.gmra.mxu0 %v10637_v61  ;;  %v8548_v36 = vor.u32 %v9368_v38, %v8545_v21 }
 0x34d   : > { %v3907_v37 = vadd.f32 %v3906_v20, %v3818_v8  ;;  %4221 = vmatmul.bf16.gmra.mxu1 %v10639_v4 }
 0x34e   : > { %13347 = vst [vmem:[#allocation129_spill] sm:$0xff] %v11139_v35  ;;  %4310 = vmatmul.bf16.gmra.mxu2 %v13348_v9  ;;  %4399 = vmatmul.bf16.gmra.mxu3 %v13349_v7  ;;  %v9304_v9 = vld [vmem:[#allocation7 + $0x1a4] sm:$0xf] }
 0x34f   : > { %4739 = vmatpush.bf16.msra.mxu3 %v8548_v36  ;;  %v8292_v23 = vor.u32 %v9304_v9, %v8289_v28  ;;  %v13352_v36 = vld [vmem:[#allocation91_spill] sm:$0xff] }
 0x351   : > { %v3995_v22 = vpop.f32.mrf.mxu2  ;;  %v4084_v8 = vpop.f32.mrf.mxu3  ;;  %4561 = vmatpush.bf16.msra.mxu1 %v8292_v23 }
 0x352   : > { %v3996_v18 = vadd.f32 %v3995_v22, %v3907_v37  ;;  %v3819_v20 = vpop.f32.mrf.mxu0  ;;  %v3908_v61 = vpop.f32.mrf.mxu1  ;;  %v13350_v22 = vld [vmem:[#allocation89_spill] sm:$0xff] }
 0x353   : > { %v3820_v4 = vadd.f32 %v3819_v20, %v11024_v39 }
 0x354   : > { %v11146_v7 = vadd.f32 %v4084_v8, %v3996_v18  ;;  %v13353_v18 = vld [vmem:[#allocation92_spill] sm:$0xff] }
 0x355   : > { %v3909_v10 = vadd.f32 %v3908_v61, %v3820_v4 }
 0x359   : > { %v3997_v35 = vpop.f32.mrf.mxu2  ;;  %v4086_v48 = vpop.f32.mrf.mxu3 }
 0x35a   : > { %v3998_v5 = vadd.f32 %v3997_v35, %v3909_v10  ;;  %v3822_v60 = vpop.f32.mrf.mxu0  ;;  %v3911_v38 = vpop.f32.mrf.mxu1 }
 0x35b   : > { %v3823_v37 = vadd.f32 %v3822_v60, %v11024_v39 }
 0x35c   : > { %v11149_v63 = vadd.f32 %v4086_v48, %v3998_v5  ;;  %4137 = vmatmul.bf16.gmra.mxu0 %v13350_v22  ;;  %v8273_v22 = vld [vmem:[#allocation7 + $0x190] sm:$0xf0] }
 0x35d   : > { %v3912_v21 = vadd.f32 %v3911_v38, %v3823_v37  ;;  %4226 = vmatmul.bf16.gmra.mxu1 %v13351_v19 }
 0x35e   : > { %4315 = vmatmul.bf16.gmra.mxu2 %v13352_v36  ;;  %4404 = vmatmul.bf16.gmra.mxu3 %v13353_v18 }
 0x361   : > { %v4000_v61 = vpop.f32.mrf.mxu2  ;;  %v4089_v28 = vpop.f32.mrf.mxu3 }
 0x362   : > { %v4001_v4 = vadd.f32 %v4000_v61, %v3912_v21  ;;  %v3824_v35 = vpop.f32.mrf.mxu0  ;;  %v3913_v8 = vpop.f32.mrf.mxu1  ;;  %v13356_v21 = vld [vmem:[#allocation95_spill] sm:$0xff]  ;;  %v13357_v61 = vld [vmem:[#allocation96_spill] sm:$0xff] }
 0x363   : > { %v3825_v9 = vadd.f32 %v3824_v35, %v11024_v39  ;;  %v9268_v35 = vld [vmem:[#allocation7 + $0x84] sm:$0xf] }
 0x364   : > { %v11156_v20 = vadd.f32 %v4089_v28, %v4001_v4  ;;  %v9332_v4 = vld [vmem:[#allocation7 + $0x284] sm:$0xf]  ;;  %v8401_v28 = vld [vmem:[#allocation7 + $0x290] sm:$0xf0] }
 0x365   : > { %v3914_v5 = vadd.f32 %v3913_v8, %v3825_v9  ;;  %v8404_v9 = vor.u32 %v9332_v4, %v8401_v28  ;;  %v8145_v8 = vld [vmem:[#allocation7 + $0x90] sm:$0xf0] }
 0x366   : > { %13354 = vst [vmem:[#allocation130_spill] sm:$0xff] %v11156_v20  ;;  %v8148_v19 = vor.u32 %v9268_v35, %v8145_v8 }
 0x367   : > { %4651 = vmatpush.bf16.msra.mxu2 %v8404_v9 }
 0x368   : > { %4473 = vmatpush.bf16.msra.mxu0 %v8148_v19  ;;  %v13359_v19 = vld [vmem:[#allocation98_spill] sm:$0xff] }
 0x369   : > { %v4002_v10 = vpop.f32.mrf.mxu2  ;;  %v4091_v48 = vpop.f32.mrf.mxu3 }
 0x36a   : > { %v4003_v23 = vadd.f32 %v4002_v10, %v3914_v5  ;;  %v3827_v60 = vpop.f32.mrf.mxu0  ;;  %v3916_v38 = vpop.f32.mrf.mxu1  ;;  %v9364_v5 = vld [vmem:[#allocation7 + $0x384] sm:$0xf]  ;;  %v8529_v10 = vld [vmem:[#allocation7 + $0x390] sm:$0xf0] }
 0x36b   : > { %v3828_v37 = vadd.f32 %v3827_v60, %v11024_v39 }
 0x36c   : > { %v11159_v36 = vadd.f32 %v4091_v48, %v4003_v23  ;;  %4142 = vmatmul.bf16.gmra.mxu0 %v10701_v24  ;;  %v8532_v23 = vor.u32 %v9364_v5, %v8529_v10 }
 0x36d   : > { %v3917_v18 = vadd.f32 %v3916_v38, %v3828_v37  ;;  %4231 = vmatmul.bf16.gmra.mxu1 %v10703_v56 }
 0x36e   : > { %13355 = vst [vmem:[#allocation131_spill] sm:$0xff] %v11159_v36  ;;  %4320 = vmatmul.bf16.gmra.mxu2 %v13356_v21  ;;  %4409 = vmatmul.bf16.gmra.mxu3 %v13357_v61  ;;  %v9300_v21 = vld [vmem:[#allocation7 + $0x184] sm:$0xf] }
 0x36f   : > { %4740 = vmatpush.bf16.msra.mxu3 %v8532_v23  ;;  %v8276_v28 = vor.u32 %v9300_v21, %v8273_v22  ;;  %v13360_v23 = vld [vmem:[#allocation99_spill] sm:$0xff] }
 0x371   : > { %v4005_v60 = vpop.f32.mrf.mxu2  ;;  %v4094_v37 = vpop.f32.mrf.mxu3  ;;  %4562 = vmatpush.bf16.msra.mxu1 %v8276_v28 }
 0x372   : > { %v4006_v48 = vadd.f32 %v4005_v60, %v3917_v18  ;;  %v3829_v38 = vpop.f32.mrf.mxu0  ;;  %v3918_v24 = vpop.f32.mrf.mxu1  ;;  %v13358_v60 = vld [vmem:[#allocation97_spill] sm:$0xff] }
 0x373   : > { %v3830_v56 = vadd.f32 %v3829_v38, %v11024_v39 }
 0x374   : > { %v11166_v61 = vadd.f32 %v4094_v37, %v4006_v48  ;;  %v13361_v48 = vld [vmem:[#allocation100_spill] sm:$0xff] }
 0x375   : > { %v3919_v4 = vadd.f32 %v3918_v24, %v3830_v56 }
 0x379   : > { %v4007_v36 = vpop.f32.mrf.mxu2  ;;  %v4096_v35 = vpop.f32.mrf.mxu3 }
 0x37a   : > { %v4008_v20 = vadd.f32 %v4007_v36, %v3919_v4  ;;  %v3832_v8 = vpop.f32.mrf.mxu0  ;;  %v3921_v5 = vpop.f32.mrf.mxu1 }
 0x37b   : > { %v3833_v18 = vadd.f32 %v3832_v8, %v11024_v39 }
 0x37c   : > { %v11169_v9 = vadd.f32 %v4096_v35, %v4008_v20  ;;  %4147 = vmatmul.bf16.gmra.mxu0 %v13358_v60 }
 0x37d   : > { %v3922_v10 = vadd.f32 %v3921_v5, %v3833_v18  ;;  %4236 = vmatmul.bf16.gmra.mxu1 %v13359_v19  ;;  %v9296_v19 = vld [vmem:[#allocation7 + $0x164] sm:$0xf] }
 0x37e   : > { %4325 = vmatmul.bf16.gmra.mxu2 %v13360_v23  ;;  %4414 = vmatmul.bf16.gmra.mxu3 %v13361_v48 }
 0x381   : > { %v4010_v24 = vpop.f32.mrf.mxu2  ;;  %v4099_v22 = vpop.f32.mrf.mxu3 }
 0x382   : > { %v4011_v56 = vadd.f32 %v4010_v24, %v3922_v10  ;;  %v3834_v36 = vpop.f32.mrf.mxu0  ;;  %v3923_v37 = vpop.f32.mrf.mxu1  ;;  %v13364_v10 = vld [vmem:[#allocation104_spill] sm:$0xff]  ;;  %v9328_v24 = vld [vmem:[#allocation7 + $0x264] sm:$0xf] }
 0x383   : > { %v3835_v21 = vadd.f32 %v3834_v36, %v11024_v39 }
 0x384   : > { %v11176_v38 = vadd.f32 %v4099_v22, %v4011_v56  ;;  %v8385_v56 = vld [vmem:[#allocation7 + $0x270] sm:$0xf0]  ;;  %v9264_v22 = vld [vmem:[#allocation7 + $0x64] sm:$0xf] }
 0x385   : > { %v3924_v20 = vadd.f32 %v3923_v37, %v3835_v21  ;;  %v8388_v36 = vor.u32 %v9328_v24, %v8385_v56  ;;  %v8129_v21 = vld [vmem:[#allocation7 + $0x70] sm:$0xf0]  ;;  %v9360_v37 = vld [vmem:[#allocation7 + $0x364] sm:$0xf] }
 0x386   : > { %13362 = vst [vmem:[#allocation132_spill] sm:$0xff] %v11176_v38  ;;  %v8257_v24 = vld [vmem:[#allocation7 + $0x170] sm:$0xf0] }
 0x387   : > { %4652 = vmatpush.bf16.msra.mxu2 %v8388_v36  ;;  %v8260_v60 = vor.u32 %v9296_v19, %v8257_v24 }
 0x389   : > { %v4012_v4 = vpop.f32.mrf.mxu2  ;;  %v4101_v35 = vpop.f32.mrf.mxu3  ;;  %4563 = vmatpush.bf16.msra.mxu1 %v8260_v60 }
 0x38a   : > { %v4013_v28 = vadd.f32 %v4012_v4, %v3924_v20  ;;  %v3837_v8 = vpop.f32.mrf.mxu0  ;;  %v3926_v5 = vpop.f32.mrf.mxu1  ;;  %v8513_v20 = vld [vmem:[#allocation7 + $0x370] sm:$0xf0] }
 0x38b   : > { %v3838_v18 = vadd.f32 %v3837_v8, %v11024_v39  ;;  %v8132_v8 = vor.u32 %v9264_v22, %v8129_v21 }
 0x38c   : > { %v11179_v23 = vadd.f32 %v4101_v35, %v4013_v28  ;;  %4152 = vmatmul.bf16.gmra.mxu0 %v10765_v31  ;;  %v8516_v28 = vor.u32 %v9360_v37, %v8513_v20  ;;  %v13365_v20 = vld [vmem:[#allocation106_spill] sm:$0xff] }
 0x38d   : > { %v3927_v48 = vadd.f32 %v3926_v5, %v3838_v18  ;;  %4241 = vmatmul.bf16.gmra.mxu1 %v10767_v53  ;;  %4474 = vmatpush.bf16.msra.mxu0 %v8132_v8 }
 0x38e   : > { %13363 = vst [vmem:[#allocation133_spill] sm:$0xff] %v11179_v23  ;;  %4330 = vmatmul.bf16.gmra.mxu2 %v10781_v0  ;;  %4419 = vmatmul.bf16.gmra.mxu3 %v13364_v10 }
 0x38f   : > { %4741 = vmatpush.bf16.msra.mxu3 %v8516_v28 }
 0x391   : > { %v4015_v4 = vpop.f32.mrf.mxu2  ;;  %v4104_v18 = vpop.f32.mrf.mxu3 }
 0x392   : > { %v4016_v35 = vadd.f32 %v4015_v4, %v3927_v48  ;;  %v3839_v5 = vpop.f32.mrf.mxu0  ;;  %v3928_v31 = vpop.f32.mrf.mxu1 }
 0x393   : > { %v3840_v53 = vadd.f32 %v3839_v5, %v11024_v39 }
 0x394   : > { %v11186_v10 = vadd.f32 %v4104_v18, %v4016_v35 }
 0x395   : > { %v3929_v0 = vadd.f32 %v3928_v31, %v3840_v53  ;;  %v13366_v31 = vld [vmem:[#allocation107_spill] sm:$0xff] }
 0x399   : > { %v4017_v56 = vpop.f32.mrf.mxu2  ;;  %v4106_v38 = vpop.f32.mrf.mxu3 }
 0x39a   : > { %v4018_v23 = vadd.f32 %v4017_v56, %v3929_v0  ;;  %v3842_v22 = vpop.f32.mrf.mxu0  ;;  %v3931_v21 = vpop.f32.mrf.mxu1 }
 0x39b   : > { %v3843_v48 = vadd.f32 %v3842_v22, %v11024_v39 }
 0x39c   : > { %v11189_v36 = vadd.f32 %v4106_v38, %v4018_v23  ;;  %4157 = vmatmul.bf16.gmra.mxu0 %v10797_v3 }
 0x39d   : > { %v3932_v37 = vadd.f32 %v3931_v21, %v3843_v48  ;;  %4246 = vmatmul.bf16.gmra.mxu1 %v10799_v49  ;;  %v8369_v21 = vld [vmem:[#allocation7 + $0x250] sm:$0xf0] }
 0x39e   : > { %4335 = vmatmul.bf16.gmra.mxu2 %v13365_v20  ;;  %4424 = vmatmul.bf16.gmra.mxu3 %v13366_v31 }
 0x3a1   : > { %v4020_v53 = vpop.f32.mrf.mxu2  ;;  %v4109_v0 = vpop.f32.mrf.mxu3 }
 0x3a2   : > { %v4021_v19 = vadd.f32 %v4020_v53, %v3932_v37  ;;  %v3844_v4 = vpop.f32.mrf.mxu0  ;;  %v3933_v28 = vpop.f32.mrf.mxu1  ;;  %v9260_v37 = vld [vmem:[#allocation7 + $0x44] sm:$0xf] }
 0x3a3   : > { %v3845_v8 = vadd.f32 %v3844_v4, %v11024_v39  ;;  %v9324_v39 = vld [vmem:[#allocation7 + $0x244] sm:$0xf]  ;;  %v8497_v4 = vld [vmem:[#allocation7 + $0x350] sm:$0xf0] }
 0x3a4   : > { %v11196_v35 = vadd.f32 %v4109_v0, %v4021_v19  ;;  %v8372_v53 = vor.u32 %v9324_v39, %v8369_v21  ;;  %v8113_v19 = vld [vmem:[#allocation7 + $0x50] sm:$0xf0]  ;;  %v9356_v0 = vld [vmem:[#allocation7 + $0x344] sm:$0xf] }
 0x3a5   : > { %v3934_v60 = vadd.f32 %v3933_v28, %v3845_v8  ;;  %v8116_v8 = vor.u32 %v9260_v37, %v8113_v19  ;;  %v8500_v28 = vor.u32 %v9356_v0, %v8497_v4  ;;  %v8241_v39 = vld [vmem:[#allocation7 + $0x150] sm:$0xf0] }
 0x3a6   : > { %4653 = vmatpush.bf16.msra.mxu2 %v8372_v53 }
 0x3a7   : > { %4475 = vmatpush.bf16.msra.mxu0 %v8116_v8  ;;  %4742 = vmatpush.bf16.msra.mxu3 %v8500_v28 }
 0x3a9   : > { %v4022_v23 = vpop.f32.mrf.mxu2  ;;  %v4111_v18 = vpop.f32.mrf.mxu3 }
 0x3aa   : > { %v4023_v38 = vadd.f32 %v4022_v23, %v3934_v60  ;;  %v4123_v5 = vpop.f32.mrf.mxu0  ;;  %v4212_v56 = vpop.f32.mrf.mxu1 }
 0x3ab   : > { %v4124_v24 = vadd.f32 %v4123_v5, %v11046_v15 }
 0x3ac   : > { %v11199_v22 = vadd.f32 %v4111_v18, %v4023_v38  ;;  %4162 = vmatmul.bf16.gmra.mxu0 %v10825_v1 }
 0x3ad   : > { %v4213_v48 = vadd.f32 %v4212_v56, %v4124_v24  ;;  %4251 = vmatmul.bf16.gmra.mxu1 %v10827_v45 }
 0x3ae   : > { %4340 = vmatmul.bf16.gmra.mxu2 %v10838_v13  ;;  %4429 = vmatmul.bf16.gmra.mxu3 %v10842_v29  ;;  %v9292_v29 = vld [vmem:[#allocation7 + $0x144] sm:$0xf]  ;;  %v11206_v13 = vstv %s6734_s19 }
 0x3af   : > { %v8244_v21 = vor.u32 %v9292_v29, %v8241_v39 }
 0x3b1   : > { %v4301_v15 = vpop.f32.mrf.mxu2  ;;  %v4390_v23 = vpop.f32.mrf.mxu3  ;;  %4564 = vmatpush.bf16.msra.mxu1 %v8244_v21 }
 0x3b2   : > { %v4302_v60 = vadd.f32 %v4301_v15, %v4213_v48  ;;  %v4125_v38 = vpop.f32.mrf.mxu0  ;;  %v4214_v5 = vpop.f32.mrf.mxu1 }
 0x3b3   : > { %v4126_v18 = vadd.f32 %v4125_v38, %v11049_v17 }
 0x3b4   : > { %v4391_v24 = vadd.f32 %v4390_v23, %v4302_v60 }
 0x3b5   : > { %v4215_v56 = vadd.f32 %v4214_v5, %v4126_v18 }
 0x3b6   : > { %v6736_v17 = vmul.f32 %v11206_v13, %v4391_v24  ;;  %vm6606_vm12 = vcmp.gt.f32.partialorder %v4391_v24, 0.0 }
 0x3b9   : > { %v4303_v45 = vpop.f32.mrf.mxu2  ;;  %v4392_v19 = vpop.f32.mrf.mxu3 }
 0x3ba   : > { %v4304_v37 = vadd.f32 %v4303_v45, %v4215_v56  ;;  %v4128_v48 = vpop.f32.mrf.mxu0  ;;  %v4217_v53 = vpop.f32.mrf.mxu1  ;;  %v11215_v45 = vsel %vm6606_vm12, %v4391_v24, %v6736_v17 }
 0x3bb   : > { %v4129_v0 = vadd.f32 %v4128_v48, %v11056_v41  ;;  %13367 = vst [vmem:[#allocation134_spill] sm:$0xff] %v11215_v45 }
 0x3bc   : > { %v4393_v4 = vadd.f32 %v4392_v19, %v4304_v37  ;;  %4167 = vmatmul.bf16.gmra.mxu0 %v10853_v26 }
 0x3bd   : > { %v4218_v15 = vadd.f32 %v4217_v53, %v4129_v0  ;;  %4256 = vmatmul.bf16.gmra.mxu1 %v10855_v46 }
 0x3be   : > { %vm6610_vm13 = vcmp.gt.f32.partialorder %v4393_v4, 0.0  ;;  %v6740_v29 = vmul.f32 %v11206_v13, %v4393_v4  ;;  %4345 = vmatmul.bf16.gmra.mxu2 %v10866_v2  ;;  %4434 = vmatmul.bf16.gmra.mxu3 %v10870_v32 }
 0x3c0   : > { %v11217_v41 = vsel %vm6610_vm13, %v4393_v4, %v6740_v29  ;;  %v8353_v29 = vld [vmem:[#allocation7 + $0x230] sm:$0xf0] }
 0x3c1   : > { %13368 = vst [vmem:[#allocation135_spill] sm:$0xff] %v11217_v41  ;;  %v4306_v28 = vpop.f32.mrf.mxu2  ;;  %v4395_v23 = vpop.f32.mrf.mxu3 }
 0x3c2   : > { %v4307_v60 = vadd.f32 %v4306_v28, %v4218_v15  ;;  %v4130_v38 = vpop.f32.mrf.mxu0  ;;  %v4219_v5 = vpop.f32.mrf.mxu1  ;;  %v9320_v15 = vld [vmem:[#allocation7 + $0x224] sm:$0xf] }
 0x3c3   : > { %v4131_v18 = vadd.f32 %v4130_v38, %v11059_v40  ;;  %v8356_v28 = vor.u32 %v9320_v15, %v8353_v29  ;;  %v8481_v38 = vld [vmem:[#allocation7 + $0x330] sm:$0xf0] }
 0x3c4   : > { %v4396_v56 = vadd.f32 %v4395_v23, %v4307_v60  ;;  %v8097_v60 = vld [vmem:[#allocation7 + $0x30] sm:$0xf0]  ;;  %v9352_v23 = vld [vmem:[#allocation7 + $0x324] sm:$0xf] }
 0x3c5   : > { %v4220_v39 = vadd.f32 %v4219_v5, %v4131_v18  ;;  %4654 = vmatpush.bf16.msra.mxu2 %v8356_v28 }
 0x3c6   : > { %v6744_v53 = vmul.f32 %v11206_v13, %v4396_v56  ;;  %vm6614_vm14 = vcmp.gt.f32.partialorder %v4396_v56, 0.0 }
 0x3c8   : > { %v11229_v18 = vsel %vm6614_vm14, %v4396_v56, %v6744_v53  ;;  %v9288_v53 = vld [vmem:[#allocation7 + $0x124] sm:$0xf] }
 0x3c9   : > { %v4308_v21 = vpop.f32.mrf.mxu2  ;;  %v4397_v19 = vpop.f32.mrf.mxu3  ;;  %13369 = vst [vmem:[#allocation136_spill] sm:$0xff] %v11229_v18 }
 0x3ca   : > { %v4309_v37 = vadd.f32 %v4308_v21, %v4220_v39  ;;  %v4133_v48 = vpop.f32.mrf.mxu0  ;;  %v4222_v0 = vpop.f32.mrf.mxu1 }
 0x3cb   : > { %v4134_v24 = vadd.f32 %v4133_v48, %v11066_v34  ;;  %v9256_v34 = vld [vmem:[#allocation7 + $0x24] sm:$0xf] }
 0x3cc   : > { %v4398_v17 = vadd.f32 %v4397_v19, %v4309_v37  ;;  %4172 = vmatmul.bf16.gmra.mxu0 %v10881_v54  ;;  %v8100_v21 = vor.u32 %v9256_v34, %v8097_v60  ;;  %v8484_v37 = vor.u32 %v9352_v23, %v8481_v38 }
 0x3cd   : > { %v4223_v4 = vadd.f32 %v4222_v0, %v4134_v24  ;;  %4261 = vmatmul.bf16.gmra.mxu1 %v10883_v44 }
 0x3ce   : > { %vm6618_vm15 = vcmp.gt.f32.partialorder %v4398_v17, 0.0  ;;  %v6748_v40 = vmul.f32 %v11206_v13, %v4398_v17  ;;  %4350 = vmatmul.bf16.gmra.mxu2 %v10894_v57  ;;  %4439 = vmatmul.bf16.gmra.mxu3 %v10898_v42 }
 0x3cf   : > { %4476 = vmatpush.bf16.msra.mxu0 %v8100_v21  ;;  %4743 = vmatpush.bf16.msra.mxu3 %v8484_v37  ;;  %v13371_v21 = vld [vmem:[#allocation112_spill] sm:$0xff] }
 0x3d0   : > { %v11231_v5 = vsel %vm6618_vm15, %v4398_v17, %v6748_v40  ;;  %v8225_v17 = vld [vmem:[#allocation7 + $0x130] sm:$0xf0] }
 0x3d1   : > { %13370 = vst [vmem:[#allocation137_spill] sm:$0xff] %v11231_v5  ;;  %v4311_v39 = vpop.f32.mrf.mxu2  ;;  %v4400_v24 = vpop.f32.mrf.mxu3  ;;  %v8228_v40 = vor.u32 %v9288_v53, %v8225_v17 }
 0x3d2   : > { %v4312_v48 = vadd.f32 %v4311_v39, %v4223_v4  ;;  %v4135_v0 = vpop.f32.mrf.mxu0  ;;  %v4224_v15 = vpop.f32.mrf.mxu1 }
 0x3d3   : > { %v4136_v8 = vadd.f32 %v4135_v0, %v11069_v14  ;;  %4565 = vmatpush.bf16.msra.mxu1 %v8228_v40 }
 0x3d4   : > { %v4401_v29 = vadd.f32 %v4400_v24, %v4312_v48 }
 0x3d5   : > { %v4225_v56 = vadd.f32 %v4224_v15, %v4136_v8 }
 0x3d6   : > { %v6752_v28 = vmul.f32 %v11206_v13, %v4401_v29  ;;  %vm6622_vm1 = vcmp.gt.f32.partialorder %v4401_v29, 0.0 }
 0x3d8   : > { %v11243_v37 = vsel %vm6622_vm1, %v4401_v29, %v6752_v28 }
 0x3d9   : > { %v4313_v45 = vpop.f32.mrf.mxu2  ;;  %v4402_v60 = vpop.f32.mrf.mxu3  ;;  %13373 = vst [vmem:[#allocation112_spill] sm:$0xff] %v11243_v37 }
 0x3da   : > { %v4314_v34 = vadd.f32 %v4313_v45, %v4225_v56  ;;  %v4138_v23 = vpop.f32.mrf.mxu0  ;;  %v4227_v38 = vpop.f32.mrf.mxu1  ;;  %v13372_v45 = vld [vmem:[#allocation113_spill] sm:$0xff] }
 0x3db   : > { %v4139_v4 = vadd.f32 %v4138_v23, %v11076_v52 }
 0x3dc   : > { %v4403_v39 = vadd.f32 %v4402_v60, %v4314_v34  ;;  %4177 = vmatmul.bf16.gmra.mxu0 %v10909_v50 }
 0x3dd   : > { %v4228_v14 = vadd.f32 %v4227_v38, %v4139_v4  ;;  %4266 = vmatmul.bf16.gmra.mxu1 %v10911_v25 }
 0x3de   : > { %vm6626_vm2 = vcmp.gt.f32.partialorder %v4403_v39, 0.0  ;;  %v6756_v8 = vmul.f32 %v11206_v13, %v4403_v39  ;;  %4355 = vmatmul.bf16.gmra.mxu2 %v13371_v21  ;;  %4444 = vmatmul.bf16.gmra.mxu3 %v13372_v45 }
 0x3e0   : > { %v11245_v52 = vsel %vm6626_vm2, %v4403_v39, %v6756_v8 }
 0x3e1   : > { %13374 = vst [vmem:[#allocation113_spill] sm:$0xff] %v11245_v52  ;;  %v4316_v48 = vpop.f32.mrf.mxu2  ;;  %v4405_v15 = vpop.f32.mrf.mxu3 }
 0x3e2   : > { %v4317_v0 = vadd.f32 %v4316_v48, %v4228_v14  ;;  %v4140_v56 = vpop.f32.mrf.mxu0  ;;  %v4229_v17 = vpop.f32.mrf.mxu1  ;;  %v13375_v14 = vld [vmem:[#allocation114_spill] sm:$0xff]  ;;  %v13376_v48 = vld [vmem:[#allocation115_spill] sm:$0xff] }
 0x3e3   : > { %v4141_v53 = vadd.f32 %v4140_v56, %v11079_v58  ;;  %v8337_v56 = vld [vmem:[#allocation7 + $0x210] sm:$0xf0] }
 0x3e4   : > { %v4406_v40 = vadd.f32 %v4405_v15, %v4317_v0  ;;  %v13377_v0 = vld [vmem:[#allocation116_spill] sm:$0xff]  ;;  %v9316_v15 = vld [vmem:[#allocation7 + $0x204] sm:$0xf] }
 0x3e5   : > { %v4230_v34 = vadd.f32 %v4229_v17, %v4141_v53  ;;  %v8340_v53 = vor.u32 %v9316_v15, %v8337_v56  ;;  %v8081_v17 = vld [vmem:[#allocation7 + $0x10] sm:$0xf0] }
 0x3e6   : > { %v6760_v39 = vmul.f32 %v11206_v13, %v4406_v40  ;;  %vm6630_vm3 = vcmp.gt.f32.partialorder %v4406_v40, 0.0 }
 0x3e7   : > { %4655 = vmatpush.bf16.msra.mxu2 %v8340_v53 }
 0x3e9   : > { %v4318_v60 = vpop.f32.mrf.mxu2  ;;  %v4407_v4 = vpop.f32.mrf.mxu3 }
 0x3ea   : > { %v4319_v23 = vadd.f32 %v4318_v60, %v4230_v34  ;;  %v4143_v38 = vpop.f32.mrf.mxu0  ;;  %v4232_v28 = vpop.f32.mrf.mxu1  ;;  %v9348_v34 = vld [vmem:[#allocation7 + $0x304] sm:$0xf]  ;;  %v8465_v60 = vld [vmem:[#allocation7 + $0x310] sm:$0xf0] }
 0x3eb   : > { %v4144_v29 = vadd.f32 %v4143_v38, %v11086_v27  ;;  %v9252_v27 = vld [vmem:[#allocation7 + $0x4] sm:$0xf] }
 0x3ec   : > { %v4408_v8 = vadd.f32 %v4407_v4, %v4319_v23  ;;  %4182 = vmatmul.bf16.gmra.mxu0 %v10937_v16  ;;  %v11257_v23 = vsel %vm6630_vm3, %v4406_v40, %v6760_v39  ;;  %v9284_v39 = vld [vmem:[#allocation7 + $0x104] sm:$0xf] }
 0x3ed   : > { %v4233_v24 = vadd.f32 %v4232_v28, %v4144_v29  ;;  %4271 = vmatmul.bf16.gmra.mxu1 %v13375_v14  ;;  %13378 = vst [vmem:[#allocation114_spill] sm:$0xff] %v11257_v23  ;;  %v8084_v29 = vor.u32 %v9252_v27, %v8081_v17  ;;  %v8468_v28 = vor.u32 %v9348_v34, %v8465_v60 }
 0x3ee   : > { %vm6634_vm4 = vcmp.gt.f32.partialorder %v4408_v8, 0.0  ;;  %v6764_v58 = vmul.f32 %v11206_v13, %v4408_v8  ;;  %4360 = vmatmul.bf16.gmra.mxu2 %v13376_v48  ;;  %4449 = vmatmul.bf16.gmra.mxu3 %v13377_v0 }
 0x3ef   : > { %4477 = vmatpush.bf16.msra.mxu0 %v8084_v29  ;;  %4744 = vmatpush.bf16.msra.mxu3 %v8468_v28 }
 0x3f0   : > { %v11259_v4 = vsel %vm6634_vm4, %v4408_v8, %v6764_v58  ;;  %v8209_v8 = vld [vmem:[#allocation7 + $0x110] sm:$0xf0] }
 0x3f1   : > { %13379 = vst [vmem:[#allocation115_spill] sm:$0xff] %v11259_v4  ;;  %v4321_v38 = vpop.f32.mrf.mxu2  ;;  %v4410_v52 = vpop.f32.mrf.mxu3  ;;  %v8212_v58 = vor.u32 %v9284_v39, %v8209_v8 }
 0x3f2   : > { %v4322_v37 = vadd.f32 %v4321_v38, %v4233_v24  ;;  %v4145_v18 = vpop.f32.mrf.mxu0  ;;  %v4234_v15 = vpop.f32.mrf.mxu1 }
 0x3f3   : > { %v4146_v5 = vadd.f32 %v4145_v18, %v11089_v12  ;;  %4566 = vmatpush.bf16.msra.mxu1 %v8212_v58  ;;  %v13380_v18 = vld [vmem:[#allocation117_spill] sm:$0xff] }
 0x3f4   : > { %v4411_v56 = vadd.f32 %v4410_v52, %v4322_v37  ;;  %v13381_v37 = vld [vmem:[#allocation118_spill] sm:$0xff]  ;;  %v13382_v52 = vld [vmem:[#allocation119_spill] sm:$0xff] }
 0x3f5   : > { %v4235_v40 = vadd.f32 %v4234_v15, %v4146_v5 }
 0x3f6   : > { %v6768_v53 = vmul.f32 %v11206_v13, %v4411_v56  ;;  %vm6638_vm5 = vcmp.gt.f32.partialorder %v4411_v56, 0.0 }
 0x3f8   : > { %v11271_v29 = vsel %vm6638_vm5, %v4411_v56, %v6768_v53 }
 0x3f9   : > { %v4323_v41 = vpop.f32.mrf.mxu2  ;;  %v4412_v17 = vpop.f32.mrf.mxu3  ;;  %13384 = vst [vmem:[#allocation116_spill] sm:$0xff] %v11271_v29 }
 0x3fa   : > { %v4324_v27 = vadd.f32 %v4323_v41, %v4235_v40  ;;  %v4148_v34 = vpop.f32.mrf.mxu0  ;;  %v4237_v60 = vpop.f32.mrf.mxu1  ;;  %v13383_v41 = vld [vmem:[#allocation120_spill] sm:$0xff] }
 0x3fb   : > { %v4149_v24 = vadd.f32 %v4148_v34, %v11096_v55 }
 0x3fc   : > { %v4413_v38 = vadd.f32 %v4412_v17, %v4324_v27  ;;  %4187 = vmatmul.bf16.gmra.mxu0 %v13380_v18 }
 0x3fd   : > { %v4238_v12 = vadd.f32 %v4237_v60, %v4149_v24  ;;  %4276 = vmatmul.bf16.gmra.mxu1 %v13381_v37 }
 0x3fe   : > { %vm6642_vm6 = vcmp.gt.f32.partialorder %v4413_v38, 0.0  ;;  %v6772_v5 = vmul.f32 %v11206_v13, %v4413_v38  ;;  %4365 = vmatmul.bf16.gmra.mxu2 %v13382_v52  ;;  %4454 = vmatmul.bf16.gmra.mxu3 %v13383_v41 }
 0x400   : > { %v11273_v55 = vsel %vm6642_vm6, %v4413_v38, %v6772_v5 }
 0x401   : > { %13385 = vst [vmem:[#allocation117_spill] sm:$0xff] %v11273_v55  ;;  %v4326_v28 = vpop.f32.mrf.mxu2  ;;  %v4415_v39 = vpop.f32.mrf.mxu3 }
 0x402   : > { %v4327_v40 = vadd.f32 %v4326_v28, %v4238_v12  ;;  %v4150_v8 = vpop.f32.mrf.mxu0  ;;  %v4239_v27 = vpop.f32.mrf.mxu1  ;;  %v13386_v12 = vld [vmem:[#allocation122_spill] sm:$0xff]  ;;  %v9472_v28 = vld [vmem:[#allocation7 + $0x6e4] sm:$0xf] }
 0x403   : > { %v4151_v58 = vadd.f32 %v4150_v8, %v11099_v6  ;;  %v9504_v8 = vld [vmem:[#allocation7 + $0x7e4] sm:$0xf] }
 0x404   : > { %v4416_v17 = vadd.f32 %v4415_v39, %v4327_v40  ;;  %v8961_v40 = vld [vmem:[#allocation7 + $0x6f0] sm:$0xf0] }
 0x405   : > { %v4240_v34 = vadd.f32 %v4239_v27, %v4151_v58  ;;  %v8705_v39 = vld [vmem:[#allocation7 + $0x4f0] sm:$0xf0] }
 0x406   : > { %v6776_v38 = vmul.f32 %v11206_v13, %v4416_v17  ;;  %vm6646_vm7 = vcmp.gt.f32.partialorder %v4416_v17, 0.0 }
 0x408   : > { %v11285_v58 = vsel %vm6646_vm7, %v4416_v17, %v6776_v38  ;;  %v9440_v38 = vld [vmem:[#allocation7 + $0x5e4] sm:$0xf] }
 0x409   : > { %v4328_v24 = vpop.f32.mrf.mxu2  ;;  %v4417_v19 = vpop.f32.mrf.mxu3  ;;  %13387 = vst [vmem:[#allocation118_spill] sm:$0xff] %v11285_v58 }
 0x40a   : > { %v4329_v60 = vadd.f32 %v4328_v24, %v4240_v34  ;;  %v4153_v23 = vpop.f32.mrf.mxu0  ;;  %v4242_v53 = vpop.f32.mrf.mxu1 }
 0x40b   : > { %v4154_v56 = vadd.f32 %v4153_v23, %v11106_v51  ;;  %v9408_v51 = vld [vmem:[#allocation7 + $0x4e4] sm:$0xf]  ;;  %v8964_v23 = vor.u32 %v9472_v28, %v8961_v40 }
 0x40c   : > { %v4418_v5 = vadd.f32 %v4417_v19, %v4329_v60  ;;  %4192 = vmatmul.bf16.gmra.mxu0 %v10993_v30  ;;  %v9089_v19 = vld [vmem:[#allocation7 + $0x7f0] sm:$0xf0]  ;;  %v8708_v24 = vor.u32 %v9408_v51, %v8705_v39 }
 0x40d   : > { %v4243_v15 = vadd.f32 %v4242_v53, %v4154_v56  ;;  %4281 = vmatmul.bf16.gmra.mxu1 %v10995_v47  ;;  %v9092_v60 = vor.u32 %v9504_v8, %v9089_v19  ;;  %5004 = vmatpush.bf16.msrb.mxu2 %v8964_v23 }
 0x40e   : > { %vm6650_vm0 = vcmp.gt.f32.partialorder %v4418_v5, 0.0  ;;  %v6780_v6 = vmul.f32 %v11206_v13, %v4418_v5  ;;  %4370 = vmatmul.bf16.gmra.mxu2 %v11006_v11  ;;  %4459 = vmatmul.bf16.gmra.mxu3 %v13386_v12 }
 0x40f   : > { %4826 = vmatpush.bf16.msrb.mxu0 %v8708_v24  ;;  %5093 = vmatpush.bf16.msrb.mxu3 %v9092_v60  ;;  %v13391_v24 = vld [vmem:[#allocation125_spill] sm:$0xff] }
 0x410   : > { %v11287_v27 = vsel %vm6650_vm0, %v4418_v5, %v6780_v6  ;;  %v8833_v5 = vld [vmem:[#allocation7 + $0x5f0] sm:$0xf0] }
 0x411   : > { %13388 = vst [vmem:[#allocation119_spill] sm:$0xff] %v11287_v27  ;;  %v4331_v34 = vpop.f32.mrf.mxu2  ;;  %v4420_v29 = vpop.f32.mrf.mxu3  ;;  %v8836_v6 = vor.u32 %v9440_v38, %v8833_v5 }
 0x412   : > { %v4332_v53 = vadd.f32 %v4331_v34, %v4243_v15  ;;  %v4155_v55 = vpop.f32.mrf.mxu0  ;;  %v4244_v28 = vpop.f32.mrf.mxu1 }
 0x413   : > { %v4156_v4 = vadd.f32 %v4155_v55, %v11109_v62  ;;  %4915 = vmatpush.bf16.msrb.mxu1 %v8836_v6  ;;  %v13389_v55 = vld [vmem:[#allocation123_spill] sm:$0xff] }
 0x414   : > { %v4421_v40 = vadd.f32 %v4420_v29, %v4332_v53  ;;  %v13390_v29 = vld [vmem:[#allocation124_spill] sm:$0xff]  ;;  %v13395_v6 = vld [vmem:[#allocation127_spill] sm:$0xff] }
 0x415   : > { %v4245_v17 = vadd.f32 %v4244_v28, %v4156_v4 }
 0x416   : > { %v6784_v23 = vmul.f32 %v11206_v13, %v4421_v40  ;;  %vm6654_vm8 = vcmp.gt.f32.partialorder %v4421_v40, 0.0 }
 0x418   : > { %v11299_v60 = vsel %vm6654_vm8, %v4421_v40, %v6784_v23 }
 0x419   : > { %v4333_v12 = vpop.f32.mrf.mxu2  ;;  %v4422_v39 = vpop.f32.mrf.mxu3  ;;  %13393 = vst [vmem:[#allocation120_spill] sm:$0xff] %v11299_v60 }
 0x41a   : > { %v4334_v51 = vadd.f32 %v4333_v12, %v4245_v17  ;;  %v4158_v8 = vpop.f32.mrf.mxu0  ;;  %v4247_v19 = vpop.f32.mrf.mxu1  ;;  %v13392_v12 = vld [vmem:[#allocation126_spill] sm:$0xff] }
 0x41b   : > { %v4159_v15 = vadd.f32 %v4158_v8, %v11116_v33 }
 0x41c   : > { %v4423_v34 = vadd.f32 %v4422_v39, %v4334_v51  ;;  %4197 = vmatmul.bf16.gmra.mxu0 %v13389_v55 }
 0x41d   : > { %v4248_v62 = vadd.f32 %v4247_v19, %v4159_v15  ;;  %4286 = vmatmul.bf16.gmra.mxu1 %v13390_v29 }
 0x41e   : > { %vm6658_vm9 = vcmp.gt.f32.partialorder %v4423_v34, 0.0  ;;  %v6788_v4 = vmul.f32 %v11206_v13, %v4423_v34  ;;  %4375 = vmatmul.bf16.gmra.mxu2 %v13391_v24  ;;  %4464 = vmatmul.bf16.gmra.mxu3 %v13392_v12 }
 0x420   : > { %v11301_v33 = vsel %vm6658_vm9, %v4423_v34, %v6788_v4 }
 0x421   : > { %13394 = vst [vmem:[#allocation138_spill] sm:$0xff] %v11301_v33  ;;  %v4336_v53 = vpop.f32.mrf.mxu2  ;;  %v4425_v38 = vpop.f32.mrf.mxu3 }
 0x422   : > { %v4337_v17 = vadd.f32 %v4336_v53, %v4248_v62  ;;  %v4160_v5 = vpop.f32.mrf.mxu0  ;;  %v4249_v39 = vpop.f32.mrf.mxu1  ;;  %v13396_v62 = vld [vmem:[#allocation13_spill] sm:$0xff] }
 0x423   : > { %v4161_v51 = vadd.f32 %v4160_v5, %v13395_v6  ;;  %v13397_v5 = vld [vmem:[#allocation14_spill] sm:$0xff]  ;;  %v9468_v6 = vld [vmem:[#allocation7 + $0x6c4] sm:$0xf] }
 0x424   : > { %v4426_v8 = vadd.f32 %v4425_v38, %v4337_v17  ;;  %v13398_v17 = vld [vmem:[#allocation15_spill] sm:$0xff]  ;;  %v13399_v38 = vld [vmem:[#allocation16_spill] sm:$0xff] }
 0x425   : > { %v4250_v15 = vadd.f32 %v4249_v39, %v4161_v51  ;;  %v8945_v51 = vld [vmem:[#allocation7 + $0x6d0] sm:$0xf0] }
 0x426   : > { %v6792_v34 = vmul.f32 %v11206_v13, %v4426_v8  ;;  %vm6662_vm10 = vcmp.gt.f32.partialorder %v4426_v8, 0.0  ;;  %v8689_v39 = vld [vmem:[#allocation7 + $0x4d0] sm:$0xf0] }
 0x429   : > { %v4338_v19 = vpop.f32.mrf.mxu2  ;;  %v4427_v58 = vpop.f32.mrf.mxu3 }
 0x42a   : > { %v4339_v56 = vadd.f32 %v4338_v19, %v4250_v15  ;;  %v4163_v27 = vpop.f32.mrf.mxu0  ;;  %v4252_v23 = vpop.f32.mrf.mxu1  ;;  %v9500_v15 = vld [vmem:[#allocation7 + $0x7c4] sm:$0xf] }
 0x42b   : > { %v4164_v40 = vadd.f32 %v4163_v27, %v11126_v43  ;;  %v9404_v43 = vld [vmem:[#allocation7 + $0x4c4] sm:$0xf]  ;;  %v8948_v27 = vor.u32 %v9468_v6, %v8945_v51 }
 0x42c   : > { %v4428_v4 = vadd.f32 %v4427_v58, %v4339_v56  ;;  %4478 = vmatmul.bf16.vlgmr.msra.gmra.mxu0 %v13396_v62  ;;  %v9073_v58 = vld [vmem:[#allocation7 + $0x7d0] sm:$0xf0]  ;;  %v11313_v56 = vsel %vm6662_vm10, %v4426_v8, %v6792_v34  ;;  %v9436_v34 = vld [vmem:[#allocation7 + $0x5c4] sm:$0xf] }
 0x42d   : > { %v4253_v28 = vadd.f32 %v4252_v23, %v4164_v40  ;;  %4567 = vmatmul.bf16.vlgmr.msra.gmra.mxu1 %v13397_v5  ;;  %13400 = vst [vmem:[#allocation127_spill] sm:$0xff] %v11313_v56  ;;  %v8692_v23 = vor.u32 %v9404_v43, %v8689_v39  ;;  %v9076_v60 = vor.u32 %v9500_v15, %v9073_v58  ;;  %v13402_v58 = vld [vmem:[#allocation128_spill] sm:$0xff] }
 0x42e   : > { %vm6666_vm11 = vcmp.gt.f32.partialorder %v4428_v4, 0.0  ;;  %v6796_v53 = vmul.f32 %v11206_v13, %v4428_v4  ;;  %4656 = vmatmul.bf16.vlgmr.msra.gmra.mxu2 %v13398_v17  ;;  %4745 = vmatmul.bf16.vlgmr.msra.gmra.mxu3 %v13399_v38 }
 0x42f   : > { %5005 = vmatpush.bf16.msrb.mxu2 %v8948_v27  ;;  %4827 = vmatpush.bf16.msrb.mxu0 %v8692_v23 }
 0x430   : > { %v11315_v19 = vsel %vm6666_vm11, %v4428_v4, %v6796_v53  ;;  %5094 = vmatpush.bf16.msrb.mxu3 %v9076_v60  ;;  %v8817_v4 = vld [vmem:[#allocation7 + $0x5d0] sm:$0xf0] }
 0x431   : > { %13401 = vst [vmem:[#allocation139_spill] sm:$0xff] %v11315_v19  ;;  %v4341_v40 = vpop.f32.mrf.mxu2  ;;  %v4430_v5 = vpop.f32.mrf.mxu3  ;;  %v8820_v53 = vor.u32 %v9436_v34, %v8817_v4 }
 0x432   : > { %v4342_v17 = vadd.f32 %v4341_v40, %v4253_v28  ;;  %v4165_v38 = vpop.f32.mrf.mxu0  ;;  %v4254_v6 = vpop.f32.mrf.mxu1 }
 0x433   : > { %v4166_v62 = vadd.f32 %v4165_v38, %v11129_v59  ;;  %4916 = vmatpush.bf16.msrb.mxu1 %v8820_v53  ;;  %v13403_v38 = vld [vmem:[#allocation17_spill] sm:$0xff] }
 0x434   : > { %v4431_v51 = vadd.f32 %v4430_v5, %v4342_v17  ;;  %v13405_v5 = vld [vmem:[#allocation19_spill] sm:$0xff] }
 0x435   : > { %v4255_v8 = vadd.f32 %v4254_v6, %v4166_v62  ;;  %v13404_v62 = vld [vmem:[#allocation18_spill] sm:$0xff] }
 0x436   : > { %v6800_v27 = vmul.f32 %v11206_v13, %v4431_v51  ;;  %vm6670_vm12 = vcmp.gt.f32.partialorder %v4431_v51, 0.0 }
 0x438   : > { %v11327_v17 = vsel %vm6670_vm12, %v4431_v51, %v6800_v27 }
 0x439   : > { %v4343_v12 = vpop.f32.mrf.mxu2  ;;  %v4432_v39 = vpop.f32.mrf.mxu3  ;;  %13407 = vst [vmem:[#allocation128_spill] sm:$0xff] %v11327_v17 }
 0x43a   : > { %v4344_v43 = vadd.f32 %v4343_v12, %v4255_v8  ;;  %v4168_v15 = vpop.f32.mrf.mxu0  ;;  %v4257_v40 = vpop.f32.mrf.mxu1  ;;  %v13406_v12 = vld [vmem:[#allocation20_spill] sm:$0xff] }
 0x43b   : > { %v4169_v28 = vadd.f32 %v4168_v15, %v13402_v58 }
 0x43c   : > { %v4433_v33 = vadd.f32 %v4432_v39, %v4344_v43  ;;  %4483 = vmatmul.bf16.gmra.mxu0 %v13403_v38  ;;  %v13409_v43 = vld [vmem:[#allocation129_spill] sm:$0xff]  ;;  %v9315_v38 = vld [vmem:[#allocation7 + $0x1f4] sm:$0xf0] }
 0x43d   : > { %v4258_v59 = vadd.f32 %v4257_v40, %v4169_v28  ;;  %4572 = vmatmul.bf16.gmra.mxu1 %v13404_v62 }
 0x43e   : > { %vm6674_vm13 = vcmp.gt.f32.partialorder %v4433_v33, 0.0  ;;  %v6804_v60 = vmul.f32 %v11206_v13, %v4433_v33  ;;  %4661 = vmatmul.bf16.gmra.mxu2 %v13405_v5  ;;  %4750 = vmatmul.bf16.gmra.mxu3 %v13406_v12 }
 0x440   : > { %v11329_v23 = vsel %vm6674_vm13, %v4433_v33, %v6804_v60 }
 0x441   : > { %13408 = vst [vmem:[#allocation140_spill] sm:$0xff] %v11329_v23  ;;  %v4346_v6 = vpop.f32.mrf.mxu2  ;;  %v4435_v4 = vpop.f32.mrf.mxu3 }
 0x442   : > { %v4347_v34 = vadd.f32 %v4346_v6, %v4258_v59  ;;  %v4170_v53 = vpop.f32.mrf.mxu0  ;;  %v4259_v15 = vpop.f32.mrf.mxu1  ;;  %v13410_v59 = vld [vmem:[#allocation21_spill] sm:$0xff] }
 0x443   : > { %v4171_v39 = vadd.f32 %v4170_v53, %v13409_v43  ;;  %v13411_v53 = vld [vmem:[#allocation22_spill] sm:$0xff]  ;;  %v9464_v43 = vld [vmem:[#allocation7 + $0x6a4] sm:$0xf] }
 0x444   : > { %v4436_v58 = vadd.f32 %v4435_v4, %v4347_v34  ;;  %v13412_v34 = vld [vmem:[#allocation23_spill] sm:$0xff]  ;;  %v13413_v4 = vld [vmem:[#allocation24_spill] sm:$0xff] }
 0x445   : > { %v4260_v28 = vadd.f32 %v4259_v15, %v4171_v39  ;;  %v8929_v39 = vld [vmem:[#allocation7 + $0x6b0] sm:$0xf0] }
 0x446   : > { %v6808_v27 = vmul.f32 %v11206_v13, %v4436_v58  ;;  %vm6678_vm14 = vcmp.gt.f32.partialorder %v4436_v58, 0.0  ;;  %v8673_v15 = vld [vmem:[#allocation7 + $0x4b0] sm:$0xf0] }
 0x449   : > { %v4348_v40 = vpop.f32.mrf.mxu2  ;;  %v4437_v19 = vpop.f32.mrf.mxu3 }
 0x44a   : > { %v4349_v56 = vadd.f32 %v4348_v40, %v4260_v28  ;;  %v4173_v12 = vpop.f32.mrf.mxu0  ;;  %v4262_v33 = vpop.f32.mrf.mxu1  ;;  %v9496_v28 = vld [vmem:[#allocation7 + $0x7a4] sm:$0xf] }
 0x44b   : > { %v4174_v51 = vadd.f32 %v4173_v12, %v11146_v7  ;;  %v9400_v7 = vld [vmem:[#allocation7 + $0x4a4] sm:$0xf]  ;;  %v8932_v12 = vor.u32 %v9464_v43, %v8929_v39 }
 0x44c   : > { %v4438_v60 = vadd.f32 %v4437_v19, %v4349_v56  ;;  %4488 = vmatmul.bf16.gmra.mxu0 %v13410_v59  ;;  %v9057_v56 = vld [vmem:[#allocation7 + $0x7b0] sm:$0xf0]  ;;  %v11341_v19 = vsel %vm6678_vm14, %v4436_v58, %v6808_v27  ;;  %v9432_v27 = vld [vmem:[#allocation7 + $0x5a4] sm:$0xf] }
 0x44d   : > { %v4263_v8 = vadd.f32 %v4262_v33, %v4174_v51  ;;  %4577 = vmatmul.bf16.gmra.mxu1 %v13411_v53  ;;  %13414 = vst [vmem:[#allocation129_spill] sm:$0xff] %v11341_v19  ;;  %v8676_v33 = vor.u32 %v9400_v7, %v8673_v15  ;;  %v9060_v17 = vor.u32 %v9496_v28, %v9057_v56  ;;  %v13416_v56 = vld [vmem:[#allocation130_spill] sm:$0xff] }
 0x44e   : > { %vm6682_vm15 = vcmp.gt.f32.partialorder %v4438_v60, 0.0  ;;  %v6812_v6 = vmul.f32 %v11206_v13, %v4438_v60  ;;  %4666 = vmatmul.bf16.gmra.mxu2 %v13412_v34  ;;  %4755 = vmatmul.bf16.gmra.mxu3 %v13413_v4 }
 0x44f   : > { %5006 = vmatpush.bf16.msrb.mxu2 %v8932_v12  ;;  %4828 = vmatpush.bf16.msrb.mxu0 %v8676_v33 }
 0x450   : > { %v11343_v40 = vsel %vm6682_vm15, %v4438_v60, %v6812_v6  ;;  %5095 = vmatpush.bf16.msrb.mxu3 %v9060_v17  ;;  %v8801_v60 = vld [vmem:[#allocation7 + $0x5b0] sm:$0xf0] }
 0x451   : > { %13415 = vst [vmem:[#allocation141_spill] sm:$0xff] %v11343_v40  ;;  %v4351_v51 = vpop.f32.mrf.mxu2  ;;  %v4440_v53 = vpop.f32.mrf.mxu3  ;;  %v8804_v6 = vor.u32 %v9432_v27, %v8801_v60 }
 0x452   : > { %v4352_v34 = vadd.f32 %v4351_v51, %v4263_v8  ;;  %v4175_v4 = vpop.f32.mrf.mxu0  ;;  %v4264_v43 = vpop.f32.mrf.mxu1 }
 0x453   : > { %v4176_v59 = vadd.f32 %v4175_v4, %v11149_v63  ;;  %4917 = vmatpush.bf16.msrb.mxu1 %v8804_v6  ;;  %v13417_v4 = vld [vmem:[#allocation25_spill] sm:$0xff] }
 0x454   : > { %v4441_v39 = vadd.f32 %v4440_v53, %v4352_v34  ;;  %v13419_v53 = vld [vmem:[#allocation27_spill] sm:$0xff] }
 0x455   : > { %v4265_v58 = vadd.f32 %v4264_v43, %v4176_v59  ;;  %v13418_v59 = vld [vmem:[#allocation26_spill] sm:$0xff] }
 0x456   : > { %v6816_v12 = vmul.f32 %v11206_v13, %v4441_v39  ;;  %vm6686_vm1 = vcmp.gt.f32.partialorder %v4441_v39, 0.0 }
 0x458   : > { %v11355_v34 = vsel %vm6686_vm1, %v4441_v39, %v6816_v12 }
 0x459   : > { %v4353_v5 = vpop.f32.mrf.mxu2  ;;  %v4442_v15 = vpop.f32.mrf.mxu3  ;;  %13421 = vst [vmem:[#allocation130_spill] sm:$0xff] %v11355_v34 }
 0x45a   : > { %v4354_v7 = vadd.f32 %v4353_v5, %v4265_v58  ;;  %v4178_v28 = vpop.f32.mrf.mxu0  ;;  %v4267_v51 = vpop.f32.mrf.mxu1  ;;  %v13420_v5 = vld [vmem:[#allocation28_spill] sm:$0xff] }
 0x45b   : > { %v4179_v8 = vadd.f32 %v4178_v28, %v13416_v56 }
 0x45c   : > { %v4443_v23 = vadd.f32 %v4442_v15, %v4354_v7  ;;  %4493 = vmatmul.bf16.gmra.mxu0 %v13417_v4  ;;  %v13423_v7 = vld [vmem:[#allocation131_spill] sm:$0xff] }
 0x45d   : > { %v4268_v63 = vadd.f32 %v4267_v51, %v4179_v8  ;;  %4582 = vmatmul.bf16.gmra.mxu1 %v13418_v59 }
 0x45e   : > { %vm6690_vm2 = vcmp.gt.f32.partialorder %v4443_v23, 0.0  ;;  %v6820_v17 = vmul.f32 %v11206_v13, %v4443_v23  ;;  %4671 = vmatmul.bf16.gmra.mxu2 %v13419_v53  ;;  %4760 = vmatmul.bf16.gmra.mxu3 %v13420_v5 }
 0x460   : > { %v11357_v33 = vsel %vm6690_vm2, %v4443_v23, %v6820_v17 }
 0x461   : > { %13422 = vst [vmem:[#allocation142_spill] sm:$0xff] %v11357_v33  ;;  %v4356_v43 = vpop.f32.mrf.mxu2  ;;  %v4445_v60 = vpop.f32.mrf.mxu3 }
 0x462   : > { %v4357_v27 = vadd.f32 %v4356_v43, %v4268_v63  ;;  %v4180_v6 = vpop.f32.mrf.mxu0  ;;  %v4269_v28 = vpop.f32.mrf.mxu1  ;;  %v13424_v63 = vld [vmem:[#allocation29_spill] sm:$0xff] }
 0x463   : > { %v4181_v15 = vadd.f32 %v4180_v6, %v13423_v7  ;;  %v13425_v6 = vld [vmem:[#allocation30_spill] sm:$0xff]  ;;  %v9460_v7 = vld [vmem:[#allocation7 + $0x684] sm:$0xf] }
 0x464   : > { %v4446_v56 = vadd.f32 %v4445_v60, %v4357_v27  ;;  %v13426_v27 = vld [vmem:[#allocation31_spill] sm:$0xff]  ;;  %v13427_v60 = vld [vmem:[#allocation32_spill] sm:$0xff] }
 0x465   : > { %v4270_v8 = vadd.f32 %v4269_v28, %v4181_v15  ;;  %v8913_v15 = vld [vmem:[#allocation7 + $0x690] sm:$0xf0] }
 0x466   : > { %v6824_v12 = vmul.f32 %v11206_v13, %v4446_v56  ;;  %vm6694_vm3 = vcmp.gt.f32.partialorder %v4446_v56, 0.0  ;;  %v8657_v28 = vld [vmem:[#allocation7 + $0x490] sm:$0xf0] }
 0x469   : > { %v4358_v51 = vpop.f32.mrf.mxu2  ;;  %v4447_v40 = vpop.f32.mrf.mxu3 }
 0x46a   : > { %v4359_v19 = vadd.f32 %v4358_v51, %v4270_v8  ;;  %v4183_v5 = vpop.f32.mrf.mxu0  ;;  %v4272_v23 = vpop.f32.mrf.mxu1  ;;  %v9492_v8 = vld [vmem:[#allocation7 + $0x784] sm:$0xf] }
 0x46b   : > { %v4184_v39 = vadd.f32 %v4183_v5, %v11166_v61  ;;  %v9396_v61 = vld [vmem:[#allocation7 + $0x484] sm:$0xf]  ;;  %v8916_v5 = vor.u32 %v9460_v7, %v8913_v15 }
 0x46c   : > { %v4448_v17 = vadd.f32 %v4447_v40, %v4359_v19  ;;  %4498 = vmatmul.bf16.gmra.mxu0 %v13424_v63  ;;  %v9041_v19 = vld [vmem:[#allocation7 + $0x790] sm:$0xf0]  ;;  %v11369_v40 = vsel %vm6694_vm3, %v4446_v56, %v6824_v12  ;;  %v9428_v12 = vld [vmem:[#allocation7 + $0x584] sm:$0xf] }
 0x46d   : > { %v4273_v58 = vadd.f32 %v4272_v23, %v4184_v39  ;;  %4587 = vmatmul.bf16.gmra.mxu1 %v13425_v6  ;;  %13428 = vst [vmem:[#allocation131_spill] sm:$0xff] %v11369_v40  ;;  %v8660_v23 = vor.u32 %v9396_v61, %v8657_v28  ;;  %v9044_v34 = vor.u32 %v9492_v8, %v9041_v19  ;;  %v13430_v19 = vld [vmem:[#allocation132_spill] sm:$0xff] }
 0x46e   : > { %vm6698_vm4 = vcmp.gt.f32.partialorder %v4448_v17, 0.0  ;;  %v6828_v43 = vmul.f32 %v11206_v13, %v4448_v17  ;;  %4676 = vmatmul.bf16.gmra.mxu2 %v13426_v27  ;;  %4765 = vmatmul.bf16.gmra.mxu3 %v13427_v60 }
 0x46f   : > { %5007 = vmatpush.bf16.msrb.mxu2 %v8916_v5  ;;  %4829 = vmatpush.bf16.msrb.mxu0 %v8660_v23 }
 0x470   : > { %v11371_v51 = vsel %vm6698_vm4, %v4448_v17, %v6828_v43  ;;  %5096 = vmatpush.bf16.msrb.mxu3 %v9044_v34  ;;  %v8785_v17 = vld [vmem:[#allocation7 + $0x590] sm:$0xf0] }
 0x471   : > { %13429 = vst [vmem:[#allocation143_spill] sm:$0xff] %v11371_v51  ;;  %v4361_v39 = vpop.f32.mrf.mxu2  ;;  %v4450_v6 = vpop.f32.mrf.mxu3  ;;  %v8788_v43 = vor.u32 %v9428_v12, %v8785_v17 }
 0x472   : > { %v4362_v27 = vadd.f32 %v4361_v39, %v4273_v58  ;;  %v4185_v60 = vpop.f32.mrf.mxu0  ;;  %v4274_v7 = vpop.f32.mrf.mxu1 }
 0x473   : > { %v4186_v63 = vadd.f32 %v4185_v60, %v11169_v9  ;;  %4918 = vmatpush.bf16.msrb.mxu1 %v8788_v43  ;;  %v13431_v60 = vld [vmem:[#allocation33_spill] sm:$0xff] }
 0x474   : > { %v4451_v15 = vadd.f32 %v4450_v6, %v4362_v27  ;;  %v13433_v6 = vld [vmem:[#allocation35_spill] sm:$0xff] }
 0x475   : > { %v4275_v56 = vadd.f32 %v4274_v7, %v4186_v63  ;;  %v13432_v63 = vld [vmem:[#allocation34_spill] sm:$0xff] }
 0x476   : > { %v6832_v5 = vmul.f32 %v11206_v13, %v4451_v15  ;;  %vm6702_vm5 = vcmp.gt.f32.partialorder %v4451_v15, 0.0 }
 0x478   : > { %v11383_v27 = vsel %vm6702_vm5, %v4451_v15, %v6832_v5 }
 0x479   : > { %v4363_v53 = vpop.f32.mrf.mxu2  ;;  %v4452_v28 = vpop.f32.mrf.mxu3  ;;  %13435 = vst [vmem:[#allocation132_spill] sm:$0xff] %v11383_v27 }
 0x47a   : > { %v4364_v61 = vadd.f32 %v4363_v53, %v4275_v56  ;;  %v4188_v8 = vpop.f32.mrf.mxu0  ;;  %v4277_v39 = vpop.f32.mrf.mxu1  ;;  %v13434_v53 = vld [vmem:[#allocation36_spill] sm:$0xff] }
 0x47b   : > { %v4189_v58 = vadd.f32 %v4188_v8, %v13430_v19 }
 0x47c   : > { %v4453_v33 = vadd.f32 %v4452_v28, %v4364_v61  ;;  %4503 = vmatmul.bf16.gmra.mxu0 %v13431_v60  ;;  %v13437_v61 = vld [vmem:[#allocation133_spill] sm:$0xff]  ;;  %v8721_v60 = vld [vmem:[#allocation7 + $0x510] sm:$0xf0] }
 0x47d   : > { %v4278_v9 = vadd.f32 %v4277_v39, %v4189_v58  ;;  %4592 = vmatmul.bf16.gmra.mxu1 %v13432_v63 }
 0x47e   : > { %vm6706_vm6 = vcmp.gt.f32.partialorder %v4453_v33, 0.0  ;;  %v6836_v34 = vmul.f32 %v11206_v13, %v4453_v33  ;;  %4681 = vmatmul.bf16.gmra.mxu2 %v13433_v6  ;;  %4770 = vmatmul.bf16.gmra.mxu3 %v13434_v53 }
 0x480   : > { %v11385_v23 = vsel %vm6706_vm6, %v4453_v33, %v6836_v34 }
 0x481   : > { %13436 = vst [vmem:[#allocation144_spill] sm:$0xff] %v11385_v23  ;;  %v4366_v7 = vpop.f32.mrf.mxu2  ;;  %v4455_v17 = vpop.f32.mrf.mxu3 }
 0x482   : > { %v4367_v12 = vadd.f32 %v4366_v7, %v4278_v9  ;;  %v4190_v43 = vpop.f32.mrf.mxu0  ;;  %v4279_v8 = vpop.f32.mrf.mxu1  ;;  %v13438_v9 = vld [vmem:[#allocation37_spill] sm:$0xff] }
 0x483   : > { %v4191_v28 = vadd.f32 %v4190_v43, %v13437_v61  ;;  %v13439_v43 = vld [vmem:[#allocation38_spill] sm:$0xff]  ;;  %v9456_v61 = vld [vmem:[#allocation7 + $0x664] sm:$0xf] }
 0x484   : > { %v4456_v19 = vadd.f32 %v4455_v17, %v4367_v12  ;;  %v13440_v12 = vld [vmem:[#allocation39_spill] sm:$0xff]  ;;  %v13441_v17 = vld [vmem:[#allocation40_spill] sm:$0xff] }
 0x485   : > { %v4280_v58 = vadd.f32 %v4279_v8, %v4191_v28  ;;  %v8897_v28 = vld [vmem:[#allocation7 + $0x670] sm:$0xf0] }
 0x486   : > { %v6840_v5 = vmul.f32 %v11206_v13, %v4456_v19  ;;  %vm6710_vm7 = vcmp.gt.f32.partialorder %v4456_v19, 0.0  ;;  %v8641_v8 = vld [vmem:[#allocation7 + $0x470] sm:$0xf0] }
 0x489   : > { %v4368_v39 = vpop.f32.mrf.mxu2  ;;  %v4457_v51 = vpop.f32.mrf.mxu3 }
 0x48a   : > { %v4369_v40 = vadd.f32 %v4368_v39, %v4280_v58  ;;  %v4193_v53 = vpop.f32.mrf.mxu0  ;;  %v4282_v33 = vpop.f32.mrf.mxu1  ;;  %v9488_v58 = vld [vmem:[#allocation7 + $0x764] sm:$0xf] }
 0x48b   : > { %v4194_v15 = vadd.f32 %v4193_v53, %v11186_v10  ;;  %v9392_v10 = vld [vmem:[#allocation7 + $0x464] sm:$0xf]  ;;  %v8900_v53 = vor.u32 %v9456_v61, %v8897_v28 }
 0x48c   : > { %v4458_v34 = vadd.f32 %v4457_v51, %v4369_v40  ;;  %4508 = vmatmul.bf16.gmra.mxu0 %v13438_v9  ;;  %v9025_v40 = vld [vmem:[#allocation7 + $0x770] sm:$0xf0]  ;;  %v11397_v51 = vsel %vm6710_vm7, %v4456_v19, %v6840_v5  ;;  %v9424_v19 = vld [vmem:[#allocation7 + $0x564] sm:$0xf] }
 0x48d   : > { %v4283_v56 = vadd.f32 %v4282_v33, %v4194_v15  ;;  %4597 = vmatmul.bf16.gmra.mxu1 %v13439_v43  ;;  %13442 = vst [vmem:[#allocation133_spill] sm:$0xff] %v11397_v51  ;;  %v8644_v33 = vor.u32 %v9392_v10, %v8641_v8  ;;  %v9028_v27 = vor.u32 %v9488_v58, %v9025_v40  ;;  %v8769_v5 = vld [vmem:[#allocation7 + $0x570] sm:$0xf0]  ;;  %v9484_v51 = vld [vmem:[#allocation7 + $0x744] sm:$0xf] }
 0x48e   : > { %vm6714_vm0 = vcmp.gt.f32.partialorder %v4458_v34, 0.0  ;;  %v6844_v7 = vmul.f32 %v11206_v13, %v4458_v34  ;;  %4686 = vmatmul.bf16.gmra.mxu2 %v13440_v12  ;;  %4775 = vmatmul.bf16.gmra.mxu3 %v13441_v17 }
 0x48f   : > { %5008 = vmatpush.bf16.msrb.mxu2 %v8900_v53  ;;  %4830 = vmatpush.bf16.msrb.mxu0 %v8644_v33 }
 0x490   : > { %v11399_v39 = vsel %vm6714_vm0, %v4458_v34, %v6844_v7  ;;  %5097 = vmatpush.bf16.msrb.mxu3 %v9028_v27  ;;  %v8772_v7 = vor.u32 %v9424_v19, %v8769_v5 }
 0x491   : > { %13443 = vst [vmem:[#allocation145_spill] sm:$0xff] %v11399_v39  ;;  %v4371_v15 = vpop.f32.mrf.mxu2  ;;  %v4460_v43 = vpop.f32.mrf.mxu3 }
 0x492   : > { %v4372_v12 = vadd.f32 %v4371_v15, %v4283_v56  ;;  %v4195_v17 = vpop.f32.mrf.mxu0  ;;  %v4284_v61 = vpop.f32.mrf.mxu1  ;;  %4919 = vmatpush.bf16.msrb.mxu1 %v8772_v7 }
 0x493   : > { %v4196_v9 = vadd.f32 %v4195_v17, %v11189_v36  ;;  %v13444_v17 = vld [vmem:[#allocation41_spill] sm:$0xff] }
 0x494   : > { %v4461_v28 = vadd.f32 %v4460_v43, %v4372_v12  ;;  %v13446_v43 = vld [vmem:[#allocation43_spill] sm:$0xff]  ;;  %v13447_v12 = vld [vmem:[#allocation44_spill] sm:$0xff] }
 0x495   : > { %v4285_v34 = vadd.f32 %v4284_v61, %v4196_v9  ;;  %v13445_v9 = vld [vmem:[#allocation42_spill] sm:$0xff] }
 0x496   : > { %v6848_v53 = vmul.f32 %v11206_v13, %v4461_v28  ;;  %vm6718_vm8 = vcmp.gt.f32.partialorder %v4461_v28, 0.0 }
 0x498   : > { %v11411_v33 = vsel %vm6718_vm8, %v4461_v28, %v6848_v53 }
 0x499   : > { %v4373_v10 = vpop.f32.mrf.mxu2  ;;  %v4462_v58 = vpop.f32.mrf.mxu3  ;;  %13448 = vst [vmem:[#allocation146_spill] sm:$0xff] %v11411_v33 }
 0x49a   : > { %v4374_v8 = vadd.f32 %v4373_v10, %v4285_v34  ;;  %v4198_v40 = vpop.f32.mrf.mxu0  ;;  %v4287_v15 = vpop.f32.mrf.mxu1 }
 0x49b   : > { %v4199_v56 = vadd.f32 %v4198_v40, %v11196_v35 }
 0x49c   : > { %v4463_v23 = vadd.f32 %v4462_v58, %v4374_v8  ;;  %4513 = vmatmul.bf16.gmra.mxu0 %v13444_v17 }
 0x49d   : > { %v4288_v36 = vadd.f32 %v4287_v15, %v4199_v56  ;;  %4602 = vmatmul.bf16.gmra.mxu1 %v13445_v9  ;;  %v9615_v56 = vld [vmem:[%s12927_s5] sm:$0xf]  ;;  %v8737_v9 = vld [vmem:[#allocation7 + $0x530] sm:$0xf0] }
 0x49e   : > { %vm6722_vm9 = vcmp.gt.f32.partialorder %v4463_v23, 0.0  ;;  %v6852_v27 = vmul.f32 %v11206_v13, %v4463_v23  ;;  %4691 = vmatmul.bf16.gmra.mxu2 %v13446_v43  ;;  %4780 = vmatmul.bf16.gmra.mxu3 %v13447_v12  ;;  %v11421_v28 = vperm.slane %v9615_v56, 1  ;;  %v8881_v56 = vld [vmem:[#allocation7 + $0x650] sm:$0xf0] }
 0x4a0   : > { %v11413_v35 = vsel %vm6722_vm9, %v4463_v23, %v6852_v27 }
 0x4a1   : > { %13449 = vst [vmem:[#allocation147_spill] sm:$0xff] %v11413_v35  ;;  %v4376_v61 = vpop.f32.mrf.mxu2  ;;  %v4465_v34 = vpop.f32.mrf.mxu3  ;;  %v8625_v35 = vld [vmem:[#allocation7 + $0x450] sm:$0xf0] }
 0x4a2   : > { %v4377_v5 = vadd.f32 %v4376_v61, %v4288_v36  ;;  %v4200_v7 = vpop.f32.mrf.mxu0  ;;  %v4289_v8 = vpop.f32.mrf.mxu1 }
 0x4a3   : > { %v4201_v10 = vadd.f32 %v4200_v7, %v11199_v22  ;;  %v13451_v7 = vld [vmem:[#allocation46_spill] sm:$0xff] }
 0x4a4   : > { %v4466_v58 = vadd.f32 %v4465_v34, %v4377_v5  ;;  %v13450_v5 = vld [vmem:[#allocation45_spill] sm:$0xff] }
 0x4a5   : > { %v4290_v40 = vadd.f32 %v4289_v8, %v4201_v10  ;;  %v13452_v10 = vld [vmem:[#allocation47_spill] sm:$0xff]  ;;  %v13453_v8 = vld [vmem:[#allocation48_spill] sm:$0xff] }
 0x4a6   : > { %v6856_v61 = vmul.f32 %v11206_v13, %v4466_v58  ;;  %vm6726_vm10 = vcmp.gt.f32.partialorder %v4466_v58, 0.0 }
 0x4a9   : > { %v4378_v23 = vpop.f32.mrf.mxu2  ;;  %v4467_v53 = vpop.f32.mrf.mxu3 }
 0x4aa   : > { %v4379_v15 = vadd.f32 %v4378_v23, %v4290_v40  ;;  %v4479_v27 = vpop.f32.mrf.mxu0  ;;  %v4568_v36 = vpop.f32.mrf.mxu1  ;;  %v9452_v40 = vld [vmem:[#allocation7 + $0x644] sm:$0xf] }
 0x4ab   : > { %v4480_v19 = vadd.f32 %v4479_v27, %v11421_v28  ;;  %v9388_v23 = vld [vmem:[#allocation7 + $0x444] sm:$0xf]  ;;  %v8884_v27 = vor.u32 %v9452_v40, %v8881_v56 }
 0x4ac   : > { %v4468_v33 = vadd.f32 %v4467_v53, %v4379_v15  ;;  %4518 = vmatmul.bf16.gmra.mxu0 %v13450_v5  ;;  %v9009_v15 = vld [vmem:[#allocation7 + $0x750] sm:$0xf0]  ;;  %v11430_v53 = vsel %vm6726_vm10, %v4466_v58, %v6856_v61  ;;  %v8628_v39 = vor.u32 %v9388_v23, %v8625_v35  ;;  %v9420_v58 = vld [vmem:[#allocation7 + $0x544] sm:$0xf] }
 0x4ad   : > { %v4569_v22 = vadd.f32 %v4568_v36, %v4480_v19  ;;  %4607 = vmatmul.bf16.gmra.mxu1 %v13451_v7  ;;  %13454 = vst [vmem:[#allocation148_spill] sm:$0xff] %v11430_v53  ;;  %v9012_v5 = vor.u32 %v9484_v51, %v9009_v15  ;;  %5009 = vmatpush.bf16.msrb.mxu2 %v8884_v27  ;;  %v13456_v7 = vld [vmem:[#allocation49_spill] sm:$0xff] }
 0x4ae   : > { %vm6730_vm11 = vcmp.gt.f32.partialorder %v4468_v33, 0.0  ;;  %v6860_v34 = vmul.f32 %v11206_v13, %v4468_v33  ;;  %4696 = vmatmul.bf16.gmra.mxu2 %v13452_v10  ;;  %4785 = vmatmul.bf16.gmra.mxu3 %v13453_v8 }
 0x4af   : > { %4831 = vmatpush.bf16.msrb.mxu0 %v8628_v39  ;;  %5098 = vmatpush.bf16.msrb.mxu3 %v9012_v5  ;;  %v13457_v39 = vld [vmem:[#allocation50_spill] sm:$0xff]  ;;  %v13459_v5 = vld [vmem:[#allocation52_spill] sm:$0xff] }
 0x4b0   : > { %v11432_v19 = vsel %vm6730_vm11, %v4468_v33, %v6860_v34  ;;  %v8753_v33 = vld [vmem:[#allocation7 + $0x550] sm:$0xf0] }
 0x4b1   : > { %13455 = vst [vmem:[#allocation149_spill] sm:$0xff] %v11432_v19  ;;  %v4657_v36 = vpop.f32.mrf.mxu2  ;;  %v4746_v12 = vpop.f32.mrf.mxu3  ;;  %v8756_v34 = vor.u32 %v9420_v58, %v8753_v33 }
 0x4b2   : > { %v4658_v10 = vadd.f32 %v4657_v36, %v4569_v22  ;;  %v4481_v8 = vpop.f32.mrf.mxu0  ;;  %v4570_v40 = vpop.f32.mrf.mxu1 }
 0x4b3   : > { %v4482_v43 = vadd.f32 %v4481_v8, %v11421_v28  ;;  %4920 = vmatpush.bf16.msrb.mxu1 %v8756_v34 }
 0x4b4   : > { %v11437_v56 = vadd.f32 %v4746_v12, %v4658_v10  ;;  %v13458_v12 = vld [vmem:[#allocation51_spill] sm:$0xff] }
 0x4b5   : > { %v4571_v61 = vadd.f32 %v4570_v40, %v4482_v43 }
 0x4b9   : > { %v4659_v51 = vpop.f32.mrf.mxu2  ;;  %v4748_v23 = vpop.f32.mrf.mxu3 }
 0x4ba   : > { %v4660_v35 = vadd.f32 %v4659_v51, %v4571_v61  ;;  %v4484_v15 = vpop.f32.mrf.mxu0  ;;  %v4573_v36 = vpop.f32.mrf.mxu1 }
 0x4bb   : > { %v4485_v22 = vadd.f32 %v4484_v15, %v11421_v28 }
 0x4bc   : > { %v11440_v27 = vadd.f32 %v4748_v23, %v4660_v35  ;;  %4523 = vmatmul.bf16.gmra.mxu0 %v13456_v7 }
 0x4bd   : > { %v4574_v8 = vadd.f32 %v4573_v36, %v4485_v22  ;;  %4612 = vmatmul.bf16.gmra.mxu1 %v13457_v39  ;;  %v8993_v39 = vld [vmem:[#allocation7 + $0x730] sm:$0xf0] }
 0x4be   : > { %4701 = vmatmul.bf16.gmra.mxu2 %v13458_v12  ;;  %4790 = vmatmul.bf16.gmra.mxu3 %v13459_v5  ;;  %v13460_v12 = vld [vmem:[#allocation53_spill] sm:$0xff] }
 0x4c1   : > { %v4662_v43 = vpop.f32.mrf.mxu2  ;;  %v4751_v40 = vpop.f32.mrf.mxu3 }
 0x4c2   : > { %v4663_v10 = vadd.f32 %v4662_v43, %v4574_v8  ;;  %v4486_v58 = vpop.f32.mrf.mxu0  ;;  %v4575_v61 = vpop.f32.mrf.mxu1  ;;  %v13461_v8 = vld [vmem:[#allocation54_spill] sm:$0xff]  ;;  %v13462_v43 = vld [vmem:[#allocation55_spill] sm:$0xff] }
 0x4c3   : > { %v4487_v33 = vadd.f32 %v4486_v58, %v11421_v28  ;;  %v13463_v58 = vld [vmem:[#allocation56_spill] sm:$0xff] }
 0x4c4   : > { %v11447_v34 = vadd.f32 %v4751_v40, %v4663_v10  ;;  %v9448_v10 = vld [vmem:[#allocation7 + $0x624] sm:$0xf]  ;;  %v8865_v40 = vld [vmem:[#allocation7 + $0x630] sm:$0xf0] }
 0x4c5   : > { %v4576_v51 = vadd.f32 %v4575_v61, %v4487_v33  ;;  %v9384_v33 = vld [vmem:[#allocation7 + $0x424] sm:$0xf]  ;;  %v8868_v61 = vor.u32 %v9448_v10, %v8865_v40 }
 0x4c7   : > { %5010 = vmatpush.bf16.msrb.mxu2 %v8868_v61 }
 0x4c9   : > { %v4664_v35 = vpop.f32.mrf.mxu2  ;;  %v4753_v15 = vpop.f32.mrf.mxu3 }
 0x4ca   : > { %v4665_v23 = vadd.f32 %v4664_v35, %v4576_v51  ;;  %v4489_v22 = vpop.f32.mrf.mxu0  ;;  %v4578_v53 = vpop.f32.mrf.mxu1  ;;  %v8609_v51 = vld [vmem:[#allocation7 + $0x430] sm:$0xf0]  ;;  %v9480_v35 = vld [vmem:[#allocation7 + $0x724] sm:$0xf] }
 0x4cb   : > { %v4490_v36 = vadd.f32 %v4489_v22, %v11421_v28  ;;  %v8612_v7 = vor.u32 %v9384_v33, %v8609_v51 }
 0x4cc   : > { %v11450_v19 = vadd.f32 %v4753_v15, %v4665_v23  ;;  %4528 = vmatmul.bf16.gmra.mxu0 %v13460_v12  ;;  %v8996_v23 = vor.u32 %v9480_v35, %v8993_v39 }
 0x4cd   : > { %v4579_v5 = vadd.f32 %v4578_v53, %v4490_v36  ;;  %4617 = vmatmul.bf16.gmra.mxu1 %v13461_v8  ;;  %4832 = vmatpush.bf16.msrb.mxu0 %v8612_v7  ;;  %v13465_v7 = vld [vmem:[#allocation58_spill] sm:$0xff] }
 0x4ce   : > { %4706 = vmatmul.bf16.gmra.mxu2 %v13462_v43  ;;  %4795 = vmatmul.bf16.gmra.mxu3 %v13463_v58  ;;  %v9416_v43 = vld [vmem:[#allocation7 + $0x524] sm:$0xf] }
 0x4cf   : > { %5099 = vmatpush.bf16.msrb.mxu3 %v8996_v23  ;;  %v8740_v40 = vor.u32 %v9416_v43, %v8737_v9  ;;  %v13466_v23 = vld [vmem:[#allocation59_spill] sm:$0xff] }
 0x4d1   : > { %v4667_v22 = vpop.f32.mrf.mxu2  ;;  %v4756_v53 = vpop.f32.mrf.mxu3  ;;  %4921 = vmatpush.bf16.msrb.mxu1 %v8740_v40 }
 0x4d2   : > { %v4668_v15 = vadd.f32 %v4667_v22, %v4579_v5  ;;  %v4491_v36 = vpop.f32.mrf.mxu0  ;;  %v4580_v12 = vpop.f32.mrf.mxu1  ;;  %v13464_v22 = vld [vmem:[#allocation57_spill] sm:$0xff] }
 0x4d3   : > { %v4492_v8 = vadd.f32 %v4491_v36, %v11421_v28 }
 0x4d4   : > { %v11457_v58 = vadd.f32 %v4756_v53, %v4668_v15  ;;  %v13467_v15 = vld [vmem:[#allocation60_spill] sm:$0xff] }
 0x4d5   : > { %v4581_v10 = vadd.f32 %v4580_v12, %v4492_v8 }
 0x4d9   : > { %v4669_v17 = vpop.f32.mrf.mxu2  ;;  %v4758_v33 = vpop.f32.mrf.mxu3 }
 0x4da   : > { %v4670_v6 = vadd.f32 %v4669_v17, %v4581_v10  ;;  %v4494_v39 = vpop.f32.mrf.mxu0  ;;  %v4583_v51 = vpop.f32.mrf.mxu1 }
 0x4db   : > { %v4495_v5 = vadd.f32 %v4494_v39, %v11421_v28 }
 0x4dc   : > { %v11460_v61 = vadd.f32 %v4758_v33, %v4670_v6  ;;  %4533 = vmatmul.bf16.gmra.mxu0 %v13464_v22  ;;  %v8977_v22 = vld [vmem:[#allocation7 + $0x710] sm:$0xf0] }
 0x4dd   : > { %v4584_v35 = vadd.f32 %v4583_v51, %v4495_v5  ;;  %4622 = vmatmul.bf16.gmra.mxu1 %v13465_v7  ;;  %v13468_v7 = vld [vmem:[#allocation61_spill] sm:$0xff] }
 0x4de   : > { %4711 = vmatmul.bf16.gmra.mxu2 %v13466_v23  ;;  %4800 = vmatmul.bf16.gmra.mxu3 %v13467_v15 }
 0x4e1   : > { %v4672_v9 = vpop.f32.mrf.mxu2  ;;  %v4761_v8 = vpop.f32.mrf.mxu3 }
 0x4e2   : > { %v4673_v12 = vadd.f32 %v4672_v9, %v4584_v35  ;;  %v4496_v17 = vpop.f32.mrf.mxu0  ;;  %v4585_v53 = vpop.f32.mrf.mxu1  ;;  %v13469_v35 = vld [vmem:[#allocation62_spill] sm:$0xff]  ;;  %v13470_v9 = vld [vmem:[#allocation63_spill] sm:$0xff] }
 0x4e3   : > { %v4497_v43 = vadd.f32 %v4496_v17, %v11421_v28  ;;  %v13471_v17 = vld [vmem:[#allocation64_spill] sm:$0xff] }
 0x4e4   : > { %v11467_v36 = vadd.f32 %v4761_v8, %v4673_v12  ;;  %v9444_v12 = vld [vmem:[#allocation7 + $0x604] sm:$0xf]  ;;  %v8849_v8 = vld [vmem:[#allocation7 + $0x610] sm:$0xf0] }
 0x4e5   : > { %v4586_v6 = vadd.f32 %v4585_v53, %v4497_v43  ;;  %v9380_v43 = vld [vmem:[#allocation7 + $0x404] sm:$0xf]  ;;  %v8852_v53 = vor.u32 %v9444_v12, %v8849_v8 }
 0x4e7   : > { %5011 = vmatpush.bf16.msrb.mxu2 %v8852_v53 }
 0x4e9   : > { %v4674_v10 = vpop.f32.mrf.mxu2  ;;  %v4763_v33 = vpop.f32.mrf.mxu3 }
 0x4ea   : > { %v4675_v40 = vadd.f32 %v4674_v10, %v4586_v6  ;;  %v4499_v39 = vpop.f32.mrf.mxu0  ;;  %v4588_v51 = vpop.f32.mrf.mxu1  ;;  %v8593_v6 = vld [vmem:[#allocation7 + $0x410] sm:$0xf0]  ;;  %v9476_v10 = vld [vmem:[#allocation7 + $0x704] sm:$0xf] }
 0x4eb   : > { %v4500_v5 = vadd.f32 %v4499_v39, %v11421_v28  ;;  %v8596_v63 = vor.u32 %v9380_v43, %v8593_v6 }
 0x4ec   : > { %v11470_v23 = vadd.f32 %v4763_v33, %v4675_v40  ;;  %4538 = vmatmul.bf16.gmra.mxu0 %v13468_v7  ;;  %v8980_v40 = vor.u32 %v9476_v10, %v8977_v22 }
 0x4ed   : > { %v4589_v15 = vadd.f32 %v4588_v51, %v4500_v5  ;;  %4627 = vmatmul.bf16.gmra.mxu1 %v13469_v35  ;;  %4833 = vmatpush.bf16.msrb.mxu0 %v8596_v63  ;;  %v13473_v63 = vld [vmem:[#allocation66_spill] sm:$0xff] }
 0x4ee   : > { %4716 = vmatmul.bf16.gmra.mxu2 %v13470_v9  ;;  %4805 = vmatmul.bf16.gmra.mxu3 %v13471_v17  ;;  %v9412_v9 = vld [vmem:[#allocation7 + $0x504] sm:$0xf] }
 0x4ef   : > { %5100 = vmatpush.bf16.msrb.mxu3 %v8980_v40  ;;  %v8724_v8 = vor.u32 %v9412_v9, %v8721_v60  ;;  %v13474_v40 = vld [vmem:[#allocation67_spill] sm:$0xff] }
 0x4f1   : > { %v4677_v39 = vpop.f32.mrf.mxu2  ;;  %v4766_v5 = vpop.f32.mrf.mxu3  ;;  %4922 = vmatpush.bf16.msrb.mxu1 %v8724_v8 }
 0x4f2   : > { %v4678_v33 = vadd.f32 %v4677_v39, %v4589_v15  ;;  %v4501_v51 = vpop.f32.mrf.mxu0  ;;  %v4590_v7 = vpop.f32.mrf.mxu1  ;;  %v13472_v39 = vld [vmem:[#allocation65_spill] sm:$0xff] }
 0x4f3   : > { %v4502_v35 = vadd.f32 %v4501_v51, %v11421_v28 }
 0x4f4   : > { %v11477_v17 = vadd.f32 %v4766_v5, %v4678_v33  ;;  %v13475_v33 = vld [vmem:[#allocation68_spill] sm:$0xff] }
 0x4f5   : > { %v4591_v12 = vadd.f32 %v4590_v7, %v4502_v35 }
 0x4f9   : > { %v4679_v59 = vpop.f32.mrf.mxu2  ;;  %v4768_v43 = vpop.f32.mrf.mxu3 }
 0x4fa   : > { %v4680_v4 = vadd.f32 %v4679_v59, %v4591_v12  ;;  %v4504_v22 = vpop.f32.mrf.mxu0  ;;  %v4593_v6 = vpop.f32.mrf.mxu1 }
 0x4fb   : > { %v4505_v15 = vadd.f32 %v4504_v22, %v11421_v28 }
 0x4fc   : > { %v11480_v53 = vadd.f32 %v4768_v43, %v4680_v4  ;;  %4543 = vmatmul.bf16.gmra.mxu0 %v13472_v39  ;;  %v9379_v39 = vld [vmem:[#allocation7 + $0x3f4] sm:$0xf0] }
 0x4fd   : > { %v4594_v10 = vadd.f32 %v4593_v6, %v4505_v15  ;;  %4632 = vmatmul.bf16.gmra.mxu1 %v13473_v63  ;;  %v13476_v63 = vld [vmem:[#allocation69_spill] sm:$0xff] }
 0x4fe   : > { %4721 = vmatmul.bf16.gmra.mxu2 %v13474_v40  ;;  %4810 = vmatmul.bf16.gmra.mxu3 %v13475_v33 }
 0x501   : > { %v4682_v60 = vpop.f32.mrf.mxu2  ;;  %v4771_v35 = vpop.f32.mrf.mxu3 }
 0x502   : > { %v4683_v7 = vadd.f32 %v4682_v60, %v4594_v10  ;;  %v4506_v59 = vpop.f32.mrf.mxu0  ;;  %v4595_v5 = vpop.f32.mrf.mxu1  ;;  %v13477_v10 = vld [vmem:[#allocation70_spill] sm:$0xff]  ;;  %v13478_v60 = vld [vmem:[#allocation71_spill] sm:$0xff] }
 0x503   : > { %v4507_v9 = vadd.f32 %v4506_v59, %v11421_v28  ;;  %v13479_v59 = vld [vmem:[#allocation72_spill] sm:$0xff] }
 0x504   : > { %v11487_v51 = vadd.f32 %v4771_v35, %v4683_v7  ;;  %v8455_v7 = vld [vmem:[#allocation7 + $0x2e8] sm:$0xf]  ;;  %v9347_v35 = vld [vmem:[#allocation7 + $0x2f4] sm:$0xf0] }
 0x505   : > { %v4596_v4 = vadd.f32 %v4595_v5, %v4507_v9  ;;  %v8199_v9 = vld [vmem:[#allocation7 + $0xe8] sm:$0xf]  ;;  %v8456_v5 = vor.u32 %v9347_v35, %v8455_v7 }
 0x507   : > { %5360 = vmatpush.bf16.msra.mxu2 %v8456_v5 }
 0x509   : > { %v4684_v12 = vpop.f32.mrf.mxu2  ;;  %v4773_v43 = vpop.f32.mrf.mxu3 }
 0x50a   : > { %v4685_v8 = vadd.f32 %v4684_v12, %v4596_v4  ;;  %v4509_v22 = vpop.f32.mrf.mxu0  ;;  %v4598_v6 = vpop.f32.mrf.mxu1  ;;  %v9283_v4 = vld [vmem:[#allocation7 + $0xf4] sm:$0xf0]  ;;  %v8583_v12 = vld [vmem:[#allocation7 + $0x3e8] sm:$0xf] }
 0x50b   : > { %v4510_v15 = vadd.f32 %v4509_v22, %v11421_v28  ;;  %v8200_v62 = vor.u32 %v9283_v4, %v8199_v9 }
 0x50c   : > { %v11490_v40 = vadd.f32 %v4773_v43, %v4685_v8  ;;  %4548 = vmatmul.bf16.gmra.mxu0 %v13476_v63  ;;  %v8584_v8 = vor.u32 %v9379_v39, %v8583_v12 }
 0x50d   : > { %v4599_v33 = vadd.f32 %v4598_v6, %v4510_v15  ;;  %4637 = vmatmul.bf16.gmra.mxu1 %v13477_v10  ;;  %5182 = vmatpush.bf16.msra.mxu0 %v8200_v62  ;;  %v13482_v62 = vld [vmem:[#allocation74_spill] sm:$0xff] }
 0x50e   : > { %4726 = vmatmul.bf16.gmra.mxu2 %v13478_v60  ;;  %4815 = vmatmul.bf16.gmra.mxu3 %v13479_v59  ;;  %v8327_v60 = vld [vmem:[#allocation7 + $0x1e8] sm:$0xf] }
 0x50f   : > { %5449 = vmatpush.bf16.msra.mxu3 %v8584_v8  ;;  %v8328_v35 = vor.u32 %v9315_v38, %v8327_v60  ;;  %v13483_v8 = vld [vmem:[#allocation75_spill] sm:$0xff] }
 0x511   : > { %v4687_v22 = vpop.f32.mrf.mxu2  ;;  %v4776_v15 = vpop.f32.mrf.mxu3  ;;  %5271 = vmatpush.bf16.msra.mxu1 %v8328_v35 }
 0x512   : > { %v4688_v43 = vadd.f32 %v4687_v22, %v4599_v33  ;;  %v4511_v6 = vpop.f32.mrf.mxu0  ;;  %v4600_v63 = vpop.f32.mrf.mxu1  ;;  %v13481_v22 = vld [vmem:[#allocation73_spill] sm:$0xff] }
 0x513   : > { %v4512_v10 = vadd.f32 %v4511_v6, %v11421_v28 }
 0x514   : > { %v11497_v59 = vadd.f32 %v4776_v15, %v4688_v43  ;;  %v13484_v43 = vld [vmem:[#allocation76_spill] sm:$0xff] }
 0x515   : > { %v4601_v7 = vadd.f32 %v4600_v63, %v4512_v10 }
 0x519   : > { %v4689_v24 = vpop.f32.mrf.mxu2  ;;  %v4778_v9 = vpop.f32.mrf.mxu3 }
 0x51a   : > { %v4690_v29 = vadd.f32 %v4689_v24, %v4601_v7  ;;  %v4514_v39 = vpop.f32.mrf.mxu0  ;;  %v4603_v4 = vpop.f32.mrf.mxu1 }
 0x51b   : > { %v4515_v33 = vadd.f32 %v4514_v39, %v11421_v28 }
 0x51c   : > { %v11500_v5 = vadd.f32 %v4778_v9, %v4690_v29  ;;  %4553 = vmatmul.bf16.gmra.mxu0 %v13481_v22  ;;  %v9375_v22 = vld [vmem:[#allocation7 + $0x3d4] sm:$0xf0] }
 0x51d   : > { %v4604_v12 = vadd.f32 %v4603_v4, %v4515_v33  ;;  %4642 = vmatmul.bf16.gmra.mxu1 %v13482_v62  ;;  %v13487_v62 = vld [vmem:[#allocation77_spill] sm:$0xff] }
 0x51e   : > { %13480 = vst [vmem:[#allocation150_spill] sm:$0xff] %v11500_v5  ;;  %4731 = vmatmul.bf16.gmra.mxu2 %v13483_v8  ;;  %4820 = vmatmul.bf16.gmra.mxu3 %v13484_v43 }
 0x521   : > { %v4692_v38 = vpop.f32.mrf.mxu2  ;;  %v4781_v10 = vpop.f32.mrf.mxu3 }
 0x522   : > { %v4693_v63 = vadd.f32 %v4692_v38, %v4604_v12  ;;  %v4516_v24 = vpop.f32.mrf.mxu0  ;;  %v4605_v15 = vpop.f32.mrf.mxu1  ;;  %v13488_v12 = vld [vmem:[#allocation78_spill] sm:$0xff]  ;;  %v13489_v38 = vld [vmem:[#allocation79_spill] sm:$0xff] }
 0x523   : > { %v4517_v60 = vadd.f32 %v4516_v24, %v11421_v28  ;;  %v13490_v24 = vld [vmem:[#allocation80_spill] sm:$0xff] }
 0x524   : > { %v11507_v6 = vadd.f32 %v4781_v10, %v4693_v63  ;;  %v8439_v63 = vld [vmem:[#allocation7 + $0x2c8] sm:$0xf]  ;;  %v9343_v10 = vld [vmem:[#allocation7 + $0x2d4] sm:$0xf0] }
 0x525   : > { %v4606_v29 = vadd.f32 %v4605_v15, %v4517_v60  ;;  %v8183_v60 = vld [vmem:[#allocation7 + $0xc8] sm:$0xf]  ;;  %v8440_v15 = vor.u32 %v9343_v10, %v8439_v63 }
 0x526   : > { %13485 = vst [vmem:[#allocation151_spill] sm:$0xff] %v11507_v6 }
 0x527   : > { %5361 = vmatpush.bf16.msra.mxu2 %v8440_v15 }
 0x529   : > { %v4694_v7 = vpop.f32.mrf.mxu2  ;;  %v4783_v9 = vpop.f32.mrf.mxu3 }
 0x52a   : > { %v4695_v35 = vadd.f32 %v4694_v7, %v4606_v29  ;;  %v4519_v39 = vpop.f32.mrf.mxu0  ;;  %v4608_v4 = vpop.f32.mrf.mxu1  ;;  %v9279_v29 = vld [vmem:[#allocation7 + $0xd4] sm:$0xf0]  ;;  %v8567_v7 = vld [vmem:[#allocation7 + $0x3c8] sm:$0xf] }
 0x52b   : > { %v4520_v33 = vadd.f32 %v4519_v39, %v11421_v28  ;;  %v8184_v55 = vor.u32 %v9279_v29, %v8183_v60 }
 0x52c   : > { %v11510_v8 = vadd.f32 %v4783_v9, %v4695_v35  ;;  %4834 = vmatmul.bf16.vlgmr.msrb.gmra.mxu0 %v13487_v62  ;;  %v8568_v35 = vor.u32 %v9375_v22, %v8567_v7 }
 0x52d   : > { %v4609_v43 = vadd.f32 %v4608_v4, %v4520_v33  ;;  %4923 = vmatmul.bf16.vlgmr.msrb.gmra.mxu1 %v13488_v12  ;;  %5183 = vmatpush.bf16.msra.mxu0 %v8184_v55  ;;  %v13494_v55 = vld [vmem:[#allocation82_spill] sm:$0xff] }
 0x52e   : > { %13486 = vst [vmem:[#allocation152_spill] sm:$0xff] %v11510_v8  ;;  %5012 = vmatmul.bf16.vlgmr.msrb.gmra.mxu2 %v13489_v38  ;;  %5101 = vmatmul.bf16.vlgmr.msrb.gmra.mxu3 %v13490_v24  ;;  %v8311_v38 = vld [vmem:[#allocation7 + $0x1c8] sm:$0xf]  ;;  %v9311_v8 = vld [vmem:[#allocation7 + $0x1d4] sm:$0xf0] }
 0x52f   : > { %5450 = vmatpush.bf16.msra.mxu3 %v8568_v35  ;;  %v8312_v10 = vor.u32 %v9311_v8, %v8311_v38  ;;  %v13495_v35 = vld [vmem:[#allocation83_spill] sm:$0xff] }
 0x531   : > { %v4697_v39 = vpop.f32.mrf.mxu2  ;;  %v4786_v33 = vpop.f32.mrf.mxu3  ;;  %5272 = vmatpush.bf16.msra.mxu1 %v8312_v10 }
 0x532   : > { %v4698_v9 = vadd.f32 %v4697_v39, %v4609_v43  ;;  %v4521_v4 = vpop.f32.mrf.mxu0  ;;  %v4610_v62 = vpop.f32.mrf.mxu1  ;;  %v13493_v39 = vld [vmem:[#allocation81_spill] sm:$0xff] }
 0x533   : > { %v4522_v12 = vadd.f32 %v4521_v4, %v11421_v28 }
 0x534   : > { %v11517_v24 = vadd.f32 %v4786_v33, %v4698_v9  ;;  %v13496_v9 = vld [vmem:[#allocation84_spill] sm:$0xff] }
 0x535   : > { %v4611_v63 = vadd.f32 %v4610_v62, %v4522_v12 }
 0x536   : > { %13491 = vst [vmem:[#allocation153_spill] sm:$0xff] %v11517_v24 }
 0x539   : > { %v4699_v6 = vpop.f32.mrf.mxu2  ;;  %v4788_v60 = vpop.f32.mrf.mxu3 }
 0x53a   : > { %v4700_v5 = vadd.f32 %v4699_v6, %v4611_v63  ;;  %v4524_v22 = vpop.f32.mrf.mxu0  ;;  %v4613_v29 = vpop.f32.mrf.mxu1 }
 0x53b   : > { %v4525_v43 = vadd.f32 %v4524_v22, %v11421_v28 }
 0x53c   : > { %v11520_v15 = vadd.f32 %v4788_v60, %v4700_v5  ;;  %4839 = vmatmul.bf16.gmra.mxu0 %v13493_v39  ;;  %v9371_v39 = vld [vmem:[#allocation7 + $0x3b4] sm:$0xf0] }
 0x53d   : > { %v4614_v7 = vadd.f32 %v4613_v29, %v4525_v43  ;;  %4928 = vmatmul.bf16.gmra.mxu1 %v13494_v55  ;;  %v13499_v55 = vld [vmem:[#allocation85_spill] sm:$0xff] }
 0x53e   : > { %13492 = vst [vmem:[#allocation154_spill] sm:$0xff] %v11520_v15  ;;  %5017 = vmatmul.bf16.gmra.mxu2 %v13495_v35  ;;  %5106 = vmatmul.bf16.gmra.mxu3 %v13496_v9 }
 0x541   : > { %v4702_v62 = vpop.f32.mrf.mxu2  ;;  %v4791_v12 = vpop.f32.mrf.mxu3 }
 0x542   : > { %v4703_v8 = vadd.f32 %v4702_v62, %v4614_v7  ;;  %v4526_v6 = vpop.f32.mrf.mxu0  ;;  %v4615_v33 = vpop.f32.mrf.mxu1  ;;  %v13500_v7 = vld [vmem:[#allocation86_spill] sm:$0xff]  ;;  %v13501_v62 = vld [vmem:[#allocation87_spill] sm:$0xff] }
 0x543   : > { %v4527_v38 = vadd.f32 %v4526_v6, %v11421_v28  ;;  %v13502_v6 = vld [vmem:[#allocation88_spill] sm:$0xff] }
 0x544   : > { %v11527_v4 = vadd.f32 %v4791_v12, %v4703_v8  ;;  %v8423_v8 = vld [vmem:[#allocation7 + $0x2a8] sm:$0xf]  ;;  %v9339_v12 = vld [vmem:[#allocation7 + $0x2b4] sm:$0xf0] }
 0x545   : > { %v4616_v5 = vadd.f32 %v4615_v33, %v4527_v38  ;;  %v8167_v38 = vld [vmem:[#allocation7 + $0xa8] sm:$0xf]  ;;  %v8424_v33 = vor.u32 %v9339_v12, %v8423_v8 }
 0x546   : > { %13497 = vst [vmem:[#allocation155_spill] sm:$0xff] %v11527_v4 }
 0x547   : > { %5362 = vmatpush.bf16.msra.mxu2 %v8424_v33 }
 0x549   : > { %v4704_v63 = vpop.f32.mrf.mxu2  ;;  %v4793_v60 = vpop.f32.mrf.mxu3 }
 0x54a   : > { %v4705_v10 = vadd.f32 %v4704_v63, %v4616_v5  ;;  %v4529_v22 = vpop.f32.mrf.mxu0  ;;  %v4618_v29 = vpop.f32.mrf.mxu1  ;;  %v9275_v5 = vld [vmem:[#allocation7 + $0xb4] sm:$0xf0]  ;;  %v8551_v63 = vld [vmem:[#allocation7 + $0x3a8] sm:$0xf] }
 0x54b   : > { %v4530_v43 = vadd.f32 %v4529_v22, %v11421_v28  ;;  %v8168_v4 = vor.u32 %v9275_v5, %v8167_v38 }
 0x54c   : > { %v11530_v35 = vadd.f32 %v4793_v60, %v4705_v10  ;;  %4844 = vmatmul.bf16.gmra.mxu0 %v13499_v55  ;;  %v8552_v10 = vor.u32 %v9371_v39, %v8551_v63 }
 0x54d   : > { %v4619_v9 = vadd.f32 %v4618_v29, %v4530_v43  ;;  %4933 = vmatmul.bf16.gmra.mxu1 %v13500_v7  ;;  %5184 = vmatpush.bf16.msra.mxu0 %v8168_v4  ;;  %v13506_v4 = vld [vmem:[#allocation90_spill] sm:$0xff] }
 0x54e   : > { %13498 = vst [vmem:[#allocation156_spill] sm:$0xff] %v11530_v35  ;;  %5022 = vmatmul.bf16.gmra.mxu2 %v13501_v62  ;;  %5111 = vmatmul.bf16.gmra.mxu3 %v13502_v6  ;;  %v8295_v62 = vld [vmem:[#allocation7 + $0x1a8] sm:$0xf]  ;;  %v9307_v35 = vld [vmem:[#allocation7 + $0x1b4] sm:$0xf0] }
 0x54f   : > { %5451 = vmatpush.bf16.msra.mxu3 %v8552_v10  ;;  %v8296_v12 = vor.u32 %v9307_v35, %v8295_v62  ;;  %v13507_v10 = vld [vmem:[#allocation91_spill] sm:$0xff] }
 0x551   : > { %v4707_v22 = vpop.f32.mrf.mxu2  ;;  %v4796_v43 = vpop.f32.mrf.mxu3  ;;  %5273 = vmatpush.bf16.msra.mxu1 %v8296_v12 }
 0x552   : > { %v4708_v60 = vadd.f32 %v4707_v22, %v4619_v9  ;;  %v4531_v29 = vpop.f32.mrf.mxu0  ;;  %v4620_v55 = vpop.f32.mrf.mxu1  ;;  %v13505_v22 = vld [vmem:[#allocation89_spill] sm:$0xff] }
 0x553   : > { %v4532_v7 = vadd.f32 %v4531_v29, %v11421_v28 }
 0x554   : > { %v11537_v6 = vadd.f32 %v4796_v43, %v4708_v60  ;;  %v13508_v60 = vld [vmem:[#allocation92_spill] sm:$0xff] }
 0x555   : > { %v4621_v8 = vadd.f32 %v4620_v55, %v4532_v7 }
 0x556   : > { %13503 = vst [vmem:[#allocation157_spill] sm:$0xff] %v11537_v6 }
 0x559   : > { %v4709_v15 = vpop.f32.mrf.mxu2  ;;  %v4798_v38 = vpop.f32.mrf.mxu3 }
 0x55a   : > { %v4710_v24 = vadd.f32 %v4709_v15, %v4621_v8  ;;  %v4534_v39 = vpop.f32.mrf.mxu0  ;;  %v4623_v5 = vpop.f32.mrf.mxu1 }
 0x55b   : > { %v4535_v9 = vadd.f32 %v4534_v39, %v11421_v28 }
 0x55c   : > { %v11540_v33 = vadd.f32 %v4798_v38, %v4710_v24  ;;  %4849 = vmatmul.bf16.gmra.mxu0 %v13505_v22  ;;  %v9367_v22 = vld [vmem:[#allocation7 + $0x394] sm:$0xf0] }
 0x55d   : > { %v4624_v63 = vadd.f32 %v4623_v5, %v4535_v9  ;;  %4938 = vmatmul.bf16.gmra.mxu1 %v13506_v4  ;;  %v13511_v4 = vld [vmem:[#allocation93_spill] sm:$0xff] }
 0x55e   : > { %13504 = vst [vmem:[#allocation158_spill] sm:$0xff] %v11540_v33  ;;  %5027 = vmatmul.bf16.gmra.mxu2 %v13507_v10  ;;  %5116 = vmatmul.bf16.gmra.mxu3 %v13508_v60 }
 0x561   : > { %v4712_v55 = vpop.f32.mrf.mxu2  ;;  %v4801_v7 = vpop.f32.mrf.mxu3 }
 0x562   : > { %v4713_v35 = vadd.f32 %v4712_v55, %v4624_v63  ;;  %v4536_v15 = vpop.f32.mrf.mxu0  ;;  %v4625_v43 = vpop.f32.mrf.mxu1  ;;  %v13512_v63 = vld [vmem:[#allocation94_spill] sm:$0xff]  ;;  %v13513_v55 = vld [vmem:[#allocation95_spill] sm:$0xff] }
 0x563   : > { %v4537_v62 = vadd.f32 %v4536_v15, %v11421_v28  ;;  %v13514_v15 = vld [vmem:[#allocation96_spill] sm:$0xff] }
 0x564   : > { %v11547_v29 = vadd.f32 %v4801_v7, %v4713_v35  ;;  %v8407_v35 = vld [vmem:[#allocation7 + $0x288] sm:$0xf]  ;;  %v9335_v7 = vld [vmem:[#allocation7 + $0x294] sm:$0xf0] }
 0x565   : > { %v4626_v24 = vadd.f32 %v4625_v43, %v4537_v62  ;;  %v8151_v62 = vld [vmem:[#allocation7 + $0x88] sm:$0xf]  ;;  %v8408_v43 = vor.u32 %v9335_v7, %v8407_v35 }
 0x566   : > { %13509 = vst [vmem:[#allocation159_spill] sm:$0xff] %v11547_v29 }
 0x567   : > { %5363 = vmatpush.bf16.msra.mxu2 %v8408_v43 }
 0x569   : > { %v4714_v8 = vpop.f32.mrf.mxu2  ;;  %v4803_v38 = vpop.f32.mrf.mxu3 }
 0x56a   : > { %v4715_v12 = vadd.f32 %v4714_v8, %v4626_v24  ;;  %v4539_v39 = vpop.f32.mrf.mxu0  ;;  %v4628_v5 = vpop.f32.mrf.mxu1  ;;  %v9271_v24 = vld [vmem:[#allocation7 + $0x94] sm:$0xf0]  ;;  %v8535_v8 = vld [vmem:[#allocation7 + $0x388] sm:$0xf] }
 0x56b   : > { %v4540_v9 = vadd.f32 %v4539_v39, %v11421_v28  ;;  %v8152_v29 = vor.u32 %v9271_v24, %v8151_v62 }
 0x56c   : > { %v11550_v10 = vadd.f32 %v4803_v38, %v4715_v12  ;;  %4854 = vmatmul.bf16.gmra.mxu0 %v13511_v4  ;;  %v8536_v12 = vor.u32 %v9367_v22, %v8535_v8 }
 0x56d   : > { %v4629_v60 = vadd.f32 %v4628_v5, %v4540_v9  ;;  %4943 = vmatmul.bf16.gmra.mxu1 %v13512_v63  ;;  %5185 = vmatpush.bf16.msra.mxu0 %v8152_v29  ;;  %v13518_v29 = vld [vmem:[#allocation98_spill] sm:$0xff] }
 0x56e   : > { %13510 = vst [vmem:[#allocation160_spill] sm:$0xff] %v11550_v10  ;;  %5032 = vmatmul.bf16.gmra.mxu2 %v13513_v55  ;;  %5121 = vmatmul.bf16.gmra.mxu3 %v13514_v15  ;;  %v8279_v55 = vld [vmem:[#allocation7 + $0x188] sm:$0xf]  ;;  %v9303_v10 = vld [vmem:[#allocation7 + $0x194] sm:$0xf0] }
 0x56f   : > { %5452 = vmatpush.bf16.msra.mxu3 %v8536_v12  ;;  %v8280_v7 = vor.u32 %v9303_v10, %v8279_v55  ;;  %v13519_v12 = vld [vmem:[#allocation99_spill] sm:$0xff] }
 0x571   : > { %v4717_v39 = vpop.f32.mrf.mxu2  ;;  %v4806_v9 = vpop.f32.mrf.mxu3  ;;  %5274 = vmatpush.bf16.msra.mxu1 %v8280_v7 }
 0x572   : > { %v4718_v38 = vadd.f32 %v4717_v39, %v4629_v60  ;;  %v4541_v5 = vpop.f32.mrf.mxu0  ;;  %v4630_v4 = vpop.f32.mrf.mxu1  ;;  %v13517_v39 = vld [vmem:[#allocation97_spill] sm:$0xff] }
 0x573   : > { %v4542_v63 = vadd.f32 %v4541_v5, %v11421_v28 }
 0x574   : > { %v11557_v15 = vadd.f32 %v4806_v9, %v4718_v38  ;;  %v13520_v38 = vld [vmem:[#allocation100_spill] sm:$0xff] }
 0x575   : > { %v4631_v35 = vadd.f32 %v4630_v4, %v4542_v63 }
 0x576   : > { %13515 = vst [vmem:[#allocation161_spill] sm:$0xff] %v11557_v15 }
 0x579   : > { %v4719_v33 = vpop.f32.mrf.mxu2  ;;  %v4808_v62 = vpop.f32.mrf.mxu3 }
 0x57a   : > { %v4720_v6 = vadd.f32 %v4719_v33, %v4631_v35  ;;  %v4544_v22 = vpop.f32.mrf.mxu0  ;;  %v4633_v24 = vpop.f32.mrf.mxu1 }
 0x57b   : > { %v4545_v60 = vadd.f32 %v4544_v22, %v11421_v28 }
 0x57c   : > { %v11560_v43 = vadd.f32 %v4808_v62, %v4720_v6  ;;  %4859 = vmatmul.bf16.gmra.mxu0 %v13517_v39  ;;  %v9363_v39 = vld [vmem:[#allocation7 + $0x374] sm:$0xf0] }
 0x57d   : > { %v4634_v8 = vadd.f32 %v4633_v24, %v4545_v60  ;;  %4948 = vmatmul.bf16.gmra.mxu1 %v13518_v29  ;;  %v13523_v29 = vld [vmem:[#allocation101_spill] sm:$0xff] }
 0x57e   : > { %13516 = vst [vmem:[#allocation162_spill] sm:$0xff] %v11560_v43  ;;  %5037 = vmatmul.bf16.gmra.mxu2 %v13519_v12  ;;  %5126 = vmatmul.bf16.gmra.mxu3 %v13520_v38 }
 0x581   : > { %v4722_v4 = vpop.f32.mrf.mxu2  ;;  %v4811_v63 = vpop.f32.mrf.mxu3 }
 0x582   : > { %v4723_v10 = vadd.f32 %v4722_v4, %v4634_v8  ;;  %v4546_v33 = vpop.f32.mrf.mxu0  ;;  %v4635_v9 = vpop.f32.mrf.mxu1  ;;  %v13524_v8 = vld [vmem:[#allocation102_spill] sm:$0xff]  ;;  %v13525_v4 = vld [vmem:[#allocation103_spill] sm:$0xff] }
 0x583   : > { %v4547_v55 = vadd.f32 %v4546_v33, %v11421_v28  ;;  %v13526_v33 = vld [vmem:[#allocation104_spill] sm:$0xff] }
 0x584   : > { %v11567_v5 = vadd.f32 %v4811_v63, %v4723_v10  ;;  %v8391_v10 = vld [vmem:[#allocation7 + $0x268] sm:$0xf]  ;;  %v9331_v63 = vld [vmem:[#allocation7 + $0x274] sm:$0xf0] }
 0x585   : > { %v4636_v6 = vadd.f32 %v4635_v9, %v4547_v55  ;;  %v8135_v55 = vld [vmem:[#allocation7 + $0x68] sm:$0xf]  ;;  %v8392_v9 = vor.u32 %v9331_v63, %v8391_v10  ;;  %v9299_v10 = vld [vmem:[#allocation7 + $0x174] sm:$0xf0] }
 0x586   : > { %13521 = vst [vmem:[#allocation163_spill] sm:$0xff] %v11567_v5 }
 0x587   : > { %5364 = vmatpush.bf16.msra.mxu2 %v8392_v9 }
 0x589   : > { %v4724_v35 = vpop.f32.mrf.mxu2  ;;  %v4813_v62 = vpop.f32.mrf.mxu3 }
 0x58a   : > { %v4725_v7 = vadd.f32 %v4724_v35, %v4636_v6  ;;  %v4549_v22 = vpop.f32.mrf.mxu0  ;;  %v4638_v24 = vpop.f32.mrf.mxu1  ;;  %v9267_v6 = vld [vmem:[#allocation7 + $0x74] sm:$0xf0]  ;;  %v8519_v35 = vld [vmem:[#allocation7 + $0x368] sm:$0xf] }
 0x58b   : > { %v4550_v60 = vadd.f32 %v4549_v22, %v11421_v28  ;;  %v8136_v5 = vor.u32 %v9267_v6, %v8135_v55 }
 0x58c   : > { %v11570_v12 = vadd.f32 %v4813_v62, %v4725_v7  ;;  %4864 = vmatmul.bf16.gmra.mxu0 %v13523_v29  ;;  %v8520_v7 = vor.u32 %v9363_v39, %v8519_v35 }
 0x58d   : > { %v4639_v38 = vadd.f32 %v4638_v24, %v4550_v60  ;;  %4953 = vmatmul.bf16.gmra.mxu1 %v13524_v8  ;;  %5186 = vmatpush.bf16.msra.mxu0 %v8136_v5 }
 0x58e   : > { %13522 = vst [vmem:[#allocation164_spill] sm:$0xff] %v11570_v12  ;;  %5042 = vmatmul.bf16.gmra.mxu2 %v13525_v4  ;;  %5131 = vmatmul.bf16.gmra.mxu3 %v13526_v33  ;;  %v8263_v12 = vld [vmem:[#allocation7 + $0x168] sm:$0xf] }
 0x58f   : > { %5453 = vmatpush.bf16.msra.mxu3 %v8520_v7  ;;  %v8264_v43 = vor.u32 %v9299_v10, %v8263_v12 }
 0x591   : > { %v4727_v22 = vpop.f32.mrf.mxu2  ;;  %v4816_v60 = vpop.f32.mrf.mxu3  ;;  %5275 = vmatpush.bf16.msra.mxu1 %v8264_v43 }
 0x592   : > { %v4728_v62 = vadd.f32 %v4727_v22, %v4639_v38  ;;  %v4551_v24 = vpop.f32.mrf.mxu0  ;;  %v4640_v29 = vpop.f32.mrf.mxu1 }
 0x593   : > { %v4552_v8 = vadd.f32 %v4551_v24, %v11421_v28 }
 0x594   : > { %v11577_v33 = vadd.f32 %v4816_v60, %v4728_v62 }
 0x595   : > { %v4641_v4 = vadd.f32 %v4640_v29, %v4552_v8 }
 0x599   : > { %v4729_v63 = vpop.f32.mrf.mxu2  ;;  %v4818_v11 = vpop.f32.mrf.mxu3 }
 0x59a   : > { %v4730_v15 = vadd.f32 %v4729_v63, %v4641_v4  ;;  %v4554_v55 = vpop.f32.mrf.mxu0  ;;  %v4643_v38 = vpop.f32.mrf.mxu1 }
 0x59b   : > { %v4555_v39 = vadd.f32 %v4554_v55, %v11421_v28  ;;  %v13527_v55 = vld [vmem:[#allocation109_spill] sm:$0xff] }
 0x59c   : > { %v11580_v9 = vadd.f32 %v4818_v11, %v4730_v15  ;;  %4869 = vmatmul.bf16.gmra.mxu0 %v10797_v3 }
 0x59d   : > { %v4644_v6 = vadd.f32 %v4643_v38, %v4555_v39  ;;  %4958 = vmatmul.bf16.gmra.mxu1 %v10799_v49  ;;  %v13528_v39 = vld [vmem:[#allocation110_spill] sm:$0xff] }
 0x59e   : > { %5047 = vmatmul.bf16.gmra.mxu2 %v13365_v20  ;;  %5136 = vmatmul.bf16.gmra.mxu3 %v13366_v31  ;;  %v8375_v38 = vld [vmem:[#allocation7 + $0x248] sm:$0xf] }
 0x5a1   : > { %v4732_v29 = vpop.f32.mrf.mxu2  ;;  %v4821_v5 = vpop.f32.mrf.mxu3 }
 0x5a2   : > { %v4733_v12 = vadd.f32 %v4732_v29, %v4644_v6  ;;  %v4556_v8 = vpop.f32.mrf.mxu0  ;;  %v4645_v35 = vpop.f32.mrf.mxu1  ;;  %v9327_v6 = vld [vmem:[#allocation7 + $0x254] sm:$0xf0]  ;;  %v8119_v29 = vld [vmem:[#allocation7 + $0x48] sm:$0xf] }
 0x5a3   : > { %v4557_v4 = vadd.f32 %v4556_v8, %v11421_v28  ;;  %v13529_v28 = vld [vmem:[#allocation111_spill] sm:$0xff]  ;;  %v8503_v8 = vld [vmem:[#allocation7 + $0x348] sm:$0xf] }
 0x5a4   : > { %v11587_v22 = vadd.f32 %v4821_v5, %v4733_v12  ;;  %v8376_v12 = vor.u32 %v9327_v6, %v8375_v38  ;;  %v9263_v5 = vld [vmem:[#allocation7 + $0x54] sm:$0xf0] }
 0x5a5   : > { %v4646_v11 = vadd.f32 %v4645_v35, %v4557_v4  ;;  %v9359_v4 = vld [vmem:[#allocation7 + $0x354] sm:$0xf0]  ;;  %v8120_v35 = vor.u32 %v9263_v5, %v8119_v29 }
 0x5a6   : > { %5365 = vmatpush.bf16.msra.mxu2 %v8376_v12 }
 0x5a7   : > { %5187 = vmatpush.bf16.msra.mxu0 %v8120_v35 }
 0x5a9   : > { %v4734_v15 = vpop.f32.mrf.mxu2  ;;  %v4823_v7 = vpop.f32.mrf.mxu3 }
 0x5aa   : > { %v4735_v43 = vadd.f32 %v4734_v15, %v4646_v11  ;;  %v4835_v62 = vpop.f32.mrf.mxu0  ;;  %v4924_v24 = vpop.f32.mrf.mxu1  ;;  %v8504_v11 = vor.u32 %v9359_v4, %v8503_v8 }
 0x5ab   : > { %v4836_v60 = vadd.f32 %v4835_v62, %v11437_v56 }
 0x5ac   : > { %v11590_v10 = vadd.f32 %v4823_v7, %v4735_v43  ;;  %4874 = vmatmul.bf16.gmra.mxu0 %v10825_v1  ;;  %5454 = vmatpush.bf16.msra.mxu3 %v8504_v11 }
 0x5ad   : > { %v4925_v63 = vadd.f32 %v4924_v24, %v4836_v60  ;;  %4963 = vmatmul.bf16.gmra.mxu1 %v13527_v55  ;;  %v9295_v55 = vld [vmem:[#allocation7 + $0x154] sm:$0xf0] }
 0x5ae   : > { %5052 = vmatmul.bf16.gmra.mxu2 %v13528_v39  ;;  %5141 = vmatmul.bf16.gmra.mxu3 %v13529_v28  ;;  %v8247_v39 = vld [vmem:[#allocation7 + $0x148] sm:$0xf] }
 0x5af   : > { %v8248_v38 = vor.u32 %v9295_v55, %v8247_v39 }
 0x5b1   : > { %v5013_v56 = vpop.f32.mrf.mxu2  ;;  %v5102_v43 = vpop.f32.mrf.mxu3  ;;  %5276 = vmatpush.bf16.msra.mxu1 %v8248_v38 }
 0x5b2   : > { %v5014_v15 = vadd.f32 %v5013_v56, %v4925_v63  ;;  %v4837_v7 = vpop.f32.mrf.mxu0  ;;  %v4926_v60 = vpop.f32.mrf.mxu1 }
 0x5b3   : > { %v4838_v62 = vadd.f32 %v4837_v7, %v11440_v27 }
 0x5b4   : > { %v5103_v24 = vadd.f32 %v5102_v43, %v5014_v15 }
 0x5b5   : > { %v4927_v28 = vadd.f32 %v4926_v60, %v4838_v62 }
 0x5b6   : > { %v6737_v12 = vmul.f32 %v11206_v13, %v5103_v24  ;;  %vm6607_vm12 = vcmp.gt.f32.partialorder %v5103_v24, 0.0 }
 0x5b8   : > { %v11604_v55 = vsel %vm6607_vm12, %v5103_v24, %v6737_v12  ;;  %v8359_v12 = vld [vmem:[#allocation7 + $0x228] sm:$0xf] }
 0x5b9   : > { %v5015_v6 = vpop.f32.mrf.mxu2  ;;  %v5104_v31 = vpop.f32.mrf.mxu3  ;;  %13530 = vst [vmem:[#allocation165_spill] sm:$0xff] %v11604_v55 }
 0x5ba   : > { %v5016_v1 = vadd.f32 %v5015_v6, %v4927_v28  ;;  %v4840_v29 = vpop.f32.mrf.mxu0  ;;  %v4929_v5 = vpop.f32.mrf.mxu1 }
 0x5bb   : > { %v4841_v63 = vadd.f32 %v4840_v29, %v11447_v34 }
 0x5bc   : > { %v5105_v8 = vadd.f32 %v5104_v31, %v5016_v1  ;;  %4879 = vmatmul.bf16.gmra.mxu0 %v10853_v26  ;;  %v13544_v1 = vld [vmem:[#allocation150_spill] sm:$0xff] }
 0x5bd   : > { %v4930_v27 = vadd.f32 %v4929_v5, %v4841_v63  ;;  %4968 = vmatmul.bf16.gmra.mxu1 %v10855_v46 }
 0x5be   : > { %vm6611_vm13 = vcmp.gt.f32.partialorder %v5105_v8, 0.0  ;;  %v6741_v4 = vmul.f32 %v11206_v13, %v5105_v8  ;;  %5057 = vmatmul.bf16.gmra.mxu2 %v10866_v2  ;;  %5146 = vmatmul.bf16.gmra.mxu3 %v10870_v32 }
 0x5c0   : > { %v11606_v34 = vsel %vm6611_vm13, %v5105_v8, %v6741_v4  ;;  %v9323_v8 = vld [vmem:[#allocation7 + $0x234] sm:$0xf0] }
 0x5c1   : > { %13531 = vst [vmem:[#allocation166_spill] sm:$0xff] %v11606_v34  ;;  %v5018_v31 = vpop.f32.mrf.mxu2  ;;  %v5107_v28 = vpop.f32.mrf.mxu3  ;;  %v9259_v4 = vld [vmem:[#allocation7 + $0x34] sm:$0xf0] }
 0x5c2   : > { %v5019_v39 = vadd.f32 %v5018_v31, %v4930_v27  ;;  %v4842_v56 = vpop.f32.mrf.mxu0  ;;  %v4931_v11 = vpop.f32.mrf.mxu1  ;;  %v8360_v27 = vor.u32 %v9323_v8, %v8359_v12  ;;  %v8487_v31 = vld [vmem:[#allocation7 + $0x328] sm:$0xf] }
 0x5c3   : > { %v4843_v35 = vadd.f32 %v4842_v56, %v11450_v19 }
 0x5c4   : > { %v5108_v15 = vadd.f32 %v5107_v28, %v5019_v39  ;;  %v9355_v39 = vld [vmem:[#allocation7 + $0x334] sm:$0xf0]  ;;  %5366 = vmatpush.bf16.msra.mxu2 %v8360_v27 }
 0x5c5   : > { %v4932_v43 = vadd.f32 %v4931_v11, %v4843_v35 }
 0x5c6   : > { %v6745_v29 = vmul.f32 %v11206_v13, %v5108_v15  ;;  %vm6615_vm14 = vcmp.gt.f32.partialorder %v5108_v15, 0.0 }
 0x5c8   : > { %v11618_v28 = vsel %vm6615_vm14, %v5108_v15, %v6745_v29  ;;  %v8231_v29 = vld [vmem:[#allocation7 + $0x128] sm:$0xf] }
 0x5c9   : > { %v5020_v7 = vpop.f32.mrf.mxu2  ;;  %v5109_v60 = vpop.f32.mrf.mxu3  ;;  %13532 = vst [vmem:[#allocation167_spill] sm:$0xff] %v11618_v28 }
 0x5ca   : > { %v5021_v62 = vadd.f32 %v5020_v7, %v4932_v43  ;;  %v4845_v38 = vpop.f32.mrf.mxu0  ;;  %v4934_v6 = vpop.f32.mrf.mxu1  ;;  %v8488_v43 = vor.u32 %v9355_v39, %v8487_v31 }
 0x5cb   : > { %v4846_v24 = vadd.f32 %v4845_v38, %v11457_v58  ;;  %v8103_v58 = vld [vmem:[#allocation7 + $0x28] sm:$0xf] }
 0x5cc   : > { %v5110_v63 = vadd.f32 %v5109_v60, %v5021_v62  ;;  %4884 = vmatmul.bf16.gmra.mxu0 %v10881_v54  ;;  %v8104_v11 = vor.u32 %v9259_v4, %v8103_v58  ;;  %5455 = vmatpush.bf16.msra.mxu3 %v8488_v43 }
 0x5cd   : > { %v4935_v5 = vadd.f32 %v4934_v6, %v4846_v24  ;;  %4973 = vmatmul.bf16.gmra.mxu1 %v10883_v44 }
 0x5ce   : > { %vm6619_vm15 = vcmp.gt.f32.partialorder %v5110_v63, 0.0  ;;  %v6749_v19 = vmul.f32 %v11206_v13, %v5110_v63  ;;  %5062 = vmatmul.bf16.gmra.mxu2 %v10894_v57  ;;  %5151 = vmatmul.bf16.gmra.mxu3 %v10898_v42 }
 0x5cf   : > { %5188 = vmatpush.bf16.msra.mxu0 %v8104_v11 }
 0x5d0   : > { %v11620_v56 = vsel %vm6619_vm15, %v5110_v63, %v6749_v19  ;;  %v9291_v63 = vld [vmem:[#allocation7 + $0x134] sm:$0xf0] }
 0x5d1   : > { %13533 = vst [vmem:[#allocation168_spill] sm:$0xff] %v11620_v56  ;;  %v5023_v35 = vpop.f32.mrf.mxu2  ;;  %v5112_v60 = vpop.f32.mrf.mxu3  ;;  %v8232_v19 = vor.u32 %v9291_v63, %v8231_v29  ;;  %v13560_v56 = vld [vmem:[#allocation154_spill] sm:$0xff] }
 0x5d2   : > { %v5024_v62 = vadd.f32 %v5023_v35, %v4935_v5  ;;  %v4847_v38 = vpop.f32.mrf.mxu0  ;;  %v4936_v6 = vpop.f32.mrf.mxu1 }
 0x5d3   : > { %v4848_v24 = vadd.f32 %v4847_v38, %v11460_v61  ;;  %5277 = vmatpush.bf16.msra.mxu1 %v8232_v19 }
 0x5d4   : > { %v5113_v12 = vadd.f32 %v5112_v60, %v5024_v62 }
 0x5d5   : > { %v4937_v15 = vadd.f32 %v4936_v6, %v4848_v24 }
 0x5d6   : > { %v6753_v27 = vmul.f32 %v11206_v13, %v5113_v12  ;;  %vm6623_vm1 = vcmp.gt.f32.partialorder %v5113_v12, 0.0 }
 0x5d8   : > { %v11632_v43 = vsel %vm6623_vm1, %v5113_v12, %v6753_v27 }
 0x5d9   : > { %v5025_v8 = vpop.f32.mrf.mxu2  ;;  %v5114_v4 = vpop.f32.mrf.mxu3  ;;  %13534 = vst [vmem:[#allocation169_spill] sm:$0xff] %v11632_v43 }
 0x5da   : > { %v5026_v58 = vadd.f32 %v5025_v8, %v4937_v15  ;;  %v4850_v31 = vpop.f32.mrf.mxu0  ;;  %v4939_v39 = vpop.f32.mrf.mxu1 }
 0x5db   : > { %v4851_v5 = vadd.f32 %v4850_v31, %v11467_v36 }
 0x5dc   : > { %v5115_v35 = vadd.f32 %v5114_v4, %v5026_v58  ;;  %4889 = vmatmul.bf16.gmra.mxu0 %v10909_v50 }
 0x5dd   : > { %v4940_v61 = vadd.f32 %v4939_v39, %v4851_v5  ;;  %4978 = vmatmul.bf16.gmra.mxu1 %v10911_v25 }
 0x5de   : > { %vm6627_vm2 = vcmp.gt.f32.partialorder %v5115_v35, 0.0  ;;  %v6757_v11 = vmul.f32 %v11206_v13, %v5115_v35  ;;  %5067 = vmatmul.bf16.gmra.mxu2 %v13371_v21  ;;  %5156 = vmatmul.bf16.gmra.mxu3 %v13372_v45 }
 0x5e0   : > { %v11634_v36 = vsel %vm6627_vm2, %v5115_v35, %v6757_v11  ;;  %v9319_v11 = vld [vmem:[#allocation7 + $0x214] sm:$0xf0] }
 0x5e1   : > { %13535 = vst [vmem:[#allocation170_spill] sm:$0xff] %v11634_v36  ;;  %v5028_v62 = vpop.f32.mrf.mxu2  ;;  %v5117_v24 = vpop.f32.mrf.mxu3 }
 0x5e2   : > { %v5029_v38 = vadd.f32 %v5028_v62, %v4940_v61  ;;  %v4852_v6 = vpop.f32.mrf.mxu0  ;;  %v4941_v29 = vpop.f32.mrf.mxu1  ;;  %v8343_v61 = vld [vmem:[#allocation7 + $0x208] sm:$0xf] }
 0x5e3   : > { %v4853_v15 = vadd.f32 %v4852_v6, %v11470_v23  ;;  %v8344_v62 = vor.u32 %v9319_v11, %v8343_v61  ;;  %v9351_v6 = vld [vmem:[#allocation7 + $0x314] sm:$0xf0] }
 0x5e4   : > { %v5118_v63 = vadd.f32 %v5117_v24, %v5029_v38  ;;  %v9255_v38 = vld [vmem:[#allocation7 + $0x14] sm:$0xf0]  ;;  %v8471_v24 = vld [vmem:[#allocation7 + $0x308] sm:$0xf] }
 0x5e5   : > { %v4942_v19 = vadd.f32 %v4941_v29, %v4853_v15  ;;  %5367 = vmatpush.bf16.msra.mxu2 %v8344_v62 }
 0x5e6   : > { %v6761_v39 = vmul.f32 %v11206_v13, %v5118_v63  ;;  %vm6631_vm3 = vcmp.gt.f32.partialorder %v5118_v63, 0.0 }
 0x5e8   : > { %v11646_v15 = vsel %vm6631_vm3, %v5118_v63, %v6761_v39  ;;  %v8215_v39 = vld [vmem:[#allocation7 + $0x108] sm:$0xf] }
 0x5e9   : > { %v5030_v8 = vpop.f32.mrf.mxu2  ;;  %v5119_v4 = vpop.f32.mrf.mxu3  ;;  %13536 = vst [vmem:[#allocation171_spill] sm:$0xff] %v11646_v15 }
 0x5ea   : > { %v5031_v58 = vadd.f32 %v5030_v8, %v4942_v19  ;;  %v4855_v31 = vpop.f32.mrf.mxu0  ;;  %v4944_v5 = vpop.f32.mrf.mxu1 }
 0x5eb   : > { %v4856_v12 = vadd.f32 %v4855_v31, %v11477_v17  ;;  %v8087_v17 = vld [vmem:[#allocation7 + $0x8] sm:$0xf] }
 0x5ec   : > { %v5120_v27 = vadd.f32 %v5119_v4, %v5031_v58  ;;  %4894 = vmatmul.bf16.gmra.mxu0 %v10937_v16  ;;  %v8088_v8 = vor.u32 %v9255_v38, %v8087_v17  ;;  %v8472_v58 = vor.u32 %v9351_v6, %v8471_v24 }
 0x5ed   : > { %v4945_v35 = vadd.f32 %v4944_v5, %v4856_v12  ;;  %4983 = vmatmul.bf16.gmra.mxu1 %v13375_v14 }
 0x5ee   : > { %vm6635_vm4 = vcmp.gt.f32.partialorder %v5120_v27, 0.0  ;;  %v6765_v23 = vmul.f32 %v11206_v13, %v5120_v27  ;;  %5072 = vmatmul.bf16.gmra.mxu2 %v13376_v48  ;;  %5161 = vmatmul.bf16.gmra.mxu3 %v13377_v0 }
 0x5ef   : > { %5189 = vmatpush.bf16.msra.mxu0 %v8088_v8  ;;  %5456 = vmatpush.bf16.msra.mxu3 %v8472_v58 }
 0x5f0   : > { %v11648_v29 = vsel %vm6635_vm4, %v5120_v27, %v6765_v23  ;;  %v9287_v27 = vld [vmem:[#allocation7 + $0x114] sm:$0xf0] }
 0x5f1   : > { %13537 = vst [vmem:[#allocation172_spill] sm:$0xff] %v11648_v29  ;;  %v5033_v19 = vpop.f32.mrf.mxu2  ;;  %v5122_v12 = vpop.f32.mrf.mxu3  ;;  %v8216_v23 = vor.u32 %v9287_v27, %v8215_v39 }
 0x5f2   : > { %v5034_v31 = vadd.f32 %v5033_v19, %v4945_v35  ;;  %v4857_v5 = vpop.f32.mrf.mxu0  ;;  %v4946_v61 = vpop.f32.mrf.mxu1 }
 0x5f3   : > { %v4858_v60 = vadd.f32 %v4857_v5, %v11480_v53  ;;  %5278 = vmatpush.bf16.msra.mxu1 %v8216_v23 }
 0x5f4   : > { %v5123_v11 = vadd.f32 %v5122_v12, %v5034_v31 }
 0x5f5   : > { %v4947_v63 = vadd.f32 %v4946_v61, %v4858_v60 }
 0x5f6   : > { %v6769_v62 = vmul.f32 %v11206_v13, %v5123_v11  ;;  %vm6639_vm5 = vcmp.gt.f32.partialorder %v5123_v11, 0.0 }
 0x5f9   : > { %v5035_v7 = vpop.f32.mrf.mxu2  ;;  %v5124_v38 = vpop.f32.mrf.mxu3 }
 0x5fa   : > { %v5036_v17 = vadd.f32 %v5035_v7, %v4947_v63  ;;  %v4860_v24 = vpop.f32.mrf.mxu0  ;;  %v4949_v6 = vpop.f32.mrf.mxu1  ;;  %v11660_v7 = vsel %vm6639_vm5, %v5123_v11, %v6769_v62 }
 0x5fb   : > { %v4861_v35 = vadd.f32 %v4860_v24, %v11487_v51  ;;  %13538 = vst [vmem:[#allocation173_spill] sm:$0xff] %v11660_v7 }
 0x5fc   : > { %v5125_v19 = vadd.f32 %v5124_v38, %v5036_v17  ;;  %4899 = vmatmul.bf16.gmra.mxu0 %v13380_v18 }
 0x5fd   : > { %v4950_v53 = vadd.f32 %v4949_v6, %v4861_v35  ;;  %4988 = vmatmul.bf16.gmra.mxu1 %v13381_v37 }
 0x5fe   : > { %vm6643_vm6 = vcmp.gt.f32.partialorder %v5125_v19, 0.0  ;;  %v6773_v60 = vmul.f32 %v11206_v13, %v5125_v19  ;;  %5077 = vmatmul.bf16.gmra.mxu2 %v13382_v52  ;;  %5166 = vmatmul.bf16.gmra.mxu3 %v13383_v41 }
 0x600   : > { %v11662_v51 = vsel %vm6643_vm6, %v5125_v19, %v6773_v60  ;;  %v13541_v60 = vld [vmem:[#allocation122_spill] sm:$0xff] }
 0x601   : > { %13539 = vst [vmem:[#allocation174_spill] sm:$0xff] %v11662_v51  ;;  %v5038_v8 = vpop.f32.mrf.mxu2  ;;  %v5127_v12 = vpop.f32.mrf.mxu3 }
 0x602   : > { %v5039_v31 = vadd.f32 %v5038_v8, %v4950_v53  ;;  %v4862_v5 = vpop.f32.mrf.mxu0  ;;  %v4951_v63 = vpop.f32.mrf.mxu1  ;;  %v13540_v53 = vld [vmem:[#allocation121_spill] sm:$0xff]  ;;  %v8967_v8 = vld [vmem:[#allocation7 + $0x6e8] sm:$0xf] }
 0x603   : > { %v4863_v61 = vadd.f32 %v4862_v5, %v11490_v40  ;;  %v9411_v5 = vld [vmem:[#allocation7 + $0x4f4] sm:$0xf0] }
 0x604   : > { %v5128_v39 = vadd.f32 %v5127_v12, %v5039_v31  ;;  %v9475_v31 = vld [vmem:[#allocation7 + $0x6f4] sm:$0xf0] }
 0x605   : > { %v4952_v27 = vadd.f32 %v4951_v63, %v4863_v61  ;;  %v8968_v12 = vor.u32 %v9475_v31, %v8967_v8  ;;  %v9095_v61 = vld [vmem:[#allocation7 + $0x7e8] sm:$0xf]  ;;  %v9507_v63 = vld [vmem:[#allocation7 + $0x7f4] sm:$0xf0] }
 0x606   : > { %v6777_v6 = vmul.f32 %v11206_v13, %v5128_v39  ;;  %vm6647_vm7 = vcmp.gt.f32.partialorder %v5128_v39, 0.0 }
 0x607   : > { %5716 = vmatpush.bf16.msrb.mxu2 %v8968_v12 }
 0x609   : > { %v5040_v23 = vpop.f32.mrf.mxu2  ;;  %v5129_v38 = vpop.f32.mrf.mxu3 }
 0x60a   : > { %v5041_v17 = vadd.f32 %v5040_v23, %v4952_v27  ;;  %v4865_v24 = vpop.f32.mrf.mxu0  ;;  %v4954_v35 = vpop.f32.mrf.mxu1  ;;  %v11674_v27 = vsel %vm6647_vm7, %v5128_v39, %v6777_v6  ;;  %v8839_v6 = vld [vmem:[#allocation7 + $0x5e8] sm:$0xf] }
 0x60b   : > { %v4866_v11 = vadd.f32 %v4865_v24, %v11497_v59  ;;  %v8711_v59 = vld [vmem:[#allocation7 + $0x4e8] sm:$0xf]  ;;  %13542 = vst [vmem:[#allocation121_spill] sm:$0xff] %v11674_v27  ;;  %v9096_v24 = vor.u32 %v9507_v63, %v9095_v61  ;;  %v13545_v63 = vld [vmem:[#allocation151_spill] sm:$0xff] }
 0x60c   : > { %v5130_v62 = vadd.f32 %v5129_v38, %v5041_v17  ;;  %4904 = vmatmul.bf16.gmra.mxu0 %v10993_v30  ;;  %v8712_v38 = vor.u32 %v9411_v5, %v8711_v59 }
 0x60d   : > { %v4955_v19 = vadd.f32 %v4954_v35, %v4866_v11  ;;  %4993 = vmatmul.bf16.gmra.mxu1 %v10995_v47  ;;  %5805 = vmatpush.bf16.msrb.mxu3 %v9096_v24 }
 0x60e   : > { %vm6651_vm0 = vcmp.gt.f32.partialorder %v5130_v62, 0.0  ;;  %v6781_v40 = vmul.f32 %v11206_v13, %v5130_v62  ;;  %5082 = vmatmul.bf16.gmra.mxu2 %v13540_v53  ;;  %5171 = vmatmul.bf16.gmra.mxu3 %v13541_v60 }
 0x60f   : > { %5538 = vmatpush.bf16.msrb.mxu0 %v8712_v38  ;;  %v13548_v38 = vld [vmem:[#allocation125_spill] sm:$0xff] }
 0x610   : > { %v11676_v23 = vsel %vm6651_vm0, %v5130_v62, %v6781_v40  ;;  %v9443_v62 = vld [vmem:[#allocation7 + $0x5f4] sm:$0xf0] }
 0x611   : > { %13543 = vst [vmem:[#allocation122_spill] sm:$0xff] %v11676_v23  ;;  %v5043_v17 = vpop.f32.mrf.mxu2  ;;  %v5132_v58 = vpop.f32.mrf.mxu3  ;;  %v8840_v40 = vor.u32 %v9443_v62, %v8839_v6 }
 0x612   : > { %v5044_v35 = vadd.f32 %v5043_v17, %v4955_v19  ;;  %v4867_v4 = vpop.f32.mrf.mxu0  ;;  %v4956_v8 = vpop.f32.mrf.mxu1 }
 0x613   : > { %v4868_v7 = vadd.f32 %v4867_v4, %v13544_v1  ;;  %5627 = vmatpush.bf16.msrb.mxu1 %v8840_v40  ;;  %v13546_v4 = vld [vmem:[#allocation123_spill] sm:$0xff] }
 0x614   : > { %v5133_v31 = vadd.f32 %v5132_v58, %v5044_v35  ;;  %v13547_v58 = vld [vmem:[#allocation124_spill] sm:$0xff] }
 0x615   : > { %v4957_v39 = vadd.f32 %v4956_v8, %v4868_v7 }
 0x616   : > { %v6785_v12 = vmul.f32 %v11206_v13, %v5133_v31  ;;  %vm6655_vm8 = vcmp.gt.f32.partialorder %v5133_v31, 0.0 }
 0x618   : > { %v11688_v24 = vsel %vm6655_vm8, %v5133_v31, %v6785_v12  ;;  %v13553_v31 = vld [vmem:[#allocation153_spill] sm:$0xff] }
 0x619   : > { %v5045_v51 = vpop.f32.mrf.mxu2  ;;  %v5134_v5 = vpop.f32.mrf.mxu3  ;;  %13550 = vst [vmem:[#allocation150_spill] sm:$0xff] %v11688_v24 }
 0x61a   : > { %v5046_v59 = vadd.f32 %v5045_v51, %v4957_v39  ;;  %v4870_v61 = vpop.f32.mrf.mxu0  ;;  %v4959_v17 = vpop.f32.mrf.mxu1  ;;  %v13549_v51 = vld [vmem:[#allocation126_spill] sm:$0xff] }
 0x61b   : > { %v4871_v19 = vadd.f32 %v4870_v61, %v13545_v63 }
 0x61c   : > { %v5135_v11 = vadd.f32 %v5134_v5, %v5046_v59  ;;  %4909 = vmatmul.bf16.gmra.mxu0 %v13546_v4  ;;  %v13552_v59 = vld [vmem:[#allocation152_spill] sm:$0xff] }
 0x61d   : > { %v4960_v1 = vadd.f32 %v4959_v17, %v4871_v19  ;;  %4998 = vmatmul.bf16.gmra.mxu1 %v13547_v58 }
 0x61e   : > { %vm6659_vm9 = vcmp.gt.f32.partialorder %v5135_v11, 0.0  ;;  %v6789_v7 = vmul.f32 %v11206_v13, %v5135_v11  ;;  %5087 = vmatmul.bf16.gmra.mxu2 %v13548_v38  ;;  %5176 = vmatmul.bf16.gmra.mxu3 %v13549_v51 }
 0x620   : > { %v11690_v35 = vsel %vm6659_vm9, %v5135_v11, %v6789_v7 }
 0x621   : > { %13551 = vst [vmem:[#allocation151_spill] sm:$0xff] %v11690_v35  ;;  %v5048_v8 = vpop.f32.mrf.mxu2  ;;  %v5137_v62 = vpop.f32.mrf.mxu3 }
 0x622   : > { %v5049_v6 = vadd.f32 %v5048_v8, %v4960_v1  ;;  %v4872_v40 = vpop.f32.mrf.mxu0  ;;  %v4961_v61 = vpop.f32.mrf.mxu1  ;;  %v13554_v1 = vld [vmem:[#allocation13_spill] sm:$0xff] }
 0x623   : > { %v4873_v5 = vadd.f32 %v4872_v40, %v13552_v59  ;;  %v13555_v40 = vld [vmem:[#allocation14_spill] sm:$0xff] }
 0x624   : > { %v5138_v63 = vadd.f32 %v5137_v62, %v5049_v6  ;;  %v13556_v6 = vld [vmem:[#allocation15_spill] sm:$0xff]  ;;  %v13557_v62 = vld [vmem:[#allocation16_spill] sm:$0xff]  ;;  %v8951_v59 = vld [vmem:[#allocation7 + $0x6c8] sm:$0xf] }
 0x625   : > { %v4962_v19 = vadd.f32 %v4961_v61, %v4873_v5  ;;  %v9471_v5 = vld [vmem:[#allocation7 + $0x6d4] sm:$0xf0] }
 0x626   : > { %v6793_v7 = vmul.f32 %v11206_v13, %v5138_v63  ;;  %vm6663_vm10 = vcmp.gt.f32.partialorder %v5138_v63, 0.0  ;;  %v8952_v61 = vor.u32 %v9471_v5, %v8951_v59 }
 0x628   : > { %5717 = vmatpush.bf16.msrb.mxu2 %v8952_v61 }
 0x629   : > { %v5050_v17 = vpop.f32.mrf.mxu2  ;;  %v5139_v23 = vpop.f32.mrf.mxu3 }
 0x62a   : > { %v5051_v27 = vadd.f32 %v5050_v17, %v4962_v19  ;;  %v4875_v15 = vpop.f32.mrf.mxu0  ;;  %v4964_v11 = vpop.f32.mrf.mxu1  ;;  %v9407_v19 = vld [vmem:[#allocation7 + $0x4d4] sm:$0xf0]  ;;  %v9079_v17 = vld [vmem:[#allocation7 + $0x7c8] sm:$0xf] }
 0x62b   : > { %v4876_v12 = vadd.f32 %v4875_v15, %v13553_v31  ;;  %v8695_v15 = vld [vmem:[#allocation7 + $0x4c8] sm:$0xf] }
 0x62c   : > { %v5140_v29 = vadd.f32 %v5139_v23, %v5051_v27  ;;  %5190 = vmatmul.bf16.vlgmr.msra.gmra.mxu0 %v13554_v1  ;;  %v9503_v27 = vld [vmem:[#allocation7 + $0x7d4] sm:$0xf0]  ;;  %v11702_v23 = vsel %vm6663_vm10, %v5138_v63, %v6793_v7  ;;  %v8823_v7 = vld [vmem:[#allocation7 + $0x5c8] sm:$0xf]  ;;  %v8329_v1 = vld [vmem:[#allocation7 + $0x1f8] sm:$0xf0] }
 0x62d   : > { %v4965_v39 = vadd.f32 %v4964_v11, %v4876_v12  ;;  %5279 = vmatmul.bf16.vlgmr.msra.gmra.mxu1 %v13555_v40  ;;  %13558 = vst [vmem:[#allocation152_spill] sm:$0xff] %v11702_v23  ;;  %v8696_v11 = vor.u32 %v9407_v19, %v8695_v15  ;;  %v9080_v24 = vor.u32 %v9503_v27, %v9079_v17  ;;  %v13561_v27 = vld [vmem:[#allocation155_spill] sm:$0xff] }
 0x62e   : > { %vm6667_vm11 = vcmp.gt.f32.partialorder %v5140_v29, 0.0  ;;  %v6797_v8 = vmul.f32 %v11206_v13, %v5140_v29  ;;  %5368 = vmatmul.bf16.vlgmr.msra.gmra.mxu2 %v13556_v6  ;;  %5457 = vmatmul.bf16.vlgmr.msra.gmra.mxu3 %v13557_v62 }
 0x62f   : > { %5539 = vmatpush.bf16.msrb.mxu0 %v8696_v11  ;;  %5806 = vmatpush.bf16.msrb.mxu3 %v9080_v24 }
 0x630   : > { %v11704_v31 = vsel %vm6667_vm11, %v5140_v29, %v6797_v8  ;;  %v9439_v29 = vld [vmem:[#allocation7 + $0x5d4] sm:$0xf0] }
 0x631   : > { %13559 = vst [vmem:[#allocation153_spill] sm:$0xff] %v11704_v31  ;;  %v5053_v12 = vpop.f32.mrf.mxu2  ;;  %v5142_v36 = vpop.f32.mrf.mxu3  ;;  %v8824_v8 = vor.u32 %v9439_v29, %v8823_v7 }
 0x632   : > { %v5054_v43 = vadd.f32 %v5053_v12, %v4965_v39  ;;  %v4877_v28 = vpop.f32.mrf.mxu0  ;;  %v4966_v59 = vpop.f32.mrf.mxu1 }
 0x633   : > { %v4878_v55 = vadd.f32 %v4877_v28, %v13560_v56  ;;  %5628 = vmatpush.bf16.msrb.mxu1 %v8824_v8  ;;  %v13562_v56 = vld [vmem:[#allocation17_spill] sm:$0xff] }
 0x634   : > { %v5143_v5 = vadd.f32 %v5142_v36, %v5054_v43  ;;  %v13563_v43 = vld [vmem:[#allocation18_spill] sm:$0xff]  ;;  %v13564_v36 = vld [vmem:[#allocation19_spill] sm:$0xff] }
 0x635   : > { %v4967_v63 = vadd.f32 %v4966_v59, %v4878_v55 }
 0x636   : > { %v6801_v61 = vmul.f32 %v11206_v13, %v5143_v5  ;;  %vm6671_vm12 = vcmp.gt.f32.partialorder %v5143_v5, 0.0 }
 0x638   : > { %v11716_v24 = vsel %vm6671_vm12, %v5143_v5, %v6801_v61  ;;  %v13569_v5 = vld [vmem:[#allocation157_spill] sm:$0xff] }
 0x639   : > { %v5055_v34 = vpop.f32.mrf.mxu2  ;;  %v5144_v19 = vpop.f32.mrf.mxu3  ;;  %13566 = vst [vmem:[#allocation154_spill] sm:$0xff] %v11716_v24 }
 0x63a   : > { %v5056_v15 = vadd.f32 %v5055_v34, %v4967_v63  ;;  %v4880_v17 = vpop.f32.mrf.mxu0  ;;  %v4969_v12 = vpop.f32.mrf.mxu1  ;;  %v13565_v34 = vld [vmem:[#allocation20_spill] sm:$0xff] }
 0x63b   : > { %v4881_v39 = vadd.f32 %v4880_v17, %v13561_v27 }
 0x63c   : > { %v5145_v35 = vadd.f32 %v5144_v19, %v5056_v15  ;;  %5195 = vmatmul.bf16.gmra.mxu0 %v13562_v56  ;;  %v13568_v15 = vld [vmem:[#allocation156_spill] sm:$0xff] }
 0x63d   : > { %v4970_v28 = vadd.f32 %v4969_v12, %v4881_v39  ;;  %5284 = vmatmul.bf16.gmra.mxu1 %v13563_v43 }
 0x63e   : > { %vm6675_vm13 = vcmp.gt.f32.partialorder %v5145_v35, 0.0  ;;  %v6805_v55 = vmul.f32 %v11206_v13, %v5145_v35  ;;  %5373 = vmatmul.bf16.gmra.mxu2 %v13564_v36  ;;  %5462 = vmatmul.bf16.gmra.mxu3 %v13565_v34 }
 0x640   : > { %v11718_v11 = vsel %vm6675_vm13, %v5145_v35, %v6805_v55 }
 0x641   : > { %13567 = vst [vmem:[#allocation155_spill] sm:$0xff] %v11718_v11  ;;  %v5058_v59 = vpop.f32.mrf.mxu2  ;;  %v5147_v29 = vpop.f32.mrf.mxu3 }
 0x642   : > { %v5059_v7 = vadd.f32 %v5058_v59, %v4970_v28  ;;  %v4882_v8 = vpop.f32.mrf.mxu0  ;;  %v4971_v17 = vpop.f32.mrf.mxu1  ;;  %v13570_v28 = vld [vmem:[#allocation21_spill] sm:$0xff] }
 0x643   : > { %v4883_v19 = vadd.f32 %v4882_v8, %v13568_v15  ;;  %v13571_v8 = vld [vmem:[#allocation22_spill] sm:$0xff] }
 0x644   : > { %v5148_v27 = vadd.f32 %v5147_v29, %v5059_v7  ;;  %v13572_v7 = vld [vmem:[#allocation23_spill] sm:$0xff]  ;;  %v13573_v29 = vld [vmem:[#allocation24_spill] sm:$0xff]  ;;  %v8935_v15 = vld [vmem:[#allocation7 + $0x6a8] sm:$0xf] }
 0x645   : > { %v4972_v39 = vadd.f32 %v4971_v17, %v4883_v19  ;;  %v9467_v19 = vld [vmem:[#allocation7 + $0x6b4] sm:$0xf0] }
 0x646   : > { %v6809_v55 = vmul.f32 %v11206_v13, %v5148_v27  ;;  %vm6679_vm14 = vcmp.gt.f32.partialorder %v5148_v27, 0.0  ;;  %v8936_v17 = vor.u32 %v9467_v19, %v8935_v15 }
 0x648   : > { %5718 = vmatpush.bf16.msrb.mxu2 %v8936_v17 }
 0x649   : > { %v5060_v12 = vpop.f32.mrf.mxu2  ;;  %v5149_v31 = vpop.f32.mrf.mxu3 }
 0x64a   : > { %v5061_v23 = vadd.f32 %v5060_v12, %v4972_v39  ;;  %v4885_v34 = vpop.f32.mrf.mxu0  ;;  %v4974_v35 = vpop.f32.mrf.mxu1  ;;  %v9403_v39 = vld [vmem:[#allocation7 + $0x4b4] sm:$0xf0]  ;;  %v9063_v12 = vld [vmem:[#allocation7 + $0x7a8] sm:$0xf] }
 0x64b   : > { %v4886_v61 = vadd.f32 %v4885_v34, %v13569_v5  ;;  %v8679_v34 = vld [vmem:[#allocation7 + $0x4a8] sm:$0xf] }
 0x64c   : > { %v5150_v36 = vadd.f32 %v5149_v31, %v5061_v23  ;;  %5200 = vmatmul.bf16.gmra.mxu0 %v13570_v28  ;;  %v9499_v23 = vld [vmem:[#allocation7 + $0x7b4] sm:$0xf0]  ;;  %v11730_v31 = vsel %vm6679_vm14, %v5148_v27, %v6809_v55  ;;  %v13576_v28 = vld [vmem:[#allocation158_spill] sm:$0xff] }
 0x64d   : > { %v4975_v63 = vadd.f32 %v4974_v35, %v4886_v61  ;;  %5289 = vmatmul.bf16.gmra.mxu1 %v13571_v8  ;;  %13574 = vst [vmem:[#allocation156_spill] sm:$0xff] %v11730_v31  ;;  %v8680_v35 = vor.u32 %v9403_v39, %v8679_v34  ;;  %v9064_v24 = vor.u32 %v9499_v23, %v9063_v12  ;;  %v8807_v55 = vld [vmem:[#allocation7 + $0x5a8] sm:$0xf]  ;;  %v13577_v23 = vld [vmem:[#allocation159_spill] sm:$0xff] }
 0x64e   : > { %vm6683_vm15 = vcmp.gt.f32.partialorder %v5150_v36, 0.0  ;;  %v6813_v59 = vmul.f32 %v11206_v13, %v5150_v36  ;;  %5378 = vmatmul.bf16.gmra.mxu2 %v13572_v7  ;;  %5467 = vmatmul.bf16.gmra.mxu3 %v13573_v29 }
 0x64f   : > { %5540 = vmatpush.bf16.msrb.mxu0 %v8680_v35  ;;  %5807 = vmatpush.bf16.msrb.mxu3 %v9064_v24  ;;  %v13579_v24 = vld [vmem:[#allocation26_spill] sm:$0xff] }
 0x650   : > { %v11732_v5 = vsel %vm6683_vm15, %v5150_v36, %v6813_v59  ;;  %v9435_v36 = vld [vmem:[#allocation7 + $0x5b4] sm:$0xf0] }
 0x651   : > { %13575 = vst [vmem:[#allocation157_spill] sm:$0xff] %v11732_v5  ;;  %v5063_v61 = vpop.f32.mrf.mxu2  ;;  %v5152_v8 = vpop.f32.mrf.mxu3  ;;  %v8808_v59 = vor.u32 %v9435_v36, %v8807_v55 }
 0x652   : > { %v5064_v7 = vadd.f32 %v5063_v61, %v4975_v63  ;;  %v4887_v29 = vpop.f32.mrf.mxu0  ;;  %v4976_v15 = vpop.f32.mrf.mxu1 }
 0x653   : > { %v4888_v43 = vadd.f32 %v4887_v29, %v13576_v28  ;;  %5629 = vmatpush.bf16.msrb.mxu1 %v8808_v59  ;;  %v13578_v29 = vld [vmem:[#allocation25_spill] sm:$0xff] }
 0x654   : > { %v5153_v19 = vadd.f32 %v5152_v8, %v5064_v7  ;;  %v13580_v8 = vld [vmem:[#allocation27_spill] sm:$0xff] }
 0x655   : > { %v4977_v27 = vadd.f32 %v4976_v15, %v4888_v43 }
 0x656   : > { %v6817_v17 = vmul.f32 %v11206_v13, %v5153_v19  ;;  %vm6687_vm1 = vcmp.gt.f32.partialorder %v5153_v19, 0.0 }
 0x658   : > { %v11744_v7 = vsel %vm6687_vm1, %v5153_v19, %v6817_v17  ;;  %v13585_v19 = vld [vmem:[#allocation161_spill] sm:$0xff] }
 0x659   : > { %v5065_v56 = vpop.f32.mrf.mxu2  ;;  %v5154_v39 = vpop.f32.mrf.mxu3  ;;  %13582 = vst [vmem:[#allocation158_spill] sm:$0xff] %v11744_v7 }
 0x65a   : > { %v5066_v34 = vadd.f32 %v5065_v56, %v4977_v27  ;;  %v4890_v12 = vpop.f32.mrf.mxu0  ;;  %v4979_v61 = vpop.f32.mrf.mxu1  ;;  %v13581_v56 = vld [vmem:[#allocation28_spill] sm:$0xff] }
 0x65b   : > { %v4891_v63 = vadd.f32 %v4890_v12, %v13577_v23 }
 0x65c   : > { %v5155_v11 = vadd.f32 %v5154_v39, %v5066_v34  ;;  %5205 = vmatmul.bf16.gmra.mxu0 %v13578_v29  ;;  %v13584_v34 = vld [vmem:[#allocation160_spill] sm:$0xff] }
 0x65d   : > { %v4980_v28 = vadd.f32 %v4979_v61, %v4891_v63  ;;  %5294 = vmatmul.bf16.gmra.mxu1 %v13579_v24 }
 0x65e   : > { %vm6691_vm2 = vcmp.gt.f32.partialorder %v5155_v11, 0.0  ;;  %v6821_v43 = vmul.f32 %v11206_v13, %v5155_v11  ;;  %5383 = vmatmul.bf16.gmra.mxu2 %v13580_v8  ;;  %5472 = vmatmul.bf16.gmra.mxu3 %v13581_v56 }
 0x660   : > { %v11746_v35 = vsel %vm6691_vm2, %v5155_v11, %v6821_v43 }
 0x661   : > { %13583 = vst [vmem:[#allocation159_spill] sm:$0xff] %v11746_v35  ;;  %v5068_v15 = vpop.f32.mrf.mxu2  ;;  %v5157_v36 = vpop.f32.mrf.mxu3 }
 0x662   : > { %v5069_v55 = vadd.f32 %v5068_v15, %v4980_v28  ;;  %v4892_v59 = vpop.f32.mrf.mxu0  ;;  %v4981_v12 = vpop.f32.mrf.mxu1  ;;  %v13586_v28 = vld [vmem:[#allocation29_spill] sm:$0xff] }
 0x663   : > { %v4893_v39 = vadd.f32 %v4892_v59, %v13584_v34  ;;  %v13587_v59 = vld [vmem:[#allocation30_spill] sm:$0xff] }
 0x664   : > { %v5158_v23 = vadd.f32 %v5157_v36, %v5069_v55  ;;  %v13588_v55 = vld [vmem:[#allocation31_spill] sm:$0xff]  ;;  %v13589_v36 = vld [vmem:[#allocation32_spill] sm:$0xff]  ;;  %v8919_v34 = vld [vmem:[#allocation7 + $0x688] sm:$0xf] }
 0x665   : > { %v4982_v63 = vadd.f32 %v4981_v12, %v4893_v39  ;;  %v9463_v39 = vld [vmem:[#allocation7 + $0x694] sm:$0xf0] }
 0x666   : > { %v6825_v43 = vmul.f32 %v11206_v13, %v5158_v23  ;;  %vm6695_vm3 = vcmp.gt.f32.partialorder %v5158_v23, 0.0  ;;  %v8920_v12 = vor.u32 %v9463_v39, %v8919_v34 }
 0x668   : > { %5719 = vmatpush.bf16.msrb.mxu2 %v8920_v12 }
 0x669   : > { %v5070_v61 = vpop.f32.mrf.mxu2  ;;  %v5159_v5 = vpop.f32.mrf.mxu3 }
 0x66a   : > { %v5071_v31 = vadd.f32 %v5070_v61, %v4982_v63  ;;  %v4895_v56 = vpop.f32.mrf.mxu0  ;;  %v4984_v11 = vpop.f32.mrf.mxu1  ;;  %v9399_v63 = vld [vmem:[#allocation7 + $0x494] sm:$0xf0]  ;;  %v9047_v61 = vld [vmem:[#allocation7 + $0x788] sm:$0xf] }
 0x66b   : > { %v4896_v17 = vadd.f32 %v4895_v56, %v13585_v19  ;;  %v8663_v56 = vld [vmem:[#allocation7 + $0x488] sm:$0xf] }
 0x66c   : > { %v5160_v8 = vadd.f32 %v5159_v5, %v5071_v31  ;;  %5210 = vmatmul.bf16.gmra.mxu0 %v13586_v28  ;;  %v9495_v31 = vld [vmem:[#allocation7 + $0x794] sm:$0xf0]  ;;  %v11758_v5 = vsel %vm6695_vm3, %v5158_v23, %v6825_v43  ;;  %v13592_v28 = vld [vmem:[#allocation162_spill] sm:$0xff] }
 0x66d   : > { %v4985_v27 = vadd.f32 %v4984_v11, %v4896_v17  ;;  %5299 = vmatmul.bf16.gmra.mxu1 %v13587_v59  ;;  %13590 = vst [vmem:[#allocation160_spill] sm:$0xff] %v11758_v5  ;;  %v8664_v11 = vor.u32 %v9399_v63, %v8663_v56  ;;  %v9048_v7 = vor.u32 %v9495_v31, %v9047_v61  ;;  %v8791_v43 = vld [vmem:[#allocation7 + $0x588] sm:$0xf]  ;;  %v13593_v31 = vld [vmem:[#allocation163_spill] sm:$0xff] }
 0x66e   : > { %vm6699_vm4 = vcmp.gt.f32.partialorder %v5160_v8, 0.0  ;;  %v6829_v15 = vmul.f32 %v11206_v13, %v5160_v8  ;;  %5388 = vmatmul.bf16.gmra.mxu2 %v13588_v55  ;;  %5477 = vmatmul.bf16.gmra.mxu3 %v13589_v36 }
 0x66f   : > { %5541 = vmatpush.bf16.msrb.mxu0 %v8664_v11  ;;  %5808 = vmatpush.bf16.msrb.mxu3 %v9048_v7  ;;  %v13595_v7 = vld [vmem:[#allocation34_spill] sm:$0xff] }
 0x670   : > { %v11760_v19 = vsel %vm6699_vm4, %v5160_v8, %v6829_v15  ;;  %v9431_v8 = vld [vmem:[#allocation7 + $0x594] sm:$0xf0] }
 0x671   : > { %13591 = vst [vmem:[#allocation161_spill] sm:$0xff] %v11760_v19  ;;  %v5073_v17 = vpop.f32.mrf.mxu2  ;;  %v5162_v59 = vpop.f32.mrf.mxu3  ;;  %v8792_v15 = vor.u32 %v9431_v8, %v8791_v43 }
 0x672   : > { %v5074_v55 = vadd.f32 %v5073_v17, %v4985_v27  ;;  %v4897_v36 = vpop.f32.mrf.mxu0  ;;  %v4986_v34 = vpop.f32.mrf.mxu1 }
 0x673   : > { %v4898_v24 = vadd.f32 %v4897_v36, %v13592_v28  ;;  %5630 = vmatpush.bf16.msrb.mxu1 %v8792_v15  ;;  %v13594_v36 = vld [vmem:[#allocation33_spill] sm:$0xff] }
 0x674   : > { %v5163_v39 = vadd.f32 %v5162_v59, %v5074_v55  ;;  %v13596_v59 = vld [vmem:[#allocation35_spill] sm:$0xff] }
 0x675   : > { %v4987_v23 = vadd.f32 %v4986_v34, %v4898_v24 }
 0x676   : > { %v6833_v12 = vmul.f32 %v11206_v13, %v5163_v39  ;;  %vm6703_vm5 = vcmp.gt.f32.partialorder %v5163_v39, 0.0 }
 0x678   : > { %v11772_v55 = vsel %vm6703_vm5, %v5163_v39, %v6833_v12 }
 0x679   : > { %v5075_v29 = vpop.f32.mrf.mxu2  ;;  %v5164_v63 = vpop.f32.mrf.mxu3  ;;  %13598 = vst [vmem:[#allocation162_spill] sm:$0xff] %v11772_v55 }
 0x67a   : > { %v5076_v56 = vadd.f32 %v5075_v29, %v4987_v23  ;;  %v4900_v61 = vpop.f32.mrf.mxu0  ;;  %v4989_v17 = vpop.f32.mrf.mxu1  ;;  %v13597_v29 = vld [vmem:[#allocation36_spill] sm:$0xff] }
 0x67b   : > { %v4901_v27 = vadd.f32 %v4900_v61, %v13593_v31 }
 0x67c   : > { %v5165_v35 = vadd.f32 %v5164_v63, %v5076_v56  ;;  %5215 = vmatmul.bf16.gmra.mxu0 %v13594_v36  ;;  %v13600_v56 = vld [vmem:[#allocation164_spill] sm:$0xff] }
 0x67d   : > { %v4990_v28 = vadd.f32 %v4989_v17, %v4901_v27  ;;  %5304 = vmatmul.bf16.gmra.mxu1 %v13595_v7  ;;  %v9415_v36 = vld [vmem:[#allocation7 + $0x514] sm:$0xf0] }
 0x67e   : > { %vm6707_vm6 = vcmp.gt.f32.partialorder %v5165_v35, 0.0  ;;  %v6837_v24 = vmul.f32 %v11206_v13, %v5165_v35  ;;  %5393 = vmatmul.bf16.gmra.mxu2 %v13596_v59  ;;  %5482 = vmatmul.bf16.gmra.mxu3 %v13597_v29 }
 0x680   : > { %v11774_v11 = vsel %vm6707_vm6, %v5165_v35, %v6837_v24 }
 0x681   : > { %13599 = vst [vmem:[#allocation163_spill] sm:$0xff] %v11774_v11  ;;  %v5078_v34 = vpop.f32.mrf.mxu2  ;;  %v5167_v8 = vpop.f32.mrf.mxu3 }
 0x682   : > { %v5079_v43 = vadd.f32 %v5078_v34, %v4990_v28  ;;  %v4902_v15 = vpop.f32.mrf.mxu0  ;;  %v4991_v61 = vpop.f32.mrf.mxu1  ;;  %v13601_v28 = vld [vmem:[#allocation37_spill] sm:$0xff] }
 0x683   : > { %v4903_v63 = vadd.f32 %v4902_v15, %v13600_v56  ;;  %v13602_v15 = vld [vmem:[#allocation38_spill] sm:$0xff] }
 0x684   : > { %v5168_v31 = vadd.f32 %v5167_v8, %v5079_v43  ;;  %v13603_v43 = vld [vmem:[#allocation39_spill] sm:$0xff]  ;;  %v13604_v8 = vld [vmem:[#allocation40_spill] sm:$0xff]  ;;  %v8903_v56 = vld [vmem:[#allocation7 + $0x668] sm:$0xf] }
 0x685   : > { %v4992_v27 = vadd.f32 %v4991_v61, %v4903_v63  ;;  %v9459_v63 = vld [vmem:[#allocation7 + $0x674] sm:$0xf0] }
 0x686   : > { %v6841_v12 = vmul.f32 %v11206_v13, %v5168_v31  ;;  %vm6711_vm7 = vcmp.gt.f32.partialorder %v5168_v31, 0.0  ;;  %v9395_v61 = vld [vmem:[#allocation7 + $0x474] sm:$0xf0] }
 0x689   : > { %v5080_v17 = vpop.f32.mrf.mxu2  ;;  %v5169_v19 = vpop.f32.mrf.mxu3 }
 0x68a   : > { %v5081_v5 = vadd.f32 %v5080_v17, %v4992_v27  ;;  %v4905_v29 = vpop.f32.mrf.mxu0  ;;  %v4994_v35 = vpop.f32.mrf.mxu1  ;;  %v9031_v27 = vld [vmem:[#allocation7 + $0x768] sm:$0xf] }
 0x68b   : > { %v4906_v39 = vadd.f32 %v4905_v29, %v11577_v33  ;;  %v8647_v33 = vld [vmem:[#allocation7 + $0x468] sm:$0xf]  ;;  %v8904_v29 = vor.u32 %v9459_v63, %v8903_v56 }
 0x68c   : > { %v5170_v24 = vadd.f32 %v5169_v19, %v5081_v5  ;;  %5220 = vmatmul.bf16.gmra.mxu0 %v13601_v28  ;;  %v9491_v5 = vld [vmem:[#allocation7 + $0x774] sm:$0xf0]  ;;  %v11786_v19 = vsel %vm6711_vm7, %v5168_v31, %v6841_v12  ;;  %v8775_v31 = vld [vmem:[#allocation7 + $0x568] sm:$0xf] }
 0x68d   : > { %v4995_v23 = vadd.f32 %v4994_v35, %v4906_v39  ;;  %5309 = vmatmul.bf16.gmra.mxu1 %v13602_v15  ;;  %13605 = vst [vmem:[#allocation164_spill] sm:$0xff] %v11786_v19  ;;  %v8648_v35 = vor.u32 %v9395_v61, %v8647_v33  ;;  %v9032_v55 = vor.u32 %v9491_v5, %v9031_v27  ;;  %v9427_v12 = vld [vmem:[#allocation7 + $0x574] sm:$0xf0]  ;;  %v9015_v19 = vld [vmem:[#allocation7 + $0x748] sm:$0xf] }
 0x68e   : > { %vm6715_vm0 = vcmp.gt.f32.partialorder %v5170_v24, 0.0  ;;  %v6845_v34 = vmul.f32 %v11206_v13, %v5170_v24  ;;  %5398 = vmatmul.bf16.gmra.mxu2 %v13603_v43  ;;  %5487 = vmatmul.bf16.gmra.mxu3 %v13604_v8 }
 0x68f   : > { %5720 = vmatpush.bf16.msrb.mxu2 %v8904_v29  ;;  %5542 = vmatpush.bf16.msrb.mxu0 %v8648_v35 }
 0x690   : > { %v11788_v17 = vsel %vm6715_vm0, %v5170_v24, %v6845_v34  ;;  %5809 = vmatpush.bf16.msrb.mxu3 %v9032_v55  ;;  %v8776_v34 = vor.u32 %v9427_v12, %v8775_v31 }
 0x691   : > { %13606 = vst [vmem:[#allocation175_spill] sm:$0xff] %v11788_v17  ;;  %v5083_v39 = vpop.f32.mrf.mxu2  ;;  %v5172_v15 = vpop.f32.mrf.mxu3 }
 0x692   : > { %v5084_v43 = vadd.f32 %v5083_v39, %v4995_v23  ;;  %v4907_v8 = vpop.f32.mrf.mxu0  ;;  %v4996_v56 = vpop.f32.mrf.mxu1  ;;  %5631 = vmatpush.bf16.msrb.mxu1 %v8776_v34 }
 0x693   : > { %v4908_v28 = vadd.f32 %v4907_v8, %v11580_v9  ;;  %v13607_v8 = vld [vmem:[#allocation41_spill] sm:$0xff] }
 0x694   : > { %v5173_v63 = vadd.f32 %v5172_v15, %v5084_v43  ;;  %v13609_v15 = vld [vmem:[#allocation43_spill] sm:$0xff]  ;;  %v13610_v43 = vld [vmem:[#allocation44_spill] sm:$0xff] }
 0x695   : > { %v4997_v24 = vadd.f32 %v4996_v56, %v4908_v28  ;;  %v13608_v28 = vld [vmem:[#allocation42_spill] sm:$0xff] }
 0x696   : > { %v6849_v29 = vmul.f32 %v11206_v13, %v5173_v63  ;;  %vm6719_vm8 = vcmp.gt.f32.partialorder %v5173_v63, 0.0 }
 0x698   : > { %v11800_v35 = vsel %vm6719_vm8, %v5173_v63, %v6849_v29 }
 0x699   : > { %v5085_v33 = vpop.f32.mrf.mxu2  ;;  %v5174_v27 = vpop.f32.mrf.mxu3  ;;  %13611 = vst [vmem:[#allocation176_spill] sm:$0xff] %v11800_v35 }
 0x69a   : > { %v5086_v61 = vadd.f32 %v5085_v33, %v4997_v24  ;;  %v4910_v5 = vpop.f32.mrf.mxu0  ;;  %v4999_v39 = vpop.f32.mrf.mxu1 }
 0x69b   : > { %v4911_v23 = vadd.f32 %v4910_v5, %v11587_v22 }
 0x69c   : > { %v5175_v11 = vadd.f32 %v5174_v27, %v5086_v61  ;;  %5225 = vmatmul.bf16.gmra.mxu0 %v13607_v8 }
 0x69d   : > { %v5000_v9 = vadd.f32 %v4999_v39, %v4911_v23  ;;  %5314 = vmatmul.bf16.gmra.mxu1 %v13608_v28  ;;  %v9616_v23 = vld [vmem:[%s12927_s5] sm:$0xf]  ;;  %v9419_v28 = vld [vmem:[#allocation7 + $0x534] sm:$0xf0] }
 0x69e   : > { %vm6723_vm9 = vcmp.gt.f32.partialorder %v5175_v11, 0.0  ;;  %v6853_v55 = vmul.f32 %v11206_v13, %v5175_v11  ;;  %5403 = vmatmul.bf16.gmra.mxu2 %v13609_v15  ;;  %5492 = vmatmul.bf16.gmra.mxu3 %v13610_v43  ;;  %v11810_v63 = vperm.slane %v9616_v23, 2  ;;  %v9455_v23 = vld [vmem:[#allocation7 + $0x654] sm:$0xf0] }
 0x6a0   : > { %v11802_v22 = vsel %vm6723_vm9, %v5175_v11, %v6853_v55 }
 0x6a1   : > { %13612 = vst [vmem:[#allocation177_spill] sm:$0xff] %v11802_v22  ;;  %v5088_v56 = vpop.f32.mrf.mxu2  ;;  %v5177_v24 = vpop.f32.mrf.mxu3  ;;  %v9391_v22 = vld [vmem:[#allocation7 + $0x454] sm:$0xf0] }
 0x6a2   : > { %v5089_v12 = vadd.f32 %v5088_v56, %v5000_v9  ;;  %v4912_v34 = vpop.f32.mrf.mxu0  ;;  %v5001_v61 = vpop.f32.mrf.mxu1 }
 0x6a3   : > { %v4913_v33 = vadd.f32 %v4912_v34, %v11590_v10  ;;  %v13614_v34 = vld [vmem:[#allocation46_spill] sm:$0xff] }
 0x6a4   : > { %v5178_v27 = vadd.f32 %v5177_v24, %v5089_v12  ;;  %v13613_v12 = vld [vmem:[#allocation45_spill] sm:$0xff] }
 0x6a5   : > { %v5002_v5 = vadd.f32 %v5001_v61, %v4913_v33  ;;  %v13615_v33 = vld [vmem:[#allocation47_spill] sm:$0xff]  ;;  %v13616_v61 = vld [vmem:[#allocation48_spill] sm:$0xff] }
 0x6a6   : > { %v6857_v56 = vmul.f32 %v11206_v13, %v5178_v27  ;;  %vm6727_vm10 = vcmp.gt.f32.partialorder %v5178_v27, 0.0 }
 0x6a9   : > { %v5090_v11 = vpop.f32.mrf.mxu2  ;;  %v5179_v29 = vpop.f32.mrf.mxu3 }
 0x6aa   : > { %v5091_v39 = vadd.f32 %v5090_v11, %v5002_v5  ;;  %v5191_v55 = vpop.f32.mrf.mxu0  ;;  %v5280_v9 = vpop.f32.mrf.mxu1  ;;  %v8887_v5 = vld [vmem:[#allocation7 + $0x648] sm:$0xf] }
 0x6ab   : > { %v5192_v31 = vadd.f32 %v5191_v55, %v11810_v63  ;;  %v8631_v11 = vld [vmem:[#allocation7 + $0x448] sm:$0xf]  ;;  %v8888_v55 = vor.u32 %v9455_v23, %v8887_v5 }
 0x6ac   : > { %v5180_v35 = vadd.f32 %v5179_v29, %v5091_v39  ;;  %5230 = vmatmul.bf16.gmra.mxu0 %v13613_v12  ;;  %v9487_v39 = vld [vmem:[#allocation7 + $0x754] sm:$0xf0]  ;;  %v11819_v29 = vsel %vm6727_vm10, %v5178_v27, %v6857_v56  ;;  %v8632_v17 = vor.u32 %v9391_v22, %v8631_v11  ;;  %v8759_v27 = vld [vmem:[#allocation7 + $0x548] sm:$0xf] }
 0x6ad   : > { %v5281_v10 = vadd.f32 %v5280_v9, %v5192_v31  ;;  %5319 = vmatmul.bf16.gmra.mxu1 %v13614_v34  ;;  %13617 = vst [vmem:[#allocation178_spill] sm:$0xff] %v11819_v29  ;;  %v9016_v12 = vor.u32 %v9487_v39, %v9015_v19  ;;  %5721 = vmatpush.bf16.msrb.mxu2 %v8888_v55  ;;  %v13619_v34 = vld [vmem:[#allocation49_spill] sm:$0xff] }
 0x6ae   : > { %vm6731_vm11 = vcmp.gt.f32.partialorder %v5180_v35, 0.0  ;;  %v6861_v24 = vmul.f32 %v11206_v13, %v5180_v35  ;;  %5408 = vmatmul.bf16.gmra.mxu2 %v13615_v33  ;;  %5497 = vmatmul.bf16.gmra.mxu3 %v13616_v61 }
 0x6af   : > { %5543 = vmatpush.bf16.msrb.mxu0 %v8632_v17  ;;  %5810 = vmatpush.bf16.msrb.mxu3 %v9016_v12  ;;  %v13620_v17 = vld [vmem:[#allocation50_spill] sm:$0xff]  ;;  %v13622_v12 = vld [vmem:[#allocation52_spill] sm:$0xff] }
 0x6b0   : > { %v11821_v31 = vsel %vm6731_vm11, %v5180_v35, %v6861_v24  ;;  %v9423_v35 = vld [vmem:[#allocation7 + $0x554] sm:$0xf0] }
 0x6b1   : > { %13618 = vst [vmem:[#allocation179_spill] sm:$0xff] %v11821_v31  ;;  %v5369_v9 = vpop.f32.mrf.mxu2  ;;  %v5458_v43 = vpop.f32.mrf.mxu3  ;;  %v8760_v24 = vor.u32 %v9423_v35, %v8759_v27 }
 0x6b2   : > { %v5370_v33 = vadd.f32 %v5369_v9, %v5281_v10  ;;  %v5193_v61 = vpop.f32.mrf.mxu0  ;;  %v5282_v5 = vpop.f32.mrf.mxu1 }
 0x6b3   : > { %v5194_v15 = vadd.f32 %v5193_v61, %v11810_v63  ;;  %5632 = vmatpush.bf16.msrb.mxu1 %v8760_v24 }
 0x6b4   : > { %v11826_v23 = vadd.f32 %v5458_v43, %v5370_v33  ;;  %v13621_v43 = vld [vmem:[#allocation51_spill] sm:$0xff] }
 0x6b5   : > { %v5283_v56 = vadd.f32 %v5282_v5, %v5194_v15 }
 0x6b9   : > { %v5371_v19 = vpop.f32.mrf.mxu2  ;;  %v5460_v11 = vpop.f32.mrf.mxu3 }
 0x6ba   : > { %v5372_v22 = vadd.f32 %v5371_v19, %v5283_v56  ;;  %v5196_v39 = vpop.f32.mrf.mxu0  ;;  %v5285_v9 = vpop.f32.mrf.mxu1 }
 0x6bb   : > { %v5197_v10 = vadd.f32 %v5196_v39, %v11810_v63 }
 0x6bc   : > { %v11829_v55 = vadd.f32 %v5460_v11, %v5372_v22  ;;  %5235 = vmatmul.bf16.gmra.mxu0 %v13619_v34 }
 0x6bd   : > { %v5286_v61 = vadd.f32 %v5285_v9, %v5197_v10  ;;  %5324 = vmatmul.bf16.gmra.mxu1 %v13620_v17  ;;  %v9483_v17 = vld [vmem:[#allocation7 + $0x734] sm:$0xf0] }
 0x6be   : > { %5413 = vmatmul.bf16.gmra.mxu2 %v13621_v43  ;;  %5502 = vmatmul.bf16.gmra.mxu3 %v13622_v12  ;;  %v13623_v43 = vld [vmem:[#allocation53_spill] sm:$0xff] }
 0x6c1   : > { %v5374_v15 = vpop.f32.mrf.mxu2  ;;  %v5463_v5 = vpop.f32.mrf.mxu3 }
 0x6c2   : > { %v5375_v33 = vadd.f32 %v5374_v15, %v5286_v61  ;;  %v5198_v27 = vpop.f32.mrf.mxu0  ;;  %v5287_v56 = vpop.f32.mrf.mxu1  ;;  %v13624_v61 = vld [vmem:[#allocation54_spill] sm:$0xff]  ;;  %v13625_v15 = vld [vmem:[#allocation55_spill] sm:$0xff] }
 0x6c3   : > { %v5199_v35 = vadd.f32 %v5198_v27, %v11810_v63  ;;  %v13626_v27 = vld [vmem:[#allocation56_spill] sm:$0xff] }
 0x6c4   : > { %v11836_v24 = vadd.f32 %v5463_v5, %v5375_v33  ;;  %v8871_v33 = vld [vmem:[#allocation7 + $0x628] sm:$0xf]  ;;  %v9451_v5 = vld [vmem:[#allocation7 + $0x634] sm:$0xf0] }
 0x6c5   : > { %v5288_v19 = vadd.f32 %v5287_v56, %v5199_v35  ;;  %v8615_v35 = vld [vmem:[#allocation7 + $0x428] sm:$0xf]  ;;  %v8872_v56 = vor.u32 %v9451_v5, %v8871_v33 }
 0x6c7   : > { %5722 = vmatpush.bf16.msrb.mxu2 %v8872_v56 }
 0x6c9   : > { %v5376_v22 = vpop.f32.mrf.mxu2  ;;  %v5465_v39 = vpop.f32.mrf.mxu3 }
 0x6ca   : > { %v5377_v11 = vadd.f32 %v5376_v22, %v5288_v19  ;;  %v5201_v10 = vpop.f32.mrf.mxu0  ;;  %v5290_v29 = vpop.f32.mrf.mxu1  ;;  %v9387_v19 = vld [vmem:[#allocation7 + $0x434] sm:$0xf0]  ;;  %v8999_v22 = vld [vmem:[#allocation7 + $0x728] sm:$0xf] }
 0x6cb   : > { %v5202_v9 = vadd.f32 %v5201_v10, %v11810_v63  ;;  %v8616_v34 = vor.u32 %v9387_v19, %v8615_v35 }
 0x6cc   : > { %v11839_v31 = vadd.f32 %v5465_v39, %v5377_v11  ;;  %5240 = vmatmul.bf16.gmra.mxu0 %v13623_v43  ;;  %v9000_v11 = vor.u32 %v9483_v17, %v8999_v22 }
 0x6cd   : > { %v5291_v12 = vadd.f32 %v5290_v29, %v5202_v9  ;;  %5329 = vmatmul.bf16.gmra.mxu1 %v13624_v61  ;;  %5544 = vmatpush.bf16.msrb.mxu0 %v8616_v34  ;;  %v13628_v34 = vld [vmem:[#allocation58_spill] sm:$0xff] }
 0x6ce   : > { %5418 = vmatmul.bf16.gmra.mxu2 %v13625_v15  ;;  %5507 = vmatmul.bf16.gmra.mxu3 %v13626_v27  ;;  %v8743_v15 = vld [vmem:[#allocation7 + $0x528] sm:$0xf] }
 0x6cf   : > { %5811 = vmatpush.bf16.msrb.mxu3 %v9000_v11  ;;  %v8744_v5 = vor.u32 %v9419_v28, %v8743_v15  ;;  %v13629_v11 = vld [vmem:[#allocation59_spill] sm:$0xff] }
 0x6d1   : > { %v5379_v10 = vpop.f32.mrf.mxu2  ;;  %v5468_v29 = vpop.f32.mrf.mxu3  ;;  %5633 = vmatpush.bf16.msrb.mxu1 %v8744_v5 }
 0x6d2   : > { %v5380_v39 = vadd.f32 %v5379_v10, %v5291_v12  ;;  %v5203_v9 = vpop.f32.mrf.mxu0  ;;  %v5292_v43 = vpop.f32.mrf.mxu1  ;;  %v13627_v10 = vld [vmem:[#allocation57_spill] sm:$0xff] }
 0x6d3   : > { %v5204_v61 = vadd.f32 %v5203_v9, %v11810_v63 }
 0x6d4   : > { %v11846_v27 = vadd.f32 %v5468_v29, %v5380_v39  ;;  %v13630_v39 = vld [vmem:[#allocation60_spill] sm:$0xff] }
 0x6d5   : > { %v5293_v33 = vadd.f32 %v5292_v43, %v5204_v61 }
 0x6d9   : > { %v5381_v8 = vpop.f32.mrf.mxu2  ;;  %v5470_v35 = vpop.f32.mrf.mxu3 }
 0x6da   : > { %v5382_v59 = vadd.f32 %v5381_v8, %v5293_v33  ;;  %v5206_v17 = vpop.f32.mrf.mxu0  ;;  %v5295_v19 = vpop.f32.mrf.mxu1 }
 0x6db   : > { %v5207_v12 = vadd.f32 %v5206_v17, %v11810_v63 }
 0x6dc   : > { %v11849_v56 = vadd.f32 %v5470_v35, %v5382_v59  ;;  %5245 = vmatmul.bf16.gmra.mxu0 %v13627_v10  ;;  %v9479_v10 = vld [vmem:[#allocation7 + $0x714] sm:$0xf0] }
 0x6dd   : > { %v5296_v22 = vadd.f32 %v5295_v19, %v5207_v12  ;;  %5334 = vmatmul.bf16.gmra.mxu1 %v13628_v34  ;;  %v13631_v34 = vld [vmem:[#allocation61_spill] sm:$0xff] }
 0x6de   : > { %5423 = vmatmul.bf16.gmra.mxu2 %v13629_v11  ;;  %5512 = vmatmul.bf16.gmra.mxu3 %v13630_v39 }
 0x6e1   : > { %v5384_v28 = vpop.f32.mrf.mxu2  ;;  %v5473_v61 = vpop.f32.mrf.mxu3 }
 0x6e2   : > { %v5385_v43 = vadd.f32 %v5384_v28, %v5296_v22  ;;  %v5208_v8 = vpop.f32.mrf.mxu0  ;;  %v5297_v29 = vpop.f32.mrf.mxu1  ;;  %v13632_v22 = vld [vmem:[#allocation62_spill] sm:$0xff]  ;;  %v13633_v28 = vld [vmem:[#allocation63_spill] sm:$0xff] }
 0x6e3   : > { %v5209_v15 = vadd.f32 %v5208_v8, %v11810_v63  ;;  %v13634_v8 = vld [vmem:[#allocation64_spill] sm:$0xff] }
 0x6e4   : > { %v11856_v9 = vadd.f32 %v5473_v61, %v5385_v43  ;;  %v8855_v43 = vld [vmem:[#allocation7 + $0x608] sm:$0xf]  ;;  %v9447_v61 = vld [vmem:[#allocation7 + $0x614] sm:$0xf0] }
 0x6e5   : > { %v5298_v59 = vadd.f32 %v5297_v29, %v5209_v15  ;;  %v8599_v15 = vld [vmem:[#allocation7 + $0x408] sm:$0xf]  ;;  %v8856_v29 = vor.u32 %v9447_v61, %v8855_v43 }
 0x6e7   : > { %5723 = vmatpush.bf16.msrb.mxu2 %v8856_v29 }
 0x6e9   : > { %v5386_v33 = vpop.f32.mrf.mxu2  ;;  %v5475_v35 = vpop.f32.mrf.mxu3 }
 0x6ea   : > { %v5387_v5 = vadd.f32 %v5386_v33, %v5298_v59  ;;  %v5211_v17 = vpop.f32.mrf.mxu0  ;;  %v5300_v19 = vpop.f32.mrf.mxu1  ;;  %v9383_v59 = vld [vmem:[#allocation7 + $0x414] sm:$0xf0]  ;;  %v8983_v33 = vld [vmem:[#allocation7 + $0x708] sm:$0xf] }
 0x6eb   : > { %v5212_v12 = vadd.f32 %v5211_v17, %v11810_v63  ;;  %v8600_v7 = vor.u32 %v9383_v59, %v8599_v15 }
 0x6ec   : > { %v11859_v11 = vadd.f32 %v5475_v35, %v5387_v5  ;;  %5250 = vmatmul.bf16.gmra.mxu0 %v13631_v34  ;;  %v8984_v5 = vor.u32 %v9479_v10, %v8983_v33 }
 0x6ed   : > { %v5301_v39 = vadd.f32 %v5300_v19, %v5212_v12  ;;  %5339 = vmatmul.bf16.gmra.mxu1 %v13632_v22  ;;  %5545 = vmatpush.bf16.msrb.mxu0 %v8600_v7  ;;  %v13636_v7 = vld [vmem:[#allocation66_spill] sm:$0xff] }
 0x6ee   : > { %5428 = vmatmul.bf16.gmra.mxu2 %v13633_v28  ;;  %5517 = vmatmul.bf16.gmra.mxu3 %v13634_v8  ;;  %v8727_v28 = vld [vmem:[#allocation7 + $0x508] sm:$0xf] }
 0x6ef   : > { %5812 = vmatpush.bf16.msrb.mxu3 %v8984_v5  ;;  %v8728_v61 = vor.u32 %v9415_v36, %v8727_v28  ;;  %v13637_v5 = vld [vmem:[#allocation67_spill] sm:$0xff] }
 0x6f1   : > { %v5389_v17 = vpop.f32.mrf.mxu2  ;;  %v5478_v12 = vpop.f32.mrf.mxu3  ;;  %5634 = vmatpush.bf16.msrb.mxu1 %v8728_v61 }
 0x6f2   : > { %v5390_v35 = vadd.f32 %v5389_v17, %v5301_v39  ;;  %v5213_v19 = vpop.f32.mrf.mxu0  ;;  %v5302_v34 = vpop.f32.mrf.mxu1  ;;  %v13635_v17 = vld [vmem:[#allocation65_spill] sm:$0xff] }
 0x6f3   : > { %v5214_v22 = vadd.f32 %v5213_v19, %v11810_v63 }
 0x6f4   : > { %v11866_v8 = vadd.f32 %v5478_v12, %v5390_v35  ;;  %v13638_v35 = vld [vmem:[#allocation68_spill] sm:$0xff] }
 0x6f5   : > { %v5303_v43 = vadd.f32 %v5302_v34, %v5214_v22 }
 0x6f9   : > { %v5391_v62 = vpop.f32.mrf.mxu2  ;;  %v5480_v15 = vpop.f32.mrf.mxu3 }
 0x6fa   : > { %v5392_v6 = vadd.f32 %v5391_v62, %v5303_v43  ;;  %v5216_v10 = vpop.f32.mrf.mxu0  ;;  %v5305_v59 = vpop.f32.mrf.mxu1 }
 0x6fb   : > { %v5217_v39 = vadd.f32 %v5216_v10, %v11810_v63 }
 0x6fc   : > { %v11869_v29 = vadd.f32 %v5480_v15, %v5392_v6  ;;  %5255 = vmatmul.bf16.gmra.mxu0 %v13635_v17  ;;  %v8585_v17 = vld [vmem:[#allocation7 + $0x3f8] sm:$0xf0] }
 0x6fd   : > { %v5306_v33 = vadd.f32 %v5305_v59, %v5217_v39  ;;  %5344 = vmatmul.bf16.gmra.mxu1 %v13636_v7  ;;  %v13639_v7 = vld [vmem:[#allocation69_spill] sm:$0xff] }
 0x6fe   : > { %5433 = vmatmul.bf16.gmra.mxu2 %v13637_v5  ;;  %5522 = vmatmul.bf16.gmra.mxu3 %v13638_v35 }
 0x701   : > { %v5394_v36 = vpop.f32.mrf.mxu2  ;;  %v5483_v22 = vpop.f32.mrf.mxu3 }
 0x702   : > { %v5395_v34 = vadd.f32 %v5394_v36, %v5306_v33  ;;  %v5218_v62 = vpop.f32.mrf.mxu0  ;;  %v5307_v12 = vpop.f32.mrf.mxu1  ;;  %v13640_v33 = vld [vmem:[#allocation70_spill] sm:$0xff]  ;;  %v13641_v36 = vld [vmem:[#allocation71_spill] sm:$0xff] }
 0x703   : > { %v5219_v28 = vadd.f32 %v5218_v62, %v11810_v63  ;;  %v13642_v62 = vld [vmem:[#allocation72_spill] sm:$0xff] }
 0x704   : > { %v11876_v19 = vadd.f32 %v5483_v22, %v5395_v34  ;;  %v9345_v34 = vld [vmem:[#allocation7 + $0x2ec] sm:$0xf]  ;;  %v8457_v22 = vld [vmem:[#allocation7 + $0x2f8] sm:$0xf0] }
 0x705   : > { %v5308_v6 = vadd.f32 %v5307_v12, %v5219_v28  ;;  %v9281_v28 = vld [vmem:[#allocation7 + $0xec] sm:$0xf]  ;;  %v8460_v12 = vor.u32 %v9345_v34, %v8457_v22 }
 0x707   : > { %6072 = vmatpush.bf16.msra.mxu2 %v8460_v12 }
 0x709   : > { %v5396_v43 = vpop.f32.mrf.mxu2  ;;  %v5485_v15 = vpop.f32.mrf.mxu3 }
 0x70a   : > { %v5397_v61 = vadd.f32 %v5396_v43, %v5308_v6  ;;  %v5221_v10 = vpop.f32.mrf.mxu0  ;;  %v5310_v59 = vpop.f32.mrf.mxu1  ;;  %v8201_v6 = vld [vmem:[#allocation7 + $0xf8] sm:$0xf0]  ;;  %v9377_v43 = vld [vmem:[#allocation7 + $0x3ec] sm:$0xf] }
 0x70b   : > { %v5222_v39 = vadd.f32 %v5221_v10, %v11810_v63  ;;  %v8204_v40 = vor.u32 %v9281_v28, %v8201_v6 }
 0x70c   : > { %v11879_v5 = vadd.f32 %v5485_v15, %v5397_v61  ;;  %5260 = vmatmul.bf16.gmra.mxu0 %v13639_v7  ;;  %v8588_v61 = vor.u32 %v9377_v43, %v8585_v17 }
 0x70d   : > { %v5311_v35 = vadd.f32 %v5310_v59, %v5222_v39  ;;  %5349 = vmatmul.bf16.gmra.mxu1 %v13640_v33  ;;  %5894 = vmatpush.bf16.msra.mxu0 %v8204_v40  ;;  %v13645_v40 = vld [vmem:[#allocation74_spill] sm:$0xff] }
 0x70e   : > { %5438 = vmatmul.bf16.gmra.mxu2 %v13641_v36  ;;  %5527 = vmatmul.bf16.gmra.mxu3 %v13642_v62  ;;  %v9313_v36 = vld [vmem:[#allocation7 + $0x1ec] sm:$0xf] }
 0x70f   : > { %6161 = vmatpush.bf16.msra.mxu3 %v8588_v61  ;;  %v8332_v22 = vor.u32 %v9313_v36, %v8329_v1  ;;  %v13646_v61 = vld [vmem:[#allocation75_spill] sm:$0xff] }
 0x711   : > { %v5399_v10 = vpop.f32.mrf.mxu2  ;;  %v5488_v39 = vpop.f32.mrf.mxu3  ;;  %5983 = vmatpush.bf16.msra.mxu1 %v8332_v22 }
 0x712   : > { %v5400_v15 = vadd.f32 %v5399_v10, %v5311_v35  ;;  %v5223_v59 = vpop.f32.mrf.mxu0  ;;  %v5312_v7 = vpop.f32.mrf.mxu1  ;;  %v13644_v10 = vld [vmem:[#allocation73_spill] sm:$0xff] }
 0x713   : > { %v5224_v33 = vadd.f32 %v5223_v59, %v11810_v63 }
 0x714   : > { %v11886_v62 = vadd.f32 %v5488_v39, %v5400_v15  ;;  %v13647_v15 = vld [vmem:[#allocation76_spill] sm:$0xff] }
 0x715   : > { %v5313_v34 = vadd.f32 %v5312_v7, %v5224_v33 }
 0x719   : > { %v5401_v51 = vpop.f32.mrf.mxu2  ;;  %v5490_v28 = vpop.f32.mrf.mxu3 }
 0x71a   : > { %v5402_v38 = vadd.f32 %v5401_v51, %v5313_v34  ;;  %v5226_v17 = vpop.f32.mrf.mxu0  ;;  %v5315_v6 = vpop.f32.mrf.mxu1 }
 0x71b   : > { %v5227_v35 = vadd.f32 %v5226_v17, %v11810_v63 }
 0x71c   : > { %v11889_v12 = vadd.f32 %v5490_v28, %v5402_v38  ;;  %5265 = vmatmul.bf16.gmra.mxu0 %v13644_v10  ;;  %v8569_v10 = vld [vmem:[#allocation7 + $0x3d8] sm:$0xf0] }
 0x71d   : > { %v5316_v43 = vadd.f32 %v5315_v6, %v5227_v35  ;;  %5354 = vmatmul.bf16.gmra.mxu1 %v13645_v40  ;;  %v13650_v40 = vld [vmem:[#allocation77_spill] sm:$0xff] }
 0x71e   : > { %13643 = vst [vmem:[#allocation180_spill] sm:$0xff] %v11889_v12  ;;  %5443 = vmatmul.bf16.gmra.mxu2 %v13646_v61  ;;  %5532 = vmatmul.bf16.gmra.mxu3 %v13647_v15 }
 0x721   : > { %v5404_v1 = vpop.f32.mrf.mxu2  ;;  %v5493_v33 = vpop.f32.mrf.mxu3 }
 0x722   : > { %v5405_v7 = vadd.f32 %v5404_v1, %v5316_v43  ;;  %v5228_v51 = vpop.f32.mrf.mxu0  ;;  %v5317_v39 = vpop.f32.mrf.mxu1  ;;  %v13651_v43 = vld [vmem:[#allocation78_spill] sm:$0xff]  ;;  %v13652_v1 = vld [vmem:[#allocation79_spill] sm:$0xff] }
 0x723   : > { %v5229_v36 = vadd.f32 %v5228_v51, %v11810_v63  ;;  %v13653_v51 = vld [vmem:[#allocation80_spill] sm:$0xff] }
 0x724   : > { %v11896_v59 = vadd.f32 %v5493_v33, %v5405_v7  ;;  %v9341_v7 = vld [vmem:[#allocation7 + $0x2cc] sm:$0xf]  ;;  %v8441_v33 = vld [vmem:[#allocation7 + $0x2d8] sm:$0xf0] }
 0x725   : > { %v5318_v38 = vadd.f32 %v5317_v39, %v5229_v36  ;;  %v9277_v36 = vld [vmem:[#allocation7 + $0xcc] sm:$0xf]  ;;  %v8444_v39 = vor.u32 %v9341_v7, %v8441_v33 }
 0x726   : > { %13648 = vst [vmem:[#allocation181_spill] sm:$0xff] %v11896_v59 }
 0x727   : > { %6073 = vmatpush.bf16.msra.mxu2 %v8444_v39 }
 0x729   : > { %v5406_v34 = vpop.f32.mrf.mxu2  ;;  %v5495_v28 = vpop.f32.mrf.mxu3 }
 0x72a   : > { %v5407_v22 = vadd.f32 %v5406_v34, %v5318_v38  ;;  %v5231_v17 = vpop.f32.mrf.mxu0  ;;  %v5320_v6 = vpop.f32.mrf.mxu1  ;;  %v8185_v38 = vld [vmem:[#allocation7 + $0xd8] sm:$0xf0]  ;;  %v9373_v34 = vld [vmem:[#allocation7 + $0x3cc] sm:$0xf] }
 0x72b   : > { %v5232_v35 = vadd.f32 %v5231_v17, %v11810_v63  ;;  %v8188_v58 = vor.u32 %v9277_v36, %v8185_v38 }
 0x72c   : > { %v11899_v61 = vadd.f32 %v5495_v28, %v5407_v22  ;;  %5546 = vmatmul.bf16.vlgmr.msrb.gmra.mxu0 %v13650_v40  ;;  %v8572_v22 = vor.u32 %v9373_v34, %v8569_v10 }
 0x72d   : > { %v5321_v15 = vadd.f32 %v5320_v6, %v5232_v35  ;;  %5635 = vmatmul.bf16.vlgmr.msrb.gmra.mxu1 %v13651_v43  ;;  %5895 = vmatpush.bf16.msra.mxu0 %v8188_v58  ;;  %v13657_v58 = vld [vmem:[#allocation82_spill] sm:$0xff] }
 0x72e   : > { %13649 = vst [vmem:[#allocation182_spill] sm:$0xff] %v11899_v61  ;;  %5724 = vmatmul.bf16.vlgmr.msrb.gmra.mxu2 %v13652_v1  ;;  %5813 = vmatmul.bf16.vlgmr.msrb.gmra.mxu3 %v13653_v51  ;;  %v9309_v1 = vld [vmem:[#allocation7 + $0x1cc] sm:$0xf]  ;;  %v8313_v61 = vld [vmem:[#allocation7 + $0x1d8] sm:$0xf0] }
 0x72f   : > { %6162 = vmatpush.bf16.msra.mxu3 %v8572_v22  ;;  %v8316_v33 = vor.u32 %v9309_v1, %v8313_v61  ;;  %v13658_v22 = vld [vmem:[#allocation83_spill] sm:$0xff] }
 0x731   : > { %v5409_v17 = vpop.f32.mrf.mxu2  ;;  %v5498_v35 = vpop.f32.mrf.mxu3  ;;  %5984 = vmatpush.bf16.msra.mxu1 %v8316_v33 }
 0x732   : > { %v5410_v28 = vadd.f32 %v5409_v17, %v5321_v15  ;;  %v5233_v6 = vpop.f32.mrf.mxu0  ;;  %v5322_v40 = vpop.f32.mrf.mxu1  ;;  %v13656_v17 = vld [vmem:[#allocation81_spill] sm:$0xff] }
 0x733   : > { %v5234_v43 = vadd.f32 %v5233_v6, %v11810_v63 }
 0x734   : > { %v11906_v51 = vadd.f32 %v5498_v35, %v5410_v28  ;;  %v13659_v28 = vld [vmem:[#allocation84_spill] sm:$0xff] }
 0x735   : > { %v5323_v7 = vadd.f32 %v5322_v40, %v5234_v43 }
 0x736   : > { %13654 = vst [vmem:[#allocation183_spill] sm:$0xff] %v11906_v51 }
 0x739   : > { %v5411_v4 = vpop.f32.mrf.mxu2  ;;  %v5500_v36 = vpop.f32.mrf.mxu3 }
 0x73a   : > { %v5412_v59 = vadd.f32 %v5411_v4, %v5323_v7  ;;  %v5236_v10 = vpop.f32.mrf.mxu0  ;;  %v5325_v38 = vpop.f32.mrf.mxu1 }
 0x73b   : > { %v5237_v15 = vadd.f32 %v5236_v10, %v11810_v63 }
 0x73c   : > { %v11909_v39 = vadd.f32 %v5500_v36, %v5412_v59  ;;  %5551 = vmatmul.bf16.gmra.mxu0 %v13656_v17  ;;  %v8553_v17 = vld [vmem:[#allocation7 + $0x3b8] sm:$0xf0] }
 0x73d   : > { %v5326_v34 = vadd.f32 %v5325_v38, %v5237_v15  ;;  %5640 = vmatmul.bf16.gmra.mxu1 %v13657_v58  ;;  %v13662_v58 = vld [vmem:[#allocation85_spill] sm:$0xff] }
 0x73e   : > { %13655 = vst [vmem:[#allocation184_spill] sm:$0xff] %v11909_v39  ;;  %5729 = vmatmul.bf16.gmra.mxu2 %v13658_v22  ;;  %5818 = vmatmul.bf16.gmra.mxu3 %v13659_v28 }
 0x741   : > { %v5414_v40 = vpop.f32.mrf.mxu2  ;;  %v5503_v43 = vpop.f32.mrf.mxu3 }
 0x742   : > { %v5415_v61 = vadd.f32 %v5414_v40, %v5326_v34  ;;  %v5238_v4 = vpop.f32.mrf.mxu0  ;;  %v5327_v35 = vpop.f32.mrf.mxu1  ;;  %v13663_v34 = vld [vmem:[#allocation86_spill] sm:$0xff]  ;;  %v13664_v40 = vld [vmem:[#allocation87_spill] sm:$0xff] }
 0x743   : > { %v5239_v1 = vadd.f32 %v5238_v4, %v11810_v63  ;;  %v13665_v4 = vld [vmem:[#allocation88_spill] sm:$0xff] }
 0x744   : > { %v11916_v6 = vadd.f32 %v5503_v43, %v5415_v61  ;;  %v9337_v61 = vld [vmem:[#allocation7 + $0x2ac] sm:$0xf]  ;;  %v8425_v43 = vld [vmem:[#allocation7 + $0x2b8] sm:$0xf0] }
 0x745   : > { %v5328_v59 = vadd.f32 %v5327_v35, %v5239_v1  ;;  %v9273_v1 = vld [vmem:[#allocation7 + $0xac] sm:$0xf]  ;;  %v8428_v35 = vor.u32 %v9337_v61, %v8425_v43 }
 0x746   : > { %13660 = vst [vmem:[#allocation185_spill] sm:$0xff] %v11916_v6 }
 0x747   : > { %6074 = vmatpush.bf16.msra.mxu2 %v8428_v35 }
 0x749   : > { %v5416_v7 = vpop.f32.mrf.mxu2  ;;  %v5505_v36 = vpop.f32.mrf.mxu3 }
 0x74a   : > { %v5417_v33 = vadd.f32 %v5416_v7, %v5328_v59  ;;  %v5241_v10 = vpop.f32.mrf.mxu0  ;;  %v5330_v38 = vpop.f32.mrf.mxu1  ;;  %v8169_v59 = vld [vmem:[#allocation7 + $0xb8] sm:$0xf0]  ;;  %v9369_v7 = vld [vmem:[#allocation7 + $0x3ac] sm:$0xf] }
 0x74b   : > { %v5242_v15 = vadd.f32 %v5241_v10, %v11810_v63  ;;  %v8172_v6 = vor.u32 %v9273_v1, %v8169_v59 }
 0x74c   : > { %v11919_v22 = vadd.f32 %v5505_v36, %v5417_v33  ;;  %5556 = vmatmul.bf16.gmra.mxu0 %v13662_v58  ;;  %v8556_v33 = vor.u32 %v9369_v7, %v8553_v17 }
 0x74d   : > { %v5331_v28 = vadd.f32 %v5330_v38, %v5242_v15  ;;  %5645 = vmatmul.bf16.gmra.mxu1 %v13663_v34  ;;  %5896 = vmatpush.bf16.msra.mxu0 %v8172_v6  ;;  %v13669_v6 = vld [vmem:[#allocation90_spill] sm:$0xff] }
 0x74e   : > { %13661 = vst [vmem:[#allocation186_spill] sm:$0xff] %v11919_v22  ;;  %5734 = vmatmul.bf16.gmra.mxu2 %v13664_v40  ;;  %5823 = vmatmul.bf16.gmra.mxu3 %v13665_v4  ;;  %v9305_v40 = vld [vmem:[#allocation7 + $0x1ac] sm:$0xf]  ;;  %v8297_v22 = vld [vmem:[#allocation7 + $0x1b8] sm:$0xf0] }
 0x74f   : > { %6163 = vmatpush.bf16.msra.mxu3 %v8556_v33  ;;  %v8300_v43 = vor.u32 %v9305_v40, %v8297_v22  ;;  %v13670_v33 = vld [vmem:[#allocation91_spill] sm:$0xff] }
 0x751   : > { %v5419_v10 = vpop.f32.mrf.mxu2  ;;  %v5508_v15 = vpop.f32.mrf.mxu3  ;;  %5985 = vmatpush.bf16.msra.mxu1 %v8300_v43 }
 0x752   : > { %v5420_v36 = vadd.f32 %v5419_v10, %v5331_v28  ;;  %v5243_v38 = vpop.f32.mrf.mxu0  ;;  %v5332_v58 = vpop.f32.mrf.mxu1  ;;  %v13668_v10 = vld [vmem:[#allocation89_spill] sm:$0xff] }
 0x753   : > { %v5244_v34 = vadd.f32 %v5243_v38, %v11810_v63 }
 0x754   : > { %v11926_v4 = vadd.f32 %v5508_v15, %v5420_v36  ;;  %v13671_v36 = vld [vmem:[#allocation92_spill] sm:$0xff] }
 0x755   : > { %v5333_v61 = vadd.f32 %v5332_v58, %v5244_v34 }
 0x756   : > { %13666 = vst [vmem:[#allocation187_spill] sm:$0xff] %v11926_v4 }
 0x759   : > { %v5421_v39 = vpop.f32.mrf.mxu2  ;;  %v5510_v1 = vpop.f32.mrf.mxu3 }
 0x75a   : > { %v5422_v51 = vadd.f32 %v5421_v39, %v5333_v61  ;;  %v5246_v17 = vpop.f32.mrf.mxu0  ;;  %v5335_v59 = vpop.f32.mrf.mxu1 }
 0x75b   : > { %v5247_v28 = vadd.f32 %v5246_v17, %v11810_v63 }
 0x75c   : > { %v11929_v35 = vadd.f32 %v5510_v1, %v5422_v51  ;;  %5561 = vmatmul.bf16.gmra.mxu0 %v13668_v10  ;;  %v8537_v10 = vld [vmem:[#allocation7 + $0x398] sm:$0xf0] }
 0x75d   : > { %v5336_v7 = vadd.f32 %v5335_v59, %v5247_v28  ;;  %5650 = vmatmul.bf16.gmra.mxu1 %v13669_v6  ;;  %v13674_v6 = vld [vmem:[#allocation93_spill] sm:$0xff] }
 0x75e   : > { %13667 = vst [vmem:[#allocation188_spill] sm:$0xff] %v11929_v35  ;;  %5739 = vmatmul.bf16.gmra.mxu2 %v13670_v33  ;;  %5828 = vmatmul.bf16.gmra.mxu3 %v13671_v36 }
 0x761   : > { %v5424_v58 = vpop.f32.mrf.mxu2  ;;  %v5513_v34 = vpop.f32.mrf.mxu3 }
 0x762   : > { %v5425_v22 = vadd.f32 %v5424_v58, %v5336_v7  ;;  %v5248_v39 = vpop.f32.mrf.mxu0  ;;  %v5337_v15 = vpop.f32.mrf.mxu1  ;;  %v13675_v7 = vld [vmem:[#allocation94_spill] sm:$0xff]  ;;  %v13676_v58 = vld [vmem:[#allocation95_spill] sm:$0xff] }
 0x763   : > { %v5249_v40 = vadd.f32 %v5248_v39, %v11810_v63  ;;  %v13677_v39 = vld [vmem:[#allocation96_spill] sm:$0xff] }
 0x764   : > { %v11936_v38 = vadd.f32 %v5513_v34, %v5425_v22  ;;  %v9333_v22 = vld [vmem:[#allocation7 + $0x28c] sm:$0xf]  ;;  %v8409_v34 = vld [vmem:[#allocation7 + $0x298] sm:$0xf0] }
 0x765   : > { %v5338_v51 = vadd.f32 %v5337_v15, %v5249_v40  ;;  %v9269_v40 = vld [vmem:[#allocation7 + $0x8c] sm:$0xf]  ;;  %v8412_v15 = vor.u32 %v9333_v22, %v8409_v34 }
 0x766   : > { %13672 = vst [vmem:[#allocation189_spill] sm:$0xff] %v11936_v38 }
 0x767   : > { %6075 = vmatpush.bf16.msra.mxu2 %v8412_v15 }
 0x769   : > { %v5426_v61 = vpop.f32.mrf.mxu2  ;;  %v5515_v1 = vpop.f32.mrf.mxu3 }
 0x76a   : > { %v5427_v43 = vadd.f32 %v5426_v61, %v5338_v51  ;;  %v5251_v17 = vpop.f32.mrf.mxu0  ;;  %v5340_v59 = vpop.f32.mrf.mxu1  ;;  %v8153_v51 = vld [vmem:[#allocation7 + $0x98] sm:$0xf0]  ;;  %v9365_v61 = vld [vmem:[#allocation7 + $0x38c] sm:$0xf] }
 0x76b   : > { %v5252_v28 = vadd.f32 %v5251_v17, %v11810_v63  ;;  %v8156_v38 = vor.u32 %v9269_v40, %v8153_v51 }
 0x76c   : > { %v11939_v33 = vadd.f32 %v5515_v1, %v5427_v43  ;;  %5566 = vmatmul.bf16.gmra.mxu0 %v13674_v6  ;;  %v8540_v43 = vor.u32 %v9365_v61, %v8537_v10 }
 0x76d   : > { %v5341_v36 = vadd.f32 %v5340_v59, %v5252_v28  ;;  %5655 = vmatmul.bf16.gmra.mxu1 %v13675_v7  ;;  %5897 = vmatpush.bf16.msra.mxu0 %v8156_v38  ;;  %v13681_v38 = vld [vmem:[#allocation98_spill] sm:$0xff] }
 0x76e   : > { %13673 = vst [vmem:[#allocation190_spill] sm:$0xff] %v11939_v33  ;;  %5744 = vmatmul.bf16.gmra.mxu2 %v13676_v58  ;;  %5833 = vmatmul.bf16.gmra.mxu3 %v13677_v39  ;;  %v9301_v58 = vld [vmem:[#allocation7 + $0x18c] sm:$0xf]  ;;  %v8281_v33 = vld [vmem:[#allocation7 + $0x198] sm:$0xf0] }
 0x76f   : > { %6164 = vmatpush.bf16.msra.mxu3 %v8540_v43  ;;  %v8284_v34 = vor.u32 %v9301_v58, %v8281_v33  ;;  %v13682_v43 = vld [vmem:[#allocation99_spill] sm:$0xff] }
 0x771   : > { %v5429_v17 = vpop.f32.mrf.mxu2  ;;  %v5518_v28 = vpop.f32.mrf.mxu3  ;;  %5986 = vmatpush.bf16.msra.mxu1 %v8284_v34 }
 0x772   : > { %v5430_v1 = vadd.f32 %v5429_v17, %v5341_v36  ;;  %v5253_v59 = vpop.f32.mrf.mxu0  ;;  %v5342_v6 = vpop.f32.mrf.mxu1  ;;  %v13680_v17 = vld [vmem:[#allocation97_spill] sm:$0xff] }
 0x773   : > { %v5254_v7 = vadd.f32 %v5253_v59, %v11810_v63 }
 0x774   : > { %v11946_v39 = vadd.f32 %v5518_v28, %v5430_v1  ;;  %v13683_v1 = vld [vmem:[#allocation100_spill] sm:$0xff] }
 0x775   : > { %v5343_v22 = vadd.f32 %v5342_v6, %v5254_v7 }
 0x776   : > { %13678 = vst [vmem:[#allocation191_spill] sm:$0xff] %v11946_v39 }
 0x779   : > { %v5431_v35 = vpop.f32.mrf.mxu2  ;;  %v5520_v40 = vpop.f32.mrf.mxu3 }
 0x77a   : > { %v5432_v4 = vadd.f32 %v5431_v35, %v5343_v22  ;;  %v5256_v10 = vpop.f32.mrf.mxu0  ;;  %v5345_v51 = vpop.f32.mrf.mxu1 }
 0x77b   : > { %v5257_v36 = vadd.f32 %v5256_v10, %v11810_v63 }
 0x77c   : > { %v11949_v15 = vadd.f32 %v5520_v40, %v5432_v4  ;;  %5571 = vmatmul.bf16.gmra.mxu0 %v13680_v17  ;;  %v8521_v17 = vld [vmem:[#allocation7 + $0x378] sm:$0xf0] }
 0x77d   : > { %v5346_v61 = vadd.f32 %v5345_v51, %v5257_v36  ;;  %5660 = vmatmul.bf16.gmra.mxu1 %v13681_v38  ;;  %v13686_v38 = vld [vmem:[#allocation101_spill] sm:$0xff] }
 0x77e   : > { %13679 = vst [vmem:[#allocation192_spill] sm:$0xff] %v11949_v15  ;;  %5749 = vmatmul.bf16.gmra.mxu2 %v13682_v43  ;;  %5838 = vmatmul.bf16.gmra.mxu3 %v13683_v1 }
 0x781   : > { %v5434_v6 = vpop.f32.mrf.mxu2  ;;  %v5523_v7 = vpop.f32.mrf.mxu3 }
 0x782   : > { %v5435_v33 = vadd.f32 %v5434_v6, %v5346_v61  ;;  %v5258_v35 = vpop.f32.mrf.mxu0  ;;  %v5347_v28 = vpop.f32.mrf.mxu1  ;;  %v13687_v61 = vld [vmem:[#allocation102_spill] sm:$0xff]  ;;  %v13688_v6 = vld [vmem:[#allocation103_spill] sm:$0xff] }
 0x783   : > { %v5259_v58 = vadd.f32 %v5258_v35, %v11810_v63  ;;  %v13689_v35 = vld [vmem:[#allocation104_spill] sm:$0xff] }
 0x784   : > { %v11956_v59 = vadd.f32 %v5523_v7, %v5435_v33  ;;  %v9329_v33 = vld [vmem:[#allocation7 + $0x26c] sm:$0xf]  ;;  %v8393_v7 = vld [vmem:[#allocation7 + $0x278] sm:$0xf0] }
 0x785   : > { %v5348_v4 = vadd.f32 %v5347_v28, %v5259_v58  ;;  %v9265_v58 = vld [vmem:[#allocation7 + $0x6c] sm:$0xf]  ;;  %v8396_v28 = vor.u32 %v9329_v33, %v8393_v7  ;;  %v8265_v33 = vld [vmem:[#allocation7 + $0x178] sm:$0xf0] }
 0x786   : > { %13684 = vst [vmem:[#allocation193_spill] sm:$0xff] %v11956_v59 }
 0x787   : > { %6076 = vmatpush.bf16.msra.mxu2 %v8396_v28 }
 0x789   : > { %v5436_v22 = vpop.f32.mrf.mxu2  ;;  %v5525_v40 = vpop.f32.mrf.mxu3 }
 0x78a   : > { %v5437_v34 = vadd.f32 %v5436_v22, %v5348_v4  ;;  %v5261_v10 = vpop.f32.mrf.mxu0  ;;  %v5350_v51 = vpop.f32.mrf.mxu1  ;;  %v8137_v4 = vld [vmem:[#allocation7 + $0x78] sm:$0xf0]  ;;  %v9361_v22 = vld [vmem:[#allocation7 + $0x36c] sm:$0xf] }
 0x78b   : > { %v5262_v36 = vadd.f32 %v5261_v10, %v11810_v63  ;;  %v8140_v59 = vor.u32 %v9265_v58, %v8137_v4 }
 0x78c   : > { %v11959_v43 = vadd.f32 %v5525_v40, %v5437_v34  ;;  %5576 = vmatmul.bf16.gmra.mxu0 %v13686_v38  ;;  %v8524_v34 = vor.u32 %v9361_v22, %v8521_v17 }
 0x78d   : > { %v5351_v1 = vadd.f32 %v5350_v51, %v5262_v36  ;;  %5665 = vmatmul.bf16.gmra.mxu1 %v13687_v61  ;;  %5898 = vmatpush.bf16.msra.mxu0 %v8140_v59 }
 0x78e   : > { %13685 = vst [vmem:[#allocation194_spill] sm:$0xff] %v11959_v43  ;;  %5754 = vmatmul.bf16.gmra.mxu2 %v13688_v6  ;;  %5843 = vmatmul.bf16.gmra.mxu3 %v13689_v35  ;;  %v9297_v43 = vld [vmem:[#allocation7 + $0x16c] sm:$0xf] }
 0x78f   : > { %6165 = vmatpush.bf16.msra.mxu3 %v8524_v34  ;;  %v8268_v15 = vor.u32 %v9297_v43, %v8265_v33 }
 0x791   : > { %v5439_v10 = vpop.f32.mrf.mxu2  ;;  %v5528_v36 = vpop.f32.mrf.mxu3  ;;  %5987 = vmatpush.bf16.msra.mxu1 %v8268_v15 }
 0x792   : > { %v5440_v40 = vadd.f32 %v5439_v10, %v5351_v1  ;;  %v5263_v51 = vpop.f32.mrf.mxu0  ;;  %v5352_v38 = vpop.f32.mrf.mxu1 }
 0x793   : > { %v5264_v61 = vadd.f32 %v5263_v51, %v11810_v63 }
 0x794   : > { %v11966_v35 = vadd.f32 %v5528_v36, %v5440_v40 }
 0x795   : > { %v5353_v6 = vadd.f32 %v5352_v38, %v5264_v61  ;;  %v13690_v38 = vld [vmem:[#allocation107_spill] sm:$0xff] }
 0x799   : > { %v5441_v7 = vpop.f32.mrf.mxu2  ;;  %v5530_v12 = vpop.f32.mrf.mxu3 }
 0x79a   : > { %v5442_v39 = vadd.f32 %v5441_v7, %v5353_v6  ;;  %v5266_v58 = vpop.f32.mrf.mxu0  ;;  %v5355_v1 = vpop.f32.mrf.mxu1 }
 0x79b   : > { %v5267_v17 = vadd.f32 %v5266_v58, %v11810_v63 }
 0x79c   : > { %v11969_v28 = vadd.f32 %v5530_v12, %v5442_v39  ;;  %5581 = vmatmul.bf16.gmra.mxu0 %v10797_v3 }
 0x79d   : > { %v5356_v4 = vadd.f32 %v5355_v1, %v5267_v17  ;;  %5670 = vmatmul.bf16.gmra.mxu1 %v10799_v49  ;;  %v13691_v17 = vld [vmem:[#allocation108_spill] sm:$0xff]  ;;  %v13692_v1 = vld [vmem:[#allocation109_spill] sm:$0xff] }
 0x79e   : > { %5759 = vmatmul.bf16.gmra.mxu2 %v13365_v20  ;;  %5848 = vmatmul.bf16.gmra.mxu3 %v13690_v38  ;;  %v8249_v38 = vld [vmem:[#allocation7 + $0x158] sm:$0xf0] }
 0x7a1   : > { %v5444_v59 = vpop.f32.mrf.mxu2  ;;  %v5533_v61 = vpop.f32.mrf.mxu3 }
 0x7a2   : > { %v5445_v43 = vadd.f32 %v5444_v59, %v5356_v4  ;;  %v5268_v6 = vpop.f32.mrf.mxu0  ;;  %v5357_v10 = vpop.f32.mrf.mxu1  ;;  %v13693_v4 = vld [vmem:[#allocation110_spill] sm:$0xff] }
 0x7a3   : > { %v5269_v22 = vadd.f32 %v5268_v6, %v11810_v63  ;;  %v13694_v63 = vld [vmem:[#allocation111_spill] sm:$0xff]  ;;  %v9325_v59 = vld [vmem:[#allocation7 + $0x24c] sm:$0xf] }
 0x7a4   : > { %v11976_v34 = vadd.f32 %v5533_v61, %v5445_v43  ;;  %v8377_v43 = vld [vmem:[#allocation7 + $0x258] sm:$0xf0]  ;;  %v9261_v61 = vld [vmem:[#allocation7 + $0x4c] sm:$0xf] }
 0x7a5   : > { %v5358_v12 = vadd.f32 %v5357_v10, %v5269_v22  ;;  %v8380_v6 = vor.u32 %v9325_v59, %v8377_v43  ;;  %v8121_v22 = vld [vmem:[#allocation7 + $0x58] sm:$0xf0]  ;;  %v9357_v10 = vld [vmem:[#allocation7 + $0x34c] sm:$0xf] }
 0x7a7   : > { %6077 = vmatpush.bf16.msra.mxu2 %v8380_v6 }
 0x7a9   : > { %v5446_v39 = vpop.f32.mrf.mxu2  ;;  %v5535_v40 = vpop.f32.mrf.mxu3 }
 0x7aa   : > { %v5447_v15 = vadd.f32 %v5446_v39, %v5358_v12  ;;  %v5547_v36 = vpop.f32.mrf.mxu0  ;;  %v5636_v33 = vpop.f32.mrf.mxu1  ;;  %v8505_v12 = vld [vmem:[#allocation7 + $0x358] sm:$0xf0]  ;;  %v8124_v39 = vor.u32 %v9261_v61, %v8121_v22 }
 0x7ab   : > { %v5548_v51 = vadd.f32 %v5547_v36, %v11826_v23 }
 0x7ac   : > { %v11979_v7 = vadd.f32 %v5535_v40, %v5447_v15  ;;  %5586 = vmatmul.bf16.gmra.mxu0 %v13691_v17  ;;  %v8508_v15 = vor.u32 %v9357_v10, %v8505_v12  ;;  %v9293_v17 = vld [vmem:[#allocation7 + $0x14c] sm:$0xf] }
 0x7ad   : > { %v5637_v58 = vadd.f32 %v5636_v33, %v5548_v51  ;;  %5675 = vmatmul.bf16.gmra.mxu1 %v13692_v1  ;;  %5899 = vmatpush.bf16.msra.mxu0 %v8124_v39  ;;  %v8252_v59 = vor.u32 %v9293_v17, %v8249_v38 }
 0x7ae   : > { %5764 = vmatmul.bf16.gmra.mxu2 %v13693_v4  ;;  %5853 = vmatmul.bf16.gmra.mxu3 %v13694_v63 }
 0x7af   : > { %6166 = vmatpush.bf16.msra.mxu3 %v8508_v15  ;;  %5988 = vmatpush.bf16.msra.mxu1 %v8252_v59 }
 0x7b1   : > { %v5725_v23 = vpop.f32.mrf.mxu2  ;;  %v5814_v36 = vpop.f32.mrf.mxu3 }
 0x7b2   : > { %v5726_v40 = vadd.f32 %v5725_v23, %v5637_v58  ;;  %v5549_v51 = vpop.f32.mrf.mxu0  ;;  %v5638_v1 = vpop.f32.mrf.mxu1 }
 0x7b3   : > { %v5550_v33 = vadd.f32 %v5549_v51, %v11829_v55 }
 0x7b4   : > { %v5815_v63 = vadd.f32 %v5814_v36, %v5726_v40 }
 0x7b5   : > { %v5639_v4 = vadd.f32 %v5638_v1, %v5550_v33 }
 0x7b6   : > { %v6738_v6 = vmul.f32 %v11206_v13, %v5815_v63  ;;  %vm6608_vm12 = vcmp.gt.f32.partialorder %v5815_v63, 0.0 }
 0x7b8   : > { %v11993_v38 = vsel %vm6608_vm12, %v5815_v63, %v6738_v6  ;;  %v9321_v6 = vld [vmem:[#allocation7 + $0x22c] sm:$0xf] }
 0x7b9   : > { %v5727_v43 = vpop.f32.mrf.mxu2  ;;  %v5816_v49 = vpop.f32.mrf.mxu3  ;;  %13695 = vst [vmem:[#allocation195_spill] sm:$0xff] %v11993_v38  ;;  %v13811_v38 = vld [vmem:[#allocation77_spill] sm:$0xff] }
 0x7ba   : > { %v5728_v20 = vadd.f32 %v5727_v43, %v5639_v4  ;;  %v5552_v61 = vpop.f32.mrf.mxu0  ;;  %v5641_v22 = vpop.f32.mrf.mxu1 }
 0x7bb   : > { %v5553_v58 = vadd.f32 %v5552_v61, %v11836_v24 }
 0x7bc   : > { %v5817_v10 = vadd.f32 %v5816_v49, %v5728_v20  ;;  %5591 = vmatmul.bf16.gmra.mxu0 %v10853_v26 }
 0x7bd   : > { %v5642_v55 = vadd.f32 %v5641_v22, %v5553_v58  ;;  %5680 = vmatmul.bf16.gmra.mxu1 %v10855_v46 }
 0x7be   : > { %vm6612_vm13 = vcmp.gt.f32.partialorder %v5817_v10, 0.0  ;;  %v6742_v1 = vmul.f32 %v11206_v13, %v5817_v10  ;;  %5769 = vmatmul.bf16.gmra.mxu2 %v10866_v2  ;;  %5858 = vmatmul.bf16.gmra.mxu3 %v10870_v32 }
 0x7c0   : > { %v11995_v24 = vsel %vm6612_vm13, %v5817_v10, %v6742_v1  ;;  %v8361_v10 = vld [vmem:[#allocation7 + $0x238] sm:$0xf0] }
 0x7c1   : > { %13696 = vst [vmem:[#allocation196_spill] sm:$0xff] %v11995_v24  ;;  %v5730_v20 = vpop.f32.mrf.mxu2  ;;  %v5819_v4 = vpop.f32.mrf.mxu3  ;;  %v8105_v1 = vld [vmem:[#allocation7 + $0x38] sm:$0xf0] }
 0x7c2   : > { %v5731_v17 = vadd.f32 %v5730_v20, %v5642_v55  ;;  %v5554_v12 = vpop.f32.mrf.mxu0  ;;  %v5643_v39 = vpop.f32.mrf.mxu1  ;;  %v8364_v55 = vor.u32 %v9321_v6, %v8361_v10  ;;  %v9353_v20 = vld [vmem:[#allocation7 + $0x32c] sm:$0xf]  ;;  %v13820_v24 = vld [vmem:[#allocation84_spill] sm:$0xff] }
 0x7c3   : > { %v5555_v23 = vadd.f32 %v5554_v12, %v11839_v31 }
 0x7c4   : > { %v5820_v15 = vadd.f32 %v5819_v4, %v5731_v17  ;;  %v8489_v17 = vld [vmem:[#allocation7 + $0x338] sm:$0xf0]  ;;  %6078 = vmatpush.bf16.msra.mxu2 %v8364_v55 }
 0x7c5   : > { %v5644_v40 = vadd.f32 %v5643_v39, %v5555_v23 }
 0x7c6   : > { %v6746_v61 = vmul.f32 %v11206_v13, %v5820_v15  ;;  %vm6616_vm14 = vcmp.gt.f32.partialorder %v5820_v15, 0.0 }
 0x7c8   : > { %v12007_v4 = vsel %vm6616_vm14, %v5820_v15, %v6746_v61  ;;  %v9289_v61 = vld [vmem:[#allocation7 + $0x12c] sm:$0xf] }
 0x7c9   : > { %v5732_v36 = vpop.f32.mrf.mxu2  ;;  %v5821_v33 = vpop.f32.mrf.mxu3  ;;  %13697 = vst [vmem:[#allocation197_spill] sm:$0xff] %v12007_v4 }
 0x7ca   : > { %v5733_v51 = vadd.f32 %v5732_v36, %v5644_v40  ;;  %v5557_v59 = vpop.f32.mrf.mxu0  ;;  %v5646_v43 = vpop.f32.mrf.mxu1  ;;  %v8492_v40 = vor.u32 %v9353_v20, %v8489_v17 }
 0x7cb   : > { %v5558_v63 = vadd.f32 %v5557_v59, %v11846_v27  ;;  %v9257_v27 = vld [vmem:[#allocation7 + $0x2c] sm:$0xf] }
 0x7cc   : > { %v5822_v58 = vadd.f32 %v5821_v33, %v5733_v51  ;;  %5596 = vmatmul.bf16.gmra.mxu0 %v10881_v54  ;;  %v8108_v39 = vor.u32 %v9257_v27, %v8105_v1  ;;  %6167 = vmatpush.bf16.msra.mxu3 %v8492_v40 }
 0x7cd   : > { %v5647_v22 = vadd.f32 %v5646_v43, %v5558_v63  ;;  %5685 = vmatmul.bf16.gmra.mxu1 %v10883_v44 }
 0x7ce   : > { %vm6620_vm15 = vcmp.gt.f32.partialorder %v5822_v58, 0.0  ;;  %v6750_v31 = vmul.f32 %v11206_v13, %v5822_v58  ;;  %5774 = vmatmul.bf16.gmra.mxu2 %v10894_v57  ;;  %5863 = vmatmul.bf16.gmra.mxu3 %v10898_v42 }
 0x7cf   : > { %5900 = vmatpush.bf16.msra.mxu0 %v8108_v39 }
 0x7d0   : > { %v12009_v12 = vsel %vm6620_vm15, %v5822_v58, %v6750_v31  ;;  %v8233_v58 = vld [vmem:[#allocation7 + $0x138] sm:$0xf0] }
 0x7d1   : > { %13698 = vst [vmem:[#allocation198_spill] sm:$0xff] %v12009_v12  ;;  %v5735_v23 = vpop.f32.mrf.mxu2  ;;  %v5824_v33 = vpop.f32.mrf.mxu3  ;;  %v8236_v31 = vor.u32 %v9289_v61, %v8233_v58 }
 0x7d2   : > { %v5736_v51 = vadd.f32 %v5735_v23, %v5647_v22  ;;  %v5559_v59 = vpop.f32.mrf.mxu0  ;;  %v5648_v43 = vpop.f32.mrf.mxu1 }
 0x7d3   : > { %v5560_v63 = vadd.f32 %v5559_v59, %v11849_v56  ;;  %5989 = vmatpush.bf16.msra.mxu1 %v8236_v31 }
 0x7d4   : > { %v5825_v6 = vadd.f32 %v5824_v33, %v5736_v51 }
 0x7d5   : > { %v5649_v15 = vadd.f32 %v5648_v43, %v5560_v63 }
 0x7d6   : > { %v6754_v55 = vmul.f32 %v11206_v13, %v5825_v6  ;;  %vm6624_vm1 = vcmp.gt.f32.partialorder %v5825_v6, 0.0 }
 0x7d8   : > { %v12021_v40 = vsel %vm6624_vm1, %v5825_v6, %v6754_v55 }
 0x7d9   : > { %v5737_v10 = vpop.f32.mrf.mxu2  ;;  %v5826_v1 = vpop.f32.mrf.mxu3  ;;  %13699 = vst [vmem:[#allocation199_spill] sm:$0xff] %v12021_v40 }
 0x7da   : > { %v5738_v27 = vadd.f32 %v5737_v10, %v5649_v15  ;;  %v5562_v20 = vpop.f32.mrf.mxu0  ;;  %v5651_v17 = vpop.f32.mrf.mxu1 }
 0x7db   : > { %v5563_v22 = vadd.f32 %v5562_v20, %v11856_v9 }
 0x7dc   : > { %v5827_v23 = vadd.f32 %v5826_v1, %v5738_v27  ;;  %5601 = vmatmul.bf16.gmra.mxu0 %v10909_v50 }
 0x7dd   : > { %v5652_v56 = vadd.f32 %v5651_v17, %v5563_v22  ;;  %5690 = vmatmul.bf16.gmra.mxu1 %v10911_v25 }
 0x7de   : > { %vm6628_vm2 = vcmp.gt.f32.partialorder %v5827_v23, 0.0  ;;  %v6758_v39 = vmul.f32 %v11206_v13, %v5827_v23  ;;  %5779 = vmatmul.bf16.gmra.mxu2 %v13371_v21  ;;  %5868 = vmatmul.bf16.gmra.mxu3 %v13372_v45 }
 0x7e0   : > { %v12023_v9 = vsel %vm6628_vm2, %v5827_v23, %v6758_v39  ;;  %v8345_v39 = vld [vmem:[#allocation7 + $0x218] sm:$0xf0] }
 0x7e1   : > { %13700 = vst [vmem:[#allocation200_spill] sm:$0xff] %v12023_v9  ;;  %v5740_v51 = vpop.f32.mrf.mxu2  ;;  %v5829_v63 = vpop.f32.mrf.mxu3 }
 0x7e2   : > { %v5741_v59 = vadd.f32 %v5740_v51, %v5652_v56  ;;  %v5564_v43 = vpop.f32.mrf.mxu0  ;;  %v5653_v61 = vpop.f32.mrf.mxu1  ;;  %v9317_v56 = vld [vmem:[#allocation7 + $0x20c] sm:$0xf] }
 0x7e3   : > { %v5565_v15 = vadd.f32 %v5564_v43, %v11859_v11  ;;  %v8348_v51 = vor.u32 %v9317_v56, %v8345_v39  ;;  %v8473_v43 = vld [vmem:[#allocation7 + $0x318] sm:$0xf0] }
 0x7e4   : > { %v5830_v58 = vadd.f32 %v5829_v63, %v5741_v59  ;;  %v8089_v59 = vld [vmem:[#allocation7 + $0x18] sm:$0xf0]  ;;  %v9349_v63 = vld [vmem:[#allocation7 + $0x30c] sm:$0xf] }
 0x7e5   : > { %v5654_v31 = vadd.f32 %v5653_v61, %v5565_v15  ;;  %6079 = vmatpush.bf16.msra.mxu2 %v8348_v51 }
 0x7e6   : > { %v6762_v17 = vmul.f32 %v11206_v13, %v5830_v58  ;;  %vm6632_vm3 = vcmp.gt.f32.partialorder %v5830_v58, 0.0 }
 0x7e8   : > { %v12035_v15 = vsel %vm6632_vm3, %v5830_v58, %v6762_v17  ;;  %v9285_v17 = vld [vmem:[#allocation7 + $0x10c] sm:$0xf] }
 0x7e9   : > { %v5742_v10 = vpop.f32.mrf.mxu2  ;;  %v5831_v1 = vpop.f32.mrf.mxu3  ;;  %13701 = vst [vmem:[#allocation201_spill] sm:$0xff] %v12035_v15 }
 0x7ea   : > { %v5743_v27 = vadd.f32 %v5742_v10, %v5654_v31  ;;  %v5567_v20 = vpop.f32.mrf.mxu0  ;;  %v5656_v22 = vpop.f32.mrf.mxu1 }
 0x7eb   : > { %v5568_v6 = vadd.f32 %v5567_v20, %v11866_v8  ;;  %v9253_v8 = vld [vmem:[#allocation7 + $0xc] sm:$0xf] }
 0x7ec   : > { %v5832_v55 = vadd.f32 %v5831_v1, %v5743_v27  ;;  %5606 = vmatmul.bf16.gmra.mxu0 %v10937_v16  ;;  %v8092_v10 = vor.u32 %v9253_v8, %v8089_v59  ;;  %v8476_v27 = vor.u32 %v9349_v63, %v8473_v43 }
 0x7ed   : > { %v5657_v23 = vadd.f32 %v5656_v22, %v5568_v6  ;;  %5695 = vmatmul.bf16.gmra.mxu1 %v13375_v14 }
 0x7ee   : > { %vm6636_vm4 = vcmp.gt.f32.partialorder %v5832_v55, 0.0  ;;  %v6766_v11 = vmul.f32 %v11206_v13, %v5832_v55  ;;  %5784 = vmatmul.bf16.gmra.mxu2 %v13376_v48  ;;  %5873 = vmatmul.bf16.gmra.mxu3 %v13377_v0 }
 0x7ef   : > { %5901 = vmatpush.bf16.msra.mxu0 %v8092_v10  ;;  %6168 = vmatpush.bf16.msra.mxu3 %v8476_v27  ;;  %v13707_v27 = vld [vmem:[#allocation180_spill] sm:$0xff] }
 0x7f0   : > { %v12037_v61 = vsel %vm6636_vm4, %v5832_v55, %v6766_v11  ;;  %v8217_v55 = vld [vmem:[#allocation7 + $0x118] sm:$0xf0] }
 0x7f1   : > { %13702 = vst [vmem:[#allocation202_spill] sm:$0xff] %v12037_v61  ;;  %v5745_v31 = vpop.f32.mrf.mxu2  ;;  %v5834_v6 = vpop.f32.mrf.mxu3  ;;  %v8220_v11 = vor.u32 %v9285_v17, %v8217_v55 }
 0x7f2   : > { %v5746_v20 = vadd.f32 %v5745_v31, %v5657_v23  ;;  %v5569_v22 = vpop.f32.mrf.mxu0  ;;  %v5658_v56 = vpop.f32.mrf.mxu1 }
 0x7f3   : > { %v5570_v33 = vadd.f32 %v5569_v22, %v11869_v29  ;;  %5990 = vmatpush.bf16.msra.mxu1 %v8220_v11 }
 0x7f4   : > { %v5835_v39 = vadd.f32 %v5834_v6, %v5746_v20 }
 0x7f5   : > { %v5659_v58 = vadd.f32 %v5658_v56, %v5570_v33 }
 0x7f6   : > { %v6770_v51 = vmul.f32 %v11206_v13, %v5835_v39  ;;  %vm6640_vm5 = vcmp.gt.f32.partialorder %v5835_v39, 0.0 }
 0x7f9   : > { %v5747_v36 = vpop.f32.mrf.mxu2  ;;  %v5836_v59 = vpop.f32.mrf.mxu3 }
 0x7fa   : > { %v5748_v8 = vadd.f32 %v5747_v36, %v5659_v58  ;;  %v5572_v63 = vpop.f32.mrf.mxu0  ;;  %v5661_v43 = vpop.f32.mrf.mxu1  ;;  %v12049_v36 = vsel %vm6640_vm5, %v5835_v39, %v6770_v51 }
 0x7fb   : > { %v5573_v23 = vadd.f32 %v5572_v63, %v11876_v19  ;;  %13703 = vst [vmem:[#allocation203_spill] sm:$0xff] %v12049_v36 }
 0x7fc   : > { %v5837_v31 = vadd.f32 %v5836_v59, %v5748_v8  ;;  %5611 = vmatmul.bf16.gmra.mxu0 %v13380_v18 }
 0x7fd   : > { %v5662_v29 = vadd.f32 %v5661_v43, %v5573_v23  ;;  %5700 = vmatmul.bf16.gmra.mxu1 %v13381_v37 }
 0x7fe   : > { %vm6644_vm6 = vcmp.gt.f32.partialorder %v5837_v31, 0.0  ;;  %v6774_v33 = vmul.f32 %v11206_v13, %v5837_v31  ;;  %5789 = vmatmul.bf16.gmra.mxu2 %v13382_v52  ;;  %5878 = vmatmul.bf16.gmra.mxu3 %v13383_v41 }
 0x800   : > { %v12051_v19 = vsel %vm6644_vm6, %v5837_v31, %v6774_v33  ;;  %v8969_v33 = vld [vmem:[#allocation7 + $0x6f8] sm:$0xf0] }
 0x801   : > { %13704 = vst [vmem:[#allocation204_spill] sm:$0xff] %v12051_v19  ;;  %v5750_v10 = vpop.f32.mrf.mxu2  ;;  %v5839_v6 = vpop.f32.mrf.mxu3 }
 0x802   : > { %v5751_v20 = vadd.f32 %v5750_v10, %v5662_v29  ;;  %v5574_v22 = vpop.f32.mrf.mxu0  ;;  %v5663_v58 = vpop.f32.mrf.mxu1  ;;  %v9473_v29 = vld [vmem:[#allocation7 + $0x6ec] sm:$0xf] }
 0x803   : > { %v5575_v56 = vadd.f32 %v5574_v22, %v11879_v5  ;;  %v8972_v10 = vor.u32 %v9473_v29, %v8969_v33  ;;  %v9097_v22 = vld [vmem:[#allocation7 + $0x7f8] sm:$0xf0] }
 0x804   : > { %v5840_v17 = vadd.f32 %v5839_v6, %v5751_v20  ;;  %v8713_v20 = vld [vmem:[#allocation7 + $0x4f8] sm:$0xf0]  ;;  %v9505_v6 = vld [vmem:[#allocation7 + $0x7ec] sm:$0xf] }
 0x805   : > { %v5664_v55 = vadd.f32 %v5663_v58, %v5575_v56  ;;  %6428 = vmatpush.bf16.msrb.mxu2 %v8972_v10 }
 0x806   : > { %v6778_v43 = vmul.f32 %v11206_v13, %v5840_v17  ;;  %vm6648_vm7 = vcmp.gt.f32.partialorder %v5840_v17, 0.0 }
 0x808   : > { %v12063_v56 = vsel %vm6648_vm7, %v5840_v17, %v6778_v43  ;;  %v9441_v43 = vld [vmem:[#allocation7 + $0x5ec] sm:$0xf] }
 0x809   : > { %v5752_v11 = vpop.f32.mrf.mxu2  ;;  %v5841_v59 = vpop.f32.mrf.mxu3  ;;  %13705 = vst [vmem:[#allocation205_spill] sm:$0xff] %v12063_v56 }
 0x80a   : > { %v5753_v8 = vadd.f32 %v5752_v11, %v5664_v55  ;;  %v5577_v63 = vpop.f32.mrf.mxu0  ;;  %v5666_v23 = vpop.f32.mrf.mxu1 }
 0x80b   : > { %v5578_v39 = vadd.f32 %v5577_v63, %v11886_v62  ;;  %v9409_v62 = vld [vmem:[#allocation7 + $0x4ec] sm:$0xf] }
 0x80c   : > { %v5842_v51 = vadd.f32 %v5841_v59, %v5753_v8  ;;  %5616 = vmatmul.bf16.gmra.mxu0 %v10993_v30  ;;  %v8716_v11 = vor.u32 %v9409_v62, %v8713_v20  ;;  %v9100_v8 = vor.u32 %v9505_v6, %v9097_v22  ;;  %v13708_v22 = vld [vmem:[#allocation181_spill] sm:$0xff] }
 0x80d   : > { %v5667_v31 = vadd.f32 %v5666_v23, %v5578_v39  ;;  %5705 = vmatmul.bf16.gmra.mxu1 %v10995_v47 }
 0x80e   : > { %vm6652_vm0 = vcmp.gt.f32.partialorder %v5842_v51, 0.0  ;;  %v6782_v5 = vmul.f32 %v11206_v13, %v5842_v51  ;;  %5794 = vmatmul.bf16.gmra.mxu2 %v13540_v53  ;;  %5883 = vmatmul.bf16.gmra.mxu3 %v13541_v60 }
 0x80f   : > { %6250 = vmatpush.bf16.msrb.mxu0 %v8716_v11  ;;  %6517 = vmatpush.bf16.msrb.mxu3 %v9100_v8  ;;  %v13709_v11 = vld [vmem:[#allocation123_spill] sm:$0xff]  ;;  %v13710_v8 = vld [vmem:[#allocation124_spill] sm:$0xff] }
 0x810   : > { %v12065_v58 = vsel %vm6652_vm0, %v5842_v51, %v6782_v5  ;;  %v8841_v51 = vld [vmem:[#allocation7 + $0x5f8] sm:$0xf0] }
 0x811   : > { %13706 = vst [vmem:[#allocation206_spill] sm:$0xff] %v12065_v58  ;;  %v5755_v55 = vpop.f32.mrf.mxu2  ;;  %v5844_v39 = vpop.f32.mrf.mxu3  ;;  %v8844_v5 = vor.u32 %v9441_v43, %v8841_v51 }
 0x812   : > { %v5756_v63 = vadd.f32 %v5755_v55, %v5667_v31  ;;  %v5579_v23 = vpop.f32.mrf.mxu0  ;;  %v5668_v29 = vpop.f32.mrf.mxu1 }
 0x813   : > { %v5580_v1 = vadd.f32 %v5579_v23, %v13707_v27  ;;  %6339 = vmatpush.bf16.msrb.mxu1 %v8844_v5 }
 0x814   : > { %v5845_v33 = vadd.f32 %v5844_v39, %v5756_v63  ;;  %v13711_v63 = vld [vmem:[#allocation125_spill] sm:$0xff] }
 0x815   : > { %v5669_v17 = vadd.f32 %v5668_v29, %v5580_v1 }
 0x816   : > { %v6786_v10 = vmul.f32 %v11206_v13, %v5845_v33  ;;  %vm6656_vm8 = vcmp.gt.f32.partialorder %v5845_v33, 0.0 }
 0x818   : > { %v12077_v39 = vsel %vm6656_vm8, %v5845_v33, %v6786_v10  ;;  %v13716_v33 = vld [vmem:[#allocation183_spill] sm:$0xff] }
 0x819   : > { %v5757_v49 = vpop.f32.mrf.mxu2  ;;  %v5846_v20 = vpop.f32.mrf.mxu3  ;;  %13713 = vst [vmem:[#allocation180_spill] sm:$0xff] %v12077_v39 }
 0x81a   : > { %v5758_v62 = vadd.f32 %v5757_v49, %v5669_v17  ;;  %v5582_v6 = vpop.f32.mrf.mxu0  ;;  %v5671_v55 = vpop.f32.mrf.mxu1  ;;  %v13712_v49 = vld [vmem:[#allocation126_spill] sm:$0xff] }
 0x81b   : > { %v5583_v31 = vadd.f32 %v5582_v6, %v13708_v22 }
 0x81c   : > { %v5847_v59 = vadd.f32 %v5846_v20, %v5758_v62  ;;  %5621 = vmatmul.bf16.gmra.mxu0 %v13709_v11  ;;  %v13715_v62 = vld [vmem:[#allocation182_spill] sm:$0xff] }
 0x81d   : > { %v5672_v27 = vadd.f32 %v5671_v55, %v5583_v31  ;;  %5710 = vmatmul.bf16.gmra.mxu1 %v13710_v8 }
 0x81e   : > { %vm6660_vm9 = vcmp.gt.f32.partialorder %v5847_v59, 0.0  ;;  %v6790_v1 = vmul.f32 %v11206_v13, %v5847_v59  ;;  %5799 = vmatmul.bf16.gmra.mxu2 %v13711_v63  ;;  %5888 = vmatmul.bf16.gmra.mxu3 %v13712_v49 }
 0x820   : > { %v12079_v23 = vsel %vm6660_vm9, %v5847_v59, %v6790_v1 }
 0x821   : > { %13714 = vst [vmem:[#allocation181_spill] sm:$0xff] %v12079_v23  ;;  %v5760_v29 = vpop.f32.mrf.mxu2  ;;  %v5849_v51 = vpop.f32.mrf.mxu3  ;;  %v13723_v23 = vld [vmem:[#allocation184_spill] sm:$0xff] }
 0x822   : > { %v5761_v43 = vadd.f32 %v5760_v29, %v5672_v27  ;;  %v5584_v5 = vpop.f32.mrf.mxu0  ;;  %v5673_v6 = vpop.f32.mrf.mxu1  ;;  %v13717_v27 = vld [vmem:[#allocation13_spill] sm:$0xff] }
 0x823   : > { %v5585_v20 = vadd.f32 %v5584_v5, %v13715_v62  ;;  %v13718_v5 = vld [vmem:[#allocation14_spill] sm:$0xff] }
 0x824   : > { %v5850_v22 = vadd.f32 %v5849_v51, %v5761_v43  ;;  %v13719_v43 = vld [vmem:[#allocation15_spill] sm:$0xff]  ;;  %v13720_v51 = vld [vmem:[#allocation16_spill] sm:$0xff]  ;;  %v9469_v62 = vld [vmem:[#allocation7 + $0x6cc] sm:$0xf] }
 0x825   : > { %v5674_v31 = vadd.f32 %v5673_v6, %v5585_v20  ;;  %v8953_v20 = vld [vmem:[#allocation7 + $0x6d8] sm:$0xf0] }
 0x826   : > { %v6794_v1 = vmul.f32 %v11206_v13, %v5850_v22  ;;  %vm6664_vm10 = vcmp.gt.f32.partialorder %v5850_v22, 0.0  ;;  %v8956_v6 = vor.u32 %v9469_v62, %v8953_v20 }
 0x828   : > { %6429 = vmatpush.bf16.msrb.mxu2 %v8956_v6 }
 0x829   : > { %v5762_v55 = vpop.f32.mrf.mxu2  ;;  %v5851_v58 = vpop.f32.mrf.mxu3 }
 0x82a   : > { %v5763_v56 = vadd.f32 %v5762_v55, %v5674_v31  ;;  %v5587_v36 = vpop.f32.mrf.mxu0  ;;  %v5676_v59 = vpop.f32.mrf.mxu1  ;;  %v8697_v31 = vld [vmem:[#allocation7 + $0x4d8] sm:$0xf0]  ;;  %v9501_v55 = vld [vmem:[#allocation7 + $0x7cc] sm:$0xf] }
 0x82b   : > { %v5588_v10 = vadd.f32 %v5587_v36, %v13716_v33  ;;  %v9405_v36 = vld [vmem:[#allocation7 + $0x4cc] sm:$0xf] }
 0x82c   : > { %v5852_v19 = vadd.f32 %v5851_v58, %v5763_v56  ;;  %5902 = vmatmul.bf16.vlgmr.msra.gmra.mxu0 %v13717_v27  ;;  %v9081_v56 = vld [vmem:[#allocation7 + $0x7d8] sm:$0xf0]  ;;  %v12091_v58 = vsel %vm6664_vm10, %v5850_v22, %v6794_v1  ;;  %v9437_v1 = vld [vmem:[#allocation7 + $0x5cc] sm:$0xf] }
 0x82d   : > { %v5677_v17 = vadd.f32 %v5676_v59, %v5588_v10  ;;  %5991 = vmatmul.bf16.vlgmr.msra.gmra.mxu1 %v13718_v5  ;;  %13721 = vst [vmem:[#allocation123_spill] sm:$0xff] %v12091_v58  ;;  %v8700_v59 = vor.u32 %v9405_v36, %v8697_v31  ;;  %v9084_v27 = vor.u32 %v9501_v55, %v9081_v56  ;;  %v13724_v56 = vld [vmem:[#allocation185_spill] sm:$0xff] }
 0x82e   : > { %vm6668_vm11 = vcmp.gt.f32.partialorder %v5852_v19, 0.0  ;;  %v6798_v29 = vmul.f32 %v11206_v13, %v5852_v19  ;;  %6080 = vmatmul.bf16.vlgmr.msra.gmra.mxu2 %v13719_v43  ;;  %6169 = vmatmul.bf16.vlgmr.msra.gmra.mxu3 %v13720_v51 }
 0x82f   : > { %6251 = vmatpush.bf16.msrb.mxu0 %v8700_v59  ;;  %6518 = vmatpush.bf16.msrb.mxu3 %v9084_v27  ;;  %v13725_v59 = vld [vmem:[#allocation17_spill] sm:$0xff]  ;;  %v13727_v27 = vld [vmem:[#allocation19_spill] sm:$0xff] }
 0x830   : > { %v12093_v33 = vsel %vm6668_vm11, %v5852_v19, %v6798_v29  ;;  %v8825_v19 = vld [vmem:[#allocation7 + $0x5d8] sm:$0xf0] }
 0x831   : > { %13722 = vst [vmem:[#allocation124_spill] sm:$0xff] %v12093_v33  ;;  %v5765_v10 = vpop.f32.mrf.mxu2  ;;  %v5854_v39 = vpop.f32.mrf.mxu3  ;;  %v8828_v29 = vor.u32 %v9437_v1, %v8825_v19 }
 0x832   : > { %v5766_v43 = vadd.f32 %v5765_v10, %v5677_v17  ;;  %v5589_v51 = vpop.f32.mrf.mxu0  ;;  %v5678_v62 = vpop.f32.mrf.mxu1 }
 0x833   : > { %v5590_v15 = vadd.f32 %v5589_v51, %v13723_v23  ;;  %6340 = vmatpush.bf16.msrb.mxu1 %v8828_v29 }
 0x834   : > { %v5855_v20 = vadd.f32 %v5854_v39, %v5766_v43  ;;  %v13726_v39 = vld [vmem:[#allocation18_spill] sm:$0xff] }
 0x835   : > { %v5679_v22 = vadd.f32 %v5678_v62, %v5590_v15 }
 0x836   : > { %v6802_v6 = vmul.f32 %v11206_v13, %v5855_v20  ;;  %vm6672_vm12 = vcmp.gt.f32.partialorder %v5855_v20, 0.0 }
 0x838   : > { %v12105_v43 = vsel %vm6672_vm12, %v5855_v20, %v6802_v6  ;;  %v13732_v20 = vld [vmem:[#allocation187_spill] sm:$0xff] }
 0x839   : > { %v5767_v61 = vpop.f32.mrf.mxu2  ;;  %v5856_v31 = vpop.f32.mrf.mxu3  ;;  %13729 = vst [vmem:[#allocation125_spill] sm:$0xff] %v12105_v43 }
 0x83a   : > { %v5768_v36 = vadd.f32 %v5767_v61, %v5679_v22  ;;  %v5592_v55 = vpop.f32.mrf.mxu0  ;;  %v5681_v10 = vpop.f32.mrf.mxu1  ;;  %v13728_v61 = vld [vmem:[#allocation20_spill] sm:$0xff] }
 0x83b   : > { %v5593_v17 = vadd.f32 %v5592_v55, %v13724_v56 }
 0x83c   : > { %v5857_v5 = vadd.f32 %v5856_v31, %v5768_v36  ;;  %5907 = vmatmul.bf16.gmra.mxu0 %v13725_v59  ;;  %v13731_v36 = vld [vmem:[#allocation186_spill] sm:$0xff] }
 0x83d   : > { %v5682_v23 = vadd.f32 %v5681_v10, %v5593_v17  ;;  %5996 = vmatmul.bf16.gmra.mxu1 %v13726_v39 }
 0x83e   : > { %vm6676_vm13 = vcmp.gt.f32.partialorder %v5857_v5, 0.0  ;;  %v6806_v15 = vmul.f32 %v11206_v13, %v5857_v5  ;;  %6085 = vmatmul.bf16.gmra.mxu2 %v13727_v27  ;;  %6174 = vmatmul.bf16.gmra.mxu3 %v13728_v61 }
 0x840   : > { %v12107_v51 = vsel %vm6676_vm13, %v5857_v5, %v6806_v15 }
 0x841   : > { %13730 = vst [vmem:[#allocation126_spill] sm:$0xff] %v12107_v51  ;;  %v5770_v62 = vpop.f32.mrf.mxu2  ;;  %v5859_v19 = vpop.f32.mrf.mxu3  ;;  %v13739_v51 = vld [vmem:[#allocation188_spill] sm:$0xff] }
 0x842   : > { %v5771_v1 = vadd.f32 %v5770_v62, %v5682_v23  ;;  %v5594_v29 = vpop.f32.mrf.mxu0  ;;  %v5683_v55 = vpop.f32.mrf.mxu1  ;;  %v13733_v23 = vld [vmem:[#allocation21_spill] sm:$0xff] }
 0x843   : > { %v5595_v31 = vadd.f32 %v5594_v29, %v13731_v36  ;;  %v13734_v29 = vld [vmem:[#allocation22_spill] sm:$0xff] }
 0x844   : > { %v5860_v56 = vadd.f32 %v5859_v19, %v5771_v1  ;;  %v13735_v1 = vld [vmem:[#allocation23_spill] sm:$0xff]  ;;  %v13736_v19 = vld [vmem:[#allocation24_spill] sm:$0xff]  ;;  %v9465_v36 = vld [vmem:[#allocation7 + $0x6ac] sm:$0xf] }
 0x845   : > { %v5684_v17 = vadd.f32 %v5683_v55, %v5595_v31  ;;  %v8937_v31 = vld [vmem:[#allocation7 + $0x6b8] sm:$0xf0]  ;;  %v9401_v55 = vld [vmem:[#allocation7 + $0x4ac] sm:$0xf] }
 0x846   : > { %v6810_v15 = vmul.f32 %v11206_v13, %v5860_v56  ;;  %vm6680_vm14 = vcmp.gt.f32.partialorder %v5860_v56, 0.0 }
 0x849   : > { %v5772_v10 = vpop.f32.mrf.mxu2  ;;  %v5861_v39 = vpop.f32.mrf.mxu3 }
 0x84a   : > { %v5773_v59 = vadd.f32 %v5772_v10, %v5684_v17  ;;  %v5597_v27 = vpop.f32.mrf.mxu0  ;;  %v5686_v5 = vpop.f32.mrf.mxu1  ;;  %v8940_v17 = vor.u32 %v9465_v36, %v8937_v31  ;;  %v8681_v10 = vld [vmem:[#allocation7 + $0x4b8] sm:$0xf0] }
 0x84b   : > { %v5598_v6 = vadd.f32 %v5597_v27, %v13732_v20  ;;  %v9497_v27 = vld [vmem:[#allocation7 + $0x7ac] sm:$0xf] }
 0x84c   : > { %v5862_v61 = vadd.f32 %v5861_v39, %v5773_v59  ;;  %5912 = vmatmul.bf16.gmra.mxu0 %v13733_v23  ;;  %v9065_v59 = vld [vmem:[#allocation7 + $0x7b8] sm:$0xf0]  ;;  %v12119_v39 = vsel %vm6680_vm14, %v5860_v56, %v6810_v15  ;;  %6430 = vmatpush.bf16.msrb.mxu2 %v8940_v17  ;;  %v9433_v15 = vld [vmem:[#allocation7 + $0x5ac] sm:$0xf] }
 0x84d   : > { %v5687_v22 = vadd.f32 %v5686_v5, %v5598_v6  ;;  %6001 = vmatmul.bf16.gmra.mxu1 %v13734_v29  ;;  %13737 = vst [vmem:[#allocation182_spill] sm:$0xff] %v12119_v39  ;;  %v8684_v5 = vor.u32 %v9401_v55, %v8681_v10  ;;  %v9068_v23 = vor.u32 %v9497_v27, %v9065_v59  ;;  %v13740_v59 = vld [vmem:[#allocation189_spill] sm:$0xff] }
 0x84e   : > { %vm6684_vm15 = vcmp.gt.f32.partialorder %v5862_v61, 0.0  ;;  %v6814_v62 = vmul.f32 %v11206_v13, %v5862_v61  ;;  %6090 = vmatmul.bf16.gmra.mxu2 %v13735_v1  ;;  %6179 = vmatmul.bf16.gmra.mxu3 %v13736_v19 }
 0x84f   : > { %6252 = vmatpush.bf16.msrb.mxu0 %v8684_v5  ;;  %6519 = vmatpush.bf16.msrb.mxu3 %v9068_v23  ;;  %v13741_v5 = vld [vmem:[#allocation25_spill] sm:$0xff]  ;;  %v13743_v23 = vld [vmem:[#allocation27_spill] sm:$0xff] }
 0x850   : > { %v12121_v20 = vsel %vm6684_vm15, %v5862_v61, %v6814_v62  ;;  %v8809_v61 = vld [vmem:[#allocation7 + $0x5b8] sm:$0xf0] }
 0x851   : > { %13738 = vst [vmem:[#allocation183_spill] sm:$0xff] %v12121_v20  ;;  %v5775_v6 = vpop.f32.mrf.mxu2  ;;  %v5864_v43 = vpop.f32.mrf.mxu3  ;;  %v8812_v62 = vor.u32 %v9433_v15, %v8809_v61 }
 0x852   : > { %v5776_v1 = vadd.f32 %v5775_v6, %v5687_v22  ;;  %v5599_v19 = vpop.f32.mrf.mxu0  ;;  %v5688_v36 = vpop.f32.mrf.mxu1 }
 0x853   : > { %v5600_v58 = vadd.f32 %v5599_v19, %v13739_v51  ;;  %6341 = vmatpush.bf16.msrb.mxu1 %v8812_v62 }
 0x854   : > { %v5865_v31 = vadd.f32 %v5864_v43, %v5776_v1  ;;  %v13742_v43 = vld [vmem:[#allocation26_spill] sm:$0xff] }
 0x855   : > { %v5689_v56 = vadd.f32 %v5688_v36, %v5600_v58 }
 0x856   : > { %v6818_v17 = vmul.f32 %v11206_v13, %v5865_v31  ;;  %vm6688_vm1 = vcmp.gt.f32.partialorder %v5865_v31, 0.0 }
 0x858   : > { %v12133_v1 = vsel %vm6688_vm1, %v5865_v31, %v6818_v17  ;;  %v13748_v31 = vld [vmem:[#allocation191_spill] sm:$0xff] }
 0x859   : > { %v5777_v33 = vpop.f32.mrf.mxu2  ;;  %v5866_v10 = vpop.f32.mrf.mxu3  ;;  %13745 = vst [vmem:[#allocation13_spill] sm:$0xff] %v12133_v1 }
 0x85a   : > { %v5778_v55 = vadd.f32 %v5777_v33, %v5689_v56  ;;  %v5602_v27 = vpop.f32.mrf.mxu0  ;;  %v5691_v6 = vpop.f32.mrf.mxu1  ;;  %v13744_v33 = vld [vmem:[#allocation28_spill] sm:$0xff] }
 0x85b   : > { %v5603_v22 = vadd.f32 %v5602_v27, %v13740_v59 }
 0x85c   : > { %v5867_v29 = vadd.f32 %v5866_v10, %v5778_v55  ;;  %5917 = vmatmul.bf16.gmra.mxu0 %v13741_v5  ;;  %v13747_v55 = vld [vmem:[#allocation190_spill] sm:$0xff] }
 0x85d   : > { %v5692_v51 = vadd.f32 %v5691_v6, %v5603_v22  ;;  %6006 = vmatmul.bf16.gmra.mxu1 %v13742_v43 }
 0x85e   : > { %vm6692_vm2 = vcmp.gt.f32.partialorder %v5867_v29, 0.0  ;;  %v6822_v58 = vmul.f32 %v11206_v13, %v5867_v29  ;;  %6095 = vmatmul.bf16.gmra.mxu2 %v13743_v23  ;;  %6184 = vmatmul.bf16.gmra.mxu3 %v13744_v33 }
 0x860   : > { %v12135_v19 = vsel %vm6692_vm2, %v5867_v29, %v6822_v58 }
 0x861   : > { %13746 = vst [vmem:[#allocation14_spill] sm:$0xff] %v12135_v19  ;;  %v5780_v36 = vpop.f32.mrf.mxu2  ;;  %v5869_v61 = vpop.f32.mrf.mxu3  ;;  %v13755_v19 = vld [vmem:[#allocation192_spill] sm:$0xff] }
 0x862   : > { %v5781_v15 = vadd.f32 %v5780_v36, %v5692_v51  ;;  %v5604_v62 = vpop.f32.mrf.mxu0  ;;  %v5693_v27 = vpop.f32.mrf.mxu1  ;;  %v13749_v51 = vld [vmem:[#allocation29_spill] sm:$0xff] }
 0x863   : > { %v5605_v10 = vadd.f32 %v5604_v62, %v13747_v55  ;;  %v13750_v62 = vld [vmem:[#allocation30_spill] sm:$0xff] }
 0x864   : > { %v5870_v59 = vadd.f32 %v5869_v61, %v5781_v15  ;;  %v13751_v15 = vld [vmem:[#allocation31_spill] sm:$0xff]  ;;  %v13752_v61 = vld [vmem:[#allocation32_spill] sm:$0xff]  ;;  %v9461_v55 = vld [vmem:[#allocation7 + $0x68c] sm:$0xf] }
 0x865   : > { %v5694_v22 = vadd.f32 %v5693_v27, %v5605_v10  ;;  %v8921_v10 = vld [vmem:[#allocation7 + $0x698] sm:$0xf0]  ;;  %v9397_v27 = vld [vmem:[#allocation7 + $0x48c] sm:$0xf] }
 0x866   : > { %v6826_v58 = vmul.f32 %v11206_v13, %v5870_v59  ;;  %vm6696_vm3 = vcmp.gt.f32.partialorder %v5870_v59, 0.0 }
 0x869   : > { %v5782_v6 = vpop.f32.mrf.mxu2  ;;  %v5871_v43 = vpop.f32.mrf.mxu3 }
 0x86a   : > { %v5783_v5 = vadd.f32 %v5782_v6, %v5694_v22  ;;  %v5607_v23 = vpop.f32.mrf.mxu0  ;;  %v5696_v29 = vpop.f32.mrf.mxu1  ;;  %v8924_v22 = vor.u32 %v9461_v55, %v8921_v10  ;;  %v8665_v6 = vld [vmem:[#allocation7 + $0x498] sm:$0xf0] }
 0x86b   : > { %v5608_v17 = vadd.f32 %v5607_v23, %v13748_v31  ;;  %v9493_v23 = vld [vmem:[#allocation7 + $0x78c] sm:$0xf] }
 0x86c   : > { %v5872_v33 = vadd.f32 %v5871_v43, %v5783_v5  ;;  %5922 = vmatmul.bf16.gmra.mxu0 %v13749_v51  ;;  %v9049_v5 = vld [vmem:[#allocation7 + $0x798] sm:$0xf0]  ;;  %v12147_v43 = vsel %vm6696_vm3, %v5870_v59, %v6826_v58  ;;  %6431 = vmatpush.bf16.msrb.mxu2 %v8924_v22  ;;  %v9429_v58 = vld [vmem:[#allocation7 + $0x58c] sm:$0xf] }
 0x86d   : > { %v5697_v56 = vadd.f32 %v5696_v29, %v5608_v17  ;;  %6011 = vmatmul.bf16.gmra.mxu1 %v13750_v62  ;;  %13753 = vst [vmem:[#allocation15_spill] sm:$0xff] %v12147_v43  ;;  %v8668_v29 = vor.u32 %v9397_v27, %v8665_v6  ;;  %v9052_v51 = vor.u32 %v9493_v23, %v9049_v5  ;;  %v13756_v5 = vld [vmem:[#allocation193_spill] sm:$0xff] }
 0x86e   : > { %vm6700_vm4 = vcmp.gt.f32.partialorder %v5872_v33, 0.0  ;;  %v6830_v36 = vmul.f32 %v11206_v13, %v5872_v33  ;;  %6100 = vmatmul.bf16.gmra.mxu2 %v13751_v15  ;;  %6189 = vmatmul.bf16.gmra.mxu3 %v13752_v61 }
 0x86f   : > { %6253 = vmatpush.bf16.msrb.mxu0 %v8668_v29  ;;  %6520 = vmatpush.bf16.msrb.mxu3 %v9052_v51  ;;  %v13757_v29 = vld [vmem:[#allocation33_spill] sm:$0xff]  ;;  %v13759_v51 = vld [vmem:[#allocation35_spill] sm:$0xff] }
 0x870   : > { %v12149_v31 = vsel %vm6700_vm4, %v5872_v33, %v6830_v36  ;;  %v8793_v33 = vld [vmem:[#allocation7 + $0x598] sm:$0xf0] }
 0x871   : > { %13754 = vst [vmem:[#allocation16_spill] sm:$0xff] %v12149_v31  ;;  %v5785_v17 = vpop.f32.mrf.mxu2  ;;  %v5874_v1 = vpop.f32.mrf.mxu3  ;;  %v8796_v36 = vor.u32 %v9429_v58, %v8793_v33  ;;  %v8729_v31 = vld [vmem:[#allocation7 + $0x518] sm:$0xf0] }
 0x872   : > { %v5786_v15 = vadd.f32 %v5785_v17, %v5697_v56  ;;  %v5609_v61 = vpop.f32.mrf.mxu0  ;;  %v5698_v55 = vpop.f32.mrf.mxu1 }
 0x873   : > { %v5610_v39 = vadd.f32 %v5609_v61, %v13755_v19  ;;  %6342 = vmatpush.bf16.msrb.mxu1 %v8796_v36 }
 0x874   : > { %v5875_v10 = vadd.f32 %v5874_v1, %v5786_v15  ;;  %v13758_v1 = vld [vmem:[#allocation34_spill] sm:$0xff] }
 0x875   : > { %v5699_v59 = vadd.f32 %v5698_v55, %v5610_v39 }
 0x876   : > { %v6834_v22 = vmul.f32 %v11206_v13, %v5875_v10  ;;  %vm6704_vm5 = vcmp.gt.f32.partialorder %v5875_v10, 0.0 }
 0x878   : > { %v12161_v15 = vsel %vm6704_vm5, %v5875_v10, %v6834_v22 }
 0x879   : > { %v5787_v20 = vpop.f32.mrf.mxu2  ;;  %v5876_v6 = vpop.f32.mrf.mxu3  ;;  %13761 = vst [vmem:[#allocation184_spill] sm:$0xff] %v12161_v15 }
 0x87a   : > { %v5788_v27 = vadd.f32 %v5787_v20, %v5699_v59  ;;  %v5612_v23 = vpop.f32.mrf.mxu0  ;;  %v5701_v17 = vpop.f32.mrf.mxu1  ;;  %v13760_v20 = vld [vmem:[#allocation36_spill] sm:$0xff] }
 0x87b   : > { %v5613_v56 = vadd.f32 %v5612_v23, %v13756_v5 }
 0x87c   : > { %v5877_v62 = vadd.f32 %v5876_v6, %v5788_v27  ;;  %5927 = vmatmul.bf16.gmra.mxu0 %v13757_v29  ;;  %v13763_v27 = vld [vmem:[#allocation194_spill] sm:$0xff] }
 0x87d   : > { %v5702_v19 = vadd.f32 %v5701_v17, %v5613_v56  ;;  %6016 = vmatmul.bf16.gmra.mxu1 %v13758_v1 }
 0x87e   : > { %vm6708_vm6 = vcmp.gt.f32.partialorder %v5877_v62, 0.0  ;;  %v6838_v39 = vmul.f32 %v11206_v13, %v5877_v62  ;;  %6105 = vmatmul.bf16.gmra.mxu2 %v13759_v51  ;;  %6194 = vmatmul.bf16.gmra.mxu3 %v13760_v20 }
 0x880   : > { %v12163_v61 = vsel %vm6708_vm6, %v5877_v62, %v6838_v39 }
 0x881   : > { %13762 = vst [vmem:[#allocation185_spill] sm:$0xff] %v12163_v61  ;;  %v5790_v55 = vpop.f32.mrf.mxu2  ;;  %v5879_v33 = vpop.f32.mrf.mxu3 }
 0x882   : > { %v5791_v58 = vadd.f32 %v5790_v55, %v5702_v19  ;;  %v5614_v36 = vpop.f32.mrf.mxu0  ;;  %v5703_v23 = vpop.f32.mrf.mxu1  ;;  %v13764_v19 = vld [vmem:[#allocation37_spill] sm:$0xff] }
 0x883   : > { %v5615_v6 = vadd.f32 %v5614_v36, %v13763_v27  ;;  %v13765_v36 = vld [vmem:[#allocation38_spill] sm:$0xff] }
 0x884   : > { %v5880_v5 = vadd.f32 %v5879_v33, %v5791_v58  ;;  %v13766_v58 = vld [vmem:[#allocation39_spill] sm:$0xff]  ;;  %v13767_v33 = vld [vmem:[#allocation40_spill] sm:$0xff]  ;;  %v9457_v27 = vld [vmem:[#allocation7 + $0x66c] sm:$0xf] }
 0x885   : > { %v5704_v56 = vadd.f32 %v5703_v23, %v5615_v6  ;;  %v8905_v6 = vld [vmem:[#allocation7 + $0x678] sm:$0xf0] }
 0x886   : > { %v6842_v22 = vmul.f32 %v11206_v13, %v5880_v5  ;;  %vm6712_vm7 = vcmp.gt.f32.partialorder %v5880_v5, 0.0  ;;  %v8908_v23 = vor.u32 %v9457_v27, %v8905_v6 }
 0x888   : > { %6432 = vmatpush.bf16.msrb.mxu2 %v8908_v23 }
 0x889   : > { %v5792_v17 = vpop.f32.mrf.mxu2  ;;  %v5881_v1 = vpop.f32.mrf.mxu3 }
 0x88a   : > { %v5793_v29 = vadd.f32 %v5792_v17, %v5704_v56  ;;  %v5617_v51 = vpop.f32.mrf.mxu0  ;;  %v5706_v62 = vpop.f32.mrf.mxu1  ;;  %v8649_v56 = vld [vmem:[#allocation7 + $0x478] sm:$0xf0]  ;;  %v9489_v17 = vld [vmem:[#allocation7 + $0x76c] sm:$0xf] }
 0x88b   : > { %v5618_v10 = vadd.f32 %v5617_v51, %v11966_v35  ;;  %v9393_v35 = vld [vmem:[#allocation7 + $0x46c] sm:$0xf] }
 0x88c   : > { %v5882_v39 = vadd.f32 %v5881_v1, %v5793_v29  ;;  %5932 = vmatmul.bf16.gmra.mxu0 %v13764_v19  ;;  %v9033_v29 = vld [vmem:[#allocation7 + $0x778] sm:$0xf0]  ;;  %v12175_v1 = vsel %vm6712_vm7, %v5880_v5, %v6842_v22  ;;  %v9425_v5 = vld [vmem:[#allocation7 + $0x56c] sm:$0xf] }
 0x88d   : > { %v5707_v20 = vadd.f32 %v5706_v62, %v5618_v10  ;;  %6021 = vmatmul.bf16.gmra.mxu1 %v13765_v36  ;;  %13768 = vst [vmem:[#allocation17_spill] sm:$0xff] %v12175_v1  ;;  %v8652_v62 = vor.u32 %v9393_v35, %v8649_v56  ;;  %v9036_v19 = vor.u32 %v9489_v17, %v9033_v29  ;;  %v8777_v22 = vld [vmem:[#allocation7 + $0x578] sm:$0xf0] }
 0x88e   : > { %vm6716_vm0 = vcmp.gt.f32.partialorder %v5882_v39, 0.0  ;;  %v6846_v55 = vmul.f32 %v11206_v13, %v5882_v39  ;;  %6110 = vmatmul.bf16.gmra.mxu2 %v13766_v58  ;;  %6199 = vmatmul.bf16.gmra.mxu3 %v13767_v33  ;;  %v8745_v1 = vld [vmem:[#allocation7 + $0x538] sm:$0xf0] }
 0x88f   : > { %6254 = vmatpush.bf16.msrb.mxu0 %v8652_v62  ;;  %6521 = vmatpush.bf16.msrb.mxu3 %v9036_v19  ;;  %v13770_v62 = vld [vmem:[#allocation41_spill] sm:$0xff]  ;;  %v13772_v19 = vld [vmem:[#allocation43_spill] sm:$0xff] }
 0x890   : > { %v12177_v51 = vsel %vm6716_vm0, %v5882_v39, %v6846_v55  ;;  %v8780_v55 = vor.u32 %v9425_v5, %v8777_v22 }
 0x891   : > { %13769 = vst [vmem:[#allocation18_spill] sm:$0xff] %v12177_v51  ;;  %v5795_v10 = vpop.f32.mrf.mxu2  ;;  %v5884_v59 = vpop.f32.mrf.mxu3 }
 0x892   : > { %v5796_v58 = vadd.f32 %v5795_v10, %v5707_v20  ;;  %v5619_v33 = vpop.f32.mrf.mxu0  ;;  %v5708_v27 = vpop.f32.mrf.mxu1  ;;  %6343 = vmatpush.bf16.msrb.mxu1 %v8780_v55 }
 0x893   : > { %v5620_v15 = vadd.f32 %v5619_v33, %v11969_v28 }
 0x894   : > { %v5885_v6 = vadd.f32 %v5884_v59, %v5796_v58  ;;  %v13773_v58 = vld [vmem:[#allocation44_spill] sm:$0xff] }
 0x895   : > { %v5709_v39 = vadd.f32 %v5708_v27, %v5620_v15  ;;  %v13771_v15 = vld [vmem:[#allocation42_spill] sm:$0xff] }
 0x896   : > { %v6850_v23 = vmul.f32 %v11206_v13, %v5885_v6  ;;  %vm6720_vm8 = vcmp.gt.f32.partialorder %v5885_v6, 0.0 }
 0x898   : > { %v12189_v33 = vsel %vm6720_vm8, %v5885_v6, %v6850_v23 }
 0x899   : > { %v5797_v35 = vpop.f32.mrf.mxu2  ;;  %v5886_v17 = vpop.f32.mrf.mxu3  ;;  %13774 = vst [vmem:[#allocation19_spill] sm:$0xff] %v12189_v33 }
 0x89a   : > { %v5798_v56 = vadd.f32 %v5797_v35, %v5709_v39  ;;  %v5622_v29 = vpop.f32.mrf.mxu0  ;;  %v5711_v10 = vpop.f32.mrf.mxu1 }
 0x89b   : > { %v5623_v20 = vadd.f32 %v5622_v29, %v11976_v34 }
 0x89c   : > { %v5887_v36 = vadd.f32 %v5886_v17, %v5798_v56  ;;  %5937 = vmatmul.bf16.gmra.mxu0 %v13770_v62 }
 0x89d   : > { %v5712_v28 = vadd.f32 %v5711_v10, %v5623_v20  ;;  %6026 = vmatmul.bf16.gmra.mxu1 %v13771_v15  ;;  %v9617_v20 = vld [vmem:[%s12927_s5] sm:$0xf] }
 0x89e   : > { %vm6724_vm9 = vcmp.gt.f32.partialorder %v5887_v36, 0.0  ;;  %v6854_v59 = vmul.f32 %v11206_v13, %v5887_v36  ;;  %6115 = vmatmul.bf16.gmra.mxu2 %v13772_v19  ;;  %6204 = vmatmul.bf16.gmra.mxu3 %v13773_v58  ;;  %v12199_v6 = vperm.slane %v9617_v20, 3  ;;  %v13776_v58 = vld [vmem:[#allocation45_spill] sm:$0xff] }
 0x8a0   : > { %v12191_v34 = vsel %vm6724_vm9, %v5887_v36, %v6854_v59 }
 0x8a1   : > { %13775 = vst [vmem:[#allocation20_spill] sm:$0xff] %v12191_v34  ;;  %v5800_v27 = vpop.f32.mrf.mxu2  ;;  %v5889_v39 = vpop.f32.mrf.mxu3 }
 0x8a2   : > { %v5801_v22 = vadd.f32 %v5800_v27, %v5712_v28  ;;  %v5624_v55 = vpop.f32.mrf.mxu0  ;;  %v5713_v56 = vpop.f32.mrf.mxu1 }
 0x8a3   : > { %v5625_v35 = vadd.f32 %v5624_v55, %v11979_v7  ;;  %v13779_v55 = vld [vmem:[#allocation48_spill] sm:$0xff] }
 0x8a4   : > { %v5890_v17 = vadd.f32 %v5889_v39, %v5801_v22  ;;  %v13777_v22 = vld [vmem:[#allocation46_spill] sm:$0xff]  ;;  %v13778_v39 = vld [vmem:[#allocation47_spill] sm:$0xff] }
 0x8a5   : > { %v5714_v29 = vadd.f32 %v5713_v56, %v5625_v35  ;;  %v9453_v35 = vld [vmem:[#allocation7 + $0x64c] sm:$0xf]  ;;  %v8889_v56 = vld [vmem:[#allocation7 + $0x658] sm:$0xf0] }
 0x8a6   : > { %v6858_v15 = vmul.f32 %v11206_v13, %v5890_v17  ;;  %vm6728_vm10 = vcmp.gt.f32.partialorder %v5890_v17, 0.0  ;;  %v8892_v20 = vor.u32 %v9453_v35, %v8889_v56 }
 0x8a8   : > { %6433 = vmatpush.bf16.msrb.mxu2 %v8892_v20 }
 0x8a9   : > { %v5802_v36 = vpop.f32.mrf.mxu2  ;;  %v5891_v23 = vpop.f32.mrf.mxu3 }
 0x8aa   : > { %v5803_v10 = vadd.f32 %v5802_v36, %v5714_v29  ;;  %v5903_v62 = vpop.f32.mrf.mxu0  ;;  %v5992_v28 = vpop.f32.mrf.mxu1  ;;  %v9389_v29 = vld [vmem:[#allocation7 + $0x44c] sm:$0xf]  ;;  %v8633_v36 = vld [vmem:[#allocation7 + $0x458] sm:$0xf0] }
 0x8ab   : > { %v5904_v59 = vadd.f32 %v5903_v62, %v12199_v6  ;;  %v9485_v62 = vld [vmem:[#allocation7 + $0x74c] sm:$0xf] }
 0x8ac   : > { %v5892_v19 = vadd.f32 %v5891_v23, %v5803_v10  ;;  %5942 = vmatmul.bf16.gmra.mxu0 %v13776_v58  ;;  %v9017_v10 = vld [vmem:[#allocation7 + $0x758] sm:$0xf0]  ;;  %v12208_v23 = vsel %vm6728_vm10, %v5890_v17, %v6858_v15  ;;  %v8636_v58 = vor.u32 %v9389_v29, %v8633_v36  ;;  %v9421_v17 = vld [vmem:[#allocation7 + $0x54c] sm:$0xf] }
 0x8ad   : > { %v5993_v7 = vadd.f32 %v5992_v28, %v5904_v59  ;;  %6031 = vmatmul.bf16.gmra.mxu1 %v13777_v22  ;;  %13780 = vst [vmem:[#allocation186_spill] sm:$0xff] %v12208_v23  ;;  %v9020_v5 = vor.u32 %v9485_v62, %v9017_v10  ;;  %v8761_v15 = vld [vmem:[#allocation7 + $0x558] sm:$0xf0]  ;;  %v13782_v22 = vld [vmem:[#allocation49_spill] sm:$0xff] }
 0x8ae   : > { %vm6732_vm11 = vcmp.gt.f32.partialorder %v5892_v19, 0.0  ;;  %v6862_v27 = vmul.f32 %v11206_v13, %v5892_v19  ;;  %6120 = vmatmul.bf16.gmra.mxu2 %v13778_v39  ;;  %6209 = vmatmul.bf16.gmra.mxu3 %v13779_v55  ;;  %v9001_v23 = vld [vmem:[#allocation7 + $0x738] sm:$0xf0] }
 0x8af   : > { %6255 = vmatpush.bf16.msrb.mxu0 %v8636_v58  ;;  %6522 = vmatpush.bf16.msrb.mxu3 %v9020_v5  ;;  %v13783_v5 = vld [vmem:[#allocation50_spill] sm:$0xff]  ;;  %v13785_v58 = vld [vmem:[#allocation52_spill] sm:$0xff] }
 0x8b0   : > { %v12210_v59 = vsel %vm6732_vm11, %v5892_v19, %v6862_v27  ;;  %v8764_v27 = vor.u32 %v9421_v17, %v8761_v15 }
 0x8b1   : > { %13781 = vst [vmem:[#allocation187_spill] sm:$0xff] %v12210_v59  ;;  %v6081_v28 = vpop.f32.mrf.mxu2  ;;  %v6170_v33 = vpop.f32.mrf.mxu3 }
 0x8b2   : > { %v6082_v39 = vadd.f32 %v6081_v28, %v5993_v7  ;;  %v5905_v55 = vpop.f32.mrf.mxu0  ;;  %v5994_v35 = vpop.f32.mrf.mxu1  ;;  %6344 = vmatpush.bf16.msrb.mxu1 %v8764_v27 }
 0x8b3   : > { %v5906_v34 = vadd.f32 %v5905_v55, %v12199_v6 }
 0x8b4   : > { %v12215_v56 = vadd.f32 %v6170_v33, %v6082_v39  ;;  %v13784_v33 = vld [vmem:[#allocation51_spill] sm:$0xff] }
 0x8b5   : > { %v5995_v19 = vadd.f32 %v5994_v35, %v5906_v34 }
 0x8b9   : > { %v6083_v29 = vpop.f32.mrf.mxu2  ;;  %v6172_v62 = vpop.f32.mrf.mxu3 }
 0x8ba   : > { %v6084_v36 = vadd.f32 %v6083_v29, %v5995_v19  ;;  %v5908_v10 = vpop.f32.mrf.mxu0  ;;  %v5997_v28 = vpop.f32.mrf.mxu1 }
 0x8bb   : > { %v5909_v7 = vadd.f32 %v5908_v10, %v12199_v6 }
 0x8bc   : > { %v12218_v20 = vadd.f32 %v6172_v62, %v6084_v36  ;;  %5947 = vmatmul.bf16.gmra.mxu0 %v13782_v22 }
 0x8bd   : > { %v5998_v55 = vadd.f32 %v5997_v28, %v5909_v7  ;;  %6036 = vmatmul.bf16.gmra.mxu1 %v13783_v5 }
 0x8be   : > { %6125 = vmatmul.bf16.gmra.mxu2 %v13784_v33  ;;  %6214 = vmatmul.bf16.gmra.mxu3 %v13785_v58  ;;  %v13786_v58 = vld [vmem:[#allocation53_spill] sm:$0xff] }
 0x8c1   : > { %v6086_v34 = vpop.f32.mrf.mxu2  ;;  %v6175_v35 = vpop.f32.mrf.mxu3 }
 0x8c2   : > { %v6087_v39 = vadd.f32 %v6086_v34, %v5998_v55  ;;  %v5910_v17 = vpop.f32.mrf.mxu0  ;;  %v5999_v19 = vpop.f32.mrf.mxu1  ;;  %v13787_v55 = vld [vmem:[#allocation54_spill] sm:$0xff]  ;;  %v13788_v34 = vld [vmem:[#allocation55_spill] sm:$0xff] }
 0x8c3   : > { %v5911_v15 = vadd.f32 %v5910_v17, %v12199_v6  ;;  %v13789_v17 = vld [vmem:[#allocation56_spill] sm:$0xff] }
 0x8c4   : > { %v12225_v27 = vadd.f32 %v6175_v35, %v6087_v39  ;;  %v9449_v39 = vld [vmem:[#allocation7 + $0x62c] sm:$0xf]  ;;  %v8873_v35 = vld [vmem:[#allocation7 + $0x638] sm:$0xf0] }
 0x8c5   : > { %v6000_v29 = vadd.f32 %v5999_v19, %v5911_v15  ;;  %v9385_v15 = vld [vmem:[#allocation7 + $0x42c] sm:$0xf]  ;;  %v8876_v19 = vor.u32 %v9449_v39, %v8873_v35 }
 0x8c7   : > { %6434 = vmatpush.bf16.msrb.mxu2 %v8876_v19 }
 0x8c9   : > { %v6088_v36 = vpop.f32.mrf.mxu2  ;;  %v6177_v10 = vpop.f32.mrf.mxu3 }
 0x8ca   : > { %v6089_v62 = vadd.f32 %v6088_v36, %v6000_v29  ;;  %v5913_v22 = vpop.f32.mrf.mxu0  ;;  %v6002_v28 = vpop.f32.mrf.mxu1  ;;  %v8617_v29 = vld [vmem:[#allocation7 + $0x438] sm:$0xf0]  ;;  %v9481_v36 = vld [vmem:[#allocation7 + $0x72c] sm:$0xf] }
 0x8cb   : > { %v5914_v7 = vadd.f32 %v5913_v22, %v12199_v6  ;;  %v8620_v59 = vor.u32 %v9385_v15, %v8617_v29 }
 0x8cc   : > { %v12228_v5 = vadd.f32 %v6177_v10, %v6089_v62  ;;  %5952 = vmatmul.bf16.gmra.mxu0 %v13786_v58  ;;  %v9004_v62 = vor.u32 %v9481_v36, %v9001_v23 }
 0x8cd   : > { %v6003_v33 = vadd.f32 %v6002_v28, %v5914_v7  ;;  %6041 = vmatmul.bf16.gmra.mxu1 %v13787_v55  ;;  %6256 = vmatpush.bf16.msrb.mxu0 %v8620_v59  ;;  %v13791_v59 = vld [vmem:[#allocation58_spill] sm:$0xff] }
 0x8ce   : > { %6130 = vmatmul.bf16.gmra.mxu2 %v13788_v34  ;;  %6219 = vmatmul.bf16.gmra.mxu3 %v13789_v17  ;;  %v9417_v17 = vld [vmem:[#allocation7 + $0x52c] sm:$0xf] }
 0x8cf   : > { %6523 = vmatpush.bf16.msrb.mxu3 %v9004_v62  ;;  %v8748_v35 = vor.u32 %v9417_v17, %v8745_v1  ;;  %v13792_v62 = vld [vmem:[#allocation59_spill] sm:$0xff] }
 0x8d1   : > { %v6091_v22 = vpop.f32.mrf.mxu2  ;;  %v6180_v7 = vpop.f32.mrf.mxu3  ;;  %6345 = vmatpush.bf16.msrb.mxu1 %v8748_v35 }
 0x8d2   : > { %v6092_v10 = vadd.f32 %v6091_v22, %v6003_v33  ;;  %v5915_v28 = vpop.f32.mrf.mxu0  ;;  %v6004_v55 = vpop.f32.mrf.mxu1  ;;  %v13790_v22 = vld [vmem:[#allocation57_spill] sm:$0xff] }
 0x8d3   : > { %v5916_v58 = vadd.f32 %v5915_v28, %v12199_v6 }
 0x8d4   : > { %v12235_v34 = vadd.f32 %v6180_v7, %v6092_v10  ;;  %v13793_v10 = vld [vmem:[#allocation60_spill] sm:$0xff] }
 0x8d5   : > { %v6005_v39 = vadd.f32 %v6004_v55, %v5916_v58 }
 0x8d9   : > { %v6093_v51 = vpop.f32.mrf.mxu2  ;;  %v6182_v15 = vpop.f32.mrf.mxu3 }
 0x8da   : > { %v6094_v61 = vadd.f32 %v6093_v51, %v6005_v39  ;;  %v5918_v23 = vpop.f32.mrf.mxu0  ;;  %v6007_v29 = vpop.f32.mrf.mxu1 }
 0x8db   : > { %v5919_v33 = vadd.f32 %v5918_v23, %v12199_v6 }
 0x8dc   : > { %v12238_v19 = vadd.f32 %v6182_v15, %v6094_v61  ;;  %5957 = vmatmul.bf16.gmra.mxu0 %v13790_v22 }
 0x8dd   : > { %v6008_v36 = vadd.f32 %v6007_v29, %v5919_v33  ;;  %6046 = vmatmul.bf16.gmra.mxu1 %v13791_v59 }
 0x8de   : > { %6135 = vmatmul.bf16.gmra.mxu2 %v13792_v62  ;;  %6224 = vmatmul.bf16.gmra.mxu3 %v13793_v10  ;;  %v13794_v62 = vld [vmem:[#allocation61_spill] sm:$0xff]  ;;  %v13796_v10 = vld [vmem:[#allocation63_spill] sm:$0xff] }
 0x8e1   : > { %v6096_v1 = vpop.f32.mrf.mxu2  ;;  %v6185_v28 = vpop.f32.mrf.mxu3 }
 0x8e2   : > { %v6097_v7 = vadd.f32 %v6096_v1, %v6008_v36  ;;  %v5920_v51 = vpop.f32.mrf.mxu0  ;;  %v6009_v55 = vpop.f32.mrf.mxu1  ;;  %v13795_v36 = vld [vmem:[#allocation62_spill] sm:$0xff]  ;;  %v13797_v1 = vld [vmem:[#allocation64_spill] sm:$0xff] }
 0x8e3   : > { %v5921_v58 = vadd.f32 %v5920_v51, %v12199_v6  ;;  %v9381_v51 = vld [vmem:[#allocation7 + $0x40c] sm:$0xf] }
 0x8e4   : > { %v12245_v17 = vadd.f32 %v6185_v28, %v6097_v7  ;;  %v9445_v7 = vld [vmem:[#allocation7 + $0x60c] sm:$0xf]  ;;  %v8857_v28 = vld [vmem:[#allocation7 + $0x618] sm:$0xf0] }
 0x8e5   : > { %v6010_v61 = vadd.f32 %v6009_v55, %v5921_v58  ;;  %v8860_v58 = vor.u32 %v9445_v7, %v8857_v28  ;;  %v8601_v55 = vld [vmem:[#allocation7 + $0x418] sm:$0xf0] }
 0x8e6   : > { %v8604_v43 = vor.u32 %v9381_v51, %v8601_v55 }
 0x8e7   : > { %6435 = vmatpush.bf16.msrb.mxu2 %v8860_v58 }
 0x8e8   : > { %6257 = vmatpush.bf16.msrb.mxu0 %v8604_v43  ;;  %v13799_v43 = vld [vmem:[#allocation66_spill] sm:$0xff] }
 0x8e9   : > { %v6098_v39 = vpop.f32.mrf.mxu2  ;;  %v6187_v15 = vpop.f32.mrf.mxu3 }
 0x8ea   : > { %v6099_v35 = vadd.f32 %v6098_v39, %v6010_v61  ;;  %v5923_v23 = vpop.f32.mrf.mxu0  ;;  %v6012_v29 = vpop.f32.mrf.mxu1  ;;  %v9477_v61 = vld [vmem:[#allocation7 + $0x70c] sm:$0xf]  ;;  %v8985_v39 = vld [vmem:[#allocation7 + $0x718] sm:$0xf0] }
 0x8eb   : > { %v5924_v33 = vadd.f32 %v5923_v23, %v12199_v6 }
 0x8ec   : > { %v12248_v22 = vadd.f32 %v6187_v15, %v6099_v35  ;;  %5962 = vmatmul.bf16.gmra.mxu0 %v13794_v62  ;;  %v8988_v35 = vor.u32 %v9477_v61, %v8985_v39 }
 0x8ed   : > { %v6013_v59 = vadd.f32 %v6012_v29, %v5924_v33  ;;  %6051 = vmatmul.bf16.gmra.mxu1 %v13795_v36 }
 0x8ee   : > { %6140 = vmatmul.bf16.gmra.mxu2 %v13796_v10  ;;  %6229 = vmatmul.bf16.gmra.mxu3 %v13797_v1  ;;  %v9413_v1 = vld [vmem:[#allocation7 + $0x50c] sm:$0xf] }
 0x8ef   : > { %6524 = vmatpush.bf16.msrb.mxu3 %v8988_v35  ;;  %v8732_v28 = vor.u32 %v9413_v1, %v8729_v31  ;;  %v13800_v35 = vld [vmem:[#allocation67_spill] sm:$0xff] }
 0x8f1   : > { %v6101_v23 = vpop.f32.mrf.mxu2  ;;  %v6190_v33 = vpop.f32.mrf.mxu3  ;;  %6346 = vmatpush.bf16.msrb.mxu1 %v8732_v28 }
 0x8f2   : > { %v6102_v15 = vadd.f32 %v6101_v23, %v6013_v59  ;;  %v5925_v29 = vpop.f32.mrf.mxu0  ;;  %v6014_v36 = vpop.f32.mrf.mxu1  ;;  %v13798_v23 = vld [vmem:[#allocation65_spill] sm:$0xff] }
 0x8f3   : > { %v5926_v62 = vadd.f32 %v5925_v29, %v12199_v6 }
 0x8f4   : > { %v12255_v10 = vadd.f32 %v6190_v33, %v6102_v15  ;;  %v13801_v15 = vld [vmem:[#allocation68_spill] sm:$0xff] }
 0x8f5   : > { %v6015_v7 = vadd.f32 %v6014_v36, %v5926_v62 }
 0x8f9   : > { %v6103_v40 = vpop.f32.mrf.mxu2  ;;  %v6192_v51 = vpop.f32.mrf.mxu3 }
 0x8fa   : > { %v6104_v9 = vadd.f32 %v6103_v40, %v6015_v7  ;;  %v5928_v55 = vpop.f32.mrf.mxu0  ;;  %v6017_v61 = vpop.f32.mrf.mxu1 }
 0x8fb   : > { %v5929_v59 = vadd.f32 %v5928_v55, %v12199_v6 }
 0x8fc   : > { %v12258_v58 = vadd.f32 %v6192_v51, %v6104_v9  ;;  %5967 = vmatmul.bf16.gmra.mxu0 %v13798_v23 }
 0x8fd   : > { %v6018_v39 = vadd.f32 %v6017_v61, %v5929_v59  ;;  %6056 = vmatmul.bf16.gmra.mxu1 %v13799_v43 }
 0x8fe   : > { %6145 = vmatmul.bf16.gmra.mxu2 %v13800_v35  ;;  %6234 = vmatmul.bf16.gmra.mxu3 %v13801_v15  ;;  %v13802_v35 = vld [vmem:[#allocation69_spill] sm:$0xff]  ;;  %v13804_v15 = vld [vmem:[#allocation71_spill] sm:$0xff] }
 0x901   : > { %v6106_v31 = vpop.f32.mrf.mxu2  ;;  %v6195_v29 = vpop.f32.mrf.mxu3 }
 0x902   : > { %v6107_v33 = vadd.f32 %v6106_v31, %v6018_v39  ;;  %v5930_v40 = vpop.f32.mrf.mxu0  ;;  %v6019_v36 = vpop.f32.mrf.mxu1  ;;  %v13803_v39 = vld [vmem:[#allocation70_spill] sm:$0xff]  ;;  %v13805_v31 = vld [vmem:[#allocation72_spill] sm:$0xff] }
 0x903   : > { %v5931_v62 = vadd.f32 %v5930_v40, %v12199_v6  ;;  %v9539_v40 = vld [vmem:[%s12929_s7 + $0xf8] sm:$0xff] }
 0x904   : > { %v12265_v1 = vadd.f32 %v6195_v29, %v6107_v33  ;;  %v9531_v33 = vld [vmem:[%s12929_s7 + $0xb8] sm:$0xff]  ;;  %7583 = vmatpush.bf16.msra.mxu3 %v9539_v40 }
 0x905   : > { %v6020_v9 = vadd.f32 %v6019_v36, %v5931_v62  ;;  %v9515_v29 = vld [vmem:[%s12929_s7 + $0x38] sm:$0xff]  ;;  %7494 = vmatpush.bf16.msra.mxu2 %v9531_v33 }
 0x906   : > { %7316 = vmatpush.bf16.msra.mxu0 %v9515_v29 }
 0x909   : > { %v6108_v7 = vpop.f32.mrf.mxu2  ;;  %v6197_v51 = vpop.f32.mrf.mxu3 }
 0x90a   : > { %v6109_v28 = vadd.f32 %v6108_v7, %v6020_v9  ;;  %v5933_v55 = vpop.f32.mrf.mxu0  ;;  %v6022_v61 = vpop.f32.mrf.mxu1 }
 0x90b   : > { %v5934_v59 = vadd.f32 %v5933_v55, %v12199_v6 }
 0x90c   : > { %v12268_v23 = vadd.f32 %v6197_v51, %v6109_v28  ;;  %5972 = vmatmul.bf16.gmra.mxu0 %v13802_v35 }
 0x90d   : > { %v6023_v43 = vadd.f32 %v6022_v61, %v5934_v59  ;;  %6061 = vmatmul.bf16.gmra.mxu1 %v13803_v39  ;;  %v9523_v59 = vld [vmem:[%s12929_s7 + $0x78] sm:$0xff] }
 0x90e   : > { %6150 = vmatmul.bf16.gmra.mxu2 %v13804_v15  ;;  %6239 = vmatmul.bf16.gmra.mxu3 %v13805_v31 }
 0x90f   : > { %7405 = vmatpush.bf16.msra.mxu1 %v9523_v59 }
 0x911   : > { %v6111_v62 = vpop.f32.mrf.mxu2  ;;  %v6200_v9 = vpop.f32.mrf.mxu3 }
 0x912   : > { %v6112_v36 = vadd.f32 %v6111_v62, %v6023_v43  ;;  %v5935_v7 = vpop.f32.mrf.mxu0  ;;  %v6024_v51 = vpop.f32.mrf.mxu1  ;;  %v13806_v62 = vld [vmem:[#allocation73_spill] sm:$0xff] }
 0x913   : > { %v5936_v28 = vadd.f32 %v5935_v7, %v12199_v6  ;;  %v13809_v7 = vld [vmem:[#allocation76_spill] sm:$0xff] }
 0x914   : > { %v12284_v55 = vadd.f32 %v6200_v9, %v6112_v36  ;;  %v13807_v36 = vld [vmem:[#allocation74_spill] sm:$0xff]  ;;  %v13808_v9 = vld [vmem:[#allocation75_spill] sm:$0xff] }
 0x915   : > { %v6025_v61 = vadd.f32 %v6024_v51, %v5936_v28 }
 0x919   : > { %v6113_v35 = vpop.f32.mrf.mxu2  ;;  %v6202_v15 = vpop.f32.mrf.mxu3 }
 0x91a   : > { %v6114_v39 = vadd.f32 %v6113_v35, %v6025_v61  ;;  %v5938_v31 = vpop.f32.mrf.mxu0  ;;  %v6027_v33 = vpop.f32.mrf.mxu1 }
 0x91b   : > { %v5939_v43 = vadd.f32 %v5938_v31, %v12199_v6 }
 0x91c   : > { %v12290_v29 = vadd.f32 %v6202_v15, %v6114_v39  ;;  %5977 = vmatmul.bf16.gmra.mxu0 %v13806_v62 }
 0x91d   : > { %v6028_v40 = vadd.f32 %v6027_v33, %v5939_v43  ;;  %6066 = vmatmul.bf16.gmra.mxu1 %v13807_v36 }
 0x91e   : > { %6155 = vmatmul.bf16.gmra.mxu2 %v13808_v9  ;;  %6244 = vmatmul.bf16.gmra.mxu3 %v13809_v7 }
 0x921   : > { %v6116_v28 = vpop.f32.mrf.mxu2  ;;  %v6205_v59 = vpop.f32.mrf.mxu3 }
 0x922   : > { %v6117_v51 = vadd.f32 %v6116_v28, %v6028_v40  ;;  %v5940_v61 = vpop.f32.mrf.mxu0  ;;  %v6029_v4 = vpop.f32.mrf.mxu1  ;;  %v13812_v40 = vld [vmem:[#allocation78_spill] sm:$0xff]  ;;  %v13813_v28 = vld [vmem:[#allocation79_spill] sm:$0xff] }
 0x923   : > { %v5941_v35 = vadd.f32 %v5940_v61, %v12199_v6  ;;  %v13814_v61 = vld [vmem:[#allocation80_spill] sm:$0xff] }
 0x924   : > { %v12297_v31 = vadd.f32 %v6205_v59, %v6117_v51  ;;  %v9514_v51 = vld [vmem:[%s12929_s7 + $0x30] sm:$0xff] }
 0x925   : > { %v6030_v39 = vadd.f32 %v6029_v4, %v5941_v35  ;;  %v9530_v4 = vld [vmem:[%s12929_s7 + $0xb0] sm:$0xff]  ;;  %7317 = vmatpush.bf16.msra.mxu0 %v9514_v51 }
 0x926   : > { %7495 = vmatpush.bf16.msra.mxu2 %v9530_v4 }
 0x929   : > { %v6118_v15 = vpop.f32.mrf.mxu2  ;;  %v6207_v33 = vpop.f32.mrf.mxu3 }
 0x92a   : > { %v6119_v43 = vadd.f32 %v6118_v15, %v6030_v39  ;;  %v5943_v62 = vpop.f32.mrf.mxu0  ;;  %v6032_v12 = vpop.f32.mrf.mxu1 }
 0x92b   : > { %v5944_v36 = vadd.f32 %v5943_v62, %v12199_v6  ;;  %v9522_v62 = vld [vmem:[%s12929_s7 + $0x70] sm:$0xff] }
 0x92c   : > { %v12300_v9 = vadd.f32 %v6207_v33, %v6119_v43  ;;  %6258 = vmatmul.bf16.vlgmr.msrb.gmra.mxu0 %v13811_v38  ;;  %7406 = vmatpush.bf16.msra.mxu1 %v9522_v62 }
 0x92d   : > { %v6033_v7 = vadd.f32 %v6032_v12, %v5944_v36  ;;  %6347 = vmatmul.bf16.vlgmr.msrb.gmra.mxu1 %v13812_v40  ;;  %v9538_v12 = vld [vmem:[%s12929_s7 + $0xf0] sm:$0xff] }
 0x92e   : > { %13810 = vst [vmem:[#allocation21_spill] sm:$0xff] %v12300_v9  ;;  %6436 = vmatmul.bf16.vlgmr.msrb.gmra.mxu2 %v13813_v28  ;;  %6525 = vmatmul.bf16.vlgmr.msrb.gmra.mxu3 %v13814_v61  ;;  %v13823_v9 = vld [vmem:[#allocation85_spill] sm:$0xff] }
 0x92f   : > { %7584 = vmatpush.bf16.msra.mxu3 %v9538_v12 }
 0x931   : > { %v6121_v59 = vpop.f32.mrf.mxu2  ;;  %v6210_v35 = vpop.f32.mrf.mxu3 }
 0x932   : > { %v6122_v38 = vadd.f32 %v6121_v59, %v6033_v7  ;;  %v5945_v39 = vpop.f32.mrf.mxu0  ;;  %v6034_v43 = vpop.f32.mrf.mxu1 }
 0x933   : > { %v5946_v15 = vadd.f32 %v5945_v39, %v12199_v6  ;;  %v13817_v39 = vld [vmem:[#allocation81_spill] sm:$0xff] }
 0x934   : > { %v12316_v33 = vadd.f32 %v6210_v35, %v6122_v38  ;;  %v13818_v38 = vld [vmem:[#allocation82_spill] sm:$0xff]  ;;  %v13819_v35 = vld [vmem:[#allocation83_spill] sm:$0xff] }
 0x935   : > { %v6035_v36 = vadd.f32 %v6034_v43, %v5946_v15 }
 0x936   : > { %13815 = vst [vmem:[#allocation22_spill] sm:$0xff] %v12316_v33 }
 0x939   : > { %v6123_v40 = vpop.f32.mrf.mxu2  ;;  %v6212_v61 = vpop.f32.mrf.mxu3 }
 0x93a   : > { %v6124_v28 = vadd.f32 %v6123_v40, %v6035_v36  ;;  %v5948_v4 = vpop.f32.mrf.mxu0  ;;  %v6037_v51 = vpop.f32.mrf.mxu1 }
 0x93b   : > { %v5949_v7 = vadd.f32 %v5948_v4, %v12199_v6 }
 0x93c   : > { %v12322_v59 = vadd.f32 %v6212_v61, %v6124_v28  ;;  %6263 = vmatmul.bf16.gmra.mxu0 %v13817_v39 }
 0x93d   : > { %v6038_v12 = vadd.f32 %v6037_v51, %v5949_v7  ;;  %6352 = vmatmul.bf16.gmra.mxu1 %v13818_v38 }
 0x93e   : > { %13816 = vst [vmem:[#allocation23_spill] sm:$0xff] %v12322_v59  ;;  %6441 = vmatmul.bf16.gmra.mxu2 %v13819_v35  ;;  %6530 = vmatmul.bf16.gmra.mxu3 %v13820_v24 }
 0x941   : > { %v6126_v15 = vpop.f32.mrf.mxu2  ;;  %v6215_v62 = vpop.f32.mrf.mxu3 }
 0x942   : > { %v6127_v43 = vadd.f32 %v6126_v15, %v6038_v12  ;;  %v5950_v36 = vpop.f32.mrf.mxu0  ;;  %v6039_v33 = vpop.f32.mrf.mxu1  ;;  %v13824_v12 = vld [vmem:[#allocation86_spill] sm:$0xff]  ;;  %v13825_v15 = vld [vmem:[#allocation87_spill] sm:$0xff] }
 0x943   : > { %v5951_v40 = vadd.f32 %v5950_v36, %v12199_v6  ;;  %v13826_v36 = vld [vmem:[#allocation88_spill] sm:$0xff] }
 0x944   : > { %v12329_v4 = vadd.f32 %v6215_v62, %v6127_v43  ;;  %v9513_v43 = vld [vmem:[%s12929_s7 + $0x28] sm:$0xff] }
 0x945   : > { %v6040_v28 = vadd.f32 %v6039_v33, %v5951_v40  ;;  %v9529_v33 = vld [vmem:[%s12929_s7 + $0xa8] sm:$0xff]  ;;  %7318 = vmatpush.bf16.msra.mxu0 %v9513_v43 }
 0x946   : > { %13821 = vst [vmem:[#allocation24_spill] sm:$0xff] %v12329_v4  ;;  %7496 = vmatpush.bf16.msra.mxu2 %v9529_v33  ;;  %v13835_v4 = vld [vmem:[#allocation93_spill] sm:$0xff] }
 0x949   : > { %v6128_v61 = vpop.f32.mrf.mxu2  ;;  %v6217_v51 = vpop.f32.mrf.mxu3 }
 0x94a   : > { %v6129_v7 = vadd.f32 %v6128_v61, %v6040_v28  ;;  %v5953_v39 = vpop.f32.mrf.mxu0  ;;  %v6042_v59 = vpop.f32.mrf.mxu1 }
 0x94b   : > { %v5954_v38 = vadd.f32 %v5953_v39, %v12199_v6  ;;  %v9521_v39 = vld [vmem:[%s12929_s7 + $0x68] sm:$0xff] }
 0x94c   : > { %v12332_v35 = vadd.f32 %v6217_v51, %v6129_v7  ;;  %6268 = vmatmul.bf16.gmra.mxu0 %v13823_v9  ;;  %7407 = vmatpush.bf16.msra.mxu1 %v9521_v39 }
 0x94d   : > { %v6043_v24 = vadd.f32 %v6042_v59, %v5954_v38  ;;  %6357 = vmatmul.bf16.gmra.mxu1 %v13824_v12  ;;  %v9537_v59 = vld [vmem:[%s12929_s7 + $0xe8] sm:$0xff] }
 0x94e   : > { %13822 = vst [vmem:[#allocation188_spill] sm:$0xff] %v12332_v35  ;;  %6446 = vmatmul.bf16.gmra.mxu2 %v13825_v15  ;;  %6535 = vmatmul.bf16.gmra.mxu3 %v13826_v36 }
 0x94f   : > { %7585 = vmatpush.bf16.msra.mxu3 %v9537_v59 }
 0x951   : > { %v6131_v62 = vpop.f32.mrf.mxu2  ;;  %v6220_v40 = vpop.f32.mrf.mxu3 }
 0x952   : > { %v6132_v9 = vadd.f32 %v6131_v62, %v6043_v24  ;;  %v5955_v28 = vpop.f32.mrf.mxu0  ;;  %v6044_v7 = vpop.f32.mrf.mxu1 }
 0x953   : > { %v5956_v61 = vadd.f32 %v5955_v28, %v12199_v6  ;;  %v13829_v28 = vld [vmem:[#allocation89_spill] sm:$0xff] }
 0x954   : > { %v12348_v51 = vadd.f32 %v6220_v40, %v6132_v9  ;;  %v13830_v9 = vld [vmem:[#allocation90_spill] sm:$0xff]  ;;  %v13831_v40 = vld [vmem:[#allocation91_spill] sm:$0xff] }
 0x955   : > { %v6045_v38 = vadd.f32 %v6044_v7, %v5956_v61 }
 0x956   : > { %13827 = vst [vmem:[#allocation189_spill] sm:$0xff] %v12348_v51  ;;  %v13832_v51 = vld [vmem:[#allocation92_spill] sm:$0xff] }
 0x959   : > { %v6133_v12 = vpop.f32.mrf.mxu2  ;;  %v6222_v36 = vpop.f32.mrf.mxu3 }
 0x95a   : > { %v6134_v15 = vadd.f32 %v6133_v12, %v6045_v38  ;;  %v5958_v33 = vpop.f32.mrf.mxu0  ;;  %v6047_v43 = vpop.f32.mrf.mxu1 }
 0x95b   : > { %v5959_v24 = vadd.f32 %v5958_v33, %v12199_v6 }
 0x95c   : > { %v12354_v62 = vadd.f32 %v6222_v36, %v6134_v15  ;;  %6273 = vmatmul.bf16.gmra.mxu0 %v13829_v28 }
 0x95d   : > { %v6048_v59 = vadd.f32 %v6047_v43, %v5959_v24  ;;  %6362 = vmatmul.bf16.gmra.mxu1 %v13830_v9 }
 0x95e   : > { %13828 = vst [vmem:[#allocation25_spill] sm:$0xff] %v12354_v62  ;;  %6451 = vmatmul.bf16.gmra.mxu2 %v13831_v40  ;;  %6540 = vmatmul.bf16.gmra.mxu3 %v13832_v51 }
 0x961   : > { %v6136_v61 = vpop.f32.mrf.mxu2  ;;  %v6225_v39 = vpop.f32.mrf.mxu3 }
 0x962   : > { %v6137_v7 = vadd.f32 %v6136_v61, %v6048_v59  ;;  %v5960_v38 = vpop.f32.mrf.mxu0  ;;  %v6049_v35 = vpop.f32.mrf.mxu1  ;;  %v13836_v59 = vld [vmem:[#allocation94_spill] sm:$0xff]  ;;  %v13837_v61 = vld [vmem:[#allocation95_spill] sm:$0xff] }
 0x963   : > { %v5961_v12 = vadd.f32 %v5960_v38, %v12199_v6  ;;  %v13838_v38 = vld [vmem:[#allocation96_spill] sm:$0xff] }
 0x964   : > { %v12361_v33 = vadd.f32 %v6225_v39, %v6137_v7  ;;  %v9512_v7 = vld [vmem:[%s12929_s7 + $0x20] sm:$0xff] }
 0x965   : > { %v6050_v15 = vadd.f32 %v6049_v35, %v5961_v12  ;;  %v9528_v35 = vld [vmem:[%s12929_s7 + $0xa0] sm:$0xff]  ;;  %7319 = vmatpush.bf16.msra.mxu0 %v9512_v7 }
 0x966   : > { %13833 = vst [vmem:[#allocation26_spill] sm:$0xff] %v12361_v33  ;;  %7497 = vmatpush.bf16.msra.mxu2 %v9528_v35  ;;  %v13846_v33 = vld [vmem:[#allocation101_spill] sm:$0xff] }
 0x969   : > { %v6138_v36 = vpop.f32.mrf.mxu2  ;;  %v6227_v43 = vpop.f32.mrf.mxu3 }
 0x96a   : > { %v6139_v24 = vadd.f32 %v6138_v36, %v6050_v15  ;;  %v5963_v28 = vpop.f32.mrf.mxu0  ;;  %v6052_v62 = vpop.f32.mrf.mxu1 }
 0x96b   : > { %v5964_v9 = vadd.f32 %v5963_v28, %v12199_v6  ;;  %v9520_v28 = vld [vmem:[%s12929_s7 + $0x60] sm:$0xff] }
 0x96c   : > { %v12364_v40 = vadd.f32 %v6227_v43, %v6139_v24  ;;  %6278 = vmatmul.bf16.gmra.mxu0 %v13835_v4  ;;  %7408 = vmatpush.bf16.msra.mxu1 %v9520_v28 }
 0x96d   : > { %v6053_v51 = vadd.f32 %v6052_v62, %v5964_v9  ;;  %6367 = vmatmul.bf16.gmra.mxu1 %v13836_v59  ;;  %v9536_v62 = vld [vmem:[%s12929_s7 + $0xe0] sm:$0xff] }
 0x96e   : > { %13834 = vst [vmem:[#allocation27_spill] sm:$0xff] %v12364_v40  ;;  %6456 = vmatmul.bf16.gmra.mxu2 %v13837_v61  ;;  %6545 = vmatmul.bf16.gmra.mxu3 %v13838_v38 }
 0x96f   : > { %7586 = vmatpush.bf16.msra.mxu3 %v9536_v62 }
 0x971   : > { %v6141_v39 = vpop.f32.mrf.mxu2  ;;  %v6230_v12 = vpop.f32.mrf.mxu3 }
 0x972   : > { %v6142_v4 = vadd.f32 %v6141_v39, %v6053_v51  ;;  %v5965_v15 = vpop.f32.mrf.mxu0  ;;  %v6054_v24 = vpop.f32.mrf.mxu1 }
 0x973   : > { %v5966_v36 = vadd.f32 %v5965_v15, %v12199_v6  ;;  %v13841_v15 = vld [vmem:[#allocation97_spill] sm:$0xff] }
 0x974   : > { %v12380_v43 = vadd.f32 %v6230_v12, %v6142_v4  ;;  %v13842_v4 = vld [vmem:[#allocation98_spill] sm:$0xff]  ;;  %v13843_v12 = vld [vmem:[#allocation99_spill] sm:$0xff] }
 0x975   : > { %v6055_v9 = vadd.f32 %v6054_v24, %v5966_v36 }
 0x976   : > { %13839 = vst [vmem:[#allocation28_spill] sm:$0xff] %v12380_v43  ;;  %v13844_v43 = vld [vmem:[#allocation100_spill] sm:$0xff] }
 0x979   : > { %v6143_v59 = vpop.f32.mrf.mxu2  ;;  %v6232_v38 = vpop.f32.mrf.mxu3 }
 0x97a   : > { %v6144_v61 = vadd.f32 %v6143_v59, %v6055_v9  ;;  %v5968_v35 = vpop.f32.mrf.mxu0  ;;  %v6057_v7 = vpop.f32.mrf.mxu1 }
 0x97b   : > { %v5969_v51 = vadd.f32 %v5968_v35, %v12199_v6 }
 0x97c   : > { %v12386_v39 = vadd.f32 %v6232_v38, %v6144_v61  ;;  %6283 = vmatmul.bf16.gmra.mxu0 %v13841_v15 }
 0x97d   : > { %v6058_v62 = vadd.f32 %v6057_v7, %v5969_v51  ;;  %6372 = vmatmul.bf16.gmra.mxu1 %v13842_v4 }
 0x97e   : > { %13840 = vst [vmem:[#allocation190_spill] sm:$0xff] %v12386_v39  ;;  %6461 = vmatmul.bf16.gmra.mxu2 %v13843_v12  ;;  %6550 = vmatmul.bf16.gmra.mxu3 %v13844_v43 }
 0x981   : > { %v6146_v36 = vpop.f32.mrf.mxu2  ;;  %v6235_v28 = vpop.f32.mrf.mxu3 }
 0x982   : > { %v6147_v24 = vadd.f32 %v6146_v36, %v6058_v62  ;;  %v5970_v9 = vpop.f32.mrf.mxu0  ;;  %v6059_v40 = vpop.f32.mrf.mxu1  ;;  %v13847_v62 = vld [vmem:[#allocation102_spill] sm:$0xff]  ;;  %v13848_v36 = vld [vmem:[#allocation103_spill] sm:$0xff] }
 0x983   : > { %v5971_v59 = vadd.f32 %v5970_v9, %v12199_v6  ;;  %v13849_v9 = vld [vmem:[#allocation104_spill] sm:$0xff] }
 0x984   : > { %v12393_v35 = vadd.f32 %v6235_v28, %v6147_v24  ;;  %v9511_v24 = vld [vmem:[%s12929_s7 + $0x18] sm:$0xff] }
 0x985   : > { %v6060_v61 = vadd.f32 %v6059_v40, %v5971_v59  ;;  %v9527_v40 = vld [vmem:[%s12929_s7 + $0x98] sm:$0xff]  ;;  %7320 = vmatpush.bf16.msra.mxu0 %v9511_v24 }
 0x986   : > { %7498 = vmatpush.bf16.msra.mxu2 %v9527_v40 }
 0x989   : > { %v6148_v38 = vpop.f32.mrf.mxu2  ;;  %v6237_v7 = vpop.f32.mrf.mxu3 }
 0x98a   : > { %v6149_v51 = vadd.f32 %v6148_v38, %v6060_v61  ;;  %v5973_v15 = vpop.f32.mrf.mxu0  ;;  %v6062_v39 = vpop.f32.mrf.mxu1 }
 0x98b   : > { %v5974_v4 = vadd.f32 %v5973_v15, %v12199_v6 }
 0x98c   : > { %v12396_v12 = vadd.f32 %v6237_v7, %v6149_v51  ;;  %6288 = vmatmul.bf16.gmra.mxu0 %v13846_v33 }
 0x98d   : > { %v6063_v43 = vadd.f32 %v6062_v39, %v5974_v4  ;;  %6377 = vmatmul.bf16.gmra.mxu1 %v13847_v62  ;;  %v9535_v39 = vld [vmem:[%s12929_s7 + $0xd8] sm:$0xff] }
 0x98e   : > { %13845 = vst [vmem:[#allocation191_spill] sm:$0xff] %v12396_v12  ;;  %6466 = vmatmul.bf16.gmra.mxu2 %v13848_v36  ;;  %6555 = vmatmul.bf16.gmra.mxu3 %v13849_v9  ;;  %v9519_v4 = vld [vmem:[%s12929_s7 + $0x58] sm:$0xff] }
 0x98f   : > { %7587 = vmatpush.bf16.msra.mxu3 %v9535_v39  ;;  %7409 = vmatpush.bf16.msra.mxu1 %v9519_v4 }
 0x991   : > { %v6151_v28 = vpop.f32.mrf.mxu2  ;;  %v6240_v59 = vpop.f32.mrf.mxu3 }
 0x992   : > { %v6152_v33 = vadd.f32 %v6151_v28, %v6063_v43  ;;  %v5975_v61 = vpop.f32.mrf.mxu0  ;;  %v6064_v51 = vpop.f32.mrf.mxu1  ;;  %v13852_v28 = vld [vmem:[#allocation105_spill] sm:$0xff] }
 0x993   : > { %v5976_v38 = vadd.f32 %v5975_v61, %v12199_v6 }
 0x994   : > { %v12412_v7 = vadd.f32 %v6240_v59, %v6152_v33  ;;  %v13853_v33 = vld [vmem:[#allocation106_spill] sm:$0xff]  ;;  %v13854_v59 = vld [vmem:[#allocation107_spill] sm:$0xff] }
 0x995   : > { %v6065_v15 = vadd.f32 %v6064_v51, %v5976_v38 }
 0x996   : > { %13850 = vst [vmem:[#allocation29_spill] sm:$0xff] %v12412_v7  ;;  %v13855_v7 = vld [vmem:[#allocation108_spill] sm:$0xff] }
 0x999   : > { %v6153_v62 = vpop.f32.mrf.mxu2  ;;  %v6242_v9 = vpop.f32.mrf.mxu3 }
 0x99a   : > { %v6154_v36 = vadd.f32 %v6153_v62, %v6065_v15  ;;  %v5978_v12 = vpop.f32.mrf.mxu0  ;;  %v6067_v40 = vpop.f32.mrf.mxu1 }
 0x99b   : > { %v5979_v43 = vadd.f32 %v5978_v12, %v12199_v6 }
 0x99c   : > { %v12418_v24 = vadd.f32 %v6242_v9, %v6154_v36  ;;  %6293 = vmatmul.bf16.gmra.mxu0 %v10797_v3 }
 0x99d   : > { %v6068_v39 = vadd.f32 %v6067_v40, %v5979_v43  ;;  %6382 = vmatmul.bf16.gmra.mxu1 %v13852_v28 }
 0x99e   : > { %13851 = vst [vmem:[#allocation30_spill] sm:$0xff] %v12418_v24  ;;  %6471 = vmatmul.bf16.gmra.mxu2 %v13853_v33  ;;  %6560 = vmatmul.bf16.gmra.mxu3 %v13854_v59 }
 0x9a1   : > { %v6156_v61 = vpop.f32.mrf.mxu2  ;;  %v6245_v51 = vpop.f32.mrf.mxu3 }
 0x9a2   : > { %v6157_v38 = vadd.f32 %v6156_v61, %v6068_v39  ;;  %v5980_v15 = vpop.f32.mrf.mxu0  ;;  %v6069_v62 = vpop.f32.mrf.mxu1  ;;  %v13856_v39 = vld [vmem:[#allocation109_spill] sm:$0xff]  ;;  %v13857_v61 = vld [vmem:[#allocation110_spill] sm:$0xff] }
 0x9a3   : > { %v5981_v4 = vadd.f32 %v5980_v15, %v12199_v6  ;;  %v13858_v6 = vld [vmem:[#allocation111_spill] sm:$0xff] }
 0x9a4   : > { %v12425_v12 = vadd.f32 %v6245_v51, %v6157_v38  ;;  %v9526_v38 = vld [vmem:[%s12929_s7 + $0x90] sm:$0xff] }
 0x9a5   : > { %v6070_v36 = vadd.f32 %v6069_v62, %v5981_v4  ;;  %7499 = vmatpush.bf16.msra.mxu2 %v9526_v38 }
 0x9a9   : > { %v6158_v9 = vpop.f32.mrf.mxu2  ;;  %v6247_v40 = vpop.f32.mrf.mxu3 }
 0x9aa   : > { %v6159_v43 = vadd.f32 %v6158_v9, %v6070_v36  ;;  %v6259_v3 = vpop.f32.mrf.mxu0  ;;  %v6348_v24 = vpop.f32.mrf.mxu1 }
 0x9ab   : > { %v6260_v28 = vadd.f32 %v6259_v3, %v12215_v56  ;;  %v9510_v56 = vld [vmem:[%s12929_s7 + $0x10] sm:$0xff] }
 0x9ac   : > { %v12428_v33 = vadd.f32 %v6247_v40, %v6159_v43  ;;  %6298 = vmatmul.bf16.gmra.mxu0 %v13855_v7  ;;  %v9518_v40 = vld [vmem:[%s12929_s7 + $0x50] sm:$0xff] }
 0x9ad   : > { %v6349_v59 = vadd.f32 %v6348_v24, %v6260_v28  ;;  %6387 = vmatmul.bf16.gmra.mxu1 %v13856_v39  ;;  %v9534_v24 = vld [vmem:[%s12929_s7 + $0xd0] sm:$0xff]  ;;  %7321 = vmatpush.bf16.msra.mxu0 %v9510_v56 }
 0x9ae   : > { %6476 = vmatmul.bf16.gmra.mxu2 %v13857_v61  ;;  %6565 = vmatmul.bf16.gmra.mxu3 %v13858_v6 }
 0x9af   : > { %7588 = vmatpush.bf16.msra.mxu3 %v9534_v24  ;;  %7410 = vmatpush.bf16.msra.mxu1 %v9518_v40 }
 0x9b1   : > { %v6437_v51 = vpop.f32.mrf.mxu2  ;;  %v6526_v15 = vpop.f32.mrf.mxu3 }
 0x9b2   : > { %v6438_v7 = vadd.f32 %v6437_v51, %v6349_v59  ;;  %v6261_v4 = vpop.f32.mrf.mxu0  ;;  %v6350_v36 = vpop.f32.mrf.mxu1 }
 0x9b3   : > { %v6262_v62 = vadd.f32 %v6261_v4, %v12218_v20 }
 0x9b4   : > { %v6527_v9 = vadd.f32 %v6526_v15, %v6438_v7 }
 0x9b5   : > { %v6351_v43 = vadd.f32 %v6350_v36, %v6262_v62 }
 0x9b6   : > { %v6739_v38 = vmul.f32 %v11206_v13, %v6527_v9  ;;  %vm6609_vm12 = vcmp.gt.f32.partialorder %v6527_v9, 0.0 }
 0x9b8   : > { %v12454_v51 = vsel %vm6609_vm12, %v6527_v9, %v6739_v38  ;;  %v9509_v38 = vld [vmem:[%s12929_s7 + $0x8] sm:$0xff] }
 0x9b9   : > { %v6439_v3 = vpop.f32.mrf.mxu2  ;;  %v6528_v39 = vpop.f32.mrf.mxu3  ;;  %7322 = vmatpush.bf16.msra.mxu0 %v9509_v38 }
 0x9ba   : > { %v6440_v28 = vadd.f32 %v6439_v3, %v6351_v43  ;;  %v6264_v61 = vpop.f32.mrf.mxu0  ;;  %v6353_v59 = vpop.f32.mrf.mxu1 }
 0x9bb   : > { %v6265_v6 = vadd.f32 %v6264_v61, %v12225_v27 }
 0x9bc   : > { %v6529_v56 = vadd.f32 %v6528_v39, %v6440_v28  ;;  %6303 = vmatmul.bf16.gmra.mxu0 %v10853_v26 }
 0x9bd   : > { %v6354_v20 = vadd.f32 %v6353_v59, %v6265_v6  ;;  %6392 = vmatmul.bf16.gmra.mxu1 %v10855_v46 }
 0x9be   : > { %vm6613_vm13 = vcmp.gt.f32.partialorder %v6529_v56, 0.0  ;;  %v6743_v24 = vmul.f32 %v11206_v13, %v6529_v56  ;;  %6481 = vmatmul.bf16.gmra.mxu2 %v10866_v2  ;;  %6570 = vmatmul.bf16.gmra.mxu3 %v10870_v32 }
 0x9c0   : > { %v12456_v27 = vsel %vm6613_vm13, %v6529_v56, %v6743_v24 }
 0x9c1   : > { %v6995_v7 = vpack.c.bf16 %v12456_v27, %v12454_v51  ;;  %v6442_v15 = vpop.f32.mrf.mxu2  ;;  %v6531_v62 = vpop.f32.mrf.mxu3 }
 0x9c2   : > { %v6443_v4 = vadd.f32 %v6442_v15, %v6354_v20  ;;  %v6266_v26 = vpop.f32.mrf.mxu0  ;;  %v6355_v43 = vpop.f32.mrf.mxu1 }
 0x9c3   : > { %v6267_v36 = vadd.f32 %v6266_v26, %v12228_v5 }
 0x9c4   : > { %v6532_v40 = vadd.f32 %v6531_v62, %v6443_v4 }
 0x9c5   : > { %v6356_v46 = vadd.f32 %v6355_v43, %v6267_v36  ;;  %v9517_v43 = vld [vmem:[%s12929_s7 + $0x48] sm:$0xff] }
 0x9c6   : > { %v6747_v61 = vmul.f32 %v11206_v13, %v6532_v40  ;;  %vm6617_vm14 = vcmp.gt.f32.partialorder %v6532_v40, 0.0  ;;  %7411 = vmatpush.bf16.msra.mxu1 %v9517_v43 }
 0x9c8   : > { %v12477_v56 = vsel %vm6617_vm14, %v6532_v40, %v6747_v61 }
 0x9c9   : > { %v6444_v3 = vpop.f32.mrf.mxu2  ;;  %v6533_v28 = vpop.f32.mrf.mxu3 }
 0x9ca   : > { %v6445_v2 = vadd.f32 %v6444_v3, %v6356_v46  ;;  %v6269_v32 = vpop.f32.mrf.mxu0  ;;  %v6358_v39 = vpop.f32.mrf.mxu1 }
 0x9cb   : > { %v6270_v9 = vadd.f32 %v6269_v32, %v12235_v34  ;;  %v9525_v34 = vld [vmem:[%s12929_s7 + $0x88] sm:$0xff] }
 0x9cc   : > { %v6534_v6 = vadd.f32 %v6533_v28, %v6445_v2  ;;  %6308 = vmatmul.bf16.gmra.mxu0 %v10881_v54  ;;  %v9533_v54 = vld [vmem:[%s12929_s7 + $0xc8] sm:$0xff]  ;;  %7500 = vmatpush.bf16.msra.mxu2 %v9525_v34 }
 0x9cd   : > { %v6359_v59 = vadd.f32 %v6358_v39, %v6270_v9  ;;  %6397 = vmatmul.bf16.gmra.mxu1 %v10883_v44  ;;  %7589 = vmatpush.bf16.msra.mxu3 %v9533_v54 }
 0x9ce   : > { %vm6621_vm15 = vcmp.gt.f32.partialorder %v6534_v6, 0.0  ;;  %v6751_v5 = vmul.f32 %v11206_v13, %v6534_v6  ;;  %6486 = vmatmul.bf16.gmra.mxu2 %v10894_v57  ;;  %6575 = vmatmul.bf16.gmra.mxu3 %v10898_v42 }
 0x9d0   : > { %v12479_v20 = vsel %vm6621_vm15, %v6534_v6, %v6751_v5 }
 0x9d1   : > { %v6447_v44 = vpop.f32.mrf.mxu2  ;;  %v6999_v57 = vpack.c.bf16 %v12479_v20, %v12477_v56  ;;  %v6536_v24 = vpop.f32.mrf.mxu3 }
 0x9d2   : > { %v6448_v42 = vadd.f32 %v6447_v44, %v6359_v59  ;;  %v6271_v15 = vpop.f32.mrf.mxu0  ;;  %v6360_v62 = vpop.f32.mrf.mxu1 }
 0x9d3   : > { %v6272_v4 = vadd.f32 %v6271_v15, %v12238_v19 }
 0x9d4   : > { %v6537_v26 = vadd.f32 %v6536_v24, %v6448_v42 }
 0x9d5   : > { %v6361_v36 = vadd.f32 %v6360_v62, %v6272_v4 }
 0x9d6   : > { %v6755_v9 = vmul.f32 %v11206_v13, %v6537_v26  ;;  %vm6625_vm1 = vcmp.gt.f32.partialorder %v6537_v26, 0.0 }
 0x9d8   : > { %v12494_v6 = vsel %vm6625_vm1, %v6537_v26, %v6755_v9 }
 0x9d9   : > { %v6449_v40 = vpop.f32.mrf.mxu2  ;;  %v6538_v3 = vpop.f32.mrf.mxu3 }
 0x9da   : > { %v6450_v46 = vadd.f32 %v6449_v40, %v6361_v36  ;;  %v6274_v2 = vpop.f32.mrf.mxu0  ;;  %v6363_v32 = vpop.f32.mrf.mxu1  ;;  %v9508_v40 = vld [vmem:[%s12929_s7] sm:$0xff] }
 0x9db   : > { %v6275_v28 = vadd.f32 %v6274_v2, %v12245_v17  ;;  %7323 = vmatpush.bf16.msra.mxu0 %v9508_v40 }
 0x9dc   : > { %v6539_v39 = vadd.f32 %v6538_v3, %v6450_v46  ;;  %6313 = vmatmul.bf16.gmra.mxu0 %v10909_v50 }
 0x9dd   : > { %v6364_v19 = vadd.f32 %v6363_v32, %v6275_v28  ;;  %6402 = vmatmul.bf16.gmra.mxu1 %v10911_v25 }
 0x9de   : > { %vm6629_vm2 = vcmp.gt.f32.partialorder %v6539_v39, 0.0  ;;  %v6759_v61 = vmul.f32 %v11206_v13, %v6539_v39  ;;  %6491 = vmatmul.bf16.gmra.mxu2 %v13371_v21  ;;  %6580 = vmatmul.bf16.gmra.mxu3 %v13372_v45 }
 0x9e0   : > { %v12496_v17 = vsel %vm6629_vm2, %v6539_v39, %v6759_v61  ;;  %v9516_v61 = vld [vmem:[%s12929_s7 + $0x40] sm:$0xff] }
 0x9e1   : > { %v6452_v59 = vpop.f32.mrf.mxu2  ;;  %v7003_v5 = vpack.c.bf16 %v12496_v17, %v12494_v6  ;;  %v6541_v38 = vpop.f32.mrf.mxu3  ;;  %7412 = vmatpush.bf16.msra.mxu1 %v9516_v61 }
 0x9e2   : > { %v6453_v34 = vadd.f32 %v6452_v59, %v6364_v19  ;;  %v6276_v50 = vpop.f32.mrf.mxu0  ;;  %v6365_v44 = vpop.f32.mrf.mxu1 }
 0x9e3   : > { %v6277_v54 = vadd.f32 %v6276_v50, %v12248_v22 }
 0x9e4   : > { %v6542_v42 = vadd.f32 %v6541_v38, %v6453_v34 }
 0x9e5   : > { %v6366_v25 = vadd.f32 %v6365_v44, %v6277_v54 }
 0x9e6   : > { %v6763_v26 = vmul.f32 %v11206_v13, %v6542_v42  ;;  %vm6633_vm3 = vcmp.gt.f32.partialorder %v6542_v42, 0.0 }
 0x9e8   : > { %v12517_v46 = vsel %vm6633_vm3, %v6542_v42, %v6763_v26 }
 0x9e9   : > { %v6454_v24 = vpop.f32.mrf.mxu2  ;;  %v6543_v15 = vpop.f32.mrf.mxu3 }
 0x9ea   : > { %v6455_v21 = vadd.f32 %v6454_v24, %v6366_v25  ;;  %v6279_v45 = vpop.f32.mrf.mxu0  ;;  %v6368_v62 = vpop.f32.mrf.mxu1 }
 0x9eb   : > { %v6280_v4 = vadd.f32 %v6279_v45, %v12255_v10  ;;  %v9524_v10 = vld [vmem:[%s12929_s7 + $0x80] sm:$0xff] }
 0x9ec   : > { %v6544_v36 = vadd.f32 %v6543_v15, %v6455_v21  ;;  %6318 = vmatmul.bf16.gmra.mxu0 %v10937_v16  ;;  %v9532_v16 = vld [vmem:[%s12929_s7 + $0xc0] sm:$0xff]  ;;  %7501 = vmatpush.bf16.msra.mxu2 %v9524_v10 }
 0x9ed   : > { %v6369_v43 = vadd.f32 %v6368_v62, %v6280_v4  ;;  %6407 = vmatmul.bf16.gmra.mxu1 %v13375_v14  ;;  %7590 = vmatpush.bf16.msra.mxu3 %v9532_v16 }
 0x9ee   : > { %vm6637_vm4 = vcmp.gt.f32.partialorder %v6544_v36, 0.0  ;;  %v6767_v22 = vmul.f32 %v11206_v13, %v6544_v36  ;;  %6496 = vmatmul.bf16.gmra.mxu2 %v13376_v48  ;;  %6585 = vmatmul.bf16.gmra.mxu3 %v13377_v0 }
 0x9f0   : > { %v12519_v3 = vsel %vm6637_vm4, %v6544_v36, %v6767_v22 }
 0x9f1   : > { %v6457_v14 = vpop.f32.mrf.mxu2  ;;  %v7007_v48 = vpack.c.bf16 %v12519_v3, %v12517_v46  ;;  %v6546_v2 = vpop.f32.mrf.mxu3 }
 0x9f2   : > { %v6458_v0 = vadd.f32 %v6457_v14, %v6369_v43  ;;  %v6281_v28 = vpop.f32.mrf.mxu0  ;;  %v6370_v9 = vpop.f32.mrf.mxu1 }
 0x9f3   : > { %v6282_v32 = vadd.f32 %v6281_v28, %v12258_v58 }
 0x9f4   : > { %v6547_v39 = vadd.f32 %v6546_v2, %v6458_v0 }
 0x9f5   : > { %v6371_v19 = vadd.f32 %v6370_v9, %v6282_v32 }
 0x9f6   : > { %v6771_v42 = vmul.f32 %v11206_v13, %v6547_v39  ;;  %vm6641_vm5 = vcmp.gt.f32.partialorder %v6547_v39, 0.0 }
 0x9f8   : > { %v12534_v21 = vsel %vm6641_vm5, %v6547_v39, %v6771_v42 }
 0x9f9   : > { %v6459_v59 = vpop.f32.mrf.mxu2  ;;  %v6548_v38 = vpop.f32.mrf.mxu3 }
 0x9fa   : > { %v6460_v34 = vadd.f32 %v6459_v59, %v6371_v19  ;;  %v6284_v50 = vpop.f32.mrf.mxu0  ;;  %v6373_v44 = vpop.f32.mrf.mxu1 }
 0x9fb   : > { %v6285_v54 = vadd.f32 %v6284_v50, %v12265_v1 }
 0x9fc   : > { %v6549_v25 = vadd.f32 %v6548_v38, %v6460_v34  ;;  %6323 = vmatmul.bf16.gmra.mxu0 %v13380_v18 }
 0x9fd   : > { %v6374_v58 = vadd.f32 %v6373_v44, %v6285_v54  ;;  %6412 = vmatmul.bf16.gmra.mxu1 %v13381_v37 }
 0x9fe   : > { %vm6645_vm6 = vcmp.gt.f32.partialorder %v6549_v25, 0.0  ;;  %v6775_v24 = vmul.f32 %v11206_v13, %v6549_v25  ;;  %6501 = vmatmul.bf16.gmra.mxu2 %v13382_v52  ;;  %6590 = vmatmul.bf16.gmra.mxu3 %v13383_v41 }
 0xa00   : > { %v12536_v1 = vsel %vm6645_vm6, %v6549_v25, %v6775_v24 }
 0xa01   : > { %v6462_v15 = vpop.f32.mrf.mxu2  ;;  %v7011_v45 = vpack.c.bf16 %v12536_v1, %v12534_v21  ;;  %v6551_v62 = vpop.f32.mrf.mxu3 }
 0xa02   : > { %v6463_v4 = vadd.f32 %v6462_v15, %v6374_v58  ;;  %v6286_v18 = vpop.f32.mrf.mxu0  ;;  %v6375_v36 = vpop.f32.mrf.mxu1 }
 0xa03   : > { %v6287_v26 = vadd.f32 %v6286_v18, %v12268_v23 }
 0xa04   : > { %v6552_v43 = vadd.f32 %v6551_v62, %v6463_v4 }
 0xa05   : > { %v6376_v37 = vadd.f32 %v6375_v36, %v6287_v26  ;;  %v13859_v26 = vld [vmem:[#allocation21_spill] sm:$0xff] }
 0xa06   : > { %v6779_v14 = vmul.f32 %v11206_v13, %v6552_v43  ;;  %vm6649_vm7 = vcmp.gt.f32.partialorder %v6552_v43, 0.0 }
 0xa08   : > { %v12548_v28 = vsel %vm6649_vm7, %v6552_v43, %v6779_v14 }
 0xa09   : > { %v6464_v22 = vpop.f32.mrf.mxu2  ;;  %v6553_v10 = vpop.f32.mrf.mxu3 }
 0xa0a   : > { %v6465_v52 = vadd.f32 %v6464_v22, %v6376_v37  ;;  %v6289_v41 = vpop.f32.mrf.mxu0  ;;  %v6378_v16 = vpop.f32.mrf.mxu1 }
 0xa0b   : > { %v6290_v40 = vadd.f32 %v6289_v41, %v12284_v55 }
 0xa0c   : > { %v6554_v0 = vadd.f32 %v6553_v10, %v6465_v52  ;;  %6328 = vmatmul.bf16.gmra.mxu0 %v10993_v30  ;;  %v13860_v10 = vld [vmem:[#allocation22_spill] sm:$0xff] }
 0xa0d   : > { %v6379_v2 = vadd.f32 %v6378_v16, %v6290_v40  ;;  %6417 = vmatmul.bf16.gmra.mxu1 %v10995_v47 }
 0xa0e   : > { %vm6653_vm0 = vcmp.gt.f32.partialorder %v6554_v0, 0.0  ;;  %v6783_v23 = vmul.f32 %v11206_v13, %v6554_v0  ;;  %6506 = vmatmul.bf16.gmra.mxu2 %v13540_v53  ;;  %6595 = vmatmul.bf16.gmra.mxu3 %v13541_v60 }
 0xa10   : > { %v12550_v55 = vsel %vm6653_vm0, %v6554_v0, %v6783_v23  ;;  %v13862_v23 = vld [vmem:[#allocation134_spill] sm:$0xff] }
 0xa11   : > { %v6467_v32 = vpop.f32.mrf.mxu2  ;;  %v7015_v9 = vpack.c.bf16 %v12550_v55, %v12548_v28  ;;  %v6556_v19 = vpop.f32.mrf.mxu3 }
 0xa12   : > { %v6468_v39 = vadd.f32 %v6467_v32, %v6379_v2  ;;  %v6291_v30 = vpop.f32.mrf.mxu0  ;;  %v6380_v59 = vpop.f32.mrf.mxu1  ;;  %v13861_v2 = vld [vmem:[#allocation135_spill] sm:$0xff] }
 0xa13   : > { %v6292_v61 = vadd.f32 %v6291_v30, %v12290_v29  ;;  %v13863_v32 = vpack.c.bf16 %v13861_v2, %v13862_v23  ;;  %v13865_v30 = vld [vmem:[#allocation165_spill] sm:$0xff] }
 0xa14   : > { %v6557_v34 = vadd.f32 %v6556_v19, %v6468_v39  ;;  %v13864_v19 = vld [vmem:[#allocation166_spill] sm:$0xff] }
 0xa15   : > { %v6381_v47 = vadd.f32 %v6380_v59, %v6292_v61  ;;  %v13866_v61 = vpack.c.bf16 %v13864_v19, %v13865_v30  ;;  %v13867_v59 = vld [vmem:[#allocation196_spill] sm:$0xff] }
 0xa16   : > { %v6787_v42 = vmul.f32 %v11206_v13, %v6557_v34  ;;  %vm6657_vm8 = vcmp.gt.f32.partialorder %v6557_v34, 0.0 }
 0xa18   : > { %v12562_v24 = vsel %vm6657_vm8, %v6557_v34, %v6787_v42  ;;  %v13868_v34 = vld [vmem:[#allocation195_spill] sm:$0xff] }
 0xa19   : > { %v6469_v38 = vpop.f32.mrf.mxu2  ;;  %v6558_v50 = vpop.f32.mrf.mxu3 }
 0xa1a   : > { %v6470_v53 = vadd.f32 %v6469_v38, %v6381_v47  ;;  %v6294_v60 = vpop.f32.mrf.mxu0  ;;  %v6383_v44 = vpop.f32.mrf.mxu1  ;;  %v13869_v47 = vpack.c.bf16 %v13867_v59, %v13868_v34  ;;  %v13881_v59 = vld [vmem:[#allocation188_spill] sm:$0xff] }
 0xa1b   : > { %v6295_v54 = vadd.f32 %v6294_v60, %v12297_v31 }
 0xa1c   : > { %v6559_v25 = vadd.f32 %v6558_v50, %v6470_v53  ;;  %6333 = vmatmul.bf16.gmra.mxu0 %v13709_v11 }
 0xa1d   : > { %v6384_v58 = vadd.f32 %v6383_v44, %v6295_v54  ;;  %6422 = vmatmul.bf16.gmra.mxu1 %v13710_v8 }
 0xa1e   : > { %vm6661_vm9 = vcmp.gt.f32.partialorder %v6559_v25, 0.0  ;;  %v6791_v29 = vmul.f32 %v11206_v13, %v6559_v25  ;;  %6511 = vmatmul.bf16.gmra.mxu2 %v13711_v63  ;;  %6600 = vmatmul.bf16.gmra.mxu3 %v13712_v49 }
 0xa20   : > { %v12564_v31 = vsel %vm6661_vm9, %v6559_v25, %v6791_v29  ;;  %v13870_v25 = vld [vmem:[#allocation23_spill] sm:$0xff] }
 0xa21   : > { %v6472_v15 = vpop.f32.mrf.mxu2  ;;  %v7019_v4 = vpack.c.bf16 %v12564_v31, %v12562_v24  ;;  %v6561_v18 = vpop.f32.mrf.mxu3 }
 0xa22   : > { %v6473_v62 = vadd.f32 %v6472_v15, %v6384_v58  ;;  %v6296_v11 = vpop.f32.mrf.mxu0  ;;  %v6385_v43 = vpop.f32.mrf.mxu1 }
 0xa23   : > { %v6297_v36 = vadd.f32 %v6296_v11, %v13859_v26 }
 0xa24   : > { %v6562_v37 = vadd.f32 %v6561_v18, %v6473_v62 }
 0xa25   : > { %v6386_v8 = vadd.f32 %v6385_v43, %v6297_v36 }
 0xa26   : > { %v6795_v16 = vmul.f32 %v11206_v13, %v6562_v37  ;;  %vm6665_vm10 = vcmp.gt.f32.partialorder %v6562_v37, 0.0 }
 0xa28   : > { %v12584_v38 = vsel %vm6665_vm10, %v6562_v37, %v6795_v16  ;;  %v13878_v16 = vld [vmem:[#allocation198_spill] sm:$0xff] }
 0xa29   : > { %v6474_v22 = vpop.f32.mrf.mxu2  ;;  %v6563_v52 = vpop.f32.mrf.mxu3 }
 0xa2a   : > { %v6475_v63 = vadd.f32 %v6474_v22, %v6386_v8  ;;  %v6299_v49 = vpop.f32.mrf.mxu0  ;;  %v6388_v40 = vpop.f32.mrf.mxu1  ;;  %v13872_v22 = vld [vmem:[#allocation137_spill] sm:$0xff] }
 0xa2b   : > { %v6300_v41 = vadd.f32 %v6299_v49, %v13860_v10  ;;  %v13875_v10 = vld [vmem:[#allocation168_spill] sm:$0xff] }
 0xa2c   : > { %v6564_v14 = vadd.f32 %v6563_v52, %v6475_v63  ;;  %7324 = vmatmul.bf16.vlgmr.msra.gmra.mxu0 %v13863_v32  ;;  %v13873_v63 = vld [vmem:[#allocation136_spill] sm:$0xff] }
 0xa2d   : > { %v6389_v0 = vadd.f32 %v6388_v40, %v6300_v41  ;;  %7413 = vmatmul.bf16.vlgmr.msra.gmra.mxu1 %v13866_v61  ;;  %v13874_v52 = vpack.c.bf16 %v13872_v22, %v13873_v63  ;;  %v13876_v41 = vld [vmem:[#allocation167_spill] sm:$0xff] }
 0xa2e   : > { %vm6669_vm11 = vcmp.gt.f32.partialorder %v6564_v14, 0.0  ;;  %v6799_v39 = vmul.f32 %v11206_v13, %v6564_v14  ;;  %7502 = vmatmul.bf16.vlgmr.msra.gmra.mxu2 %v13869_v47  ;;  %7591 = vmatmul.bf16.vlgmr.msra.gmra.mxu3 %v6995_v7  ;;  %v13871_v7 = vld [vmem:[#allocation24_spill] sm:$0xff]  ;;  %v13877_v40 = vpack.c.bf16 %v13875_v10, %v13876_v41 }
 0xa30   : > { %v12586_v53 = vsel %vm6669_vm11, %v6564_v14, %v6799_v39  ;;  %v13879_v14 = vld [vmem:[#allocation197_spill] sm:$0xff] }
 0xa31   : > { %v6477_v50 = vpop.f32.mrf.mxu2  ;;  %v7023_v60 = vpack.c.bf16 %v12586_v53, %v12584_v38  ;;  %v6566_v44 = vpop.f32.mrf.mxu3  ;;  %v12748_v38 = vld [vmem:[%s12930_s8] ss:$0 sm:$0xff] }
 0xa32   : > { %v6478_v54 = vadd.f32 %v6477_v50, %v6389_v0  ;;  %v6301_v42 = vpop.f32.mrf.mxu0  ;;  %v6390_v29 = vpop.f32.mrf.mxu1  ;;  %v13880_v0 = vpack.c.bf16 %v13878_v16, %v13879_v14  ;;  %v13892_v16 = vld [vmem:[#allocation25_spill] sm:$0xff] }
 0xa33   : > { %v6302_v58 = vadd.f32 %v6301_v42, %v13870_v25 }
 0xa34   : > { %v6567_v15 = vadd.f32 %v6566_v44, %v6478_v54 }
 0xa35   : > { %v6391_v62 = vadd.f32 %v6390_v29, %v6302_v58 }
 0xa36   : > { %v6803_v43 = vmul.f32 %v11206_v13, %v6567_v15  ;;  %vm6673_vm12 = vcmp.gt.f32.partialorder %v6567_v15, 0.0 }
 0xa38   : > { %v12606_v2 = vsel %vm6673_vm12, %v6567_v15, %v6803_v43  ;;  %v13889_v43 = vld [vmem:[#allocation200_spill] sm:$0xff] }
 0xa39   : > { %v6479_v18 = vpop.f32.mrf.mxu2  ;;  %v6568_v51 = vpop.f32.mrf.mxu3 }
 0xa3a   : > { %v6480_v11 = vadd.f32 %v6479_v18, %v6391_v62  ;;  %v6304_v27 = vpop.f32.mrf.mxu0  ;;  %v6393_v36 = vpop.f32.mrf.mxu1  ;;  %v13883_v18 = vld [vmem:[#allocation113_spill] sm:$0xff] }
 0xa3b   : > { %v6305_v26 = vadd.f32 %v6304_v27, %v13871_v7  ;;  %v13886_v7 = vld [vmem:[#allocation170_spill] sm:$0xff] }
 0xa3c   : > { %v6569_v37 = vadd.f32 %v6568_v51, %v6480_v11  ;;  %7329 = vmatmul.bf16.gmra.mxu0 %v13874_v52  ;;  %v13884_v11 = vld [vmem:[#allocation112_spill] sm:$0xff] }
 0xa3d   : > { %v6394_v8 = vadd.f32 %v6393_v36, %v6305_v26  ;;  %7418 = vmatmul.bf16.gmra.mxu1 %v13877_v40  ;;  %v13885_v51 = vpack.c.bf16 %v13883_v18, %v13884_v11  ;;  %v13887_v26 = vld [vmem:[#allocation169_spill] sm:$0xff] }
 0xa3e   : > { %vm6677_vm13 = vcmp.gt.f32.partialorder %v6569_v37, 0.0  ;;  %v6807_v49 = vmul.f32 %v11206_v13, %v6569_v37  ;;  %7507 = vmatmul.bf16.gmra.mxu2 %v13880_v0  ;;  %7596 = vmatmul.bf16.gmra.mxu3 %v6999_v57  ;;  %v13882_v57 = vld [vmem:[#allocation189_spill] sm:$0xff]  ;;  %v13888_v36 = vpack.c.bf16 %v13886_v7, %v13887_v26 }
 0xa40   : > { %v12608_v23 = vsel %vm6677_vm13, %v6569_v37, %v6807_v49  ;;  %v13890_v37 = vld [vmem:[#allocation199_spill] sm:$0xff] }
 0xa41   : > { %v6482_v32 = vpop.f32.mrf.mxu2  ;;  %v7027_v39 = vpack.c.bf16 %v12608_v23, %v12606_v2  ;;  %v6571_v30 = vpop.f32.mrf.mxu3 }
 0xa42   : > { %v6483_v19 = vadd.f32 %v6482_v32, %v6394_v8  ;;  %v6306_v61 = vpop.f32.mrf.mxu0  ;;  %v6395_v47 = vpop.f32.mrf.mxu1  ;;  %v13891_v8 = vpack.c.bf16 %v13889_v43, %v13890_v37  ;;  %v13903_v43 = vld [vmem:[#allocation27_spill] sm:$0xff] }
 0xa43   : > { %v6307_v34 = vadd.f32 %v6306_v61, %v13881_v59 }
 0xa44   : > { %v6572_v50 = vadd.f32 %v6571_v30, %v6483_v19 }
 0xa45   : > { %v6396_v54 = vadd.f32 %v6395_v47, %v6307_v34 }
 0xa46   : > { %v6811_v29 = vmul.f32 %v11206_v13, %v6572_v50  ;;  %vm6681_vm14 = vcmp.gt.f32.partialorder %v6572_v50, 0.0 }
 0xa48   : > { %v12628_v22 = vsel %vm6681_vm14, %v6572_v50, %v6811_v29  ;;  %v13900_v29 = vld [vmem:[#allocation202_spill] sm:$0xff] }
 0xa49   : > { %v6484_v44 = vpop.f32.mrf.mxu2  ;;  %v6573_v56 = vpop.f32.mrf.mxu3 }
 0xa4a   : > { %v6485_v42 = vadd.f32 %v6484_v44, %v6396_v54  ;;  %v6309_v20 = vpop.f32.mrf.mxu0  ;;  %v6398_v58 = vpop.f32.mrf.mxu1  ;;  %v13894_v44 = vld [vmem:[#allocation115_spill] sm:$0xff] }
 0xa4b   : > { %v6310_v25 = vadd.f32 %v6309_v20, %v13882_v57  ;;  %v13897_v57 = vld [vmem:[#allocation172_spill] sm:$0xff] }
 0xa4c   : > { %v6574_v15 = vadd.f32 %v6573_v56, %v6485_v42  ;;  %7334 = vmatmul.bf16.gmra.mxu0 %v13885_v51  ;;  %v13895_v42 = vld [vmem:[#allocation114_spill] sm:$0xff] }
 0xa4d   : > { %v6399_v62 = vadd.f32 %v6398_v58, %v6310_v25  ;;  %7423 = vmatmul.bf16.gmra.mxu1 %v13888_v36  ;;  %v13896_v56 = vpack.c.bf16 %v13894_v44, %v13895_v42  ;;  %v13898_v25 = vld [vmem:[#allocation171_spill] sm:$0xff] }
 0xa4e   : > { %vm6685_vm15 = vcmp.gt.f32.partialorder %v6574_v15, 0.0  ;;  %v6815_v27 = vmul.f32 %v11206_v13, %v6574_v15  ;;  %7512 = vmatmul.bf16.gmra.mxu2 %v13891_v8  ;;  %7601 = vmatmul.bf16.gmra.mxu3 %v7003_v5  ;;  %v13893_v5 = vld [vmem:[#allocation26_spill] sm:$0xff]  ;;  %v13899_v58 = vpack.c.bf16 %v13897_v57, %v13898_v25 }
 0xa50   : > { %v12630_v63 = vsel %vm6685_vm15, %v6574_v15, %v6815_v27  ;;  %v13901_v15 = vld [vmem:[#allocation201_spill] sm:$0xff] }
 0xa51   : > { %v6487_v52 = vpop.f32.mrf.mxu2  ;;  %v7031_v49 = vpack.c.bf16 %v12630_v63, %v12628_v22  ;;  %v6576_v41 = vpop.f32.mrf.mxu3 }
 0xa52   : > { %v6488_v10 = vadd.f32 %v6487_v52, %v6399_v62  ;;  %v6311_v40 = vpop.f32.mrf.mxu0  ;;  %v6400_v0 = vpop.f32.mrf.mxu1  ;;  %v13902_v62 = vpack.c.bf16 %v13900_v29, %v13901_v15  ;;  %v13914_v29 = vld [vmem:[#allocation190_spill] sm:$0xff] }
 0xa53   : > { %v6312_v14 = vadd.f32 %v6311_v40, %v13892_v16 }
 0xa54   : > { %v6577_v32 = vadd.f32 %v6576_v41, %v6488_v10 }
 0xa55   : > { %v6401_v19 = vadd.f32 %v6400_v0, %v6312_v14 }
 0xa56   : > { %v6819_v47 = vmul.f32 %v11206_v13, %v6577_v32  ;;  %vm6689_vm1 = vcmp.gt.f32.partialorder %v6577_v32, 0.0 }
 0xa58   : > { %v12650_v18 = vsel %vm6689_vm1, %v6577_v32, %v6819_v47  ;;  %v13911_v47 = vld [vmem:[#allocation204_spill] sm:$0xff] }
 0xa59   : > { %v6489_v30 = vpop.f32.mrf.mxu2  ;;  %v6578_v6 = vpop.f32.mrf.mxu3 }
 0xa5a   : > { %v6490_v61 = vadd.f32 %v6489_v30, %v6401_v19  ;;  %v6314_v17 = vpop.f32.mrf.mxu0  ;;  %v6403_v34 = vpop.f32.mrf.mxu1  ;;  %v13905_v30 = vld [vmem:[#allocation117_spill] sm:$0xff] }
 0xa5b   : > { %v6315_v59 = vadd.f32 %v6314_v17, %v13893_v5  ;;  %v13908_v5 = vld [vmem:[#allocation174_spill] sm:$0xff] }
 0xa5c   : > { %v6579_v50 = vadd.f32 %v6578_v6, %v6490_v61  ;;  %7339 = vmatmul.bf16.gmra.mxu0 %v13896_v56  ;;  %v13906_v61 = vld [vmem:[#allocation116_spill] sm:$0xff] }
 0xa5d   : > { %v6404_v54 = vadd.f32 %v6403_v34, %v6315_v59  ;;  %7428 = vmatmul.bf16.gmra.mxu1 %v13899_v58  ;;  %v13907_v6 = vpack.c.bf16 %v13905_v30, %v13906_v61  ;;  %v13909_v59 = vld [vmem:[#allocation173_spill] sm:$0xff] }
 0xa5e   : > { %vm6693_vm2 = vcmp.gt.f32.partialorder %v6579_v50, 0.0  ;;  %v6823_v20 = vmul.f32 %v11206_v13, %v6579_v50  ;;  %7517 = vmatmul.bf16.gmra.mxu2 %v13902_v62  ;;  %7606 = vmatmul.bf16.gmra.mxu3 %v7007_v48  ;;  %v13904_v48 = vld [vmem:[#allocation28_spill] sm:$0xff]  ;;  %v13910_v34 = vpack.c.bf16 %v13908_v5, %v13909_v59  ;;  %v13924_v59 = vld [vmem:[#allocation191_spill] sm:$0xff] }
 0xa60   : > { %v12652_v11 = vsel %vm6693_vm2, %v6579_v50, %v6823_v20  ;;  %v13912_v50 = vld [vmem:[#allocation203_spill] sm:$0xff] }
 0xa61   : > { %v6492_v51 = vpop.f32.mrf.mxu2  ;;  %v7035_v27 = vpack.c.bf16 %v12652_v11, %v12650_v18  ;;  %v6581_v26 = vpop.f32.mrf.mxu3 }
 0xa62   : > { %v6493_v7 = vadd.f32 %v6492_v51, %v6404_v54  ;;  %v6316_v36 = vpop.f32.mrf.mxu0  ;;  %v6405_v8 = vpop.f32.mrf.mxu1  ;;  %v13913_v54 = vpack.c.bf16 %v13911_v47, %v13912_v50 }
 0xa63   : > { %v6317_v37 = vadd.f32 %v6316_v36, %v13903_v43 }
 0xa64   : > { %v6582_v52 = vadd.f32 %v6581_v26, %v6493_v7 }
 0xa65   : > { %v6406_v10 = vadd.f32 %v6405_v8, %v6317_v37 }
 0xa66   : > { %v6827_v0 = vmul.f32 %v11206_v13, %v6582_v52  ;;  %vm6697_vm3 = vcmp.gt.f32.partialorder %v6582_v52, 0.0 }
 0xa68   : > { %v12672_v44 = vsel %vm6697_vm3, %v6582_v52, %v6827_v0  ;;  %v13922_v0 = vld [vmem:[#allocation205_spill] sm:$0xff] }
 0xa69   : > { %v6494_v41 = vpop.f32.mrf.mxu2  ;;  %v6583_v46 = vpop.f32.mrf.mxu3 }
 0xa6a   : > { %v6495_v40 = vadd.f32 %v6494_v41, %v6406_v10  ;;  %v6319_v3 = vpop.f32.mrf.mxu0  ;;  %v6408_v14 = vpop.f32.mrf.mxu1  ;;  %v13915_v10 = vld [vmem:[#allocation119_spill] sm:$0xff]  ;;  %v13916_v41 = vld [vmem:[#allocation118_spill] sm:$0xff] }
 0xa6b   : > { %v6320_v16 = vadd.f32 %v6319_v3, %v13904_v48  ;;  %v13918_v3 = vld [vmem:[#allocation122_spill] sm:$0xff]  ;;  %v13919_v48 = vld [vmem:[#allocation121_spill] sm:$0xff] }
 0xa6c   : > { %v6584_v32 = vadd.f32 %v6583_v46, %v6495_v40  ;;  %7344 = vmatmul.bf16.gmra.mxu0 %v13907_v6  ;;  %v13917_v40 = vpack.c.bf16 %v13915_v10, %v13916_v41 }
 0xa6d   : > { %v6409_v19 = vadd.f32 %v6408_v14, %v6320_v16  ;;  %7433 = vmatmul.bf16.gmra.mxu1 %v13910_v34  ;;  %v13920_v16 = vpack.c.bf16 %v13918_v3, %v13919_v48  ;;  %v13921_v14 = vld [vmem:[#allocation206_spill] sm:$0xff] }
 0xa6e   : > { %vm6701_vm4 = vcmp.gt.f32.partialorder %v6584_v32, 0.0  ;;  %v6831_v17 = vmul.f32 %v11206_v13, %v6584_v32  ;;  %7522 = vmatmul.bf16.gmra.mxu2 %v13913_v54  ;;  %7611 = vmatmul.bf16.gmra.mxu3 %v7011_v45 }
 0xa70   : > { %v12674_v42 = vsel %vm6701_vm4, %v6584_v32, %v6831_v17 }
 0xa71   : > { %v6497_v56 = vpop.f32.mrf.mxu2  ;;  %v7039_v20 = vpack.c.bf16 %v12674_v42, %v12672_v44  ;;  %v6586_v25 = vpop.f32.mrf.mxu3 }
 0xa72   : > { %v6498_v57 = vadd.f32 %v6497_v56, %v6409_v19  ;;  %v6321_v58 = vpop.f32.mrf.mxu0  ;;  %v6410_v62 = vpop.f32.mrf.mxu1 }
 0xa73   : > { %v6322_v15 = vadd.f32 %v6321_v58, %v13914_v29 }
 0xa74   : > { %v6587_v51 = vadd.f32 %v6586_v25, %v6498_v57 }
 0xa75   : > { %v6411_v7 = vadd.f32 %v6410_v62, %v6322_v15 }
 0xa76   : > { %v6835_v37 = vmul.f32 %v11206_v13, %v6587_v51  ;;  %vm6705_vm5 = vcmp.gt.f32.partialorder %v6587_v51, 0.0 }
 0xa78   : > { %v12694_v32 = vsel %vm6705_vm5, %v6587_v51, %v6835_v37  ;;  %v13926_v51 = vld [vmem:[#allocation138_spill] sm:$0xff]  ;;  %v13933_v37 = vld [vmem:[#allocation180_spill] sm:$0xff] }
 0xa79   : > { %v6499_v26 = vpop.f32.mrf.mxu2  ;;  %v6588_v21 = vpop.f32.mrf.mxu3 }
 0xa7a   : > { %v6500_v36 = vadd.f32 %v6499_v26, %v6411_v7  ;;  %v6324_v1 = vpop.f32.mrf.mxu0  ;;  %v6413_v43 = vpop.f32.mrf.mxu1  ;;  %v13927_v7 = vld [vmem:[#allocation120_spill] sm:$0xff] }
 0xa7b   : > { %v6325_v45 = vadd.f32 %v6324_v1, %v12393_v35  ;;  %v13923_v35 = vpack.c.bf16 %v13921_v14, %v13922_v0  ;;  %v13928_v26 = vpack.c.bf16 %v13926_v51, %v13927_v7  ;;  %v13930_v1 = vld [vmem:[#allocation150_spill] sm:$0xff] }
 0xa7c   : > { %v6589_v8 = vadd.f32 %v6588_v21, %v6500_v36  ;;  %7349 = vmatmul.bf16.gmra.mxu0 %v13917_v40  ;;  %v13929_v21 = vld [vmem:[#allocation151_spill] sm:$0xff] }
 0xa7d   : > { %v6414_v52 = vadd.f32 %v6413_v43, %v6325_v45  ;;  %7438 = vmatmul.bf16.gmra.mxu1 %v13920_v16  ;;  %v13931_v45 = vpack.c.bf16 %v13929_v21, %v13930_v1  ;;  %v13932_v43 = vld [vmem:[#allocation181_spill] sm:$0xff]  ;;  %v13935_v16 = vld [vmem:[#allocation30_spill] sm:$0xff] }
 0xa7e   : > { %vm6709_vm6 = vcmp.gt.f32.partialorder %v6589_v8, 0.0  ;;  %v6839_v46 = vmul.f32 %v11206_v13, %v6589_v8  ;;  %7527 = vmatmul.bf16.gmra.mxu2 %v13923_v35  ;;  %7616 = vmatmul.bf16.gmra.mxu3 %v7015_v9  ;;  %v13925_v9 = vld [vmem:[#allocation29_spill] sm:$0xff] }
 0xa80   : > { %v12696_v19 = vsel %vm6709_vm6, %v6589_v8, %v6839_v46  ;;  %v13934_v8 = vpack.c.bf16 %v13932_v43, %v13933_v37 }
 0xa81   : > { %v6502_v30 = vpop.f32.mrf.mxu2  ;;  %v7043_v61 = vpack.c.bf16 %v12696_v19, %v12694_v32  ;;  %v6591_v17 = vpop.f32.mrf.mxu3  ;;  %v13990_v19 = vld [vmem:[#allocation145_spill] sm:$0xff] }
 0xa82   : > { %v6503_v6 = vadd.f32 %v6502_v30, %v6414_v52  ;;  %v6326_v5 = vpop.f32.mrf.mxu0  ;;  %v6415_v47 = vpop.f32.mrf.mxu1 }
 0xa83   : > { %v6327_v34 = vadd.f32 %v6326_v5, %v13924_v59 }
 0xa84   : > { %v6592_v50 = vadd.f32 %v6591_v17, %v6503_v6 }
 0xa85   : > { %v6416_v54 = vadd.f32 %v6415_v47, %v6327_v34 }
 0xa86   : > { %v6843_v29 = vmul.f32 %v11206_v13, %v6592_v50  ;;  %vm6713_vm7 = vcmp.gt.f32.partialorder %v6592_v50, 0.0 }
 0xa88   : > { %v12716_v52 = vsel %vm6713_vm7, %v6592_v50, %v6843_v29  ;;  %v13936_v50 = vld [vmem:[#allocation139_spill] sm:$0xff] }
 0xa89   : > { %v6504_v56 = vpop.f32.mrf.mxu2  ;;  %v6593_v28 = vpop.f32.mrf.mxu3 }
 0xa8a   : > { %v6505_v57 = vadd.f32 %v6504_v56, %v6416_v54  ;;  %v6329_v55 = vpop.f32.mrf.mxu0  ;;  %v6418_v58 = vpop.f32.mrf.mxu1  ;;  %v13937_v54 = vld [vmem:[#allocation127_spill] sm:$0xff] }
 0xa8b   : > { %v6330_v25 = vadd.f32 %v6329_v55, %v13925_v9  ;;  %v13938_v56 = vpack.c.bf16 %v13936_v50, %v13937_v54  ;;  %v13940_v55 = vld [vmem:[#allocation152_spill] sm:$0xff] }
 0xa8c   : > { %v6594_v15 = vadd.f32 %v6593_v28, %v6505_v57  ;;  %7354 = vmatmul.bf16.gmra.mxu0 %v13928_v26  ;;  %v13939_v28 = vld [vmem:[#allocation153_spill] sm:$0xff] }
 0xa8d   : > { %v6419_v62 = vadd.f32 %v6418_v58, %v6330_v25  ;;  %7443 = vmatmul.bf16.gmra.mxu1 %v13931_v45  ;;  %v13941_v9 = vpack.c.bf16 %v13939_v28, %v13940_v55  ;;  %v13942_v25 = vld [vmem:[#allocation124_spill] sm:$0xff]  ;;  %v13943_v58 = vld [vmem:[#allocation123_spill] sm:$0xff] }
 0xa8e   : > { %vm6717_vm0 = vcmp.gt.f32.partialorder %v6594_v15, 0.0  ;;  %v6847_v36 = vmul.f32 %v11206_v13, %v6594_v15  ;;  %7532 = vmatmul.bf16.gmra.mxu2 %v13934_v8  ;;  %7621 = vmatmul.bf16.gmra.mxu3 %v7019_v4 }
 0xa90   : > { %v12718_v10 = vsel %vm6717_vm0, %v6594_v15, %v6847_v36 }
 0xa91   : > { %v6507_v41 = vpop.f32.mrf.mxu2  ;;  %v7047_v40 = vpack.c.bf16 %v12718_v10, %v12716_v52  ;;  %v6596_v3 = vpop.f32.mrf.mxu3  ;;  %v13999_v10 = vld [vmem:[#allocation147_spill] sm:$0xff] }
 0xa92   : > { %v6508_v46 = vadd.f32 %v6507_v41, %v6419_v62  ;;  %v6331_v48 = vpop.f32.mrf.mxu0  ;;  %v6420_v0 = vpop.f32.mrf.mxu1 }
 0xa93   : > { %v6332_v14 = vadd.f32 %v6331_v48, %v13935_v16  ;;  %v13946_v16 = vld [vmem:[#allocation128_spill] sm:$0xff] }
 0xa94   : > { %v6597_v35 = vadd.f32 %v6596_v3, %v6508_v46 }
 0xa95   : > { %v6421_v30 = vadd.f32 %v6420_v0, %v6332_v14 }
 0xa96   : > { %v6851_v59 = vmul.f32 %v11206_v13, %v6597_v35  ;;  %vm6721_vm8 = vcmp.gt.f32.partialorder %v6597_v35, 0.0 }
 0xa98   : > { %v12738_v29 = vsel %vm6721_vm8, %v6597_v35, %v6851_v59  ;;  %v13948_v35 = vld [vmem:[#allocation155_spill] sm:$0xff] }
 0xa99   : > { %v6509_v6 = vpop.f32.mrf.mxu2  ;;  %v6598_v24 = vpop.f32.mrf.mxu3 }
 0xa9a   : > { %v6510_v17 = vadd.f32 %v6509_v6, %v6421_v30  ;;  %v6334_v31 = vpop.f32.mrf.mxu0  ;;  %v6423_v5 = vpop.f32.mrf.mxu1  ;;  %v13949_v30 = vld [vmem:[#allocation154_spill] sm:$0xff] }
 0xa9b   : > { %v6335_v4 = vadd.f32 %v6334_v31, %v12425_v12  ;;  %v13944_v12 = vpack.c.bf16 %v13942_v25, %v13943_v58  ;;  %v13950_v6 = vpack.c.bf16 %v13948_v35, %v13949_v30 }
 0xa9c   : > { %v6599_v34 = vadd.f32 %v6598_v24, %v6510_v17  ;;  %7359 = vmatmul.bf16.gmra.mxu0 %v13938_v56  ;;  %v13951_v17 = vld [vmem:[#allocation126_spill] sm:$0xff]  ;;  %v13952_v24 = vld [vmem:[#allocation125_spill] sm:$0xff] }
 0xa9d   : > { %v6424_v47 = vadd.f32 %v6423_v5, %v6335_v4  ;;  %7448 = vmatmul.bf16.gmra.mxu1 %v13941_v9  ;;  %v13953_v31 = vpack.c.bf16 %v13951_v17, %v13952_v24  ;;  %v13964_v17 = vld [vmem:[#allocation130_spill] sm:$0xff] }
 0xa9e   : > { %vm6725_vm9 = vcmp.gt.f32.partialorder %v6599_v34, 0.0  ;;  %v6855_v57 = vmul.f32 %v11206_v13, %v6599_v34  ;;  %7537 = vmatmul.bf16.gmra.mxu2 %v13944_v12  ;;  %7626 = vmatmul.bf16.gmra.mxu3 %v7023_v60 }
 0xaa0   : > { %v12740_v15 = vsel %vm6725_vm9, %v6599_v34, %v6855_v57 }
 0xaa1   : > { %v6512_v62 = vpop.f32.mrf.mxu2  ;;  %v7051_v51 = vpack.c.bf16 %v12740_v15, %v12738_v29  ;;  %v6601_v26 = vpop.f32.mrf.mxu3  ;;  %v14008_v15 = vld [vmem:[#allocation149_spill] sm:$0xff] }
 0xaa2   : > { %v6513_v7 = vadd.f32 %v6512_v62, %v6424_v47  ;;  %v6336_v36 = vpop.f32.mrf.mxu0  ;;  %v6425_v1 = vpop.f32.mrf.mxu1  ;;  %v13954_v62 = vld [vmem:[#allocation141_spill] sm:$0xff] }
 0xaa3   : > { %v6337_v21 = vadd.f32 %v6336_v36, %v12428_v33  ;;  %v13945_v33 = vld [vmem:[#allocation140_spill] sm:$0xff]  ;;  %v13957_v36 = vld [vmem:[#allocation157_spill] sm:$0xff] }
 0xaa4   : > { %v6602_v45 = vadd.f32 %v6601_v26, %v6513_v7  ;;  %v13947_v14 = vpack.c.bf16 %v13945_v33, %v13946_v16  ;;  %v13955_v7 = vld [vmem:[#allocation129_spill] sm:$0xff] }
 0xaa5   : > { %v6426_v43 = vadd.f32 %v6425_v1, %v6337_v21  ;;  %v13956_v26 = vpack.c.bf16 %v13954_v62, %v13955_v7  ;;  %v13958_v21 = vld [vmem:[#allocation156_spill] sm:$0xff] }
 0xaa6   : > { %v6859_v46 = vmul.f32 %v11206_v13, %v6602_v45  ;;  %vm6729_vm10 = vcmp.gt.f32.partialorder %v6602_v45, 0.0  ;;  %v13959_v1 = vpack.c.bf16 %v13957_v36, %v13958_v21  ;;  %v13973_v36 = vld [vmem:[#allocation131_spill] sm:$0xff] }
 0xaa8   : > { %v12765_v5 = vsel %vm6729_vm10, %v6602_v45, %v6859_v46  ;;  %v13960_v45 = vld [vmem:[#allocation183_spill] sm:$0xff] }
 0xaa9   : > { %v6514_v53 = vpop.f32.mrf.mxu2  ;;  %v6603_v37 = vpop.f32.mrf.mxu3 }
 0xaaa   : > { %v6515_v60 = vadd.f32 %v6514_v53, %v6426_v43  ;;  %v7325_v8 = vpop.f32.mrf.mxu0  ;;  %v7414_v41 = vpop.f32.mrf.mxu1  ;;  %v13961_v43 = vld [vmem:[#allocation182_spill] sm:$0xff] }
 0xaab   : > { %v7326_v48 = vadd.f32 %v12748_v38, %v7325_v8  ;;  %v13962_v53 = vpack.c.bf16 %v13960_v45, %v13961_v43  ;;  %v13976_v45 = vld [vmem:[#allocation160_spill] sm:$0xff] }
 0xaac   : > { %v6604_v3 = vadd.f32 %v6603_v37, %v6515_v60  ;;  %7364 = vmatmul.bf16.gmra.mxu0 %v13947_v14 }
 0xaad   : > { %7453 = vmatmul.bf16.gmra.mxu1 %v13950_v6  ;;  %v7415_v4 = vadd.f32 %v7414_v41, %v7326_v48 }
 0xaae   : > { %vm6733_vm11 = vcmp.gt.f32.partialorder %v6604_v3, 0.0  ;;  %v6863_v0 = vmul.f32 %v11206_v13, %v6604_v3  ;;  %7542 = vmatmul.bf16.gmra.mxu2 %v13953_v31  ;;  %7631 = vmatmul.bf16.gmra.mxu3 %v7027_v39  ;;  %v13966_v31 = vld [vmem:[#allocation159_spill] sm:$0xff] }
 0xab0   : > { %v12767_v59 = vsel %vm6733_vm11, %v6604_v3, %v6863_v0 }
 0xab1   : > { %v7503_v34 = vpop.f32.mrf.mxu2  ;;  %v7055_v13 = vpack.c.bf16 %v12767_v59, %v12765_v5  ;;  %v7592_v50 = vpop.f32.mrf.mxu3 }
 0xab2   : > { %v7504_v47 = vadd.f32 %v7503_v34, %v7415_v4  ;;  %v7327_v54 = vpop.f32.mrf.mxu0  ;;  %v7416_v56 = vpop.f32.mrf.mxu1  ;;  %v13967_v4 = vld [vmem:[#allocation158_spill] sm:$0xff] }
 0xab3   : > { %v7328_v57 = vadd.f32 %v12748_v38, %v7327_v54  ;;  %v13968_v34 = vpack.c.bf16 %v13966_v31, %v13967_v4  ;;  %v13985_v31 = vld [vmem:[#allocation162_spill] sm:$0xff] }
 0xab4   : > { %v7593_v28 = vadd.f32 %v7592_v50, %v7504_v47  ;;  %v13969_v47 = vld [vmem:[#allocation14_spill] sm:$0xff]  ;;  %v13970_v50 = vld [vmem:[#allocation13_spill] sm:$0xff] }
 0xab5   : > { %v7417_v55 = vadd.f32 %v7416_v56, %v7328_v57  ;;  %v13971_v54 = vpack.c.bf16 %v13969_v47, %v13970_v50  ;;  %v13988_v47 = vld [vmem:[#allocation184_spill] sm:$0xff] }
 0xab6   : > { %7672 = vxpose.xlu0.b32.start [1/16] (narrow) %v7593_v28, 8 }
 0xab9   : > { %v7505_v2 = vpop.f32.mrf.mxu2  ;;  %v7594_v39 = vpop.f32.mrf.mxu3 }
 0xaba   : > { %v7506_v23 = vadd.f32 %v7505_v2, %v7417_v55  ;;  %v7330_v9 = vpop.f32.mrf.mxu0  ;;  %v7419_v25 = vpop.f32.mrf.mxu1 }
 0xabb   : > { %v7331_v58 = vadd.f32 %v12748_v38, %v7330_v9 }
 0xabc   : > { %v7595_v12 = vadd.f32 %v7594_v39, %v7506_v23  ;;  %7369 = vmatmul.bf16.gmra.mxu0 %v13956_v26 }
 0xabd   : > { %7458 = vmatmul.bf16.gmra.mxu1 %v13959_v1  ;;  %v7420_v60 = vadd.f32 %v7419_v25, %v7331_v58  ;;  %v13975_v1 = vld [vmem:[#allocation161_spill] sm:$0xff] }
 0xabe   : > { %7547 = vmatmul.bf16.gmra.mxu2 %v13962_v53  ;;  %7636 = vmatmul.bf16.gmra.mxu3 %v7031_v49  ;;  %v13963_v49 = vld [vmem:[#allocation142_spill] sm:$0xff]  ;;  %v13977_v43 = vpack.c.bf16 %v13975_v1, %v13976_v45  ;;  %v13978_v53 = vld [vmem:[#allocation16_spill] sm:$0xff]  ;;  %v13997_v1 = vld [vmem:[#allocation17_spill] sm:$0xff] }
 0xabf   : > { %7673 = vxpose.xlu0.b32.cont [2/16] (narrow) %v7595_v12, 8  ;;  %v13965_v24 = vpack.c.bf16 %v13963_v49, %v13964_v17  ;;  %v13982_v49 = vld [vmem:[#allocation132_spill] sm:$0xff] }
 0xac1   : > { %v7508_v37 = vpop.f32.mrf.mxu2  ;;  %v7597_v41 = vpop.f32.mrf.mxu3 }
 0xac2   : > { %v7509_v8 = vadd.f32 %v7508_v37, %v7420_v60  ;;  %v7332_v46 = vpop.f32.mrf.mxu0  ;;  %v7421_v3 = vpop.f32.mrf.mxu1  ;;  %v13979_v60 = vld [vmem:[#allocation15_spill] sm:$0xff] }
 0xac3   : > { %v7333_v33 = vadd.f32 %v12748_v38, %v7332_v46  ;;  %v13980_v37 = vpack.c.bf16 %v13978_v53, %v13979_v60 }
 0xac4   : > { %v7598_v48 = vadd.f32 %v7597_v41, %v7509_v8 }
 0xac5   : > { %v7422_v16 = vadd.f32 %v7421_v3, %v7333_v33 }
 0xac7   : > { %7674 = vxpose.xlu0.b32.cont [3/16] (narrow) %v7598_v48, 8 }
 0xac9   : > { %v7510_v14 = vpop.f32.mrf.mxu2  ;;  %v7599_v35 = vpop.f32.mrf.mxu3 }
 0xaca   : > { %v7511_v0 = vadd.f32 %v7510_v14, %v7422_v16  ;;  %v7335_v30 = vpop.f32.mrf.mxu0  ;;  %v7424_v6 = vpop.f32.mrf.mxu1 }
 0xacb   : > { %v7336_v22 = vadd.f32 %v12748_v38, %v7335_v30 }
 0xacc   : > { %v7600_v63 = vadd.f32 %v7599_v35, %v7511_v0  ;;  %7374 = vmatmul.bf16.gmra.mxu0 %v13965_v24  ;;  %v13984_v24 = vld [vmem:[#allocation163_spill] sm:$0xff] }
 0xacd   : > { %7463 = vmatmul.bf16.gmra.mxu1 %v13968_v34  ;;  %v7425_v56 = vadd.f32 %v7424_v6, %v7336_v22  ;;  %v13986_v4 = vpack.c.bf16 %v13984_v24, %v13985_v31  ;;  %v13987_v34 = vld [vmem:[#allocation185_spill] sm:$0xff] }
 0xace   : > { %7552 = vmatmul.bf16.gmra.mxu2 %v13971_v54  ;;  %7641 = vmatmul.bf16.gmra.mxu3 %v7035_v27  ;;  %v13972_v27 = vld [vmem:[#allocation143_spill] sm:$0xff]  ;;  %v13989_v50 = vpack.c.bf16 %v13987_v34, %v13988_v47 }
 0xacf   : > { %7675 = vxpose.xlu0.b32.cont [4/16] (narrow) %v7600_v63, 8  ;;  %v13974_v21 = vpack.c.bf16 %v13972_v27, %v13973_v36  ;;  %v13994_v27 = vld [vmem:[#allocation164_spill] sm:$0xff] }
 0xad1   : > { %v7513_v57 = vpop.f32.mrf.mxu2  ;;  %v7602_v55 = vpop.f32.mrf.mxu3 }
 0xad2   : > { %v7514_v28 = vadd.f32 %v7513_v57, %v7425_v56  ;;  %v7337_v2 = vpop.f32.mrf.mxu0  ;;  %v7426_v23 = vpop.f32.mrf.mxu1 }
 0xad3   : > { %v7338_v9 = vadd.f32 %v12748_v38, %v7337_v2 }
 0xad4   : > { %v7603_v39 = vadd.f32 %v7602_v55, %v7514_v28 }
 0xad5   : > { %v7427_v25 = vadd.f32 %v7426_v23, %v7338_v9 }
 0xad7   : > { %7676 = vxpose.xlu0.b32.cont [5/16] (narrow) %v7603_v39, 8 }
 0xad9   : > { %v7515_v58 = vpop.f32.mrf.mxu2  ;;  %v7604_v62 = vpop.f32.mrf.mxu3 }
 0xada   : > { %v7516_v12 = vadd.f32 %v7515_v58, %v7427_v25  ;;  %v7340_v7 = vpop.f32.mrf.mxu0  ;;  %v7429_v26 = vpop.f32.mrf.mxu1 }
 0xadb   : > { %v7341_v18 = vadd.f32 %v12748_v38, %v7340_v7 }
 0xadc   : > { %v7605_v11 = vadd.f32 %v7604_v62, %v7516_v12  ;;  %7379 = vmatmul.bf16.gmra.mxu0 %v13974_v21  ;;  %v13996_v21 = vld [vmem:[#allocation18_spill] sm:$0xff] }
 0xadd   : > { %7468 = vmatmul.bf16.gmra.mxu1 %v13977_v43  ;;  %v7430_v8 = vadd.f32 %v7429_v26, %v7341_v18  ;;  %v13998_v45 = vpack.c.bf16 %v13996_v21, %v13997_v1 }
 0xade   : > { %7557 = vmatmul.bf16.gmra.mxu2 %v13980_v37  ;;  %7646 = vmatmul.bf16.gmra.mxu3 %v7039_v20  ;;  %v13981_v20 = vld [vmem:[#allocation144_spill] sm:$0xff] }
 0xadf   : > { %7677 = vxpose.xlu0.b32.cont [6/16] (narrow) %v7605_v11, 8  ;;  %v13983_v17 = vpack.c.bf16 %v13981_v20, %v13982_v49  ;;  %v13993_v11 = vld [vmem:[#allocation175_spill] sm:$0xff] }
 0xae0   : > { %v13995_v36 = vpack.c.bf16 %v13993_v11, %v13994_v27  ;;  %v14006_v20 = vld [vmem:[#allocation19_spill] sm:$0xff] }
 0xae1   : > { %v7518_v41 = vpop.f32.mrf.mxu2  ;;  %v7607_v3 = vpop.f32.mrf.mxu3 }
 0xae2   : > { %v7519_v46 = vadd.f32 %v7518_v41, %v7430_v8  ;;  %v7342_v48 = vpop.f32.mrf.mxu0  ;;  %v7431_v33 = vpop.f32.mrf.mxu1 }
 0xae3   : > { %v7343_v14 = vadd.f32 %v12748_v38, %v7342_v48 }
 0xae4   : > { %v7608_v16 = vadd.f32 %v7607_v3, %v7519_v46 }
 0xae5   : > { %v7432_v0 = vadd.f32 %v7431_v33, %v7343_v14 }
 0xae7   : > { %7678 = vxpose.xlu0.b32.cont [7/16] (narrow) %v7608_v16, 8 }
 0xae9   : > { %v7520_v35 = vpop.f32.mrf.mxu2  ;;  %v7609_v6 = vpop.f32.mrf.mxu3 }
 0xaea   : > { %v7521_v30 = vadd.f32 %v7520_v35, %v7432_v0  ;;  %v7345_v22 = vpop.f32.mrf.mxu0  ;;  %v7434_v63 = vpop.f32.mrf.mxu1 }
 0xaeb   : > { %v7346_v44 = vadd.f32 %v12748_v38, %v7345_v22  ;;  %v14002_v22 = vld [vmem:[#allocation177_spill] sm:$0xff] }
 0xaec   : > { %v7610_v42 = vadd.f32 %v7609_v6, %v7521_v30  ;;  %7384 = vmatmul.bf16.gmra.mxu0 %v13983_v17 }
 0xaed   : > { %7473 = vmatmul.bf16.gmra.mxu1 %v13986_v4  ;;  %v7435_v54 = vadd.f32 %v7434_v63, %v7346_v44  ;;  %v14003_v63 = vld [vmem:[#allocation176_spill] sm:$0xff] }
 0xaee   : > { %7562 = vmatmul.bf16.gmra.mxu2 %v13989_v50  ;;  %7651 = vmatmul.bf16.gmra.mxu3 %v7043_v61  ;;  %v13991_v61 = vld [vmem:[#allocation133_spill] sm:$0xff]  ;;  %v14004_v44 = vpack.c.bf16 %v14002_v22, %v14003_v63 }
 0xaef   : > { %7679 = vxpose.xlu0.b32.cont [8/16] (narrow) %v7610_v42, 8  ;;  %v13992_v18 = vpack.c.bf16 %v13990_v19, %v13991_v61  ;;  %v14005_v42 = vld [vmem:[#allocation20_spill] sm:$0xff] }
 0xaf0   : > { %v14007_v49 = vpack.c.bf16 %v14005_v42, %v14006_v20 }
 0xaf1   : > { %v7523_v56 = vpop.f32.mrf.mxu2  ;;  %v7612_v28 = vpop.f32.mrf.mxu3 }
 0xaf2   : > { %v7524_v57 = vadd.f32 %v7523_v56, %v7435_v54  ;;  %v7347_v55 = vpop.f32.mrf.mxu0  ;;  %v7436_v2 = vpop.f32.mrf.mxu1 }
 0xaf3   : > { %v7348_v39 = vadd.f32 %v12748_v38, %v7347_v55 }
 0xaf4   : > { %v7613_v23 = vadd.f32 %v7612_v28, %v7524_v57 }
 0xaf5   : > { %v7437_v9 = vadd.f32 %v7436_v2, %v7348_v39 }
 0xaf7   : > { %7680 = vxpose.xlu0.b32.cont [9/16] (narrow) %v7613_v23, 8 }
 0xaf9   : > { %v7525_v25 = vpop.f32.mrf.mxu2  ;;  %v7614_v12 = vpop.f32.mrf.mxu3 }
 0xafa   : > { %v7526_v58 = vadd.f32 %v7525_v25, %v7437_v9  ;;  %v7350_v62 = vpop.f32.mrf.mxu0  ;;  %v7439_v7 = vpop.f32.mrf.mxu1  ;;  %v14011_v25 = vld [vmem:[#allocation179_spill] sm:$0xff] }
 0xafb   : > { %v7351_v32 = vadd.f32 %v12748_v38, %v7350_v62  ;;  %v14014_v62 = vld [vmem:[#allocation187_spill] sm:$0xff] }
 0xafc   : > { %v7615_v26 = vadd.f32 %v7614_v12, %v7526_v58  ;;  %7389 = vmatmul.bf16.gmra.mxu0 %v13992_v18  ;;  %v14012_v58 = vld [vmem:[#allocation178_spill] sm:$0xff] }
 0xafd   : > { %7478 = vmatmul.bf16.gmra.mxu1 %v13995_v36  ;;  %v7440_v43 = vadd.f32 %v7439_v7, %v7351_v32  ;;  %v14013_v12 = vpack.c.bf16 %v14011_v25, %v14012_v58  ;;  %v14015_v7 = vld [vmem:[#allocation186_spill] sm:$0xff] }
 0xafe   : > { %7567 = vmatmul.bf16.gmra.mxu2 %v13998_v45  ;;  %7656 = vmatmul.bf16.gmra.mxu3 %v7047_v40  ;;  %v14000_v40 = vld [vmem:[#allocation146_spill] sm:$0xff] }
 0xaff   : > { %7681 = vxpose.xlu0.b32.cont [10/16] (narrow) %v7615_v26, 8  ;;  %v14001_v6 = vpack.c.bf16 %v13999_v10, %v14000_v40  ;;  %v14016_v26 = vpack.c.bf16 %v14014_v62, %v14015_v7 }
 0xb01   : > { %v7528_v53 = vpop.f32.mrf.mxu2  ;;  %v7617_v37 = vpop.f32.mrf.mxu3 }
 0xb02   : > { %v7529_v60 = vadd.f32 %v7528_v53, %v7440_v43  ;;  %v7352_v8 = vpop.f32.mrf.mxu0  ;;  %v7441_v41 = vpop.f32.mrf.mxu1 }
 0xb03   : > { %v7353_v3 = vadd.f32 %v12748_v38, %v7352_v8 }
 0xb04   : > { %v7618_v46 = vadd.f32 %v7617_v37, %v7529_v60 }
 0xb05   : > { %v7442_v48 = vadd.f32 %v7441_v41, %v7353_v3 }
 0xb07   : > { %7682 = vxpose.xlu0.b32.cont [11/16] (narrow) %v7618_v46, 8 }
 0xb09   : > { %v7530_v33 = vpop.f32.mrf.mxu2  ;;  %v7619_v14 = vpop.f32.mrf.mxu3 }
 0xb0a   : > { %v7531_v16 = vadd.f32 %v7530_v33, %v7442_v48  ;;  %v7355_v0 = vpop.f32.mrf.mxu0  ;;  %v7444_v35 = vpop.f32.mrf.mxu1 }
 0xb0b   : > { %v7356_v52 = vadd.f32 %v12748_v38, %v7355_v0 }
 0xb0c   : > { %v7620_v30 = vadd.f32 %v7619_v14, %v7531_v16  ;;  %7394 = vmatmul.bf16.gmra.mxu0 %v14001_v6 }
 0xb0d   : > { %7483 = vmatmul.bf16.gmra.mxu1 %v14004_v44  ;;  %v7445_v17 = vadd.f32 %v7444_v35, %v7356_v52 }
 0xb0e   : > { %7572 = vmatmul.bf16.gmra.mxu2 %v14007_v49  ;;  %7661 = vmatmul.bf16.gmra.mxu3 %v7051_v51  ;;  %v14009_v51 = vld [vmem:[#allocation148_spill] sm:$0xff] }
 0xb0f   : > { %7683 = vxpose.xlu0.b32.cont [12/16] (narrow) %v7620_v30, 8  ;;  %v14010_v9 = vpack.c.bf16 %v14008_v15, %v14009_v51 }
 0xb11   : > { %v7533_v24 = vpop.f32.mrf.mxu2  ;;  %v7622_v4 = vpop.f32.mrf.mxu3 }
 0xb12   : > { %v7534_v31 = vadd.f32 %v7533_v24, %v7445_v17  ;;  %v7357_v34 = vpop.f32.mrf.mxu0  ;;  %v7446_v47 = vpop.f32.mrf.mxu1 }
 0xb13   : > { %v7358_v54 = vadd.f32 %v12748_v38, %v7357_v34 }
 0xb14   : > { %v7623_v50 = vadd.f32 %v7622_v4, %v7534_v31 }
 0xb15   : > { %v7447_v56 = vadd.f32 %v7446_v47, %v7358_v54 }
 0xb17   : > { %7684 = vxpose.xlu0.b32.cont [13/16] (narrow) %v7623_v50, 8 }
 0xb19   : > { %v7535_v57 = vpop.f32.mrf.mxu2  ;;  %v7624_v55 = vpop.f32.mrf.mxu3 }
 0xb1a   : > { %v7536_v28 = vadd.f32 %v7535_v57, %v7447_v56  ;;  %v7360_v2 = vpop.f32.mrf.mxu0  ;;  %v7449_v23 = vpop.f32.mrf.mxu1 }
 0xb1b   : > { %v7361_v29 = vadd.f32 %v12748_v38, %v7360_v2 }
 0xb1c   : > { %v7625_v39 = vadd.f32 %v7624_v55, %v7536_v28  ;;  %7399 = vmatmul.bf16.gmra.mxu0 %v14010_v9 }
 0xb1d   : > { %7488 = vmatmul.bf16.gmra.mxu1 %v14013_v12  ;;  %v7450_v32 = vadd.f32 %v7449_v23, %v7361_v29 }
 0xb1e   : > { %7577 = vmatmul.bf16.gmra.mxu2 %v14016_v26  ;;  %7666 = vmatmul.bf16.gmra.mxu3 %v7055_v13 }
 0xb1f   : > { %7685 = vxpose.xlu0.b32.cont [14/16] (narrow) %v7625_v39, 8 }
 0xb21   : > { %v7538_v19 = vpop.f32.mrf.mxu2  ;;  %v7627_v18 = vpop.f32.mrf.mxu3 }
 0xb22   : > { %v7539_v61 = vadd.f32 %v7538_v19, %v7450_v32  ;;  %v7362_v11 = vpop.f32.mrf.mxu0  ;;  %v7451_v27 = vpop.f32.mrf.mxu1 }
 0xb23   : > { %v7363_v21 = vadd.f32 %v12748_v38, %v7362_v11 }
 0xb24   : > { %v7628_v36 = vadd.f32 %v7627_v18, %v7539_v61 }
 0xb25   : > { %v7452_v1 = vadd.f32 %v7451_v27, %v7363_v21 }
 0xb27   : > { %7686 = vxpose.xlu0.b32.cont [15/16] (narrow) %v7628_v36, 8 }
 0xb29   : > { %v7540_v45 = vpop.f32.mrf.mxu2  ;;  %v7629_v53 = vpop.f32.mrf.mxu3 }
 0xb2a   : > { %v7541_v43 = vadd.f32 %v7540_v45, %v7452_v1  ;;  %v7365_v60 = vpop.f32.mrf.mxu0  ;;  %v7454_v37 = vpop.f32.mrf.mxu1 }
 0xb2b   : > { %v7366_v5 = vadd.f32 %v12748_v38, %v7365_v60 }
 0xb2c   : > { %v7630_v8 = vadd.f32 %v7629_v53, %v7541_v43 }
 0xb2d   : > { %v7455_v59 = vadd.f32 %v7454_v37, %v7366_v5 }
 0xb2f   : > { %7687 = vxpose.xlu0.b32.end [16/16] (narrow) %v7630_v8, 8 }
 0xb31   : > { %v7543_v13 = vpop.f32.mrf.mxu2  ;;  %v7632_v46 = vpop.f32.mrf.mxu3 }
 0xb32   : > { %v7544_v41 = vadd.f32 %v7543_v13, %v7455_v59  ;;  %v7367_v3 = vpop.f32.mrf.mxu0  ;;  %v7456_v48 = vpop.f32.mrf.mxu1 }
 0xb33   : > { %v7368_v33 = vadd.f32 %v12748_v38, %v7367_v3 }
 0xb34   : > { %v7633_v16 = vadd.f32 %v7632_v46, %v7544_v41 }
 0xb35   : > { %v7457_v14 = vadd.f32 %v7456_v48, %v7368_v33 }
 0xb36   : > { %7704 = vxpose.xlu1.b32.start [1/16] (narrow) %v7633_v16, 8 }
 0xb39   : > { %v7545_v0 = vpop.f32.mrf.mxu2  ;;  %v7634_v30 = vpop.f32.mrf.mxu3 }
 0xb3a   : > { %v7546_v35 = vadd.f32 %v7545_v0, %v7457_v14  ;;  %v7370_v52 = vpop.f32.mrf.mxu0  ;;  %v7459_v10 = vpop.f32.mrf.mxu1 }
 0xb3b   : > { %v7371_v6 = vadd.f32 %v12748_v38, %v7370_v52 }
 0xb3c   : > { %v7635_v40 = vadd.f32 %v7634_v30, %v7546_v35 }
 0xb3d   : > { %v7460_v22 = vadd.f32 %v7459_v10, %v7371_v6 }
 0xb3e   : > { %7705 = vxpose.xlu1.b32.cont [2/16] (narrow) %v7635_v40, 8 }
 0xb41   : > { %v7548_v63 = vpop.f32.mrf.mxu2  ;;  %v7637_v42 = vpop.f32.mrf.mxu3 }
 0xb42   : > { %v7549_v44 = vadd.f32 %v7548_v63, %v7460_v22  ;;  %v7372_v20 = vpop.f32.mrf.mxu0  ;;  %v7461_v49 = vpop.f32.mrf.mxu1 }
 0xb43   : > { %v7373_v24 = vadd.f32 %v12748_v38, %v7372_v20 }
 0xb44   : > { %v7638_v17 = vadd.f32 %v7637_v42, %v7549_v44 }
 0xb45   : > { %v7462_v31 = vadd.f32 %v7461_v49, %v7373_v24 }
 0xb46   : > { %7706 = vxpose.xlu1.b32.cont [3/16] (narrow) %v7638_v17, 8 }
 0xb49   : > { %v7550_v4 = vpop.f32.mrf.mxu2  ;;  %v7639_v47 = vpop.f32.mrf.mxu3 }
 0xb4a   : > { %v7551_v34 = vadd.f32 %v7550_v4, %v7462_v31  ;;  %v7375_v50 = vpop.f32.mrf.mxu0  ;;  %v7464_v54 = vpop.f32.mrf.mxu1 }
 0xb4b   : > { %v7376_v57 = vadd.f32 %v12748_v38, %v7375_v50 }
 0xb4c   : > { %v7640_v56 = vadd.f32 %v7639_v47, %v7551_v34 }
 0xb4d   : > { %v7465_v28 = vadd.f32 %v7464_v54, %v7376_v57 }
 0xb4e   : > { %7707 = vxpose.xlu1.b32.cont [4/16] (narrow) %v7640_v56, 8 }
 0xb51   : > { %v7553_v55 = vpop.f32.mrf.mxu2  ;;  %v7642_v23 = vpop.f32.mrf.mxu3 }
 0xb52   : > { %v7554_v2 = vadd.f32 %v7553_v55, %v7465_v28  ;;  %v7377_v39 = vpop.f32.mrf.mxu0  ;;  %v7466_v29 = vpop.f32.mrf.mxu1 }
 0xb53   : > { %v7378_v51 = vadd.f32 %v12748_v38, %v7377_v39 }
 0xb54   : > { %v7643_v15 = vadd.f32 %v7642_v23, %v7554_v2 }
 0xb55   : > { %v7467_v9 = vadd.f32 %v7466_v29, %v7378_v51 }
 0xb56   : > { %7708 = vxpose.xlu1.b32.cont [5/16] (narrow) %v7643_v15, 8 }
 0xb59   : > { %v7555_v25 = vpop.f32.mrf.mxu2  ;;  %v7644_v12 = vpop.f32.mrf.mxu3 }
 0xb5a   : > { %v7556_v58 = vadd.f32 %v7555_v25, %v7467_v9  ;;  %v7380_v62 = vpop.f32.mrf.mxu0  ;;  %v7469_v7 = vpop.f32.mrf.mxu1 }
 0xb5b   : > { %v7381_v32 = vadd.f32 %v12748_v38, %v7380_v62 }
 0xb5c   : > { %v7645_v26 = vadd.f32 %v7644_v12, %v7556_v58 }
 0xb5d   : > { %v7470_v19 = vadd.f32 %v7469_v7, %v7381_v32 }
 0xb5e   : > { %7709 = vxpose.xlu1.b32.cont [6/16] (narrow) %v7645_v26, 8 }
 0xb61   : > { %v7558_v61 = vpop.f32.mrf.mxu2  ;;  %v7647_v11 = vpop.f32.mrf.mxu3 }
 0xb62   : > { %v7559_v18 = vadd.f32 %v7558_v61, %v7470_v19  ;;  %v7382_v27 = vpop.f32.mrf.mxu0  ;;  %v7471_v36 = vpop.f32.mrf.mxu1 }
 0xb63   : > { %v7383_v1 = vadd.f32 %v12748_v38, %v7382_v27  ;;  %v7688_v61 = vpop.trf.xlu0 }
 0xb64   : > { %v7648_v21 = vadd.f32 %v7647_v11, %v7559_v18  ;;  %v9229_v27 = vmul.f32 -1.442695, %v7688_v61 }
 0xb65   : > { %v7472_v45 = vadd.f32 %v7471_v36, %v7383_v1 }
 0xb66   : > { %7710 = vxpose.xlu1.b32.cont [7/16] (narrow) %v7648_v21, 8  ;;  %9606 = vpow2.f32 %v9229_v27 }
 0xb69   : > { %v7560_v43 = vpop.f32.mrf.mxu2  ;;  %v7649_v60 = vpop.f32.mrf.mxu3 }
 0xb6a   : > { %v7561_v53 = vadd.f32 %v7560_v43, %v7472_v45  ;;  %v7385_v37 = vpop.f32.mrf.mxu0  ;;  %v7474_v8 = vpop.f32.mrf.mxu1 }
 0xb6b   : > { %v7386_v59 = vadd.f32 %v12748_v38, %v7385_v37 }
 0xb6c   : > { %v7650_v5 = vadd.f32 %v7649_v60, %v7561_v53 }
 0xb6d   : > { %v7475_v13 = vadd.f32 %v7474_v8, %v7386_v59 }
 0xb6e   : > { %7711 = vxpose.xlu1.b32.cont [8/16] (narrow) %v7650_v5, 8  ;;  %v9607_v5 = vpop.eup %9606 }
 0xb71   : > { %v7563_v41 = vpop.f32.mrf.mxu2  ;;  %v7652_v3 = vpop.f32.mrf.mxu3 }
 0xb72   : > { %v7564_v46 = vadd.f32 %v7563_v41, %v7475_v13  ;;  %v7387_v48 = vpop.f32.mrf.mxu0  ;;  %v7476_v33 = vpop.f32.mrf.mxu1  ;;  %v7742_v41 = vadd.f32 1.0, %v9607_v5 }
 0xb73   : > { %v7388_v14 = vadd.f32 %v12748_v38, %v7387_v48 }
 0xb74   : > { %v7653_v16 = vadd.f32 %v7652_v3, %v7564_v46  ;;  %9608 = vrcp.f32 %v7742_v41  ;;  %vm7749_vm12 = vweird.f32 %v7742_v41 }
 0xb75   : > { %v7477_v0 = vadd.f32 %v7476_v33, %v7388_v14  ;;  %v7755_v33 = vand.u32 2147483648, %v7742_v41 }
 0xb76   : > { %7712 = vxpose.xlu1.b32.cont [9/16] (narrow) %v7653_v16, 8 }
 0xb77   : > { %v7756_v16 = vor.u32 1.1754944e-38, %v7755_v33 }
 0xb79   : > { %v7565_v35 = vpop.f32.mrf.mxu2  ;;  %v7654_v52 = vpop.f32.mrf.mxu3 }
 0xb7a   : > { %v7566_v30 = vadd.f32 %v7565_v35, %v7477_v0  ;;  %v7390_v10 = vpop.f32.mrf.mxu0  ;;  %v7479_v40 = vpop.f32.mrf.mxu1  ;;  %v7753_v0 = vand.u32 2147483647, %v7742_v41 }
 0xb7b   : > { %v7391_v22 = vadd.f32 %v12748_v38, %v7390_v10  ;;  %v9609_v46 = vpop.eup %9608 }
 0xb7c   : > { %v7655_v6 = vadd.f32 %v7654_v52, %v7566_v30  ;;  %v7745_v3 = vmul.f32 %v9609_v46, %v7742_v41  ;;  %vm7750_vm13 = vweird.f32 %v9609_v46  ;;  %vm7754_vm15 = vcmp.eq.f32.partialorder %v7753_v0, 8.507059e+37 }
 0xb7d   : > { %v7480_v63 = vadd.f32 %v7479_v40, %v7391_v22  ;;  %vm7751_vm14 = vmor %vm7749_vm12, %vm7750_vm13 }
 0xb7e   : > { %7713 = vxpose.xlu1.b32.cont [10/16] (narrow) %v7655_v6, 8  ;;  %v7746_v48 = vsub.f32 1.0, %v7745_v3 }
 0xb81   : > { %v7568_v44 = vpop.f32.mrf.mxu2  ;;  %v7657_v20 = vpop.f32.mrf.mxu3 }
 0xb82   : > { %v7569_v42 = vadd.f32 %v7568_v44, %v7480_v63  ;;  %v7392_v49 = vpop.f32.mrf.mxu0  ;;  %v7481_v17 = vpop.f32.mrf.mxu1 }
 0xb83   : > { %v7393_v31 = vadd.f32 %v12748_v38, %v7392_v49 }
 0xb84   : > { %v7658_v24 = vadd.f32 %v7657_v20, %v7569_v42 }
 0xb85   : > { %v7482_v4 = vadd.f32 %v7481_v17, %v7393_v31 }
 0xb86   : > { %7714 = vxpose.xlu1.b32.cont [11/16] (narrow) %v7658_v24, 8 }
 0xb89   : > { %v7570_v34 = vpop.f32.mrf.mxu2  ;;  %v7659_v50 = vpop.f32.mrf.mxu3 }
 0xb8a   : > { %v7571_v47 = vadd.f32 %v7570_v34, %v7482_v4  ;;  %v7395_v54 = vpop.f32.mrf.mxu0  ;;  %v7484_v56 = vpop.f32.mrf.mxu1 }
 0xb8b   : > { %v7396_v28 = vadd.f32 %v12748_v38, %v7395_v54 }
 0xb8c   : > { %v7660_v57 = vadd.f32 %v7659_v50, %v7571_v47 }
 0xb8d   : > { %v7485_v55 = vadd.f32 %v7484_v56, %v7396_v28 }
 0xb8e   : > { %7715 = vxpose.xlu1.b32.cont [12/16] (narrow) %v7660_v57, 8 }
 0xb91   : > { %v7573_v2 = vpop.f32.mrf.mxu2  ;;  %v7662_v39 = vpop.f32.mrf.mxu3 }
 0xb92   : > { %v7574_v23 = vadd.f32 %v7573_v2, %v7485_v55  ;;  %v7397_v29 = vpop.f32.mrf.mxu0  ;;  %v7486_v15 = vpop.f32.mrf.mxu1 }
 0xb93   : > { %v7398_v9 = vadd.f32 %v12748_v38, %v7397_v29 }
 0xb94   : > { %v7663_v51 = vadd.f32 %v7662_v39, %v7574_v23 }
 0xb95   : > { %v7487_v25 = vadd.f32 %v7486_v15, %v7398_v9 }
 0xb96   : > { %7716 = vxpose.xlu1.b32.cont [13/16] (narrow) %v7663_v51, 8 }
 0xb99   : > { %v7575_v58 = vpop.f32.mrf.mxu2  ;;  %v7664_v62 = vpop.f32.mrf.mxu3 }
 0xb9a   : > { %v7576_v12 = vadd.f32 %v7575_v58, %v7487_v25  ;;  %v7400_v7 = vpop.f32.mrf.mxu0  ;;  %v7489_v19 = vpop.f32.mrf.mxu1 }
 0xb9b   : > { %v7401_v32 = vadd.f32 %v12748_v38, %v7400_v7 }
 0xb9c   : > { %v7665_v26 = vadd.f32 %v7664_v62, %v7576_v12 }
 0xb9d   : > { %v7490_v18 = vadd.f32 %v7489_v19, %v7401_v32 }
 0xb9e   : > { %7717 = vxpose.xlu1.b32.cont [14/16] (narrow) %v7665_v26, 8 }
 0xba1   : > { %v7578_v11 = vpop.f32.mrf.mxu2  ;;  %v7667_v21 = vpop.f32.mrf.mxu3 }
 0xba2   : > { %v7579_v36 = vadd.f32 %v7578_v11, %v7490_v18  ;;  %v7402_v1 = vpop.f32.mrf.mxu0  ;;  %v7491_v53 = vpop.f32.mrf.mxu1 }
 0xba3   : > { %v7403_v43 = vadd.f32 %v12748_v38, %v7402_v1  ;;  %v7747_v38 = vmul.f32 %v9609_v46, %v7746_v48 }
 0xba4   : > { %v7668_v45 = vadd.f32 %v7667_v21, %v7579_v36 }
 0xba5   : > { %v7492_v60 = vadd.f32 %v7491_v53, %v7403_v43  ;;  %v7748_v14 = vadd.f32 %v9609_v46, %v7747_v38 }
 0xba6   : > { %7718 = vxpose.xlu1.b32.cont [15/16] (narrow) %v7668_v45, 8 }
 0xba7   : > { %v7752_v35 = vsel %vm7751_vm14, %v9609_v46, %v7748_v14 }
 0xba8   : > { %v7757_v30 = vsel %vm7754_vm15, %v7756_v16, %v7752_v35 }
 0xba9   : > { %v7580_v37 = vpop.f32.mrf.mxu2  ;;  %v7669_v59 = vpop.f32.mrf.mxu3  ;;  %7774 = vst [vmem:[%s374_s27] sm:$0xff] %v7757_v30 }
 0xbaa   : > { %v7581_v8 = vadd.f32 %v7580_v37, %v7492_v60 }
 0xbac   : > { %v7670_v13 = vadd.f32 %v7669_v59, %v7581_v8 }
 0xbae   : > { %7719 = vxpose.xlu1.b32.end [16/16] (narrow) %v7670_v13, 8 }
 0xbda   : > { %v7720_v52 = vpop.trf.xlu1 }
 0xbdb   : > { %v9230_v10 = vmul.f32 -1.442695, %v7720_v52 }
 0xbdd   : > { %9610 = vpow2.f32 %v9230_v10 }
 0xbe3   : > { %v9611_v40 = vpop.eup %9610 }
 0xbe4   : > { %v7743_v6 = vadd.f32 1.0, %v9611_v40 }
 0xbe6   : > { %9612 = vrcp.f32 %v7743_v6  ;;  %v7770_v42 = vand.u32 2147483648, %v7743_v6  ;;  %v7768_v49 = vand.u32 2147483647, %v7743_v6  ;;  %vm7764_vm2 = vweird.f32 %v7743_v6 }
 0xbe8   : > { %v7771_v24 = vor.u32 1.1754944e-38, %v7770_v42  ;;  %vm7769_vm4 = vcmp.eq.f32.partialorder %v7768_v49, 8.507059e+37 }
 0xbec   : > { %v9613_v22 = vpop.eup %9612 }
 0xbed   : > { %v7760_v63 = vmul.f32 %v9613_v22, %v7743_v6  ;;  %vm7765_vm1 = vweird.f32 %v9613_v22 }
 0xbee   : > { %vm7766_vm3 = vmor %vm7764_vm2, %vm7765_vm1 }
 0xbef   : > { %v7761_v44 = vsub.f32 1.0, %v7760_v63 }
 0xbf1   : > { %v7762_v20 = vmul.f32 %v9613_v22, %v7761_v44 }
 0xbf3   : > { %v7763_v17 = vadd.f32 %v9613_v22, %v7762_v20 }
 0xbf5   : > { %v7767_v31 = vsel %vm7766_vm3, %v9613_v22, %v7763_v17 }
 0xbf6   : > { %v7772_v4 = vsel %vm7769_vm4, %v7771_v24, %v7767_v31 }
 0xbf7   : > { %7775 = vst [vmem:[%s374_s27 + $0x8] sm:$0xff] %v7772_v4 }
 0xbf8   : > { %9705 = shalt.err (!%p9702_p8)
}
 0xbf9   : > { %9549 = dma.vmem_to_hbm [thread:$0]  (%p9850_p5), %s7791_s11, 256, %s7793_s12, %s7777_s3  }
 0xbfa PF: > { %p9566_p9 = scmp.ge.s32.totalorder %s9748_s16, 2  ;;  %s7804_s26 = sand.u32 1, %s9736_s13  }
 0xbfb   : > { %s7805_s27 = scalar_lea.sflag [#allocation6], %s7804_s26 }
 0xbfc   : > { %p9559_p10 = pnand %p9566_p9, %p9854_p6 }
 0xbfe   : > { %p9560_p11 = pneg %p9559_p10 }
 0xc00   : > { %9731 = dma.done.wait (%p9560_p11), %s7805_s27, 256  }
 0xc01   : > { %9733 = vsyncadd (%p9560_p11), %s7805_s27, 4294967040  ;;  %p23_p12 = scmp.ge.s32.totalorder %s9837_s17, 4   ;;  %s14017_s13 = smov %s9740_s14 }
 0xc02   : > { %s14018_s14 = smov %s9744_s15  ;;  %s14019_s15 = smov %s9848_s20 }
 0xc03   : > { %s14020_s16 = smov %s9837_s17  ;;  %25 = sbr.rel (!%p23_p12) target bundleno = 8 (0x8), region = 100 }
 0xc08   :  { %7811 = vsyncpa [#allocation5], 1 }
 0xc09   :  { %7813 = vsyncpa [#allocation5 + $0x1], 1 }
 0xc0a   :  { %7814 = vsyncpa [#allocation8], 1 }
 0xc0b   :  { %7815 = vsyncpa [#allocation6], 1 }
 0xc0c   :  { %7817 = vsyncpa [#allocation6 + $0x1], 1 }

</bundles_post_ra>
